<compile_context>
chip_gen: v7x
topology: tpu7x:2x2x1
jax: 0.10.0
libtpu: 0.0.40
codegen_flags: <defaults>
</compile_context>

<pallas_src>
import math

import jax
import jax.numpy as jnp
from jax import lax
from jax.experimental import pallas as pl
from jax.experimental.pallas import tpu as pltpu  # noqa: F401


# ----------------------------------------------------------------------------
# Small-instance hyperparameters (same structure as hotspot_model.__init__).
# ----------------------------------------------------------------------------
BATCH = 2
VOCAB1, EMBED1, HEADS1, LEN1, FEAT1 = 1024, 128, 4, 16, 128   # "Trans1"
VOCAB2, EMBED2, HEADS2, LEN2, FEAT2 = 14,   32,  4, 8,  32    # "Trans2"
EXPANSION = 4
EXTRA_FEATS = 22
OUTPUT_NUM = 10
OUT_PAD = 128          # final logits padded to a lane-dense 128-wide store
LN_EPS = 1e-5
BN_EPS = 1e-5

ENC_PARAM_KEYS = (
    "word_emb", "pos_emb", "wq_bd", "wk_bd", "wv_bd", "w_fco", "b_fco",
    "ln1_g", "ln1_b", "ln2_g", "ln2_b",
    "w_ff1", "b_ff1", "w_ff2", "b_ff2",
    "w_big",
)
N_ENC = len(ENC_PARAM_KEYS)


# ----------------------------------------------------------------------------
# In-kernel helpers (plain traced functions, called from the fused kernel).
# ----------------------------------------------------------------------------
def _layernorm(x, g, b, eps=LN_EPS):
    mu = jnp.mean(x, axis=-1, keepdims=True)
    xc = x - mu
    var = jnp.mean(xc * xc, axis=-1, keepdims=True)
    return xc * lax.rsqrt(var + eps) * g + b


def _bf16(x):
    return x.astype(jnp.bfloat16)


def _encoder(tok_ref, padd_ref, prefs, *, batch, seq_len, embed, heads,
             out_pad):
    """One Transformer encoder + fc1 + eval-BN + output-head slice (folded).

    Processes ALL batch rows at once (stacked along sublanes) and returns the
    (batch, out_pad) contribution of this encoder to the final logits.
    """
    (emb_ref, pos_ref, wq_ref, wk_ref, wv_ref, wfo_ref, bfo_ref,
     g1_ref, b1_ref, g2_ref, b2_ref,
     wff1_ref, bff1_ref, wff2_ref, bff2_ref, wbig_ref) = prefs

    dh = embed // heads
    bl = batch * seq_len
    vocab = emb_ref.shape[0]

    # --- embedding lookup as a one-hot matmul (table resident in VMEM) ------
    # TODO(synk): for the real 98372x512 vocab, replace with a DMA row gather
    # from an HBM-resident table (memory_space=pl.ANY + make_async_copy).
    tok = tok_ref[...]                                        # (B*L, 1) int32
    onehot = (lax.broadcasted_iota(jnp.int32, (bl, vocab), 1) == tok
              ).astype(jnp.bfloat16)                          # exact 0/1
    x = jnp.dot(onehot, emb_ref[...], preferred_element_type=jnp.float32)
    pos = pos_ref[...]                                        # (L, E) f32
    x = x + jnp.concatenate([pos] * batch, axis=0)            # (B*L, E) f32

    # --- Q/K/V: three full-width matmuls against block-diagonal weights -----
    # (1/sqrt(embed) softmax scale is folded into wq in glue)
    xb = _bf16(x)
    q = jnp.dot(xb, wq_ref[...], preferred_element_type=jnp.float32)
    k = jnp.dot(xb, wk_ref[...], preferred_element_type=jnp.float32)
    v = jnp.dot(xb, wv_ref[...], preferred_element_type=jnp.float32)

    # --- per-row, per-head attention (additive key mask hoisted to glue) ----
    padd = padd_ref[...]                                      # (B, L) f32
    o_rows = []
    for b in range(batch):                                    # static unroll
        r0 = b * seq_len
        pad_b = padd[b:b + 1, :]                              # (1, L)
        head_outs = []
        for h in range(heads):                                # static unroll
            c0 = h * dh
            qh = _bf16(q[r0:r0 + seq_len, c0:c0 + dh])
            kh = _bf16(k[r0:r0 + seq_len, c0:c0 + dh])
            vh = _bf16(v[r0:r0 + seq_len, c0:c0 + dh])
            e = jnp.einsum("qd,kd->qk", qh, kh,
                           preferred_element_type=jnp.float32)  # (L, L)
            e = e + pad_b                                     # key padding mask
            e = e - jnp.max(e, axis=-1, keepdims=True)
            p = jnp.exp(e)
            p = p * pl.reciprocal(jnp.sum(p, axis=-1, keepdims=True),
                                  approx=True)
            head_outs.append(jnp.dot(_bf16(p), vh,
                                     preferred_element_type=jnp.float32))
        o_rows.append(jnp.concatenate(head_outs, axis=-1))    # (L, E)
    o_all = jnp.concatenate(o_rows, axis=0)                   # (B*L, E)

    # --- head concat + fc_out as ONE full-width matmul -----------------------
    attn = jnp.dot(_bf16(o_all), wfo_ref[...],
                   preferred_element_type=jnp.float32) + bfo_ref[...]

    # --- norm1(attn + x), feed-forward, norm2 (dropout = identity, eval) ----
    x1 = _layernorm(attn + x, g1_ref[...], b1_ref[...])
    hid = jnp.dot(_bf16(x1), wff1_ref[...],
                  preferred_element_type=jnp.float32) + bff1_ref[...]
    hid = jnp.maximum(hid, 0.0)
    ff = jnp.dot(_bf16(hid), wff2_ref[...],
                 preferred_element_type=jnp.float32) + bff2_ref[...]
    x2 = _layernorm(ff + x1, g2_ref[...], b2_ref[...])        # (B*L, E)

    # --- fc1 + eval-BatchNorm + output-head slice, folded into w_big --------
    #     contribution = sum_l x2[:, l] @ w_big[l]   (data stays in vregs)
    acc = jnp.zeros((batch, out_pad), jnp.float32)
    for l in range(seq_len):                                  # static unroll
        rows = jnp.concatenate(
            [x2[b * seq_len + l: b * seq_len + l + 1, :] for b in range(batch)],
            axis=0)                                           # (B, E)
        acc = acc + jnp.dot(_bf16(rows), wbig_ref[l],
                            preferred_element_type=jnp.float32)
    return acc                                                # (B, OUT_PAD)


def _hotspot_kernel(*refs):
    """Fully fused hotspot_model forward (all batch rows in one invocation)."""
    tok1_ref, padd1_ref, tok2_ref, padd2_ref, ext_ref = refs[:5]
    p1 = refs[5:5 + N_ENC]
    p2 = refs[5 + N_ENC:5 + 2 * N_ENC]
    wout3_ref = refs[5 + 2 * N_ENC]
    cout_ref = refs[5 + 2 * N_ENC + 1]
    out_ref = refs[5 + 2 * N_ENC + 2]

    c1 = _encoder(tok1_ref, padd1_ref, p1, batch=BATCH, seq_len=LEN1,
                  embed=EMBED1, heads=HEADS1, out_pad=OUT_PAD)
    c2 = _encoder(tok2_ref, padd2_ref, p2, batch=BATCH, seq_len=LEN2,
                  embed=EMBED2, heads=HEADS2, out_pad=OUT_PAD)
    extras = _bf16(ext_ref[...])                              # (B, 22), exact

    # Final head: encoder contributions already include their w_out slices;
    # only the extras slice and the folded constant remain.
    logits = (c1 + c2
              + jnp.dot(extras, wout3_ref[...],
                        preferred_element_type=jnp.float32)
              + cout_ref[...])                                # (B, OUT_PAD)
    out_ref[...] = logits


# ----------------------------------------------------------------------------
# Host-side wrapper: one pallas_call (no grid) for the whole model.
# ----------------------------------------------------------------------------
@jax.jit
def hotspot_forward(src, params):
    batch = src.shape[0]
    assert batch == BATCH
    tok1 = src[:, :LEN1].astype(jnp.int32)
    tok2 = src[:, LEN1:LEN1 + LEN2].astype(jnp.int32)
    extras = src[:, LEN1 + LEN2:].astype(jnp.float32)          # (B, 22)

    tok1_col = tok1.reshape(batch * LEN1, 1)                   # (B*L1, 1)
    tok2_col = tok2.reshape(batch * LEN2, 1)                   # (B*L2, 1)
    # Additive key-padding mask (0 keep / -1e20 pad), hoisted out of the kernel.
    padd1 = jnp.where(tok1 != 0, 0.0, -1e20).astype(jnp.float32)   # (B, L1)
    padd2 = jnp.where(tok2 != 0, 0.0, -1e20).astype(jnp.float32)   # (B, L2)

    args = [tok1_col, padd1, tok2_col, padd2, extras]
    args += [params["p1"][k] for k in ENC_PARAM_KEYS]
    args += [params["p2"][k] for k in ENC_PARAM_KEYS]
    args += [params["w_out3"], params["const_out"]]

    out = pl.pallas_call(
        _hotspot_kernel,
        out_shape=jax.ShapeDtypeStruct((batch, OUT_PAD), jnp.float32),
    )(*args)
    return out[:, :OUTPUT_NUM]


# ----------------------------------------------------------------------------
# Deterministic synthetic parameter init (kernel-friendly, pre-folded layouts).
# ----------------------------------------------------------------------------
def init_encoder_params(key, vocab, embed, heads, seq_len, expansion, feat,
                        w_out_enc):
    dh = embed // heads
    ks = jax.random.split(key, 10)

    def w(k, shape, scale=0.02):
        return jax.random.normal(k, shape, jnp.float32) * scale

    # Per-head projections (one shared (dh,dh) weight, exactly as the PyTorch
    # module), expanded to block-diagonal (E,E) so Q/K/V are single full-width
    # matmuls.  The 1/sqrt(embed) softmax scale is folded into the query.
    wq_small = w(ks[2], (dh, dh)) * (1.0 / math.sqrt(embed))
    wk_small = w(ks[3], (dh, dh))
    wv_small = w(ks[4], (dh, dh))

    def blockdiag(ws):
        m = jnp.zeros((embed, embed), jnp.float32)
        for h in range(heads):
            m = m.at[h * dh:(h + 1) * dh, h * dh:(h + 1) * dh].set(ws)
        return m.astype(jnp.bfloat16)

    # BatchNorm1d eval-mode running stats folded into scale/shift.
    bn_g = jnp.ones((feat,), jnp.float32)
    bn_b = jnp.zeros((feat,), jnp.float32)
    bn_rm = jnp.zeros((feat,), jnp.float32)
    bn_rv = jnp.ones((feat,), jnp.float32)
    bn_scale = bn_g / jnp.sqrt(bn_rv + BN_EPS)
    bn_shift = bn_b - bn_rm * bn_scale

    # fc1 weight in (L, E, feat) layout.  NOTE: for real PyTorch weights this
    # is fc1.weight.T.reshape(L, E, feat) (matches Flatten ordering).
    w_fc1_3d = w(ks[8], (seq_len * embed, feat)).reshape(seq_len, embed, feat)
    b_fc1 = w(ks[9], (feat,))

    # Fold fc1 + BN(eval) + this encoder's slice of the final output head:
    #   feat @ w_out_enc  ==  sum_l x2[l] @ w_big[l]  +  const
    w_big = jnp.einsum("lef,fo->leo",
                       w_fc1_3d * bn_scale[None, None, :],
                       w_out_enc).astype(jnp.bfloat16)
    const = (b_fc1 * bn_scale + bn_shift)[None, :] @ w_out_enc   # (1, OUT_PAD)

    params = dict(
        word_emb=w(ks[0], (vocab, embed)).astype(jnp.bfloat16),
        pos_emb=w(ks[1], (seq_len, embed)),                   # f32 (added only)
        wq_bd=blockdiag(wq_small),
        wk_bd=blockdiag(wk_small),
        wv_bd=blockdiag(wv_small),
        w_fco=w(ks[5], (embed, embed)).astype(jnp.bfloat16),
        b_fco=jnp.zeros((1, embed), jnp.float32),
        ln1_g=jnp.ones((1, embed), jnp.float32),
        ln1_b=jnp.zeros((1, embed), jnp.float32),
        ln2_g=jnp.ones((1, embed), jnp.float32),
        ln2_b=jnp.zeros((1, embed), jnp.float32),
        w_ff1=w(ks[6], (embed, expansion * embed)).astype(jnp.bfloat16),
        b_ff1=jnp.zeros((1, expansion * embed), jnp.float32),
        w_ff2=w(ks[7], (expansion * embed, embed)).astype(jnp.bfloat16),
        b_ff2=jnp.zeros((1, embed), jnp.float32),
        w_big=w_big,
    )
    return params, const


if __name__ == "__main__":
    key = jax.random.PRNGKey(0)
    k_p1, k_p2, k_out, k_t1, k_t2, k_ex = jax.random.split(key, 6)

    # Final output head, split per input-feature group and padded to 128 lanes.
    w_out = jax.random.normal(
        k_out, (FEAT1 + FEAT2 + EXTRA_FEATS, OUTPUT_NUM), jnp.float32) * 0.02
    w_out_pad = jnp.zeros((FEAT1 + FEAT2 + EXTRA_FEATS, OUT_PAD),
                          jnp.float32).at[:, :OUTPUT_NUM].set(w_out)
    w_out1 = w_out_pad[:FEAT1]
    w_out2 = w_out_pad[FEAT1:FEAT1 + FEAT2]
    w_out3 = w_out_pad[FEAT1 + FEAT2:]
    b_out = jnp.zeros((1, OUT_PAD), jnp.float32)

    p1, const1 = init_encoder_params(k_p1, VOCAB1, EMBED1, HEADS1, LEN1,
                                     EXPANSION, FEAT1, w_out1)
    p2, const2 = init_encoder_params(k_p2, VOCAB2, EMBED2, HEADS2, LEN2,
                                     EXPANSION, FEAT2, w_out2)

    params = dict(
        p1=p1, p2=p2,
        w_out3=w_out3.astype(jnp.bfloat16),
        const_out=(b_out + const1 + const2).astype(jnp.float32),
    )

    # src row = [Trans1 token ids | Trans2 token ids | 22 extra features]
    tok1 = jax.random.randint(k_t1, (BATCH, LEN1), 0, VOCAB1, dtype=jnp.int32)
    tok2 = jax.random.randint(k_t2, (BATCH, LEN2), 0, VOCAB2, dtype=jnp.int32)
    extras = jax.random.randint(k_ex, (BATCH, EXTRA_FEATS), 0, 5,
                                dtype=jnp.int32)
    src = jnp.concatenate([tok1, tok2, extras], axis=1)

    logits = hotspot_forward(src, params)
    jax.block_until_ready(logits)
    assert logits.shape == (BATCH, OUTPUT_NUM)
    assert bool(jnp.all(jnp.isfinite(logits)))
    print("KERNEL_OK")
</pallas_src>

<mosaic_0001>
module attributes {stable_mosaic.version = 11 : i64} {
  func.func @_hotspot_kernel(%arg0: memref<32x1xi32, #tpu.memory_space<vmem>>, %arg1: memref<2x16xf32, #tpu.memory_space<vmem>>, %arg2: memref<16x1xi32, #tpu.memory_space<vmem>>, %arg3: memref<2x8xf32, #tpu.memory_space<vmem>>, %arg4: memref<2x22xf32, #tpu.memory_space<vmem>>, %arg5: memref<1024x128xbf16, #tpu.memory_space<vmem>>, %arg6: memref<16x128xf32, #tpu.memory_space<vmem>>, %arg7: memref<128x128xbf16, #tpu.memory_space<vmem>>, %arg8: memref<128x128xbf16, #tpu.memory_space<vmem>>, %arg9: memref<128x128xbf16, #tpu.memory_space<vmem>>, %arg10: memref<128x128xbf16, #tpu.memory_space<vmem>>, %arg11: memref<1x128xf32, #tpu.memory_space<vmem>>, %arg12: memref<1x128xf32, #tpu.memory_space<vmem>>, %arg13: memref<1x128xf32, #tpu.memory_space<vmem>>, %arg14: memref<1x128xf32, #tpu.memory_space<vmem>>, %arg15: memref<1x128xf32, #tpu.memory_space<vmem>>, %arg16: memref<128x512xbf16, #tpu.memory_space<vmem>>, %arg17: memref<1x512xf32, #tpu.memory_space<vmem>>, %arg18: memref<512x128xbf16, #tpu.memory_space<vmem>>, %arg19: memref<1x128xf32, #tpu.memory_space<vmem>>, %arg20: memref<16x128x128xbf16, #tpu.memory_space<vmem>>, %arg21: memref<14x32xbf16, #tpu.memory_space<vmem>>, %arg22: memref<8x32xf32, #tpu.memory_space<vmem>>, %arg23: memref<32x32xbf16, #tpu.memory_space<vmem>>, %arg24: memref<32x32xbf16, #tpu.memory_space<vmem>>, %arg25: memref<32x32xbf16, #tpu.memory_space<vmem>>, %arg26: memref<32x32xbf16, #tpu.memory_space<vmem>>, %arg27: memref<1x32xf32, #tpu.memory_space<vmem>>, %arg28: memref<1x32xf32, #tpu.memory_space<vmem>>, %arg29: memref<1x32xf32, #tpu.memory_space<vmem>>, %arg30: memref<1x32xf32, #tpu.memory_space<vmem>>, %arg31: memref<1x32xf32, #tpu.memory_space<vmem>>, %arg32: memref<32x128xbf16, #tpu.memory_space<vmem>>, %arg33: memref<1x128xf32, #tpu.memory_space<vmem>>, %arg34: memref<128x32xbf16, #tpu.memory_space<vmem>>, %arg35: memref<1x32xf32, #tpu.memory_space<vmem>>, %arg36: memref<8x32x128xbf16, #tpu.memory_space<vmem>>, %arg37: memref<22x128xbf16, #tpu.memory_space<vmem>>, %arg38: memref<1x128xf32, #tpu.memory_space<vmem>>, %arg39: memref<2x128xf32, #tpu.memory_space<vmem>>) attributes {dimension_semantics = [], scalar_prefetch = 0 : i64, scratch_operands = 0 : i64, tpu.core_type = #tpu.core_type<tc>} {
    %c0 = arith.constant 0 : index
    %c0_0 = arith.constant 0 : index
    %0 = vector.load %arg0[%c0, %c0_0] : memref<32x1xi32, #tpu.memory_space<vmem>>, vector<32x1xi32>
    %1 = tpu.iota {dimensions = array<i32: 1>} : vector<32x1024xi32>
    %2 = vector.broadcast %0 : vector<32x1xi32> to vector<32x1024xi32>
    %3 = arith.cmpi eq, %1, %2 : vector<32x1024xi32>
    %4 = arith.extui %3 : vector<32x1024xi1> to vector<32x1024xi32>
    %5 = arith.sitofp %4 : vector<32x1024xi32> to vector<32x1024xf32>
    %6 = arith.truncf %5 : vector<32x1024xf32> to vector<32x1024xbf16>
    %c0_1 = arith.constant 0 : index
    %c0_2 = arith.constant 0 : index
    %7 = vector.load %arg5[%c0_1, %c0_2] : memref<1024x128xbf16, #tpu.memory_space<vmem>>, vector<1024x128xbf16>
    %cst = arith.constant dense<0.000000e+00> : vector<32x128xf32>
    %8 = tpu.matmul %6, %7, %cst {dimension_numbers = #tpu.dot_dimension_numbers<[1], [0], [0], [1], [0, 0, 1, 1], [], []>} : vector<32x1024xbf16>, vector<1024x128xbf16>, vector<32x128xf32> -> vector<32x128xf32>
    %c0_3 = arith.constant 0 : index
    %c0_4 = arith.constant 0 : index
    %9 = vector.load %arg6[%c0_3, %c0_4] : memref<16x128xf32, #tpu.memory_space<vmem>>, vector<16x128xf32>
    %10 = tpu.concatenate %9, %9 in 0 : vector<16x128xf32>, vector<16x128xf32> -> vector<32x128xf32>
    %11 = arith.addf %8, %10 : vector<32x128xf32>
    %12 = arith.truncf %11 : vector<32x128xf32> to vector<32x128xbf16>
    %c0_5 = arith.constant 0 : index
    %c0_6 = arith.constant 0 : index
    %13 = vector.load %arg7[%c0_5, %c0_6] : memref<128x128xbf16, #tpu.memory_space<vmem>>, vector<128x128xbf16>
    %cst_7 = arith.constant dense<0.000000e+00> : vector<32x128xf32>
    %14 = tpu.matmul %12, %13, %cst_7 {dimension_numbers = #tpu.dot_dimension_numbers<[1], [0], [0], [1], [0, 0, 1, 1], [], []>} : vector<32x128xbf16>, vector<128x128xbf16>, vector<32x128xf32> -> vector<32x128xf32>
    %c0_8 = arith.constant 0 : index
    %c0_9 = arith.constant 0 : index
    %15 = vector.load %arg8[%c0_8, %c0_9] : memref<128x128xbf16, #tpu.memory_space<vmem>>, vector<128x128xbf16>
    %cst_10 = arith.constant dense<0.000000e+00> : vector<32x128xf32>
    %16 = tpu.matmul %12, %15, %cst_10 {dimension_numbers = #tpu.dot_dimension_numbers<[1], [0], [0], [1], [0, 0, 1, 1], [], []>} : vector<32x128xbf16>, vector<128x128xbf16>, vector<32x128xf32> -> vector<32x128xf32>
    %c0_11 = arith.constant 0 : index
    %c0_12 = arith.constant 0 : index
    %17 = vector.load %arg9[%c0_11, %c0_12] : memref<128x128xbf16, #tpu.memory_space<vmem>>, vector<128x128xbf16>
    %cst_13 = arith.constant dense<0.000000e+00> : vector<32x128xf32>
    %18 = tpu.matmul %12, %17, %cst_13 {dimension_numbers = #tpu.dot_dimension_numbers<[1], [0], [0], [1], [0, 0, 1, 1], [], []>} : vector<32x128xbf16>, vector<128x128xbf16>, vector<32x128xf32> -> vector<32x128xf32>
    %c0_14 = arith.constant 0 : index
    %c0_15 = arith.constant 0 : index
    %19 = vector.load %arg1[%c0_14, %c0_15] : memref<2x16xf32, #tpu.memory_space<vmem>>, vector<2x16xf32>
    %20 = vector.extract_strided_slice %19 {offsets = [0, 0], sizes = [1, 16], strides = [1, 1]} : vector<2x16xf32> to vector<1x16xf32>
    %21 = vector.extract_strided_slice %14 {offsets = [0, 0], sizes = [16, 32], strides = [1, 1]} : vector<32x128xf32> to vector<16x32xf32>
    %22 = arith.truncf %21 : vector<16x32xf32> to vector<16x32xbf16>
    %23 = vector.extract_strided_slice %16 {offsets = [0, 0], sizes = [16, 32], strides = [1, 1]} : vector<32x128xf32> to vector<16x32xf32>
    %24 = arith.truncf %23 : vector<16x32xf32> to vector<16x32xbf16>
    %25 = vector.extract_strided_slice %18 {offsets = [0, 0], sizes = [16, 32], strides = [1, 1]} : vector<32x128xf32> to vector<16x32xf32>
    %26 = arith.truncf %25 : vector<16x32xf32> to vector<16x32xbf16>
    "tpu.trace_start"() <{level = 10 : i32, message = "qd,kd->qk"}> : () -> ()
    %cst_16 = arith.constant dense<0.000000e+00> : vector<16x16xf32>
    %27 = tpu.matmul %22, %24, %cst_16 {dimension_numbers = #tpu.dot_dimension_numbers<[1], [1], [0], [0], [0, 0, 1, 0], [], []>} : vector<16x32xbf16>, vector<16x32xbf16>, vector<16x16xf32> -> vector<16x16xf32>
    "tpu.trace_stop"() : () -> ()
    %28 = vector.broadcast %20 : vector<1x16xf32> to vector<16x16xf32>
    %29 = arith.addf %27, %28 : vector<16x16xf32>
    %cst_17 = arith.constant dense<0xFF800000> : vector<16xf32>
    %30 = vector.multi_reduction <maximumf>, %29, %cst_17 [1] : vector<16x16xf32> to vector<16xf32>
    %31 = vector.shape_cast %30 : vector<16xf32> to vector<16x1xf32>
    %32 = vector.broadcast %31 : vector<16x1xf32> to vector<16x16xf32>
    %33 = arith.subf %29, %32 : vector<16x16xf32>
    %34 = math.exp %33 : vector<16x16xf32>
    %cst_18 = arith.constant dense<0.000000e+00> : vector<16xf32>
    %35 = vector.multi_reduction <add>, %34, %cst_18 [1] : vector<16x16xf32> to vector<16xf32>
    %36 = vector.shape_cast %35 : vector<16xf32> to vector<16x1xf32>
    %37 = tpu.reciprocal %36 {approx = true} : vector<16x1xf32> -> vector<16x1xf32>
    %38 = vector.broadcast %37 : vector<16x1xf32> to vector<16x16xf32>
    %39 = arith.mulf %34, %38 : vector<16x16xf32>
    %40 = arith.truncf %39 : vector<16x16xf32> to vector<16x16xbf16>
    %cst_19 = arith.constant dense<0.000000e+00> : vector<16x32xf32>
    %41 = tpu.matmul %40, %26, %cst_19 {dimension_numbers = #tpu.dot_dimension_numbers<[1], [0], [0], [1], [0, 0, 1, 1], [], []>} : vector<16x16xbf16>, vector<16x32xbf16>, vector<16x32xf32> -> vector<16x32xf32>
    %42 = vector.extract_strided_slice %14 {offsets = [0, 32], sizes = [16, 32], strides = [1, 1]} : vector<32x128xf32> to vector<16x32xf32>
    %43 = arith.truncf %42 : vector<16x32xf32> to vector<16x32xbf16>
    %44 = vector.extract_strided_slice %16 {offsets = [0, 32], sizes = [16, 32], strides = [1, 1]} : vector<32x128xf32> to vector<16x32xf32>
    %45 = arith.truncf %44 : vector<16x32xf32> to vector<16x32xbf16>
    %46 = vector.extract_strided_slice %18 {offsets = [0, 32], sizes = [16, 32], strides = [1, 1]} : vector<32x128xf32> to vector<16x32xf32>
    %47 = arith.truncf %46 : vector<16x32xf32> to vector<16x32xbf16>
    "tpu.trace_start"() <{level = 10 : i32, message = "qd,kd->qk"}> : () -> ()
    %cst_20 = arith.constant dense<0.000000e+00> : vector<16x16xf32>
    %48 = tpu.matmul %43, %45, %cst_20 {dimension_numbers = #tpu.dot_dimension_numbers<[1], [1], [0], [0], [0, 0, 1, 0], [], []>} : vector<16x32xbf16>, vector<16x32xbf16>, vector<16x16xf32> -> vector<16x16xf32>
    "tpu.trace_stop"() : () -> ()
    %49 = vector.broadcast %20 : vector<1x16xf32> to vector<16x16xf32>
    %50 = arith.addf %48, %49 : vector<16x16xf32>
    %cst_21 = arith.constant dense<0xFF800000> : vector<16xf32>
    %51 = vector.multi_reduction <maximumf>, %50, %cst_21 [1] : vector<16x16xf32> to vector<16xf32>
    %52 = vector.shape_cast %51 : vector<16xf32> to vector<16x1xf32>
    %53 = vector.broadcast %52 : vector<16x1xf32> to vector<16x16xf32>
    %54 = arith.subf %50, %53 : vector<16x16xf32>
    %55 = math.exp %54 : vector<16x16xf32>
    %cst_22 = arith.constant dense<0.000000e+00> : vector<16xf32>
    %56 = vector.multi_reduction <add>, %55, %cst_22 [1] : vector<16x16xf32> to vector<16xf32>
    %57 = vector.shape_cast %56 : vector<16xf32> to vector<16x1xf32>
    %58 = tpu.reciprocal %57 {approx = true} : vector<16x1xf32> -> vector<16x1xf32>
    %59 = vector.broadcast %58 : vector<16x1xf32> to vector<16x16xf32>
    %60 = arith.mulf %55, %59 : vector<16x16xf32>
    %61 = arith.truncf %60 : vector<16x16xf32> to vector<16x16xbf16>
    %cst_23 = arith.constant dense<0.000000e+00> : vector<16x32xf32>
    %62 = tpu.matmul %61, %47, %cst_23 {dimension_numbers = #tpu.dot_dimension_numbers<[1], [0], [0], [1], [0, 0, 1, 1], [], []>} : vector<16x16xbf16>, vector<16x32xbf16>, vector<16x32xf32> -> vector<16x32xf32>
    %63 = vector.extract_strided_slice %14 {offsets = [0, 64], sizes = [16, 32], strides = [1, 1]} : vector<32x128xf32> to vector<16x32xf32>
    %64 = arith.truncf %63 : vector<16x32xf32> to vector<16x32xbf16>
    %65 = vector.extract_strided_slice %16 {offsets = [0, 64], sizes = [16, 32], strides = [1, 1]} : vector<32x128xf32> to vector<16x32xf32>
    %66 = arith.truncf %65 : vector<16x32xf32> to vector<16x32xbf16>
    %67 = vector.extract_strided_slice %18 {offsets = [0, 64], sizes = [16, 32], strides = [1, 1]} : vector<32x128xf32> to vector<16x32xf32>
    %68 = arith.truncf %67 : vector<16x32xf32> to vector<16x32xbf16>
    "tpu.trace_start"() <{level = 10 : i32, message = "qd,kd->qk"}> : () -> ()
    %cst_24 = arith.constant dense<0.000000e+00> : vector<16x16xf32>
    %69 = tpu.matmul %64, %66, %cst_24 {dimension_numbers = #tpu.dot_dimension_numbers<[1], [1], [0], [0], [0, 0, 1, 0], [], []>} : vector<16x32xbf16>, vector<16x32xbf16>, vector<16x16xf32> -> vector<16x16xf32>
    "tpu.trace_stop"() : () -> ()
    %70 = vector.broadcast %20 : vector<1x16xf32> to vector<16x16xf32>
    %71 = arith.addf %69, %70 : vector<16x16xf32>
    %cst_25 = arith.constant dense<0xFF800000> : vector<16xf32>
    %72 = vector.multi_reduction <maximumf>, %71, %cst_25 [1] : vector<16x16xf32> to vector<16xf32>
    %73 = vector.shape_cast %72 : vector<16xf32> to vector<16x1xf32>
    %74 = vector.broadcast %73 : vector<16x1xf32> to vector<16x16xf32>
    %75 = arith.subf %71, %74 : vector<16x16xf32>
    %76 = math.exp %75 : vector<16x16xf32>
    %cst_26 = arith.constant dense<0.000000e+00> : vector<16xf32>
    %77 = vector.multi_reduction <add>, %76, %cst_26 [1] : vector<16x16xf32> to vector<16xf32>
    %78 = vector.shape_cast %77 : vector<16xf32> to vector<16x1xf32>
    %79 = tpu.reciprocal %78 {approx = true} : vector<16x1xf32> -> vector<16x1xf32>
    %80 = vector.broadcast %79 : vector<16x1xf32> to vector<16x16xf32>
    %81 = arith.mulf %76, %80 : vector<16x16xf32>
    %82 = arith.truncf %81 : vector<16x16xf32> to vector<16x16xbf16>
    %cst_27 = arith.constant dense<0.000000e+00> : vector<16x32xf32>
    %83 = tpu.matmul %82, %68, %cst_27 {dimension_numbers = #tpu.dot_dimension_numbers<[1], [0], [0], [1], [0, 0, 1, 1], [], []>} : vector<16x16xbf16>, vector<16x32xbf16>, vector<16x32xf32> -> vector<16x32xf32>
    %84 = vector.extract_strided_slice %14 {offsets = [0, 96], sizes = [16, 32], strides = [1, 1]} : vector<32x128xf32> to vector<16x32xf32>
    %85 = arith.truncf %84 : vector<16x32xf32> to vector<16x32xbf16>
    %86 = vector.extract_strided_slice %16 {offsets = [0, 96], sizes = [16, 32], strides = [1, 1]} : vector<32x128xf32> to vector<16x32xf32>
    %87 = arith.truncf %86 : vector<16x32xf32> to vector<16x32xbf16>
    %88 = vector.extract_strided_slice %18 {offsets = [0, 96], sizes = [16, 32], strides = [1, 1]} : vector<32x128xf32> to vector<16x32xf32>
    %89 = arith.truncf %88 : vector<16x32xf32> to vector<16x32xbf16>
    "tpu.trace_start"() <{level = 10 : i32, message = "qd,kd->qk"}> : () -> ()
    %cst_28 = arith.constant dense<0.000000e+00> : vector<16x16xf32>
    %90 = tpu.matmul %85, %87, %cst_28 {dimension_numbers = #tpu.dot_dimension_numbers<[1], [1], [0], [0], [0, 0, 1, 0], [], []>} : vector<16x32xbf16>, vector<16x32xbf16>, vector<16x16xf32> -> vector<16x16xf32>
    "tpu.trace_stop"() : () -> ()
    %91 = vector.broadcast %20 : vector<1x16xf32> to vector<16x16xf32>
    %92 = arith.addf %90, %91 : vector<16x16xf32>
    %cst_29 = arith.constant dense<0xFF800000> : vector<16xf32>
    %93 = vector.multi_reduction <maximumf>, %92, %cst_29 [1] : vector<16x16xf32> to vector<16xf32>
    %94 = vector.shape_cast %93 : vector<16xf32> to vector<16x1xf32>
    %95 = vector.broadcast %94 : vector<16x1xf32> to vector<16x16xf32>
    %96 = arith.subf %92, %95 : vector<16x16xf32>
    %97 = math.exp %96 : vector<16x16xf32>
    %cst_30 = arith.constant dense<0.000000e+00> : vector<16xf32>
    %98 = vector.multi_reduction <add>, %97, %cst_30 [1] : vector<16x16xf32> to vector<16xf32>
    %99 = vector.shape_cast %98 : vector<16xf32> to vector<16x1xf32>
    %100 = tpu.reciprocal %99 {approx = true} : vector<16x1xf32> -> vector<16x1xf32>
    %101 = vector.broadcast %100 : vector<16x1xf32> to vector<16x16xf32>
    %102 = arith.mulf %97, %101 : vector<16x16xf32>
    %103 = arith.truncf %102 : vector<16x16xf32> to vector<16x16xbf16>
    %cst_31 = arith.constant dense<0.000000e+00> : vector<16x32xf32>
    %104 = tpu.matmul %103, %89, %cst_31 {dimension_numbers = #tpu.dot_dimension_numbers<[1], [0], [0], [1], [0, 0, 1, 1], [], []>} : vector<16x16xbf16>, vector<16x32xbf16>, vector<16x32xf32> -> vector<16x32xf32>
    %105 = tpu.concatenate %41, %62, %83, %104 in 1 : vector<16x32xf32>, vector<16x32xf32>, vector<16x32xf32>, vector<16x32xf32> -> vector<16x128xf32>
    %106 = vector.extract_strided_slice %19 {offsets = [1, 0], sizes = [1, 16], strides = [1, 1]} : vector<2x16xf32> to vector<1x16xf32>
    %107 = vector.extract_strided_slice %14 {offsets = [16, 0], sizes = [16, 32], strides = [1, 1]} : vector<32x128xf32> to vector<16x32xf32>
    %108 = arith.truncf %107 : vector<16x32xf32> to vector<16x32xbf16>
    %109 = vector.extract_strided_slice %16 {offsets = [16, 0], sizes = [16, 32], strides = [1, 1]} : vector<32x128xf32> to vector<16x32xf32>
    %110 = arith.truncf %109 : vector<16x32xf32> to vector<16x32xbf16>
    %111 = vector.extract_strided_slice %18 {offsets = [16, 0], sizes = [16, 32], strides = [1, 1]} : vector<32x128xf32> to vector<16x32xf32>
    %112 = arith.truncf %111 : vector<16x32xf32> to vector<16x32xbf16>
    "tpu.trace_start"() <{level = 10 : i32, message = "qd,kd->qk"}> : () -> ()
    %cst_32 = arith.constant dense<0.000000e+00> : vector<16x16xf32>
    %113 = tpu.matmul %108, %110, %cst_32 {dimension_numbers = #tpu.dot_dimension_numbers<[1], [1], [0], [0], [0, 0, 1, 0], [], []>} : vector<16x32xbf16>, vector<16x32xbf16>, vector<16x16xf32> -> vector<16x16xf32>
    "tpu.trace_stop"() : () -> ()
    %114 = vector.broadcast %106 : vector<1x16xf32> to vector<16x16xf32>
    %115 = arith.addf %113, %114 : vector<16x16xf32>
    %cst_33 = arith.constant dense<0xFF800000> : vector<16xf32>
    %116 = vector.multi_reduction <maximumf>, %115, %cst_33 [1] : vector<16x16xf32> to vector<16xf32>
    %117 = vector.shape_cast %116 : vector<16xf32> to vector<16x1xf32>
    %118 = vector.broadcast %117 : vector<16x1xf32> to vector<16x16xf32>
    %119 = arith.subf %115, %118 : vector<16x16xf32>
    %120 = math.exp %119 : vector<16x16xf32>
    %cst_34 = arith.constant dense<0.000000e+00> : vector<16xf32>
    %121 = vector.multi_reduction <add>, %120, %cst_34 [1] : vector<16x16xf32> to vector<16xf32>
    %122 = vector.shape_cast %121 : vector<16xf32> to vector<16x1xf32>
    %123 = tpu.reciprocal %122 {approx = true} : vector<16x1xf32> -> vector<16x1xf32>
    %124 = vector.broadcast %123 : vector<16x1xf32> to vector<16x16xf32>
    %125 = arith.mulf %120, %124 : vector<16x16xf32>
    %126 = arith.truncf %125 : vector<16x16xf32> to vector<16x16xbf16>
    %cst_35 = arith.constant dense<0.000000e+00> : vector<16x32xf32>
    %127 = tpu.matmul %126, %112, %cst_35 {dimension_numbers = #tpu.dot_dimension_numbers<[1], [0], [0], [1], [0, 0, 1, 1], [], []>} : vector<16x16xbf16>, vector<16x32xbf16>, vector<16x32xf32> -> vector<16x32xf32>
    %128 = vector.extract_strided_slice %14 {offsets = [16, 32], sizes = [16, 32], strides = [1, 1]} : vector<32x128xf32> to vector<16x32xf32>
    %129 = arith.truncf %128 : vector<16x32xf32> to vector<16x32xbf16>
    %130 = vector.extract_strided_slice %16 {offsets = [16, 32], sizes = [16, 32], strides = [1, 1]} : vector<32x128xf32> to vector<16x32xf32>
    %131 = arith.truncf %130 : vector<16x32xf32> to vector<16x32xbf16>
    %132 = vector.extract_strided_slice %18 {offsets = [16, 32], sizes = [16, 32], strides = [1, 1]} : vector<32x128xf32> to vector<16x32xf32>
    %133 = arith.truncf %132 : vector<16x32xf32> to vector<16x32xbf16>
    "tpu.trace_start"() <{level = 10 : i32, message = "qd,kd->qk"}> : () -> ()
    %cst_36 = arith.constant dense<0.000000e+00> : vector<16x16xf32>
    %134 = tpu.matmul %129, %131, %cst_36 {dimension_numbers = #tpu.dot_dimension_numbers<[1], [1], [0], [0], [0, 0, 1, 0], [], []>} : vector<16x32xbf16>, vector<16x32xbf16>, vector<16x16xf32> -> vector<16x16xf32>
    "tpu.trace_stop"() : () -> ()
    %135 = vector.broadcast %106 : vector<1x16xf32> to vector<16x16xf32>
    %136 = arith.addf %134, %135 : vector<16x16xf32>
    %cst_37 = arith.constant dense<0xFF800000> : vector<16xf32>
    %137 = vector.multi_reduction <maximumf>, %136, %cst_37 [1] : vector<16x16xf32> to vector<16xf32>
    %138 = vector.shape_cast %137 : vector<16xf32> to vector<16x1xf32>
    %139 = vector.broadcast %138 : vector<16x1xf32> to vector<16x16xf32>
    %140 = arith.subf %136, %139 : vector<16x16xf32>
    %141 = math.exp %140 : vector<16x16xf32>
    %cst_38 = arith.constant dense<0.000000e+00> : vector<16xf32>
    %142 = vector.multi_reduction <add>, %141, %cst_38 [1] : vector<16x16xf32> to vector<16xf32>
    %143 = vector.shape_cast %142 : vector<16xf32> to vector<16x1xf32>
    %144 = tpu.reciprocal %143 {approx = true} : vector<16x1xf32> -> vector<16x1xf32>
    %145 = vector.broadcast %144 : vector<16x1xf32> to vector<16x16xf32>
    %146 = arith.mulf %141, %145 : vector<16x16xf32>
    %147 = arith.truncf %146 : vector<16x16xf32> to vector<16x16xbf16>
    %cst_39 = arith.constant dense<0.000000e+00> : vector<16x32xf32>
    %148 = tpu.matmul %147, %133, %cst_39 {dimension_numbers = #tpu.dot_dimension_numbers<[1], [0], [0], [1], [0, 0, 1, 1], [], []>} : vector<16x16xbf16>, vector<16x32xbf16>, vector<16x32xf32> -> vector<16x32xf32>
    %149 = vector.extract_strided_slice %14 {offsets = [16, 64], sizes = [16, 32], strides = [1, 1]} : vector<32x128xf32> to vector<16x32xf32>
    %150 = arith.truncf %149 : vector<16x32xf32> to vector<16x32xbf16>
    %151 = vector.extract_strided_slice %16 {offsets = [16, 64], sizes = [16, 32], strides = [1, 1]} : vector<32x128xf32> to vector<16x32xf32>
    %152 = arith.truncf %151 : vector<16x32xf32> to vector<16x32xbf16>
    %153 = vector.extract_strided_slice %18 {offsets = [16, 64], sizes = [16, 32], strides = [1, 1]} : vector<32x128xf32> to vector<16x32xf32>
    %154 = arith.truncf %153 : vector<16x32xf32> to vector<16x32xbf16>
    "tpu.trace_start"() <{level = 10 : i32, message = "qd,kd->qk"}> : () -> ()
    %cst_40 = arith.constant dense<0.000000e+00> : vector<16x16xf32>
    %155 = tpu.matmul %150, %152, %cst_40 {dimension_numbers = #tpu.dot_dimension_numbers<[1], [1], [0], [0], [0, 0, 1, 0], [], []>} : vector<16x32xbf16>, vector<16x32xbf16>, vector<16x16xf32> -> vector<16x16xf32>
    "tpu.trace_stop"() : () -> ()
    %156 = vector.broadcast %106 : vector<1x16xf32> to vector<16x16xf32>
    %157 = arith.addf %155, %156 : vector<16x16xf32>
    %cst_41 = arith.constant dense<0xFF800000> : vector<16xf32>
    %158 = vector.multi_reduction <maximumf>, %157, %cst_41 [1] : vector<16x16xf32> to vector<16xf32>
    %159 = vector.shape_cast %158 : vector<16xf32> to vector<16x1xf32>
    %160 = vector.broadcast %159 : vector<16x1xf32> to vector<16x16xf32>
    %161 = arith.subf %157, %160 : vector<16x16xf32>
    %162 = math.exp %161 : vector<16x16xf32>
    %cst_42 = arith.constant dense<0.000000e+00> : vector<16xf32>
    %163 = vector.multi_reduction <add>, %162, %cst_42 [1] : vector<16x16xf32> to vector<16xf32>
    %164 = vector.shape_cast %163 : vector<16xf32> to vector<16x1xf32>
    %165 = tpu.reciprocal %164 {approx = true} : vector<16x1xf32> -> vector<16x1xf32>
    %166 = vector.broadcast %165 : vector<16x1xf32> to vector<16x16xf32>
    %167 = arith.mulf %162, %166 : vector<16x16xf32>
    %168 = arith.truncf %167 : vector<16x16xf32> to vector<16x16xbf16>
    %cst_43 = arith.constant dense<0.000000e+00> : vector<16x32xf32>
    %169 = tpu.matmul %168, %154, %cst_43 {dimension_numbers = #tpu.dot_dimension_numbers<[1], [0], [0], [1], [0, 0, 1, 1], [], []>} : vector<16x16xbf16>, vector<16x32xbf16>, vector<16x32xf32> -> vector<16x32xf32>
    %170 = vector.extract_strided_slice %14 {offsets = [16, 96], sizes = [16, 32], strides = [1, 1]} : vector<32x128xf32> to vector<16x32xf32>
    %171 = arith.truncf %170 : vector<16x32xf32> to vector<16x32xbf16>
    %172 = vector.extract_strided_slice %16 {offsets = [16, 96], sizes = [16, 32], strides = [1, 1]} : vector<32x128xf32> to vector<16x32xf32>
    %173 = arith.truncf %172 : vector<16x32xf32> to vector<16x32xbf16>
    %174 = vector.extract_strided_slice %18 {offsets = [16, 96], sizes = [16, 32], strides = [1, 1]} : vector<32x128xf32> to vector<16x32xf32>
    %175 = arith.truncf %174 : vector<16x32xf32> to vector<16x32xbf16>
    "tpu.trace_start"() <{level = 10 : i32, message = "qd,kd->qk"}> : () -> ()
    %cst_44 = arith.constant dense<0.000000e+00> : vector<16x16xf32>
    %176 = tpu.matmul %171, %173, %cst_44 {dimension_numbers = #tpu.dot_dimension_numbers<[1], [1], [0], [0], [0, 0, 1, 0], [], []>} : vector<16x32xbf16>, vector<16x32xbf16>, vector<16x16xf32> -> vector<16x16xf32>
    "tpu.trace_stop"() : () -> ()
    %177 = vector.broadcast %106 : vector<1x16xf32> to vector<16x16xf32>
    %178 = arith.addf %176, %177 : vector<16x16xf32>
    %cst_45 = arith.constant dense<0xFF800000> : vector<16xf32>
    %179 = vector.multi_reduction <maximumf>, %178, %cst_45 [1] : vector<16x16xf32> to vector<16xf32>
    %180 = vector.shape_cast %179 : vector<16xf32> to vector<16x1xf32>
    %181 = vector.broadcast %180 : vector<16x1xf32> to vector<16x16xf32>
    %182 = arith.subf %178, %181 : vector<16x16xf32>
    %183 = math.exp %182 : vector<16x16xf32>
    %cst_46 = arith.constant dense<0.000000e+00> : vector<16xf32>
    %184 = vector.multi_reduction <add>, %183, %cst_46 [1] : vector<16x16xf32> to vector<16xf32>
    %185 = vector.shape_cast %184 : vector<16xf32> to vector<16x1xf32>
    %186 = tpu.reciprocal %185 {approx = true} : vector<16x1xf32> -> vector<16x1xf32>
    %187 = vector.broadcast %186 : vector<16x1xf32> to vector<16x16xf32>
    %188 = arith.mulf %183, %187 : vector<16x16xf32>
    %189 = arith.truncf %188 : vector<16x16xf32> to vector<16x16xbf16>
    %cst_47 = arith.constant dense<0.000000e+00> : vector<16x32xf32>
    %190 = tpu.matmul %189, %175, %cst_47 {dimension_numbers = #tpu.dot_dimension_numbers<[1], [0], [0], [1], [0, 0, 1, 1], [], []>} : vector<16x16xbf16>, vector<16x32xbf16>, vector<16x32xf32> -> vector<16x32xf32>
    %191 = tpu.concatenate %127, %148, %169, %190 in 1 : vector<16x32xf32>, vector<16x32xf32>, vector<16x32xf32>, vector<16x32xf32> -> vector<16x128xf32>
    %192 = tpu.concatenate %105, %191 in 0 : vector<16x128xf32>, vector<16x128xf32> -> vector<32x128xf32>
    %193 = arith.truncf %192 : vector<32x128xf32> to vector<32x128xbf16>
    %c0_48 = arith.constant 0 : index
    %c0_49 = arith.constant 0 : index
    %194 = vector.load %arg10[%c0_48, %c0_49] : memref<128x128xbf16, #tpu.memory_space<vmem>>, vector<128x128xbf16>
    %cst_50 = arith.constant dense<0.000000e+00> : vector<32x128xf32>
    %195 = tpu.matmul %193, %194, %cst_50 {dimension_numbers = #tpu.dot_dimension_numbers<[1], [0], [0], [1], [0, 0, 1, 1], [], []>} : vector<32x128xbf16>, vector<128x128xbf16>, vector<32x128xf32> -> vector<32x128xf32>
    %c0_51 = arith.constant 0 : index
    %c0_52 = arith.constant 0 : index
    %196 = vector.load %arg11[%c0_51, %c0_52] : memref<1x128xf32, #tpu.memory_space<vmem>>, vector<1x128xf32>
    %197 = vector.broadcast %196 : vector<1x128xf32> to vector<32x128xf32>
    %198 = arith.addf %195, %197 : vector<32x128xf32>
    %199 = arith.addf %198, %11 : vector<32x128xf32>
    %c0_53 = arith.constant 0 : index
    %c0_54 = arith.constant 0 : index
    %200 = vector.load %arg12[%c0_53, %c0_54] : memref<1x128xf32, #tpu.memory_space<vmem>>, vector<1x128xf32>
    %c0_55 = arith.constant 0 : index
    %c0_56 = arith.constant 0 : index
    %201 = vector.load %arg13[%c0_55, %c0_56] : memref<1x128xf32, #tpu.memory_space<vmem>>, vector<1x128xf32>
    %cst_57 = arith.constant dense<0.000000e+00> : vector<32xf32>
    %202 = vector.multi_reduction <add>, %199, %cst_57 [1] : vector<32x128xf32> to vector<32xf32>
    %203 = vector.shape_cast %202 : vector<32xf32> to vector<32x1xf32>
    %cst_58 = arith.constant 1.280000e+02 : f32
    %204 = vector.broadcast %cst_58 : f32 to vector<32x1xf32>
    %205 = arith.divf %203, %204 : vector<32x1xf32>
    %206 = vector.broadcast %205 : vector<32x1xf32> to vector<32x128xf32>
    %207 = arith.subf %199, %206 : vector<32x128xf32>
    %208 = arith.mulf %207, %207 : vector<32x128xf32>
    %cst_59 = arith.constant dense<0.000000e+00> : vector<32xf32>
    %209 = vector.multi_reduction <add>, %208, %cst_59 [1] : vector<32x128xf32> to vector<32xf32>
    %210 = vector.shape_cast %209 : vector<32xf32> to vector<32x1xf32>
    %cst_60 = arith.constant 1.280000e+02 : f32
    %211 = vector.broadcast %cst_60 : f32 to vector<32x1xf32>
    %212 = arith.divf %210, %211 : vector<32x1xf32>
    %cst_61 = arith.constant 9.99999974E-6 : f32
    %213 = vector.broadcast %cst_61 : f32 to vector<32x1xf32>
    %214 = arith.addf %212, %213 : vector<32x1xf32>
    %215 = math.rsqrt %214 : vector<32x1xf32>
    %216 = vector.broadcast %215 : vector<32x1xf32> to vector<32x128xf32>
    %217 = arith.mulf %207, %216 : vector<32x128xf32>
    %218 = vector.broadcast %200 : vector<1x128xf32> to vector<32x128xf32>
    %219 = arith.mulf %217, %218 : vector<32x128xf32>
    %220 = vector.broadcast %201 : vector<1x128xf32> to vector<32x128xf32>
    %221 = arith.addf %219, %220 : vector<32x128xf32>
    %222 = arith.truncf %221 : vector<32x128xf32> to vector<32x128xbf16>
    %c0_62 = arith.constant 0 : index
    %c0_63 = arith.constant 0 : index
    %223 = vector.load %arg16[%c0_62, %c0_63] : memref<128x512xbf16, #tpu.memory_space<vmem>>, vector<128x512xbf16>
    %cst_64 = arith.constant dense<0.000000e+00> : vector<32x512xf32>
    %224 = tpu.matmul %222, %223, %cst_64 {dimension_numbers = #tpu.dot_dimension_numbers<[1], [0], [0], [1], [0, 0, 1, 1], [], []>} : vector<32x128xbf16>, vector<128x512xbf16>, vector<32x512xf32> -> vector<32x512xf32>
    %c0_65 = arith.constant 0 : index
    %c0_66 = arith.constant 0 : index
    %225 = vector.load %arg17[%c0_65, %c0_66] : memref<1x512xf32, #tpu.memory_space<vmem>>, vector<1x512xf32>
    %226 = vector.broadcast %225 : vector<1x512xf32> to vector<32x512xf32>
    %227 = arith.addf %224, %226 : vector<32x512xf32>
    %cst_67 = arith.constant 0.000000e+00 : f32
    %228 = vector.broadcast %cst_67 : f32 to vector<32x512xf32>
    %229 = arith.maximumf %227, %228 : vector<32x512xf32>
    %230 = arith.truncf %229 : vector<32x512xf32> to vector<32x512xbf16>
    %c0_68 = arith.constant 0 : index
    %c0_69 = arith.constant 0 : index
    %231 = vector.load %arg18[%c0_68, %c0_69] : memref<512x128xbf16, #tpu.memory_space<vmem>>, vector<512x128xbf16>
    %cst_70 = arith.constant dense<0.000000e+00> : vector<32x128xf32>
    %232 = tpu.matmul %230, %231, %cst_70 {dimension_numbers = #tpu.dot_dimension_numbers<[1], [0], [0], [1], [0, 0, 1, 1], [], []>} : vector<32x512xbf16>, vector<512x128xbf16>, vector<32x128xf32> -> vector<32x128xf32>
    %c0_71 = arith.constant 0 : index
    %c0_72 = arith.constant 0 : index
    %233 = vector.load %arg19[%c0_71, %c0_72] : memref<1x128xf32, #tpu.memory_space<vmem>>, vector<1x128xf32>
    %234 = vector.broadcast %233 : vector<1x128xf32> to vector<32x128xf32>
    %235 = arith.addf %232, %234 : vector<32x128xf32>
    %236 = arith.addf %235, %221 : vector<32x128xf32>
    %c0_73 = arith.constant 0 : index
    %c0_74 = arith.constant 0 : index
    %237 = vector.load %arg14[%c0_73, %c0_74] : memref<1x128xf32, #tpu.memory_space<vmem>>, vector<1x128xf32>
    %c0_75 = arith.constant 0 : index
    %c0_76 = arith.constant 0 : index
    %238 = vector.load %arg15[%c0_75, %c0_76] : memref<1x128xf32, #tpu.memory_space<vmem>>, vector<1x128xf32>
    %cst_77 = arith.constant dense<0.000000e+00> : vector<32xf32>
    %239 = vector.multi_reduction <add>, %236, %cst_77 [1] : vector<32x128xf32> to vector<32xf32>
    %240 = vector.shape_cast %239 : vector<32xf32> to vector<32x1xf32>
    %cst_78 = arith.constant 1.280000e+02 : f32
    %241 = vector.broadcast %cst_78 : f32 to vector<32x1xf32>
    %242 = arith.divf %240, %241 : vector<32x1xf32>
    %243 = vector.broadcast %242 : vector<32x1xf32> to vector<32x128xf32>
    %244 = arith.subf %236, %243 : vector<32x128xf32>
    %245 = arith.mulf %244, %244 : vector<32x128xf32>
    %cst_79 = arith.constant dense<0.000000e+00> : vector<32xf32>
    %246 = vector.multi_reduction <add>, %245, %cst_79 [1] : vector<32x128xf32> to vector<32xf32>
    %247 = vector.shape_cast %246 : vector<32xf32> to vector<32x1xf32>
    %cst_80 = arith.constant 1.280000e+02 : f32
    %248 = vector.broadcast %cst_80 : f32 to vector<32x1xf32>
    %249 = arith.divf %247, %248 : vector<32x1xf32>
    %cst_81 = arith.constant 9.99999974E-6 : f32
    %250 = vector.broadcast %cst_81 : f32 to vector<32x1xf32>
    %251 = arith.addf %249, %250 : vector<32x1xf32>
    %252 = math.rsqrt %251 : vector<32x1xf32>
    %253 = vector.broadcast %252 : vector<32x1xf32> to vector<32x128xf32>
    %254 = arith.mulf %244, %253 : vector<32x128xf32>
    %255 = vector.broadcast %237 : vector<1x128xf32> to vector<32x128xf32>
    %256 = arith.mulf %254, %255 : vector<32x128xf32>
    %257 = vector.broadcast %238 : vector<1x128xf32> to vector<32x128xf32>
    %258 = arith.addf %256, %257 : vector<32x128xf32>
    %cst_82 = arith.constant 0.000000e+00 : f32
    %259 = vector.broadcast %cst_82 : f32 to vector<2x128xf32>
    %260 = vector.extract_strided_slice %258 {offsets = [0, 0], sizes = [1, 128], strides = [1, 1]} : vector<32x128xf32> to vector<1x128xf32>
    %261 = vector.extract_strided_slice %258 {offsets = [16, 0], sizes = [1, 128], strides = [1, 1]} : vector<32x128xf32> to vector<1x128xf32>
    %262 = tpu.concatenate %260, %261 in 0 : vector<1x128xf32>, vector<1x128xf32> -> vector<2x128xf32>
    %263 = arith.truncf %262 : vector<2x128xf32> to vector<2x128xbf16>
    %c0_83 = arith.constant 0 : index
    %c0_84 = arith.constant 0 : index
    %c0_85 = arith.constant 0 : index
    %264 = vector.load %arg20[%c0_83, %c0_84, %c0_85] : memref<16x128x128xbf16, #tpu.memory_space<vmem>>, vector<1x128x128xbf16>
    %265 = vector.shape_cast %264 : vector<1x128x128xbf16> to vector<128x128xbf16>
    %cst_86 = arith.constant dense<0.000000e+00> : vector<2x128xf32>
    %266 = tpu.matmul %263, %265, %cst_86 {dimension_numbers = #tpu.dot_dimension_numbers<[1], [0], [0], [1], [0, 0, 1, 1], [], []>} : vector<2x128xbf16>, vector<128x128xbf16>, vector<2x128xf32> -> vector<2x128xf32>
    %267 = arith.addf %259, %266 : vector<2x128xf32>
    %268 = vector.extract_strided_slice %258 {offsets = [1, 0], sizes = [1, 128], strides = [1, 1]} : vector<32x128xf32> to vector<1x128xf32>
    %269 = vector.extract_strided_slice %258 {offsets = [17, 0], sizes = [1, 128], strides = [1, 1]} : vector<32x128xf32> to vector<1x128xf32>
    %270 = tpu.concatenate %268, %269 in 0 : vector<1x128xf32>, vector<1x128xf32> -> vector<2x128xf32>
    %271 = arith.truncf %270 : vector<2x128xf32> to vector<2x128xbf16>
    %c1 = arith.constant 1 : index
    %c0_87 = arith.constant 0 : index
    %c0_88 = arith.constant 0 : index
    %272 = vector.load %arg20[%c1, %c0_87, %c0_88] : memref<16x128x128xbf16, #tpu.memory_space<vmem>>, vector<1x128x128xbf16>
    %273 = vector.shape_cast %272 : vector<1x128x128xbf16> to vector<128x128xbf16>
    %cst_89 = arith.constant dense<0.000000e+00> : vector<2x128xf32>
    %274 = tpu.matmul %271, %273, %cst_89 {dimension_numbers = #tpu.dot_dimension_numbers<[1], [0], [0], [1], [0, 0, 1, 1], [], []>} : vector<2x128xbf16>, vector<128x128xbf16>, vector<2x128xf32> -> vector<2x128xf32>
    %275 = arith.addf %267, %274 : vector<2x128xf32>
    %276 = vector.extract_strided_slice %258 {offsets = [2, 0], sizes = [1, 128], strides = [1, 1]} : vector<32x128xf32> to vector<1x128xf32>
    %277 = vector.extract_strided_slice %258 {offsets = [18, 0], sizes = [1, 128], strides = [1, 1]} : vector<32x128xf32> to vector<1x128xf32>
    %278 = tpu.concatenate %276, %277 in 0 : vector<1x128xf32>, vector<1x128xf32> -> vector<2x128xf32>
    %279 = arith.truncf %278 : vector<2x128xf32> to vector<2x128xbf16>
    %c2 = arith.constant 2 : index
    %c0_90 = arith.constant 0 : index
    %c0_91 = arith.constant 0 : index
    %280 = vector.load %arg20[%c2, %c0_90, %c0_91] : memref<16x128x128xbf16, #tpu.memory_space<vmem>>, vector<1x128x128xbf16>
    %281 = vector.shape_cast %280 : vector<1x128x128xbf16> to vector<128x128xbf16>
    %cst_92 = arith.constant dense<0.000000e+00> : vector<2x128xf32>
    %282 = tpu.matmul %279, %281, %cst_92 {dimension_numbers = #tpu.dot_dimension_numbers<[1], [0], [0], [1], [0, 0, 1, 1], [], []>} : vector<2x128xbf16>, vector<128x128xbf16>, vector<2x128xf32> -> vector<2x128xf32>
    %283 = arith.addf %275, %282 : vector<2x128xf32>
    %284 = vector.extract_strided_slice %258 {offsets = [3, 0], sizes = [1, 128], strides = [1, 1]} : vector<32x128xf32> to vector<1x128xf32>
    %285 = vector.extract_strided_slice %258 {offsets = [19, 0], sizes = [1, 128], strides = [1, 1]} : vector<32x128xf32> to vector<1x128xf32>
    %286 = tpu.concatenate %284, %285 in 0 : vector<1x128xf32>, vector<1x128xf32> -> vector<2x128xf32>
    %287 = arith.truncf %286 : vector<2x128xf32> to vector<2x128xbf16>
    %c3 = arith.constant 3 : index
    %c0_93 = arith.constant 0 : index
    %c0_94 = arith.constant 0 : index
    %288 = vector.load %arg20[%c3, %c0_93, %c0_94] : memref<16x128x128xbf16, #tpu.memory_space<vmem>>, vector<1x128x128xbf16>
    %289 = vector.shape_cast %288 : vector<1x128x128xbf16> to vector<128x128xbf16>
    %cst_95 = arith.constant dense<0.000000e+00> : vector<2x128xf32>
    %290 = tpu.matmul %287, %289, %cst_95 {dimension_numbers = #tpu.dot_dimension_numbers<[1], [0], [0], [1], [0, 0, 1, 1], [], []>} : vector<2x128xbf16>, vector<128x128xbf16>, vector<2x128xf32> -> vector<2x128xf32>
    %291 = arith.addf %283, %290 : vector<2x128xf32>
    %292 = vector.extract_strided_slice %258 {offsets = [4, 0], sizes = [1, 128], strides = [1, 1]} : vector<32x128xf32> to vector<1x128xf32>
    %293 = vector.extract_strided_slice %258 {offsets = [20, 0], sizes = [1, 128], strides = [1, 1]} : vector<32x128xf32> to vector<1x128xf32>
    %294 = tpu.concatenate %292, %293 in 0 : vector<1x128xf32>, vector<1x128xf32> -> vector<2x128xf32>
    %295 = arith.truncf %294 : vector<2x128xf32> to vector<2x128xbf16>
    %c4 = arith.constant 4 : index
    %c0_96 = arith.constant 0 : index
    %c0_97 = arith.constant 0 : index
    %296 = vector.load %arg20[%c4, %c0_96, %c0_97] : memref<16x128x128xbf16, #tpu.memory_space<vmem>>, vector<1x128x128xbf16>
    %297 = vector.shape_cast %296 : vector<1x128x128xbf16> to vector<128x128xbf16>
    %cst_98 = arith.constant dense<0.000000e+00> : vector<2x128xf32>
    %298 = tpu.matmul %295, %297, %cst_98 {dimension_numbers = #tpu.dot_dimension_numbers<[1], [0], [0], [1], [0, 0, 1, 1], [], []>} : vector<2x128xbf16>, vector<128x128xbf16>, vector<2x128xf32> -> vector<2x128xf32>
    %299 = arith.addf %291, %298 : vector<2x128xf32>
    %300 = vector.extract_strided_slice %258 {offsets = [5, 0], sizes = [1, 128], strides = [1, 1]} : vector<32x128xf32> to vector<1x128xf32>
    %301 = vector.extract_strided_slice %258 {offsets = [21, 0], sizes = [1, 128], strides = [1, 1]} : vector<32x128xf32> to vector<1x128xf32>
    %302 = tpu.concatenate %300, %301 in 0 : vector<1x128xf32>, vector<1x128xf32> -> vector<2x128xf32>
    %303 = arith.truncf %302 : vector<2x128xf32> to vector<2x128xbf16>
    %c5 = arith.constant 5 : index
    %c0_99 = arith.constant 0 : index
    %c0_100 = arith.constant 0 : index
    %304 = vector.load %arg20[%c5, %c0_99, %c0_100] : memref<16x128x128xbf16, #tpu.memory_space<vmem>>, vector<1x128x128xbf16>
    %305 = vector.shape_cast %304 : vector<1x128x128xbf16> to vector<128x128xbf16>
    %cst_101 = arith.constant dense<0.000000e+00> : vector<2x128xf32>
    %306 = tpu.matmul %303, %305, %cst_101 {dimension_numbers = #tpu.dot_dimension_numbers<[1], [0], [0], [1], [0, 0, 1, 1], [], []>} : vector<2x128xbf16>, vector<128x128xbf16>, vector<2x128xf32> -> vector<2x128xf32>
    %307 = arith.addf %299, %306 : vector<2x128xf32>
    %308 = vector.extract_strided_slice %258 {offsets = [6, 0], sizes = [1, 128], strides = [1, 1]} : vector<32x128xf32> to vector<1x128xf32>
    %309 = vector.extract_strided_slice %258 {offsets = [22, 0], sizes = [1, 128], strides = [1, 1]} : vector<32x128xf32> to vector<1x128xf32>
    %310 = tpu.concatenate %308, %309 in 0 : vector<1x128xf32>, vector<1x128xf32> -> vector<2x128xf32>
    %311 = arith.truncf %310 : vector<2x128xf32> to vector<2x128xbf16>
    %c6 = arith.constant 6 : index
    %c0_102 = arith.constant 0 : index
    %c0_103 = arith.constant 0 : index
    %312 = vector.load %arg20[%c6, %c0_102, %c0_103] : memref<16x128x128xbf16, #tpu.memory_space<vmem>>, vector<1x128x128xbf16>
    %313 = vector.shape_cast %312 : vector<1x128x128xbf16> to vector<128x128xbf16>
    %cst_104 = arith.constant dense<0.000000e+00> : vector<2x128xf32>
    %314 = tpu.matmul %311, %313, %cst_104 {dimension_numbers = #tpu.dot_dimension_numbers<[1], [0], [0], [1], [0, 0, 1, 1], [], []>} : vector<2x128xbf16>, vector<128x128xbf16>, vector<2x128xf32> -> vector<2x128xf32>
    %315 = arith.addf %307, %314 : vector<2x128xf32>
    %316 = vector.extract_strided_slice %258 {offsets = [7, 0], sizes = [1, 128], strides = [1, 1]} : vector<32x128xf32> to vector<1x128xf32>
    %317 = vector.extract_strided_slice %258 {offsets = [23, 0], sizes = [1, 128], strides = [1, 1]} : vector<32x128xf32> to vector<1x128xf32>
    %318 = tpu.concatenate %316, %317 in 0 : vector<1x128xf32>, vector<1x128xf32> -> vector<2x128xf32>
    %319 = arith.truncf %318 : vector<2x128xf32> to vector<2x128xbf16>
    %c7 = arith.constant 7 : index
    %c0_105 = arith.constant 0 : index
    %c0_106 = arith.constant 0 : index
    %320 = vector.load %arg20[%c7, %c0_105, %c0_106] : memref<16x128x128xbf16, #tpu.memory_space<vmem>>, vector<1x128x128xbf16>
    %321 = vector.shape_cast %320 : vector<1x128x128xbf16> to vector<128x128xbf16>
    %cst_107 = arith.constant dense<0.000000e+00> : vector<2x128xf32>
    %322 = tpu.matmul %319, %321, %cst_107 {dimension_numbers = #tpu.dot_dimension_numbers<[1], [0], [0], [1], [0, 0, 1, 1], [], []>} : vector<2x128xbf16>, vector<128x128xbf16>, vector<2x128xf32> -> vector<2x128xf32>
    %323 = arith.addf %315, %322 : vector<2x128xf32>
    %324 = vector.extract_strided_slice %258 {offsets = [8, 0], sizes = [1, 128], strides = [1, 1]} : vector<32x128xf32> to vector<1x128xf32>
    %325 = vector.extract_strided_slice %258 {offsets = [24, 0], sizes = [1, 128], strides = [1, 1]} : vector<32x128xf32> to vector<1x128xf32>
    %326 = tpu.concatenate %324, %325 in 0 : vector<1x128xf32>, vector<1x128xf32> -> vector<2x128xf32>
    %327 = arith.truncf %326 : vector<2x128xf32> to vector<2x128xbf16>
    %c8 = arith.constant 8 : index
    %c0_108 = arith.constant 0 : index
    %c0_109 = arith.constant 0 : index
    %328 = vector.load %arg20[%c8, %c0_108, %c0_109] : memref<16x128x128xbf16, #tpu.memory_space<vmem>>, vector<1x128x128xbf16>
    %329 = vector.shape_cast %328 : vector<1x128x128xbf16> to vector<128x128xbf16>
    %cst_110 = arith.constant dense<0.000000e+00> : vector<2x128xf32>
    %330 = tpu.matmul %327, %329, %cst_110 {dimension_numbers = #tpu.dot_dimension_numbers<[1], [0], [0], [1], [0, 0, 1, 1], [], []>} : vector<2x128xbf16>, vector<128x128xbf16>, vector<2x128xf32> -> vector<2x128xf32>
    %331 = arith.addf %323, %330 : vector<2x128xf32>
    %332 = vector.extract_strided_slice %258 {offsets = [9, 0], sizes = [1, 128], strides = [1, 1]} : vector<32x128xf32> to vector<1x128xf32>
    %333 = vector.extract_strided_slice %258 {offsets = [25, 0], sizes = [1, 128], strides = [1, 1]} : vector<32x128xf32> to vector<1x128xf32>
    %334 = tpu.concatenate %332, %333 in 0 : vector<1x128xf32>, vector<1x128xf32> -> vector<2x128xf32>
    %335 = arith.truncf %334 : vector<2x128xf32> to vector<2x128xbf16>
    %c9 = arith.constant 9 : index
    %c0_111 = arith.constant 0 : index
    %c0_112 = arith.constant 0 : index
    %336 = vector.load %arg20[%c9, %c0_111, %c0_112] : memref<16x128x128xbf16, #tpu.memory_space<vmem>>, vector<1x128x128xbf16>
    %337 = vector.shape_cast %336 : vector<1x128x128xbf16> to vector<128x128xbf16>
    %cst_113 = arith.constant dense<0.000000e+00> : vector<2x128xf32>
    %338 = tpu.matmul %335, %337, %cst_113 {dimension_numbers = #tpu.dot_dimension_numbers<[1], [0], [0], [1], [0, 0, 1, 1], [], []>} : vector<2x128xbf16>, vector<128x128xbf16>, vector<2x128xf32> -> vector<2x128xf32>
    %339 = arith.addf %331, %338 : vector<2x128xf32>
    %340 = vector.extract_strided_slice %258 {offsets = [10, 0], sizes = [1, 128], strides = [1, 1]} : vector<32x128xf32> to vector<1x128xf32>
    %341 = vector.extract_strided_slice %258 {offsets = [26, 0], sizes = [1, 128], strides = [1, 1]} : vector<32x128xf32> to vector<1x128xf32>
    %342 = tpu.concatenate %340, %341 in 0 : vector<1x128xf32>, vector<1x128xf32> -> vector<2x128xf32>
    %343 = arith.truncf %342 : vector<2x128xf32> to vector<2x128xbf16>
    %c10 = arith.constant 10 : index
    %c0_114 = arith.constant 0 : index
    %c0_115 = arith.constant 0 : index
    %344 = vector.load %arg20[%c10, %c0_114, %c0_115] : memref<16x128x128xbf16, #tpu.memory_space<vmem>>, vector<1x128x128xbf16>
    %345 = vector.shape_cast %344 : vector<1x128x128xbf16> to vector<128x128xbf16>
    %cst_116 = arith.constant dense<0.000000e+00> : vector<2x128xf32>
    %346 = tpu.matmul %343, %345, %cst_116 {dimension_numbers = #tpu.dot_dimension_numbers<[1], [0], [0], [1], [0, 0, 1, 1], [], []>} : vector<2x128xbf16>, vector<128x128xbf16>, vector<2x128xf32> -> vector<2x128xf32>
    %347 = arith.addf %339, %346 : vector<2x128xf32>
    %348 = vector.extract_strided_slice %258 {offsets = [11, 0], sizes = [1, 128], strides = [1, 1]} : vector<32x128xf32> to vector<1x128xf32>
    %349 = vector.extract_strided_slice %258 {offsets = [27, 0], sizes = [1, 128], strides = [1, 1]} : vector<32x128xf32> to vector<1x128xf32>
    %350 = tpu.concatenate %348, %349 in 0 : vector<1x128xf32>, vector<1x128xf32> -> vector<2x128xf32>
    %351 = arith.truncf %350 : vector<2x128xf32> to vector<2x128xbf16>
    %c11 = arith.constant 11 : index
    %c0_117 = arith.constant 0 : index
    %c0_118 = arith.constant 0 : index
    %352 = vector.load %arg20[%c11, %c0_117, %c0_118] : memref<16x128x128xbf16, #tpu.memory_space<vmem>>, vector<1x128x128xbf16>
    %353 = vector.shape_cast %352 : vector<1x128x128xbf16> to vector<128x128xbf16>
    %cst_119 = arith.constant dense<0.000000e+00> : vector<2x128xf32>
    %354 = tpu.matmul %351, %353, %cst_119 {dimension_numbers = #tpu.dot_dimension_numbers<[1], [0], [0], [1], [0, 0, 1, 1], [], []>} : vector<2x128xbf16>, vector<128x128xbf16>, vector<2x128xf32> -> vector<2x128xf32>
    %355 = arith.addf %347, %354 : vector<2x128xf32>
    %356 = vector.extract_strided_slice %258 {offsets = [12, 0], sizes = [1, 128], strides = [1, 1]} : vector<32x128xf32> to vector<1x128xf32>
    %357 = vector.extract_strided_slice %258 {offsets = [28, 0], sizes = [1, 128], strides = [1, 1]} : vector<32x128xf32> to vector<1x128xf32>
    %358 = tpu.concatenate %356, %357 in 0 : vector<1x128xf32>, vector<1x128xf32> -> vector<2x128xf32>
    %359 = arith.truncf %358 : vector<2x128xf32> to vector<2x128xbf16>
    %c12 = arith.constant 12 : index
    %c0_120 = arith.constant 0 : index
    %c0_121 = arith.constant 0 : index
    %360 = vector.load %arg20[%c12, %c0_120, %c0_121] : memref<16x128x128xbf16, #tpu.memory_space<vmem>>, vector<1x128x128xbf16>
    %361 = vector.shape_cast %360 : vector<1x128x128xbf16> to vector<128x128xbf16>
    %cst_122 = arith.constant dense<0.000000e+00> : vector<2x128xf32>
    %362 = tpu.matmul %359, %361, %cst_122 {dimension_numbers = #tpu.dot_dimension_numbers<[1], [0], [0], [1], [0, 0, 1, 1], [], []>} : vector<2x128xbf16>, vector<128x128xbf16>, vector<2x128xf32> -> vector<2x128xf32>
    %363 = arith.addf %355, %362 : vector<2x128xf32>
    %364 = vector.extract_strided_slice %258 {offsets = [13, 0], sizes = [1, 128], strides = [1, 1]} : vector<32x128xf32> to vector<1x128xf32>
    %365 = vector.extract_strided_slice %258 {offsets = [29, 0], sizes = [1, 128], strides = [1, 1]} : vector<32x128xf32> to vector<1x128xf32>
    %366 = tpu.concatenate %364, %365 in 0 : vector<1x128xf32>, vector<1x128xf32> -> vector<2x128xf32>
    %367 = arith.truncf %366 : vector<2x128xf32> to vector<2x128xbf16>
    %c13 = arith.constant 13 : index
    %c0_123 = arith.constant 0 : index
    %c0_124 = arith.constant 0 : index
    %368 = vector.load %arg20[%c13, %c0_123, %c0_124] : memref<16x128x128xbf16, #tpu.memory_space<vmem>>, vector<1x128x128xbf16>
    %369 = vector.shape_cast %368 : vector<1x128x128xbf16> to vector<128x128xbf16>
    %cst_125 = arith.constant dense<0.000000e+00> : vector<2x128xf32>
    %370 = tpu.matmul %367, %369, %cst_125 {dimension_numbers = #tpu.dot_dimension_numbers<[1], [0], [0], [1], [0, 0, 1, 1], [], []>} : vector<2x128xbf16>, vector<128x128xbf16>, vector<2x128xf32> -> vector<2x128xf32>
    %371 = arith.addf %363, %370 : vector<2x128xf32>
    %372 = vector.extract_strided_slice %258 {offsets = [14, 0], sizes = [1, 128], strides = [1, 1]} : vector<32x128xf32> to vector<1x128xf32>
    %373 = vector.extract_strided_slice %258 {offsets = [30, 0], sizes = [1, 128], strides = [1, 1]} : vector<32x128xf32> to vector<1x128xf32>
    %374 = tpu.concatenate %372, %373 in 0 : vector<1x128xf32>, vector<1x128xf32> -> vector<2x128xf32>
    %375 = arith.truncf %374 : vector<2x128xf32> to vector<2x128xbf16>
    %c14 = arith.constant 14 : index
    %c0_126 = arith.constant 0 : index
    %c0_127 = arith.constant 0 : index
    %376 = vector.load %arg20[%c14, %c0_126, %c0_127] : memref<16x128x128xbf16, #tpu.memory_space<vmem>>, vector<1x128x128xbf16>
    %377 = vector.shape_cast %376 : vector<1x128x128xbf16> to vector<128x128xbf16>
    %cst_128 = arith.constant dense<0.000000e+00> : vector<2x128xf32>
    %378 = tpu.matmul %375, %377, %cst_128 {dimension_numbers = #tpu.dot_dimension_numbers<[1], [0], [0], [1], [0, 0, 1, 1], [], []>} : vector<2x128xbf16>, vector<128x128xbf16>, vector<2x128xf32> -> vector<2x128xf32>
    %379 = arith.addf %371, %378 : vector<2x128xf32>
    %380 = vector.extract_strided_slice %258 {offsets = [15, 0], sizes = [1, 128], strides = [1, 1]} : vector<32x128xf32> to vector<1x128xf32>
    %381 = vector.extract_strided_slice %258 {offsets = [31, 0], sizes = [1, 128], strides = [1, 1]} : vector<32x128xf32> to vector<1x128xf32>
    %382 = tpu.concatenate %380, %381 in 0 : vector<1x128xf32>, vector<1x128xf32> -> vector<2x128xf32>
    %383 = arith.truncf %382 : vector<2x128xf32> to vector<2x128xbf16>
    %c15 = arith.constant 15 : index
    %c0_129 = arith.constant 0 : index
    %c0_130 = arith.constant 0 : index
    %384 = vector.load %arg20[%c15, %c0_129, %c0_130] : memref<16x128x128xbf16, #tpu.memory_space<vmem>>, vector<1x128x128xbf16>
    %385 = vector.shape_cast %384 : vector<1x128x128xbf16> to vector<128x128xbf16>
    %cst_131 = arith.constant dense<0.000000e+00> : vector<2x128xf32>
    %386 = tpu.matmul %383, %385, %cst_131 {dimension_numbers = #tpu.dot_dimension_numbers<[1], [0], [0], [1], [0, 0, 1, 1], [], []>} : vector<2x128xbf16>, vector<128x128xbf16>, vector<2x128xf32> -> vector<2x128xf32>
    %387 = arith.addf %379, %386 : vector<2x128xf32>
    %c0_132 = arith.constant 0 : index
    %c0_133 = arith.constant 0 : index
    %388 = vector.load %arg2[%c0_132, %c0_133] : memref<16x1xi32, #tpu.memory_space<vmem>>, vector<16x1xi32>
    %389 = tpu.iota {dimensions = array<i32: 1>} : vector<16x14xi32>
    %390 = vector.broadcast %388 : vector<16x1xi32> to vector<16x14xi32>
    %391 = arith.cmpi eq, %389, %390 : vector<16x14xi32>
    %392 = arith.extui %391 : vector<16x14xi1> to vector<16x14xi32>
    %393 = arith.sitofp %392 : vector<16x14xi32> to vector<16x14xf32>
    %394 = arith.truncf %393 : vector<16x14xf32> to vector<16x14xbf16>
    %c0_134 = arith.constant 0 : index
    %c0_135 = arith.constant 0 : index
    %395 = vector.load %arg21[%c0_134, %c0_135] : memref<14x32xbf16, #tpu.memory_space<vmem>>, vector<14x32xbf16>
    %cst_136 = arith.constant dense<0.000000e+00> : vector<16x32xf32>
    %396 = tpu.matmul %394, %395, %cst_136 {dimension_numbers = #tpu.dot_dimension_numbers<[1], [0], [0], [1], [0, 0, 1, 1], [], []>} : vector<16x14xbf16>, vector<14x32xbf16>, vector<16x32xf32> -> vector<16x32xf32>
    %c0_137 = arith.constant 0 : index
    %c0_138 = arith.constant 0 : index
    %397 = vector.load %arg22[%c0_137, %c0_138] : memref<8x32xf32, #tpu.memory_space<vmem>>, vector<8x32xf32>
    %398 = tpu.concatenate %397, %397 in 0 : vector<8x32xf32>, vector<8x32xf32> -> vector<16x32xf32>
    %399 = arith.addf %396, %398 : vector<16x32xf32>
    %400 = arith.truncf %399 : vector<16x32xf32> to vector<16x32xbf16>
    %c0_139 = arith.constant 0 : index
    %c0_140 = arith.constant 0 : index
    %401 = vector.load %arg23[%c0_139, %c0_140] : memref<32x32xbf16, #tpu.memory_space<vmem>>, vector<32x32xbf16>
    %cst_141 = arith.constant dense<0.000000e+00> : vector<16x32xf32>
    %402 = tpu.matmul %400, %401, %cst_141 {dimension_numbers = #tpu.dot_dimension_numbers<[1], [0], [0], [1], [0, 0, 1, 1], [], []>} : vector<16x32xbf16>, vector<32x32xbf16>, vector<16x32xf32> -> vector<16x32xf32>
    %c0_142 = arith.constant 0 : index
    %c0_143 = arith.constant 0 : index
    %403 = vector.load %arg24[%c0_142, %c0_143] : memref<32x32xbf16, #tpu.memory_space<vmem>>, vector<32x32xbf16>
    %cst_144 = arith.constant dense<0.000000e+00> : vector<16x32xf32>
    %404 = tpu.matmul %400, %403, %cst_144 {dimension_numbers = #tpu.dot_dimension_numbers<[1], [0], [0], [1], [0, 0, 1, 1], [], []>} : vector<16x32xbf16>, vector<32x32xbf16>, vector<16x32xf32> -> vector<16x32xf32>
    %c0_145 = arith.constant 0 : index
    %c0_146 = arith.constant 0 : index
    %405 = vector.load %arg25[%c0_145, %c0_146] : memref<32x32xbf16, #tpu.memory_space<vmem>>, vector<32x32xbf16>
    %cst_147 = arith.constant dense<0.000000e+00> : vector<16x32xf32>
    %406 = tpu.matmul %400, %405, %cst_147 {dimension_numbers = #tpu.dot_dimension_numbers<[1], [0], [0], [1], [0, 0, 1, 1], [], []>} : vector<16x32xbf16>, vector<32x32xbf16>, vector<16x32xf32> -> vector<16x32xf32>
    %c0_148 = arith.constant 0 : index
    %c0_149 = arith.constant 0 : index
    %407 = vector.load %arg3[%c0_148, %c0_149] : memref<2x8xf32, #tpu.memory_space<vmem>>, vector<2x8xf32>
    %408 = vector.extract_strided_slice %407 {offsets = [0, 0], sizes = [1, 8], strides = [1, 1]} : vector<2x8xf32> to vector<1x8xf32>
    %409 = vector.extract_strided_slice %402 {offsets = [0, 0], sizes = [8, 8], strides = [1, 1]} : vector<16x32xf32> to vector<8x8xf32>
    %410 = arith.truncf %409 : vector<8x8xf32> to vector<8x8xbf16>
    %411 = vector.extract_strided_slice %404 {offsets = [0, 0], sizes = [8, 8], strides = [1, 1]} : vector<16x32xf32> to vector<8x8xf32>
    %412 = arith.truncf %411 : vector<8x8xf32> to vector<8x8xbf16>
    %413 = vector.extract_strided_slice %406 {offsets = [0, 0], sizes = [8, 8], strides = [1, 1]} : vector<16x32xf32> to vector<8x8xf32>
    %414 = arith.truncf %413 : vector<8x8xf32> to vector<8x8xbf16>
    "tpu.trace_start"() <{level = 10 : i32, message = "qd,kd->qk"}> : () -> ()
    %cst_150 = arith.constant dense<0.000000e+00> : vector<8x8xf32>
    %415 = tpu.matmul %410, %412, %cst_150 {dimension_numbers = #tpu.dot_dimension_numbers<[1], [1], [0], [0], [0, 0, 1, 0], [], []>} : vector<8x8xbf16>, vector<8x8xbf16>, vector<8x8xf32> -> vector<8x8xf32>
    "tpu.trace_stop"() : () -> ()
    %416 = vector.broadcast %408 : vector<1x8xf32> to vector<8x8xf32>
    %417 = arith.addf %415, %416 : vector<8x8xf32>
    %cst_151 = arith.constant dense<0xFF800000> : vector<8xf32>
    %418 = vector.multi_reduction <maximumf>, %417, %cst_151 [1] : vector<8x8xf32> to vector<8xf32>
    %419 = vector.shape_cast %418 : vector<8xf32> to vector<8x1xf32>
    %420 = vector.broadcast %419 : vector<8x1xf32> to vector<8x8xf32>
    %421 = arith.subf %417, %420 : vector<8x8xf32>
    %422 = math.exp %421 : vector<8x8xf32>
    %cst_152 = arith.constant dense<0.000000e+00> : vector<8xf32>
    %423 = vector.multi_reduction <add>, %422, %cst_152 [1] : vector<8x8xf32> to vector<8xf32>
    %424 = vector.shape_cast %423 : vector<8xf32> to vector<8x1xf32>
    %425 = tpu.reciprocal %424 {approx = true} : vector<8x1xf32> -> vector<8x1xf32>
    %426 = vector.broadcast %425 : vector<8x1xf32> to vector<8x8xf32>
    %427 = arith.mulf %422, %426 : vector<8x8xf32>
    %428 = arith.truncf %427 : vector<8x8xf32> to vector<8x8xbf16>
    %cst_153 = arith.constant dense<0.000000e+00> : vector<8x8xf32>
    %429 = tpu.matmul %428, %414, %cst_153 {dimension_numbers = #tpu.dot_dimension_numbers<[1], [0], [0], [1], [0, 0, 1, 1], [], []>} : vector<8x8xbf16>, vector<8x8xbf16>, vector<8x8xf32> -> vector<8x8xf32>
    %430 = vector.extract_strided_slice %402 {offsets = [0, 8], sizes = [8, 8], strides = [1, 1]} : vector<16x32xf32> to vector<8x8xf32>
    %431 = arith.truncf %430 : vector<8x8xf32> to vector<8x8xbf16>
    %432 = vector.extract_strided_slice %404 {offsets = [0, 8], sizes = [8, 8], strides = [1, 1]} : vector<16x32xf32> to vector<8x8xf32>
    %433 = arith.truncf %432 : vector<8x8xf32> to vector<8x8xbf16>
    %434 = vector.extract_strided_slice %406 {offsets = [0, 8], sizes = [8, 8], strides = [1, 1]} : vector<16x32xf32> to vector<8x8xf32>
    %435 = arith.truncf %434 : vector<8x8xf32> to vector<8x8xbf16>
    "tpu.trace_start"() <{level = 10 : i32, message = "qd,kd->qk"}> : () -> ()
    %cst_154 = arith.constant dense<0.000000e+00> : vector<8x8xf32>
    %436 = tpu.matmul %431, %433, %cst_154 {dimension_numbers = #tpu.dot_dimension_numbers<[1], [1], [0], [0], [0, 0, 1, 0], [], []>} : vector<8x8xbf16>, vector<8x8xbf16>, vector<8x8xf32> -> vector<8x8xf32>
    "tpu.trace_stop"() : () -> ()
    %437 = vector.broadcast %408 : vector<1x8xf32> to vector<8x8xf32>
    %438 = arith.addf %436, %437 : vector<8x8xf32>
    %cst_155 = arith.constant dense<0xFF800000> : vector<8xf32>
    %439 = vector.multi_reduction <maximumf>, %438, %cst_155 [1] : vector<8x8xf32> to vector<8xf32>
    %440 = vector.shape_cast %439 : vector<8xf32> to vector<8x1xf32>
    %441 = vector.broadcast %440 : vector<8x1xf32> to vector<8x8xf32>
    %442 = arith.subf %438, %441 : vector<8x8xf32>
    %443 = math.exp %442 : vector<8x8xf32>
    %cst_156 = arith.constant dense<0.000000e+00> : vector<8xf32>
    %444 = vector.multi_reduction <add>, %443, %cst_156 [1] : vector<8x8xf32> to vector<8xf32>
    %445 = vector.shape_cast %444 : vector<8xf32> to vector<8x1xf32>
    %446 = tpu.reciprocal %445 {approx = true} : vector<8x1xf32> -> vector<8x1xf32>
    %447 = vector.broadcast %446 : vector<8x1xf32> to vector<8x8xf32>
    %448 = arith.mulf %443, %447 : vector<8x8xf32>
    %449 = arith.truncf %448 : vector<8x8xf32> to vector<8x8xbf16>
    %cst_157 = arith.constant dense<0.000000e+00> : vector<8x8xf32>
    %450 = tpu.matmul %449, %435, %cst_157 {dimension_numbers = #tpu.dot_dimension_numbers<[1], [0], [0], [1], [0, 0, 1, 1], [], []>} : vector<8x8xbf16>, vector<8x8xbf16>, vector<8x8xf32> -> vector<8x8xf32>
    %451 = vector.extract_strided_slice %402 {offsets = [0, 16], sizes = [8, 8], strides = [1, 1]} : vector<16x32xf32> to vector<8x8xf32>
    %452 = arith.truncf %451 : vector<8x8xf32> to vector<8x8xbf16>
    %453 = vector.extract_strided_slice %404 {offsets = [0, 16], sizes = [8, 8], strides = [1, 1]} : vector<16x32xf32> to vector<8x8xf32>
    %454 = arith.truncf %453 : vector<8x8xf32> to vector<8x8xbf16>
    %455 = vector.extract_strided_slice %406 {offsets = [0, 16], sizes = [8, 8], strides = [1, 1]} : vector<16x32xf32> to vector<8x8xf32>
    %456 = arith.truncf %455 : vector<8x8xf32> to vector<8x8xbf16>
    "tpu.trace_start"() <{level = 10 : i32, message = "qd,kd->qk"}> : () -> ()
    %cst_158 = arith.constant dense<0.000000e+00> : vector<8x8xf32>
    %457 = tpu.matmul %452, %454, %cst_158 {dimension_numbers = #tpu.dot_dimension_numbers<[1], [1], [0], [0], [0, 0, 1, 0], [], []>} : vector<8x8xbf16>, vector<8x8xbf16>, vector<8x8xf32> -> vector<8x8xf32>
    "tpu.trace_stop"() : () -> ()
    %458 = vector.broadcast %408 : vector<1x8xf32> to vector<8x8xf32>
    %459 = arith.addf %457, %458 : vector<8x8xf32>
    %cst_159 = arith.constant dense<0xFF800000> : vector<8xf32>
    %460 = vector.multi_reduction <maximumf>, %459, %cst_159 [1] : vector<8x8xf32> to vector<8xf32>
    %461 = vector.shape_cast %460 : vector<8xf32> to vector<8x1xf32>
    %462 = vector.broadcast %461 : vector<8x1xf32> to vector<8x8xf32>
    %463 = arith.subf %459, %462 : vector<8x8xf32>
    %464 = math.exp %463 : vector<8x8xf32>
    %cst_160 = arith.constant dense<0.000000e+00> : vector<8xf32>
    %465 = vector.multi_reduction <add>, %464, %cst_160 [1] : vector<8x8xf32> to vector<8xf32>
    %466 = vector.shape_cast %465 : vector<8xf32> to vector<8x1xf32>
    %467 = tpu.reciprocal %466 {approx = true} : vector<8x1xf32> -> vector<8x1xf32>
    %468 = vector.broadcast %467 : vector<8x1xf32> to vector<8x8xf32>
    %469 = arith.mulf %464, %468 : vector<8x8xf32>
    %470 = arith.truncf %469 : vector<8x8xf32> to vector<8x8xbf16>
    %cst_161 = arith.constant dense<0.000000e+00> : vector<8x8xf32>
    %471 = tpu.matmul %470, %456, %cst_161 {dimension_numbers = #tpu.dot_dimension_numbers<[1], [0], [0], [1], [0, 0, 1, 1], [], []>} : vector<8x8xbf16>, vector<8x8xbf16>, vector<8x8xf32> -> vector<8x8xf32>
    %472 = vector.extract_strided_slice %402 {offsets = [0, 24], sizes = [8, 8], strides = [1, 1]} : vector<16x32xf32> to vector<8x8xf32>
    %473 = arith.truncf %472 : vector<8x8xf32> to vector<8x8xbf16>
    %474 = vector.extract_strided_slice %404 {offsets = [0, 24], sizes = [8, 8], strides = [1, 1]} : vector<16x32xf32> to vector<8x8xf32>
    %475 = arith.truncf %474 : vector<8x8xf32> to vector<8x8xbf16>
    %476 = vector.extract_strided_slice %406 {offsets = [0, 24], sizes = [8, 8], strides = [1, 1]} : vector<16x32xf32> to vector<8x8xf32>
    %477 = arith.truncf %476 : vector<8x8xf32> to vector<8x8xbf16>
    "tpu.trace_start"() <{level = 10 : i32, message = "qd,kd->qk"}> : () -> ()
    %cst_162 = arith.constant dense<0.000000e+00> : vector<8x8xf32>
    %478 = tpu.matmul %473, %475, %cst_162 {dimension_numbers = #tpu.dot_dimension_numbers<[1], [1], [0], [0], [0, 0, 1, 0], [], []>} : vector<8x8xbf16>, vector<8x8xbf16>, vector<8x8xf32> -> vector<8x8xf32>
    "tpu.trace_stop"() : () -> ()
    %479 = vector.broadcast %408 : vector<1x8xf32> to vector<8x8xf32>
    %480 = arith.addf %478, %479 : vector<8x8xf32>
    %cst_163 = arith.constant dense<0xFF800000> : vector<8xf32>
    %481 = vector.multi_reduction <maximumf>, %480, %cst_163 [1] : vector<8x8xf32> to vector<8xf32>
    %482 = vector.shape_cast %481 : vector<8xf32> to vector<8x1xf32>
    %483 = vector.broadcast %482 : vector<8x1xf32> to vector<8x8xf32>
    %484 = arith.subf %480, %483 : vector<8x8xf32>
    %485 = math.exp %484 : vector<8x8xf32>
    %cst_164 = arith.constant dense<0.000000e+00> : vector<8xf32>
    %486 = vector.multi_reduction <add>, %485, %cst_164 [1] : vector<8x8xf32> to vector<8xf32>
    %487 = vector.shape_cast %486 : vector<8xf32> to vector<8x1xf32>
    %488 = tpu.reciprocal %487 {approx = true} : vector<8x1xf32> -> vector<8x1xf32>
    %489 = vector.broadcast %488 : vector<8x1xf32> to vector<8x8xf32>
    %490 = arith.mulf %485, %489 : vector<8x8xf32>
    %491 = arith.truncf %490 : vector<8x8xf32> to vector<8x8xbf16>
    %cst_165 = arith.constant dense<0.000000e+00> : vector<8x8xf32>
    %492 = tpu.matmul %491, %477, %cst_165 {dimension_numbers = #tpu.dot_dimension_numbers<[1], [0], [0], [1], [0, 0, 1, 1], [], []>} : vector<8x8xbf16>, vector<8x8xbf16>, vector<8x8xf32> -> vector<8x8xf32>
    %493 = tpu.concatenate %429, %450, %471, %492 in 1 : vector<8x8xf32>, vector<8x8xf32>, vector<8x8xf32>, vector<8x8xf32> -> vector<8x32xf32>
    %494 = vector.extract_strided_slice %407 {offsets = [1, 0], sizes = [1, 8], strides = [1, 1]} : vector<2x8xf32> to vector<1x8xf32>
    %495 = vector.extract_strided_slice %402 {offsets = [8, 0], sizes = [8, 8], strides = [1, 1]} : vector<16x32xf32> to vector<8x8xf32>
    %496 = arith.truncf %495 : vector<8x8xf32> to vector<8x8xbf16>
    %497 = vector.extract_strided_slice %404 {offsets = [8, 0], sizes = [8, 8], strides = [1, 1]} : vector<16x32xf32> to vector<8x8xf32>
    %498 = arith.truncf %497 : vector<8x8xf32> to vector<8x8xbf16>
    %499 = vector.extract_strided_slice %406 {offsets = [8, 0], sizes = [8, 8], strides = [1, 1]} : vector<16x32xf32> to vector<8x8xf32>
    %500 = arith.truncf %499 : vector<8x8xf32> to vector<8x8xbf16>
    "tpu.trace_start"() <{level = 10 : i32, message = "qd,kd->qk"}> : () -> ()
    %cst_166 = arith.constant dense<0.000000e+00> : vector<8x8xf32>
    %501 = tpu.matmul %496, %498, %cst_166 {dimension_numbers = #tpu.dot_dimension_numbers<[1], [1], [0], [0], [0, 0, 1, 0], [], []>} : vector<8x8xbf16>, vector<8x8xbf16>, vector<8x8xf32> -> vector<8x8xf32>
    "tpu.trace_stop"() : () -> ()
    %502 = vector.broadcast %494 : vector<1x8xf32> to vector<8x8xf32>
    %503 = arith.addf %501, %502 : vector<8x8xf32>
    %cst_167 = arith.constant dense<0xFF800000> : vector<8xf32>
    %504 = vector.multi_reduction <maximumf>, %503, %cst_167 [1] : vector<8x8xf32> to vector<8xf32>
    %505 = vector.shape_cast %504 : vector<8xf32> to vector<8x1xf32>
    %506 = vector.broadcast %505 : vector<8x1xf32> to vector<8x8xf32>
    %507 = arith.subf %503, %506 : vector<8x8xf32>
    %508 = math.exp %507 : vector<8x8xf32>
    %cst_168 = arith.constant dense<0.000000e+00> : vector<8xf32>
    %509 = vector.multi_reduction <add>, %508, %cst_168 [1] : vector<8x8xf32> to vector<8xf32>
    %510 = vector.shape_cast %509 : vector<8xf32> to vector<8x1xf32>
    %511 = tpu.reciprocal %510 {approx = true} : vector<8x1xf32> -> vector<8x1xf32>
    %512 = vector.broadcast %511 : vector<8x1xf32> to vector<8x8xf32>
    %513 = arith.mulf %508, %512 : vector<8x8xf32>
    %514 = arith.truncf %513 : vector<8x8xf32> to vector<8x8xbf16>
    %cst_169 = arith.constant dense<0.000000e+00> : vector<8x8xf32>
    %515 = tpu.matmul %514, %500, %cst_169 {dimension_numbers = #tpu.dot_dimension_numbers<[1], [0], [0], [1], [0, 0, 1, 1], [], []>} : vector<8x8xbf16>, vector<8x8xbf16>, vector<8x8xf32> -> vector<8x8xf32>
    %516 = vector.extract_strided_slice %402 {offsets = [8, 8], sizes = [8, 8], strides = [1, 1]} : vector<16x32xf32> to vector<8x8xf32>
    %517 = arith.truncf %516 : vector<8x8xf32> to vector<8x8xbf16>
    %518 = vector.extract_strided_slice %404 {offsets = [8, 8], sizes = [8, 8], strides = [1, 1]} : vector<16x32xf32> to vector<8x8xf32>
    %519 = arith.truncf %518 : vector<8x8xf32> to vector<8x8xbf16>
    %520 = vector.extract_strided_slice %406 {offsets = [8, 8], sizes = [8, 8], strides = [1, 1]} : vector<16x32xf32> to vector<8x8xf32>
    %521 = arith.truncf %520 : vector<8x8xf32> to vector<8x8xbf16>
    "tpu.trace_start"() <{level = 10 : i32, message = "qd,kd->qk"}> : () -> ()
    %cst_170 = arith.constant dense<0.000000e+00> : vector<8x8xf32>
    %522 = tpu.matmul %517, %519, %cst_170 {dimension_numbers = #tpu.dot_dimension_numbers<[1], [1], [0], [0], [0, 0, 1, 0], [], []>} : vector<8x8xbf16>, vector<8x8xbf16>, vector<8x8xf32> -> vector<8x8xf32>
    "tpu.trace_stop"() : () -> ()
    %523 = vector.broadcast %494 : vector<1x8xf32> to vector<8x8xf32>
    %524 = arith.addf %522, %523 : vector<8x8xf32>
    %cst_171 = arith.constant dense<0xFF800000> : vector<8xf32>
    %525 = vector.multi_reduction <maximumf>, %524, %cst_171 [1] : vector<8x8xf32> to vector<8xf32>
    %526 = vector.shape_cast %525 : vector<8xf32> to vector<8x1xf32>
    %527 = vector.broadcast %526 : vector<8x1xf32> to vector<8x8xf32>
    %528 = arith.subf %524, %527 : vector<8x8xf32>
    %529 = math.exp %528 : vector<8x8xf32>
    %cst_172 = arith.constant dense<0.000000e+00> : vector<8xf32>
    %530 = vector.multi_reduction <add>, %529, %cst_172 [1] : vector<8x8xf32> to vector<8xf32>
    %531 = vector.shape_cast %530 : vector<8xf32> to vector<8x1xf32>
    %532 = tpu.reciprocal %531 {approx = true} : vector<8x1xf32> -> vector<8x1xf32>
    %533 = vector.broadcast %532 : vector<8x1xf32> to vector<8x8xf32>
    %534 = arith.mulf %529, %533 : vector<8x8xf32>
    %535 = arith.truncf %534 : vector<8x8xf32> to vector<8x8xbf16>
    %cst_173 = arith.constant dense<0.000000e+00> : vector<8x8xf32>
    %536 = tpu.matmul %535, %521, %cst_173 {dimension_numbers = #tpu.dot_dimension_numbers<[1], [0], [0], [1], [0, 0, 1, 1], [], []>} : vector<8x8xbf16>, vector<8x8xbf16>, vector<8x8xf32> -> vector<8x8xf32>
    %537 = vector.extract_strided_slice %402 {offsets = [8, 16], sizes = [8, 8], strides = [1, 1]} : vector<16x32xf32> to vector<8x8xf32>
    %538 = arith.truncf %537 : vector<8x8xf32> to vector<8x8xbf16>
    %539 = vector.extract_strided_slice %404 {offsets = [8, 16], sizes = [8, 8], strides = [1, 1]} : vector<16x32xf32> to vector<8x8xf32>
    %540 = arith.truncf %539 : vector<8x8xf32> to vector<8x8xbf16>
    %541 = vector.extract_strided_slice %406 {offsets = [8, 16], sizes = [8, 8], strides = [1, 1]} : vector<16x32xf32> to vector<8x8xf32>
    %542 = arith.truncf %541 : vector<8x8xf32> to vector<8x8xbf16>
    "tpu.trace_start"() <{level = 10 : i32, message = "qd,kd->qk"}> : () -> ()
    %cst_174 = arith.constant dense<0.000000e+00> : vector<8x8xf32>
    %543 = tpu.matmul %538, %540, %cst_174 {dimension_numbers = #tpu.dot_dimension_numbers<[1], [1], [0], [0], [0, 0, 1, 0], [], []>} : vector<8x8xbf16>, vector<8x8xbf16>, vector<8x8xf32> -> vector<8x8xf32>
    "tpu.trace_stop"() : () -> ()
    %544 = vector.broadcast %494 : vector<1x8xf32> to vector<8x8xf32>
    %545 = arith.addf %543, %544 : vector<8x8xf32>
    %cst_175 = arith.constant dense<0xFF800000> : vector<8xf32>
    %546 = vector.multi_reduction <maximumf>, %545, %cst_175 [1] : vector<8x8xf32> to vector<8xf32>
    %547 = vector.shape_cast %546 : vector<8xf32> to vector<8x1xf32>
    %548 = vector.broadcast %547 : vector<8x1xf32> to vector<8x8xf32>
    %549 = arith.subf %545, %548 : vector<8x8xf32>
    %550 = math.exp %549 : vector<8x8xf32>
    %cst_176 = arith.constant dense<0.000000e+00> : vector<8xf32>
    %551 = vector.multi_reduction <add>, %550, %cst_176 [1] : vector<8x8xf32> to vector<8xf32>
    %552 = vector.shape_cast %551 : vector<8xf32> to vector<8x1xf32>
    %553 = tpu.reciprocal %552 {approx = true} : vector<8x1xf32> -> vector<8x1xf32>
    %554 = vector.broadcast %553 : vector<8x1xf32> to vector<8x8xf32>
    %555 = arith.mulf %550, %554 : vector<8x8xf32>
    %556 = arith.truncf %555 : vector<8x8xf32> to vector<8x8xbf16>
    %cst_177 = arith.constant dense<0.000000e+00> : vector<8x8xf32>
    %557 = tpu.matmul %556, %542, %cst_177 {dimension_numbers = #tpu.dot_dimension_numbers<[1], [0], [0], [1], [0, 0, 1, 1], [], []>} : vector<8x8xbf16>, vector<8x8xbf16>, vector<8x8xf32> -> vector<8x8xf32>
    %558 = vector.extract_strided_slice %402 {offsets = [8, 24], sizes = [8, 8], strides = [1, 1]} : vector<16x32xf32> to vector<8x8xf32>
    %559 = arith.truncf %558 : vector<8x8xf32> to vector<8x8xbf16>
    %560 = vector.extract_strided_slice %404 {offsets = [8, 24], sizes = [8, 8], strides = [1, 1]} : vector<16x32xf32> to vector<8x8xf32>
    %561 = arith.truncf %560 : vector<8x8xf32> to vector<8x8xbf16>
    %562 = vector.extract_strided_slice %406 {offsets = [8, 24], sizes = [8, 8], strides = [1, 1]} : vector<16x32xf32> to vector<8x8xf32>
    %563 = arith.truncf %562 : vector<8x8xf32> to vector<8x8xbf16>
    "tpu.trace_start"() <{level = 10 : i32, message = "qd,kd->qk"}> : () -> ()
    %cst_178 = arith.constant dense<0.000000e+00> : vector<8x8xf32>
    %564 = tpu.matmul %559, %561, %cst_178 {dimension_numbers = #tpu.dot_dimension_numbers<[1], [1], [0], [0], [0, 0, 1, 0], [], []>} : vector<8x8xbf16>, vector<8x8xbf16>, vector<8x8xf32> -> vector<8x8xf32>
    "tpu.trace_stop"() : () -> ()
    %565 = vector.broadcast %494 : vector<1x8xf32> to vector<8x8xf32>
    %566 = arith.addf %564, %565 : vector<8x8xf32>
    %cst_179 = arith.constant dense<0xFF800000> : vector<8xf32>
    %567 = vector.multi_reduction <maximumf>, %566, %cst_179 [1] : vector<8x8xf32> to vector<8xf32>
    %568 = vector.shape_cast %567 : vector<8xf32> to vector<8x1xf32>
    %569 = vector.broadcast %568 : vector<8x1xf32> to vector<8x8xf32>
    %570 = arith.subf %566, %569 : vector<8x8xf32>
    %571 = math.exp %570 : vector<8x8xf32>
    %cst_180 = arith.constant dense<0.000000e+00> : vector<8xf32>
    %572 = vector.multi_reduction <add>, %571, %cst_180 [1] : vector<8x8xf32> to vector<8xf32>
    %573 = vector.shape_cast %572 : vector<8xf32> to vector<8x1xf32>
    %574 = tpu.reciprocal %573 {approx = true} : vector<8x1xf32> -> vector<8x1xf32>
    %575 = vector.broadcast %574 : vector<8x1xf32> to vector<8x8xf32>
    %576 = arith.mulf %571, %575 : vector<8x8xf32>
    %577 = arith.truncf %576 : vector<8x8xf32> to vector<8x8xbf16>
    %cst_181 = arith.constant dense<0.000000e+00> : vector<8x8xf32>
    %578 = tpu.matmul %577, %563, %cst_181 {dimension_numbers = #tpu.dot_dimension_numbers<[1], [0], [0], [1], [0, 0, 1, 1], [], []>} : vector<8x8xbf16>, vector<8x8xbf16>, vector<8x8xf32> -> vector<8x8xf32>
    %579 = tpu.concatenate %515, %536, %557, %578 in 1 : vector<8x8xf32>, vector<8x8xf32>, vector<8x8xf32>, vector<8x8xf32> -> vector<8x32xf32>
    %580 = tpu.concatenate %493, %579 in 0 : vector<8x32xf32>, vector<8x32xf32> -> vector<16x32xf32>
    %581 = arith.truncf %580 : vector<16x32xf32> to vector<16x32xbf16>
    %c0_182 = arith.constant 0 : index
    %c0_183 = arith.constant 0 : index
    %582 = vector.load %arg26[%c0_182, %c0_183] : memref<32x32xbf16, #tpu.memory_space<vmem>>, vector<32x32xbf16>
    %cst_184 = arith.constant dense<0.000000e+00> : vector<16x32xf32>
    %583 = tpu.matmul %581, %582, %cst_184 {dimension_numbers = #tpu.dot_dimension_numbers<[1], [0], [0], [1], [0, 0, 1, 1], [], []>} : vector<16x32xbf16>, vector<32x32xbf16>, vector<16x32xf32> -> vector<16x32xf32>
    %c0_185 = arith.constant 0 : index
    %c0_186 = arith.constant 0 : index
    %584 = vector.load %arg27[%c0_185, %c0_186] : memref<1x32xf32, #tpu.memory_space<vmem>>, vector<1x32xf32>
    %585 = vector.broadcast %584 : vector<1x32xf32> to vector<16x32xf32>
    %586 = arith.addf %583, %585 : vector<16x32xf32>
    %587 = arith.addf %586, %399 : vector<16x32xf32>
    %c0_187 = arith.constant 0 : index
    %c0_188 = arith.constant 0 : index
    %588 = vector.load %arg28[%c0_187, %c0_188] : memref<1x32xf32, #tpu.memory_space<vmem>>, vector<1x32xf32>
    %c0_189 = arith.constant 0 : index
    %c0_190 = arith.constant 0 : index
    %589 = vector.load %arg29[%c0_189, %c0_190] : memref<1x32xf32, #tpu.memory_space<vmem>>, vector<1x32xf32>
    %cst_191 = arith.constant dense<0.000000e+00> : vector<16xf32>
    %590 = vector.multi_reduction <add>, %587, %cst_191 [1] : vector<16x32xf32> to vector<16xf32>
    %591 = vector.shape_cast %590 : vector<16xf32> to vector<16x1xf32>
    %cst_192 = arith.constant 3.200000e+01 : f32
    %592 = vector.broadcast %cst_192 : f32 to vector<16x1xf32>
    %593 = arith.divf %591, %592 : vector<16x1xf32>
    %594 = vector.broadcast %593 : vector<16x1xf32> to vector<16x32xf32>
    %595 = arith.subf %587, %594 : vector<16x32xf32>
    %596 = arith.mulf %595, %595 : vector<16x32xf32>
    %cst_193 = arith.constant dense<0.000000e+00> : vector<16xf32>
    %597 = vector.multi_reduction <add>, %596, %cst_193 [1] : vector<16x32xf32> to vector<16xf32>
    %598 = vector.shape_cast %597 : vector<16xf32> to vector<16x1xf32>
    %cst_194 = arith.constant 3.200000e+01 : f32
    %599 = vector.broadcast %cst_194 : f32 to vector<16x1xf32>
    %600 = arith.divf %598, %599 : vector<16x1xf32>
    %cst_195 = arith.constant 9.99999974E-6 : f32
    %601 = vector.broadcast %cst_195 : f32 to vector<16x1xf32>
    %602 = arith.addf %600, %601 : vector<16x1xf32>
    %603 = math.rsqrt %602 : vector<16x1xf32>
    %604 = vector.broadcast %603 : vector<16x1xf32> to vector<16x32xf32>
    %605 = arith.mulf %595, %604 : vector<16x32xf32>
    %606 = vector.broadcast %588 : vector<1x32xf32> to vector<16x32xf32>
    %607 = arith.mulf %605, %606 : vector<16x32xf32>
    %608 = vector.broadcast %589 : vector<1x32xf32> to vector<16x32xf32>
    %609 = arith.addf %607, %608 : vector<16x32xf32>
    %610 = arith.truncf %609 : vector<16x32xf32> to vector<16x32xbf16>
    %c0_196 = arith.constant 0 : index
    %c0_197 = arith.constant 0 : index
    %611 = vector.load %arg32[%c0_196, %c0_197] : memref<32x128xbf16, #tpu.memory_space<vmem>>, vector<32x128xbf16>
    %cst_198 = arith.constant dense<0.000000e+00> : vector<16x128xf32>
    %612 = tpu.matmul %610, %611, %cst_198 {dimension_numbers = #tpu.dot_dimension_numbers<[1], [0], [0], [1], [0, 0, 1, 1], [], []>} : vector<16x32xbf16>, vector<32x128xbf16>, vector<16x128xf32> -> vector<16x128xf32>
    %c0_199 = arith.constant 0 : index
    %c0_200 = arith.constant 0 : index
    %613 = vector.load %arg33[%c0_199, %c0_200] : memref<1x128xf32, #tpu.memory_space<vmem>>, vector<1x128xf32>
    %614 = vector.broadcast %613 : vector<1x128xf32> to vector<16x128xf32>
    %615 = arith.addf %612, %614 : vector<16x128xf32>
    %cst_201 = arith.constant 0.000000e+00 : f32
    %616 = vector.broadcast %cst_201 : f32 to vector<16x128xf32>
    %617 = arith.maximumf %615, %616 : vector<16x128xf32>
    %618 = arith.truncf %617 : vector<16x128xf32> to vector<16x128xbf16>
    %c0_202 = arith.constant 0 : index
    %c0_203 = arith.constant 0 : index
    %619 = vector.load %arg34[%c0_202, %c0_203] : memref<128x32xbf16, #tpu.memory_space<vmem>>, vector<128x32xbf16>
    %cst_204 = arith.constant dense<0.000000e+00> : vector<16x32xf32>
    %620 = tpu.matmul %618, %619, %cst_204 {dimension_numbers = #tpu.dot_dimension_numbers<[1], [0], [0], [1], [0, 0, 1, 1], [], []>} : vector<16x128xbf16>, vector<128x32xbf16>, vector<16x32xf32> -> vector<16x32xf32>
    %c0_205 = arith.constant 0 : index
    %c0_206 = arith.constant 0 : index
    %621 = vector.load %arg35[%c0_205, %c0_206] : memref<1x32xf32, #tpu.memory_space<vmem>>, vector<1x32xf32>
    %622 = vector.broadcast %621 : vector<1x32xf32> to vector<16x32xf32>
    %623 = arith.addf %620, %622 : vector<16x32xf32>
    %624 = arith.addf %623, %609 : vector<16x32xf32>
    %c0_207 = arith.constant 0 : index
    %c0_208 = arith.constant 0 : index
    %625 = vector.load %arg30[%c0_207, %c0_208] : memref<1x32xf32, #tpu.memory_space<vmem>>, vector<1x32xf32>
    %c0_209 = arith.constant 0 : index
    %c0_210 = arith.constant 0 : index
    %626 = vector.load %arg31[%c0_209, %c0_210] : memref<1x32xf32, #tpu.memory_space<vmem>>, vector<1x32xf32>
    %cst_211 = arith.constant dense<0.000000e+00> : vector<16xf32>
    %627 = vector.multi_reduction <add>, %624, %cst_211 [1] : vector<16x32xf32> to vector<16xf32>
    %628 = vector.shape_cast %627 : vector<16xf32> to vector<16x1xf32>
    %cst_212 = arith.constant 3.200000e+01 : f32
    %629 = vector.broadcast %cst_212 : f32 to vector<16x1xf32>
    %630 = arith.divf %628, %629 : vector<16x1xf32>
    %631 = vector.broadcast %630 : vector<16x1xf32> to vector<16x32xf32>
    %632 = arith.subf %624, %631 : vector<16x32xf32>
    %633 = arith.mulf %632, %632 : vector<16x32xf32>
    %cst_213 = arith.constant dense<0.000000e+00> : vector<16xf32>
    %634 = vector.multi_reduction <add>, %633, %cst_213 [1] : vector<16x32xf32> to vector<16xf32>
    %635 = vector.shape_cast %634 : vector<16xf32> to vector<16x1xf32>
    %cst_214 = arith.constant 3.200000e+01 : f32
    %636 = vector.broadcast %cst_214 : f32 to vector<16x1xf32>
    %637 = arith.divf %635, %636 : vector<16x1xf32>
    %cst_215 = arith.constant 9.99999974E-6 : f32
    %638 = vector.broadcast %cst_215 : f32 to vector<16x1xf32>
    %639 = arith.addf %637, %638 : vector<16x1xf32>
    %640 = math.rsqrt %639 : vector<16x1xf32>
    %641 = vector.broadcast %640 : vector<16x1xf32> to vector<16x32xf32>
    %642 = arith.mulf %632, %641 : vector<16x32xf32>
    %643 = vector.broadcast %625 : vector<1x32xf32> to vector<16x32xf32>
    %644 = arith.mulf %642, %643 : vector<16x32xf32>
    %645 = vector.broadcast %626 : vector<1x32xf32> to vector<16x32xf32>
    %646 = arith.addf %644, %645 : vector<16x32xf32>
    %cst_216 = arith.constant 0.000000e+00 : f32
    %647 = vector.broadcast %cst_216 : f32 to vector<2x128xf32>
    %648 = vector.extract_strided_slice %646 {offsets = [0, 0], sizes = [1, 32], strides = [1, 1]} : vector<16x32xf32> to vector<1x32xf32>
    %649 = vector.extract_strided_slice %646 {offsets = [8, 0], sizes = [1, 32], strides = [1, 1]} : vector<16x32xf32> to vector<1x32xf32>
    %650 = tpu.concatenate %648, %649 in 0 : vector<1x32xf32>, vector<1x32xf32> -> vector<2x32xf32>
    %651 = arith.truncf %650 : vector<2x32xf32> to vector<2x32xbf16>
    %c0_217 = arith.constant 0 : index
    %c0_218 = arith.constant 0 : index
    %c0_219 = arith.constant 0 : index
    %652 = vector.load %arg36[%c0_217, %c0_218, %c0_219] : memref<8x32x128xbf16, #tpu.memory_space<vmem>>, vector<1x32x128xbf16>
    %653 = vector.shape_cast %652 : vector<1x32x128xbf16> to vector<32x128xbf16>
    %cst_220 = arith.constant dense<0.000000e+00> : vector<2x128xf32>
    %654 = tpu.matmul %651, %653, %cst_220 {dimension_numbers = #tpu.dot_dimension_numbers<[1], [0], [0], [1], [0, 0, 1, 1], [], []>} : vector<2x32xbf16>, vector<32x128xbf16>, vector<2x128xf32> -> vector<2x128xf32>
    %655 = arith.addf %647, %654 : vector<2x128xf32>
    %656 = vector.extract_strided_slice %646 {offsets = [1, 0], sizes = [1, 32], strides = [1, 1]} : vector<16x32xf32> to vector<1x32xf32>
    %657 = vector.extract_strided_slice %646 {offsets = [9, 0], sizes = [1, 32], strides = [1, 1]} : vector<16x32xf32> to vector<1x32xf32>
    %658 = tpu.concatenate %656, %657 in 0 : vector<1x32xf32>, vector<1x32xf32> -> vector<2x32xf32>
    %659 = arith.truncf %658 : vector<2x32xf32> to vector<2x32xbf16>
    %c1_221 = arith.constant 1 : index
    %c0_222 = arith.constant 0 : index
    %c0_223 = arith.constant 0 : index
    %660 = vector.load %arg36[%c1_221, %c0_222, %c0_223] : memref<8x32x128xbf16, #tpu.memory_space<vmem>>, vector<1x32x128xbf16>
    %661 = vector.shape_cast %660 : vector<1x32x128xbf16> to vector<32x128xbf16>
    %cst_224 = arith.constant dense<0.000000e+00> : vector<2x128xf32>
    %662 = tpu.matmul %659, %661, %cst_224 {dimension_numbers = #tpu.dot_dimension_numbers<[1], [0], [0], [1], [0, 0, 1, 1], [], []>} : vector<2x32xbf16>, vector<32x128xbf16>, vector<2x128xf32> -> vector<2x128xf32>
    %663 = arith.addf %655, %662 : vector<2x128xf32>
    %664 = vector.extract_strided_slice %646 {offsets = [2, 0], sizes = [1, 32], strides = [1, 1]} : vector<16x32xf32> to vector<1x32xf32>
    %665 = vector.extract_strided_slice %646 {offsets = [10, 0], sizes = [1, 32], strides = [1, 1]} : vector<16x32xf32> to vector<1x32xf32>
    %666 = tpu.concatenate %664, %665 in 0 : vector<1x32xf32>, vector<1x32xf32> -> vector<2x32xf32>
    %667 = arith.truncf %666 : vector<2x32xf32> to vector<2x32xbf16>
    %c2_225 = arith.constant 2 : index
    %c0_226 = arith.constant 0 : index
    %c0_227 = arith.constant 0 : index
    %668 = vector.load %arg36[%c2_225, %c0_226, %c0_227] : memref<8x32x128xbf16, #tpu.memory_space<vmem>>, vector<1x32x128xbf16>
    %669 = vector.shape_cast %668 : vector<1x32x128xbf16> to vector<32x128xbf16>
    %cst_228 = arith.constant dense<0.000000e+00> : vector<2x128xf32>
    %670 = tpu.matmul %667, %669, %cst_228 {dimension_numbers = #tpu.dot_dimension_numbers<[1], [0], [0], [1], [0, 0, 1, 1], [], []>} : vector<2x32xbf16>, vector<32x128xbf16>, vector<2x128xf32> -> vector<2x128xf32>
    %671 = arith.addf %663, %670 : vector<2x128xf32>
    %672 = vector.extract_strided_slice %646 {offsets = [3, 0], sizes = [1, 32], strides = [1, 1]} : vector<16x32xf32> to vector<1x32xf32>
    %673 = vector.extract_strided_slice %646 {offsets = [11, 0], sizes = [1, 32], strides = [1, 1]} : vector<16x32xf32> to vector<1x32xf32>
    %674 = tpu.concatenate %672, %673 in 0 : vector<1x32xf32>, vector<1x32xf32> -> vector<2x32xf32>
    %675 = arith.truncf %674 : vector<2x32xf32> to vector<2x32xbf16>
    %c3_229 = arith.constant 3 : index
    %c0_230 = arith.constant 0 : index
    %c0_231 = arith.constant 0 : index
    %676 = vector.load %arg36[%c3_229, %c0_230, %c0_231] : memref<8x32x128xbf16, #tpu.memory_space<vmem>>, vector<1x32x128xbf16>
    %677 = vector.shape_cast %676 : vector<1x32x128xbf16> to vector<32x128xbf16>
    %cst_232 = arith.constant dense<0.000000e+00> : vector<2x128xf32>
    %678 = tpu.matmul %675, %677, %cst_232 {dimension_numbers = #tpu.dot_dimension_numbers<[1], [0], [0], [1], [0, 0, 1, 1], [], []>} : vector<2x32xbf16>, vector<32x128xbf16>, vector<2x128xf32> -> vector<2x128xf32>
    %679 = arith.addf %671, %678 : vector<2x128xf32>
    %680 = vector.extract_strided_slice %646 {offsets = [4, 0], sizes = [1, 32], strides = [1, 1]} : vector<16x32xf32> to vector<1x32xf32>
    %681 = vector.extract_strided_slice %646 {offsets = [12, 0], sizes = [1, 32], strides = [1, 1]} : vector<16x32xf32> to vector<1x32xf32>
    %682 = tpu.concatenate %680, %681 in 0 : vector<1x32xf32>, vector<1x32xf32> -> vector<2x32xf32>
    %683 = arith.truncf %682 : vector<2x32xf32> to vector<2x32xbf16>
    %c4_233 = arith.constant 4 : index
    %c0_234 = arith.constant 0 : index
    %c0_235 = arith.constant 0 : index
    %684 = vector.load %arg36[%c4_233, %c0_234, %c0_235] : memref<8x32x128xbf16, #tpu.memory_space<vmem>>, vector<1x32x128xbf16>
    %685 = vector.shape_cast %684 : vector<1x32x128xbf16> to vector<32x128xbf16>
    %cst_236 = arith.constant dense<0.000000e+00> : vector<2x128xf32>
    %686 = tpu.matmul %683, %685, %cst_236 {dimension_numbers = #tpu.dot_dimension_numbers<[1], [0], [0], [1], [0, 0, 1, 1], [], []>} : vector<2x32xbf16>, vector<32x128xbf16>, vector<2x128xf32> -> vector<2x128xf32>
    %687 = arith.addf %679, %686 : vector<2x128xf32>
    %688 = vector.extract_strided_slice %646 {offsets = [5, 0], sizes = [1, 32], strides = [1, 1]} : vector<16x32xf32> to vector<1x32xf32>
    %689 = vector.extract_strided_slice %646 {offsets = [13, 0], sizes = [1, 32], strides = [1, 1]} : vector<16x32xf32> to vector<1x32xf32>
    %690 = tpu.concatenate %688, %689 in 0 : vector<1x32xf32>, vector<1x32xf32> -> vector<2x32xf32>
    %691 = arith.truncf %690 : vector<2x32xf32> to vector<2x32xbf16>
    %c5_237 = arith.constant 5 : index
    %c0_238 = arith.constant 0 : index
    %c0_239 = arith.constant 0 : index
    %692 = vector.load %arg36[%c5_237, %c0_238, %c0_239] : memref<8x32x128xbf16, #tpu.memory_space<vmem>>, vector<1x32x128xbf16>
    %693 = vector.shape_cast %692 : vector<1x32x128xbf16> to vector<32x128xbf16>
    %cst_240 = arith.constant dense<0.000000e+00> : vector<2x128xf32>
    %694 = tpu.matmul %691, %693, %cst_240 {dimension_numbers = #tpu.dot_dimension_numbers<[1], [0], [0], [1], [0, 0, 1, 1], [], []>} : vector<2x32xbf16>, vector<32x128xbf16>, vector<2x128xf32> -> vector<2x128xf32>
    %695 = arith.addf %687, %694 : vector<2x128xf32>
    %696 = vector.extract_strided_slice %646 {offsets = [6, 0], sizes = [1, 32], strides = [1, 1]} : vector<16x32xf32> to vector<1x32xf32>
    %697 = vector.extract_strided_slice %646 {offsets = [14, 0], sizes = [1, 32], strides = [1, 1]} : vector<16x32xf32> to vector<1x32xf32>
    %698 = tpu.concatenate %696, %697 in 0 : vector<1x32xf32>, vector<1x32xf32> -> vector<2x32xf32>
    %699 = arith.truncf %698 : vector<2x32xf32> to vector<2x32xbf16>
    %c6_241 = arith.constant 6 : index
    %c0_242 = arith.constant 0 : index
    %c0_243 = arith.constant 0 : index
    %700 = vector.load %arg36[%c6_241, %c0_242, %c0_243] : memref<8x32x128xbf16, #tpu.memory_space<vmem>>, vector<1x32x128xbf16>
    %701 = vector.shape_cast %700 : vector<1x32x128xbf16> to vector<32x128xbf16>
    %cst_244 = arith.constant dense<0.000000e+00> : vector<2x128xf32>
    %702 = tpu.matmul %699, %701, %cst_244 {dimension_numbers = #tpu.dot_dimension_numbers<[1], [0], [0], [1], [0, 0, 1, 1], [], []>} : vector<2x32xbf16>, vector<32x128xbf16>, vector<2x128xf32> -> vector<2x128xf32>
    %703 = arith.addf %695, %702 : vector<2x128xf32>
    %704 = vector.extract_strided_slice %646 {offsets = [7, 0], sizes = [1, 32], strides = [1, 1]} : vector<16x32xf32> to vector<1x32xf32>
    %705 = vector.extract_strided_slice %646 {offsets = [15, 0], sizes = [1, 32], strides = [1, 1]} : vector<16x32xf32> to vector<1x32xf32>
    %706 = tpu.concatenate %704, %705 in 0 : vector<1x32xf32>, vector<1x32xf32> -> vector<2x32xf32>
    %707 = arith.truncf %706 : vector<2x32xf32> to vector<2x32xbf16>
    %c7_245 = arith.constant 7 : index
    %c0_246 = arith.constant 0 : index
    %c0_247 = arith.constant 0 : index
    %708 = vector.load %arg36[%c7_245, %c0_246, %c0_247] : memref<8x32x128xbf16, #tpu.memory_space<vmem>>, vector<1x32x128xbf16>
    %709 = vector.shape_cast %708 : vector<1x32x128xbf16> to vector<32x128xbf16>
    %cst_248 = arith.constant dense<0.000000e+00> : vector<2x128xf32>
    %710 = tpu.matmul %707, %709, %cst_248 {dimension_numbers = #tpu.dot_dimension_numbers<[1], [0], [0], [1], [0, 0, 1, 1], [], []>} : vector<2x32xbf16>, vector<32x128xbf16>, vector<2x128xf32> -> vector<2x128xf32>
    %711 = arith.addf %703, %710 : vector<2x128xf32>
    %c0_249 = arith.constant 0 : index
    %c0_250 = arith.constant 0 : index
    %712 = vector.load %arg4[%c0_249, %c0_250] : memref<2x22xf32, #tpu.memory_space<vmem>>, vector<2x22xf32>
    %713 = arith.truncf %712 : vector<2x22xf32> to vector<2x22xbf16>
    %714 = arith.addf %387, %711 : vector<2x128xf32>
    %c0_251 = arith.constant 0 : index
    %c0_252 = arith.constant 0 : index
    %715 = vector.load %arg37[%c0_251, %c0_252] : memref<22x128xbf16, #tpu.memory_space<vmem>>, vector<22x128xbf16>
    %cst_253 = arith.constant dense<0.000000e+00> : vector<2x128xf32>
    %716 = tpu.matmul %713, %715, %cst_253 {dimension_numbers = #tpu.dot_dimension_numbers<[1], [0], [0], [1], [0, 0, 1, 1], [], []>} : vector<2x22xbf16>, vector<22x128xbf16>, vector<2x128xf32> -> vector<2x128xf32>
    %717 = arith.addf %714, %716 : vector<2x128xf32>
    %c0_254 = arith.constant 0 : index
    %c0_255 = arith.constant 0 : index
    %718 = vector.load %arg38[%c0_254, %c0_255] : memref<1x128xf32, #tpu.memory_space<vmem>>, vector<1x128xf32>
    %719 = vector.broadcast %718 : vector<1x128xf32> to vector<2x128xf32>
    %720 = arith.addf %717, %719 : vector<2x128xf32>
    %c0_256 = arith.constant 0 : index
    %c0_257 = arith.constant 0 : index
    %721 = vector.load %arg39[%c0_256, %c0_257] : memref<2x128xf32, #tpu.memory_space<vmem>>, vector<2x128xf32>
    tpu.vector_store %arg39[%c0_256, %c0_257], %720 {strides = array<i32>} : memref<2x128xf32, #tpu.memory_space<vmem>>, vector<2x128xf32>,
    return
  }
}

</mosaic_0001>

<bundles_post_ra>
// kernel: hotspot_forward.1
= control target key start
LH: loop header
LB: loop body
LE: loop exit
PB: predicated region body
PF: predicated region fallthrough
CT: control target
= control target key end

     0   :  { %s10471_s6 = smov 1   ;;  %s10472_s10 = smov 2   ;;  %s11996_s0 = inlined_call_operand.smem [shape: u32[40], index: -1, kind: input, shape index: {}] }
   0x1   :  { %s10558_s5 = sld [smem:[%s11996_s0]]   ;;  %s10473_s14 = smov 3  }
   0x2   :  { %s10563_s9 = sld [smem:[%s11996_s0 + %s10471_s6]]   ;;  %s10474_s18 = smov 4  }
   0x3   :  { %s10568_s13 = sld [smem:[%s11996_s0 + %s10472_s10]]   ;;  %s10475_s22 = smov 5  }
   0x4   :  { %s10573_s17 = sld [smem:[%s11996_s0 + %s10473_s14]]   ;;  %s10476_s26 = smov 6  }
   0x5   :  { %s10578_s21 = sld [smem:[%s11996_s0 + %s10474_s18]]   ;;  %s10477_s30 = smov 7  }
   0x6   :  { %s10583_s25 = sld [smem:[%s11996_s0 + %s10475_s22]]   ;;  %s10478_s4 = smov 8  }
   0x7   :  { %12014 = sst [smem:[#allocation55_spill]] %s10558_s5  ;;  %s10479_s10 = smov 9  }
   0x8   :  { %12015 = sst [smem:[#allocation56_spill]] %s10563_s9  ;;  %s10480_s15 = smov 10  }
   0x9   :  { %12016 = sst [smem:[#allocation57_spill]] %s10568_s13  ;;  %s10481_s20 = smov 11  }
   0xa   :  { %12017 = sst [smem:[#allocation58_spill]] %s10573_s17  ;;  %s10483_s1 = smov 13  }
   0xb   :  { %12018 = sst [smem:[#allocation59_spill]] %s10578_s21  ;;  %s10484_s7 = smov 14  }
   0xc   :  { %s10588_s29 = sld [smem:[%s11996_s0 + %s10476_s26]]   ;;  %s10482_s26 = smov 12  }
   0xd   :  { %s10593_s3 = sld [smem:[%s11996_s0 + %s10477_s30]]   ;;  %s10486_s22 = smov 16  }
   0xe   :  { %s10598_s8 = sld [smem:[%s11996_s0 + %s10478_s4]]   ;;  %s10487_s28 = smov 17  }
   0xf   :  { %s10603_s14 = sld [smem:[%s11996_s0 + %s10479_s10]]  }
  0x10   :  { %s10608_s19 = sld [smem:[%s11996_s0 + %s10480_s15]]   ;;  %s10485_s15 = smov 15  }
  0x11   :  { %s10613_s24 = sld [smem:[%s11996_s0 + %s10481_s20]]  }
  0x12   :  { %12019 = sst [smem:[#allocation60_spill]] %s10588_s29 }
  0x13   :  { %12020 = sst [smem:[#allocation61_spill]] %s10593_s3 }
  0x14   :  { %s10618_s30 = sld [smem:[%s11996_s0 + %s10482_s26]]  }
  0x15   :  { %s10623_s6 = sld [smem:[%s11996_s0 + %s10483_s1]]  }
  0x16   :  { %s10628_s12 = sld [smem:[%s11996_s0 + %s10484_s7]]   ;;  %s10488_s7 = smov 18  }
  0x17   :  { %12021 = sst [smem:[#allocation62_spill]] %s10613_s24 }
  0x18   :  { %s10633_s20 = sld [smem:[%s11996_s0 + %s10485_s15]]   ;;  %s10489_s15 = smov 19  }
  0x19   :  { %s10638_s27 = sld [smem:[%s11996_s0 + %s10486_s22]]   ;;  %s10490_s22 = smov 20  }
  0x1a   :  { %12022 = sst [smem:[#allocation63_spill]] %s10618_s30 }
  0x1b   :  { %s10643_s4 = sld [smem:[%s11996_s0 + %s10487_s28]]   ;;  %s10491_s28 = smov 21  }
  0x1c   :  { %s10648_s21 = sld [smem:[%s11996_s0 + %s10488_s7]]   ;;  %s10492_s7 = smov 22  }
  0x1d   :  { %s10653_s17 = sld [smem:[%s11996_s0 + %s10489_s15]]   ;;  %s10493_s15 = smov 23  }
  0x1e   :  { %12023 = sst [smem:[#allocation64_spill]] %s10633_s20 }
  0x1f   :  { %s10658_s13 = sld [smem:[%s11996_s0 + %s10490_s22]]   ;;  %s10494_s22 = smov 24  }
  0x20   :  { %s10663_s30 = sld [smem:[%s11996_s0 + %s10491_s28]]   ;;  %s10495_s28 = smov 25  }
  0x21   :  { %12024 = sst [smem:[#allocation65_spill]] %s10643_s4 }
  0x22   :  { %s10668_s24 = sld [smem:[%s11996_s0 + %s10492_s7]]   ;;  %s10496_s7 = smov 26  }
  0x23   :  { %12025 = sst [smem:[#allocation66_spill]] %s10653_s17 }
  0x24   :  { %s10673_s9 = sld [smem:[%s11996_s0 + %s10493_s15]]   ;;  %s10497_s15 = smov 27  }
  0x25   :  { %s10678_s29 = sld [smem:[%s11996_s0 + %s10494_s22]]   ;;  %s10498_s22 = smov 28  }
  0x26   :  { %12026 = sst [smem:[#allocation67_spill]] %s10663_s30 }
  0x27   :  { %s10683_s3 = sld [smem:[%s11996_s0 + %s10495_s28]]   ;;  %s10499_s28 = smov 29  }
  0x28   :  { %s10688_s5 = sld [smem:[%s11996_s0 + %s10496_s7]]   ;;  %s10500_s7 = smov 30  }
  0x2a   :  { %12027 = sst [smem:[#allocation68_spill]] %s10673_s9 }
  0x2b   :  { %12028 = sst [smem:[#allocation69_spill]] %s10678_s29 }
  0x2c   :  { %s10693_s9 = sld [smem:[%s11996_s0 + %s10497_s15]]   ;;  %s10501_s15 = smov 31  }
  0x2d   :  { %12029 = sst [smem:[#allocation70_spill]] %s10683_s3 }
  0x2e   :  { %12030 = sst [smem:[#allocation71_spill]] %s10688_s5 }
  0x2f   :  { %s10698_s29 = sld [smem:[%s11996_s0 + %s10498_s22]]   ;;  %s10502_s22 = smov 32  }
  0x30   :  { %s10703_s3 = sld [smem:[%s11996_s0 + %s10499_s28]]   ;;  %s10503_s28 = smov 33  }
  0x31   :  { %s10708_s5 = sld [smem:[%s11996_s0 + %s10500_s7]]   ;;  %s10504_s7 = smov 34  }
  0x32   :  { %s10713_s30 = sld [smem:[%s11996_s0 + %s10501_s15]]   ;;  %s10505_s15 = smov 35  }
  0x33   :  { %s10723_s17 = sld [smem:[%s11996_s0 + %s10503_s28]]   ;;  %s10507_s28 = smov 37  }
  0x34   :  { %s10733_s4 = sld [smem:[%s11996_s0 + %s10505_s15]]   ;;  %s10509_s15 = smov 39  }
  0x35   :  { %12031 = sst [smem:[#allocation72_spill]] %s10698_s29 }
  0x36   :  { %s10718_s29 = sld [smem:[%s11996_s0 + %s10502_s22]]   ;;  %s10506_s22 = smov 36  }
  0x37   :  { %12032 = sst [smem:[#allocation73_spill]] %s10708_s5 }
  0x38   :  { %s10728_s5 = sld [smem:[%s11996_s0 + %s10504_s7]]   ;;  %s10508_s7 = smov 38  }
  0x39   :  { %s10743_s20 = sld [smem:[%s11996_s0 + %s10507_s28]]  }
  0x3a   :  { %12035 = sst [smem:[#allocation76_spill]] %s10733_s4 }
  0x3b   :  { %s10753_s4 = sld [smem:[%s11996_s0 + %s10509_s15]]  }
  0x3c   :  { %12033 = sst [smem:[#allocation74_spill]] %s10718_s29 }
  0x3d   :  { %s10738_s29 = sld [smem:[%s11996_s0 + %s10506_s22]]  }
  0x3e   :  { %12034 = sst [smem:[#allocation75_spill]] %s10728_s5 }
  0x3f   :  { %s10748_s5 = sld [smem:[%s11996_s0 + %s10508_s7]]  }
  0x40   :  { %84 = vsyncpa [#allocation3], 0 }
  0x41   :  { %85 = vsyncpa [#allocation6], 0 }
  0x42   :  { %86 = vsyncpa [#allocation9], 0 }
  0x43   :  { %87 = vsyncpa [#allocation12], 0 }
  0x44   :  { %88 = vsyncpa [#allocation15], 0 }
  0x45   :  { %89 = vsyncpa [#allocation18], 0 }
  0x46   :  { %90 = vsyncpa [#allocation21], 0 }
  0x47   :  { %91 = vsyncpa [#allocation24], 0 }
  0x48   :  { %92 = vsyncpa [#allocation27], 0 }
  0x49   :  { %93 = vsyncpa [#allocation30], 0 }
  0x4a   :  { %94 = vsyncpa [#allocation33], 0 }
  0x4b   :  { %95 = vsyncpa [#allocation36], 0 }
  0x4c   :  { %96 = vsyncpa [#allocation39], 0 }
  0x4d   :  { %97 = vsyncpa [#allocation4], 0  ;;  %s10510_s22 = smov [#allocation5]   ;;  %s10511_s23 = smov [#allocation8]  }
  0x4e   :  { %s129_s0 = sshll.u32 %s10510_s22, 4  ;;  %s153_s26 = sshll.u32 %s10511_s23, 4  ;;  %s130_s0 = int_to_ptr.vmem [resolvable:$true] %s129_s0  ;;  %s10755_s26 = int_to_ptr.vmem [resolvable:$true] %s153_s26 }
  0x4f   :  { %s9893_s28 = scalar_lea.hbm %s10598_s8, 1024 }
  0x50   :  { %p9894_p0 = scmp.ne.s32.totalorder %s10598_s8, %s9893_s28  ;;  %p9897_p1 = scmp.lt.u32.totalorder %s9893_s28, %s10598_s8 }
  0x52   :  { %p9899_p2 = pnand %p9897_p1, %p9894_p0 }
  0x54   :  { %9902 = shalt.err (!%p9899_p2)
}
  0x55   :  { %s9903_s1 = scalar_lea.vmem %s130_s0, 1024  ;;  %p9908_p4 = scmp.lt.s32.totalorder %s130_s0, %s130_s0 }
  0x56   :  { %p9904_p3 = scmp.ne.s32.totalorder %s130_s0, %s9903_s1  ;;  %p9909_p5 = scmp.lt.s32.totalorder %s9903_s1, %s9903_s1 }
  0x58   :  { %p9910_p6 = por %p9909_p5, %p9908_p4 }
  0x5a   :  { %p9911_p7 = pnand %p9910_p6, %p9904_p3 }
  0x5c   :  { %9914 = shalt.err (!%p9911_p7)
}
  0x5d   :  { %s10512_s2 = smov 64   ;;  %s10513_s7 = smov 4  }
  0x5e   :  { %135 = dma.hbm_to_vmem [thread:$0]  %s10598_s8, 1024, %s130_s0, [#allocation6], %s10512_s2, %s10512_s2, %s10513_s7  }
  0x5f   :  { %s9915_s10 = scalar_lea.hbm %s10608_s19, 1024 }
  0x60   :  { %p9916_p8 = scmp.ne.s32.totalorder %s10608_s19, %s9915_s10  ;;  %p9919_p9 = scmp.lt.u32.totalorder %s9915_s10, %s10608_s19 }
  0x62   :  { %p9921_p10 = pnand %p9919_p9, %p9916_p8 }
  0x64   :  { %9924 = shalt.err (!%p9921_p10)
}
  0x65   :  { %s9925_s11 = scalar_lea.vmem %s10755_s26, 1024  ;;  %p9930_p12 = scmp.lt.s32.totalorder %s10755_s26, %s10755_s26 }
  0x66   :  { %p9926_p11 = scmp.ne.s32.totalorder %s10755_s26, %s9925_s11  ;;  %p9931_p13 = scmp.lt.s32.totalorder %s9925_s11, %s9925_s11 }
  0x68   :  { %p9932_p0 = por %p9931_p13, %p9930_p12 }
  0x6a   :  { %p9933_p1 = pnand %p9932_p0, %p9926_p11 }
  0x6c   :  { %9936 = shalt.err (!%p9933_p1)
}
  0x6d   :  { %159 = dma.hbm_to_vmem [thread:$0]  %s10608_s19, 1024, %s10755_s26, [#allocation9], %s10512_s2, %s10512_s2, %s10513_s7  }
  0x6e   :  { %s10514_s8 = smov [#allocation11]   ;;  %s10515_s16 = smov [#allocation14]  }
  0x6f   :  { %s180_s15 = sshll.u32 %s10514_s8, 4  ;;  %s199_s18 = sshll.u32 %s10515_s16, 4  ;;  %s181_s15 = int_to_ptr.vmem [resolvable:$true] %s180_s15  ;;  %s10776_s18 = int_to_ptr.vmem [resolvable:$true] %s199_s18 }
  0x70   :  { %s9937_s22 = scalar_lea.hbm %s10628_s12, 16 }
  0x71   :  { %p9938_p2 = scmp.ne.s32.totalorder %s10628_s12, %s9937_s22  ;;  %p9941_p3 = scmp.lt.u32.totalorder %s9937_s22, %s10628_s12 }
  0x73   :  { %p9943_p4 = pnand %p9941_p3, %p9938_p2 }
  0x75   :  { %9946 = shalt.err (!%p9943_p4)
}
  0x76   :  { %s9947_s0 = scalar_lea.vmem %s181_s15, 16  ;;  %s9951_s23 = scalar_lea.vmem %s181_s15, 32 }
  0x77   :  { %p9948_p5 = scmp.ne.s32.totalorder %s181_s15, %s9947_s0  ;;  %p9952_p6 = scmp.lt.s32.totalorder %s181_s15, %s181_s15 }
  0x78   :  { %p9953_p7 = scmp.lt.s32.totalorder %s9951_s23, %s9947_s0 }
  0x7a   :  { %p9954_p8 = por %p9953_p7, %p9952_p6 }
  0x7c   :  { %p9955_p9 = pnand %p9954_p8, %p9948_p5 }
  0x7e   :  { %9958 = shalt.err (!%p9955_p9)
}
  0x7f   :  { %183 = dma.hbm_to_vmem [thread:$0]  %s10628_s12, 16, %s181_s15, [#allocation12]  }
  0x80   :  { %s9959_s19 = scalar_lea.hbm %s10638_s27, 4096 }
  0x81   :  { %p9960_p10 = scmp.ne.s32.totalorder %s10638_s27, %s9959_s19  ;;  %p9963_p11 = scmp.lt.u32.totalorder %s9959_s19, %s10638_s27 }
  0x83   :  { %p9965_p12 = pnand %p9963_p11, %p9960_p10 }
  0x85   :  { %9968 = shalt.err (!%p9965_p12)
}
  0x86   :  { %s9969_s26 = scalar_lea.vmem %s10776_s18, 4096  ;;  %p9974_p0 = scmp.lt.s32.totalorder %s10776_s18, %s10776_s18 }
  0x87   :  { %p9970_p13 = scmp.ne.s32.totalorder %s10776_s18, %s9969_s26  ;;  %p9975_p1 = scmp.lt.s32.totalorder %s9969_s26, %s9969_s26 }
  0x89   :  { %p9976_p2 = por %p9975_p1, %p9974_p0 }
  0x8b   :  { %p9977_p3 = pnand %p9976_p2, %p9970_p13 }
  0x8d   :  { %9980 = shalt.err (!%p9977_p3)
}
  0x8e   :  { %s10516_s28 = smov 256   ;;  %s10517_s12 = smov 16  }
  0x8f   :  { %205 = dma.hbm_to_vmem [thread:$0]  %s10638_s27, 4096, %s10776_s18, [#allocation15], %s10516_s28, %s10516_s28, %s10517_s12  }
  0x90   :  { %s10518_s1 = smov [#allocation17]   ;;  %s10519_s11 = smov [#allocation20]  }
  0x91   :  { %s221_s10 = sshll.u32 %s10518_s1, 4  ;;  %s243_s8 = sshll.u32 %s10519_s11, 4  ;;  %s222_s10 = int_to_ptr.vmem [resolvable:$true] %s221_s10  ;;  %s10792_s8 = int_to_ptr.vmem [resolvable:$true] %s243_s8 }
  0x92   :  { %s9981_s15 = scalar_lea.hbm %s10648_s21, 4096 }
  0x93   :  { %p9982_p4 = scmp.ne.s32.totalorder %s10648_s21, %s9981_s15  ;;  %p9985_p5 = scmp.lt.u32.totalorder %s9981_s15, %s10648_s21 }
  0x95   :  { %p9987_p6 = pnand %p9985_p5, %p9982_p4 }
  0x97   :  { %9990 = shalt.err (!%p9987_p6)
}
  0x98   :  { %s9991_s16 = scalar_lea.vmem %s222_s10, 4096  ;;  %p9996_p8 = scmp.lt.s32.totalorder %s222_s10, %s222_s10 }
  0x99   :  { %p9992_p7 = scmp.ne.s32.totalorder %s222_s10, %s9991_s16  ;;  %p9997_p9 = scmp.lt.s32.totalorder %s9991_s16, %s9991_s16 }
  0x9b   :  { %p9998_p10 = por %p9997_p9, %p9996_p8 }
  0x9d   :  { %p9999_p11 = pnand %p9998_p10, %p9992_p7 }
  0x9f   :  { %10002 = shalt.err (!%p9999_p11)
}
  0xa0   :  { %227 = dma.hbm_to_vmem [thread:$0]  %s10648_s21, 4096, %s222_s10, [#allocation18], %s10512_s2, %s10512_s2, %s10513_s7  }
  0xa1   :  { %s10003_s27 = scalar_lea.hbm %s10658_s13, 16384 }
  0xa2   :  { %p10004_p12 = scmp.ne.s32.totalorder %s10658_s13, %s10003_s27  ;;  %p10007_p13 = scmp.lt.u32.totalorder %s10003_s27, %s10658_s13 }
  0xa4   :  { %p10009_p0 = pnand %p10007_p13, %p10004_p12 }
  0xa6   :  { %10012 = shalt.err (!%p10009_p0)
}
  0xa7   :  { %s10013_s18 = scalar_lea.vmem %s10792_s8, 16384  ;;  %p10018_p2 = scmp.lt.s32.totalorder %s10792_s8, %s10792_s8 }
  0xa8   :  { %p10014_p1 = scmp.ne.s32.totalorder %s10792_s8, %s10013_s18  ;;  %p10019_p3 = scmp.lt.s32.totalorder %s10013_s18, %s10013_s18 }
  0xaa   :  { %p10020_p4 = por %p10019_p3, %p10018_p2 }
  0xac   :  { %p10021_p5 = pnand %p10020_p4, %p10014_p1 }
  0xae   :  { %10024 = shalt.err (!%p10021_p5)
}
  0xaf   :  { %249 = dma.hbm_to_vmem [thread:$0]  %s10658_s13, 16384, %s10792_s8, [#allocation21], %s10512_s2, %s10512_s2, %s10513_s7  }
  0xb0   :  { %s10520_s21 = smov [#allocation23]   ;;  %s10521_s0 = smov [#allocation26]  }
  0xb1   :  { %s268_s22 = sshll.u32 %s10520_s21, 4  ;;  %s296_s23 = sshll.u32 %s10521_s0, 4  ;;  %s269_s22 = int_to_ptr.vmem [resolvable:$true] %s268_s22  ;;  %s297_s23 = int_to_ptr.vmem [resolvable:$true] %s296_s23 }
  0xb2   :  { %s10025_s19 = scalar_lea.hbm %s10668_s24, 128 }
  0xb3   :  { %p10026_p6 = scmp.ne.s32.totalorder %s10668_s24, %s10025_s19  ;;  %p10029_p7 = scmp.lt.u32.totalorder %s10025_s19, %s10668_s24 }
  0xb5   :  { %p10031_p8 = pnand %p10029_p7, %p10026_p6 }
  0xb7   :  { %10034 = shalt.err (!%p10031_p8)
}
  0xb8   :  { %s10035_s26 = scalar_lea.vmem %s269_s22, 128  ;;  %p10040_p10 = scmp.lt.s32.totalorder %s269_s22, %s269_s22 }
  0xb9   :  { %p10036_p9 = scmp.ne.s32.totalorder %s269_s22, %s10035_s26  ;;  %p10041_p11 = scmp.lt.s32.totalorder %s10035_s26, %s10035_s26 }
  0xbb   :  { %p10042_p12 = por %p10041_p11, %p10040_p10 }
  0xbd   :  { %p10043_p13 = pnand %p10042_p12, %p10036_p9 }
  0xbf   :  { %10046 = shalt.err (!%p10043_p13)
}
  0xc0   :  { %271 = dma.hbm_to_vmem [thread:$0]  %s10668_s24, 128, %s269_s22, [#allocation24]  }
  0xc1   :  { %s10047_s13 = scalar_lea.hbm %s10693_s9, 16 }
  0xc2   :  { %p10048_p0 = scmp.ne.s32.totalorder %s10693_s9, %s10047_s13  ;;  %p10051_p1 = scmp.lt.u32.totalorder %s10047_s13, %s10693_s9 }
  0xc4   :  { %p10053_p2 = pnand %p10051_p1, %p10048_p0 }
  0xc6   :  { %10056 = shalt.err (!%p10053_p2)
}
  0xc7   :  { %s10057_s28 = scalar_lea.vmem %s297_s23, 16  ;;  %s10061_s1 = scalar_lea.vmem %s297_s23, 32 }
  0xc8   :  { %p10058_p3 = scmp.ne.s32.totalorder %s297_s23, %s10057_s28  ;;  %p10062_p4 = scmp.lt.s32.totalorder %s297_s23, %s297_s23 }
  0xc9   :  { %p10063_p5 = scmp.lt.s32.totalorder %s10061_s1, %s10057_s28 }
  0xcb   :  { %p10064_p6 = por %p10063_p5, %p10062_p4 }
  0xcd   :  { %p10065_p7 = pnand %p10064_p6, %p10058_p3 }
  0xcf   :  { %10068 = shalt.err (!%p10065_p7)
}
  0xd0   :  { %299 = dma.hbm_to_vmem [thread:$0]  %s10693_s9, 16, %s297_s23, [#allocation27]  }
  0xd1   :  { %s10522_s10 = smov [#allocation29]   ;;  %s10523_s11 = smov [#allocation32]  }
  0xd2   :  { %s316_s24 = sshll.u32 %s10522_s10, 4  ;;  %s336_s8 = sshll.u32 %s10523_s11, 4  ;;  %s317_s24 = int_to_ptr.vmem [resolvable:$true] %s316_s24  ;;  %s337_s8 = int_to_ptr.vmem [resolvable:$true] %s336_s8 }
  0xd3   :  { %s10069_s15 = scalar_lea.hbm %s10703_s3, 16 }
  0xd4   :  { %p10070_p8 = scmp.ne.s32.totalorder %s10703_s3, %s10069_s15  ;;  %p10073_p9 = scmp.lt.u32.totalorder %s10069_s15, %s10703_s3 }
  0xd6   :  { %p10075_p10 = pnand %p10073_p9, %p10070_p8 }
  0xd8   :  { %10078 = shalt.err (!%p10075_p10)
}
  0xd9   :  { %s10079_s16 = scalar_lea.vmem %s317_s24, 16  ;;  %s10083_s27 = scalar_lea.vmem %s317_s24, 32 }
  0xda   :  { %p10080_p11 = scmp.ne.s32.totalorder %s317_s24, %s10079_s16  ;;  %p10084_p12 = scmp.lt.s32.totalorder %s317_s24, %s317_s24 }
  0xdb   :  { %p10085_p13 = scmp.lt.s32.totalorder %s10083_s27, %s10079_s16 }
  0xdd   :  { %p10086_p0 = por %p10085_p13, %p10084_p12 }
  0xdf   :  { %p10087_p1 = pnand %p10086_p0, %p10080_p11 }
  0xe1   :  { %10090 = shalt.err (!%p10087_p1)
}
  0xe2   :  { %319 = dma.hbm_to_vmem [thread:$0]  %s10703_s3, 16, %s317_s24, [#allocation30]  }
  0xe3   :  { %s10091_s9 = scalar_lea.hbm %s10713_s30, 16 }
  0xe4   :  { %p10092_p2 = scmp.ne.s32.totalorder %s10713_s30, %s10091_s9  ;;  %p10095_p3 = scmp.lt.u32.totalorder %s10091_s9, %s10713_s30 }
  0xe6   :  { %p10097_p4 = pnand %p10095_p3, %p10092_p2 }
  0xe8   :  { %10100 = shalt.err (!%p10097_p4)
}
  0xe9   :  { %s10101_s18 = scalar_lea.vmem %s337_s8, 16  ;;  %s10105_s21 = scalar_lea.vmem %s337_s8, 32 }
  0xea   :  { %p10102_p5 = scmp.ne.s32.totalorder %s337_s8, %s10101_s18  ;;  %p10106_p6 = scmp.lt.s32.totalorder %s337_s8, %s337_s8 }
  0xeb   :  { %p10107_p7 = scmp.lt.s32.totalorder %s10105_s21, %s10101_s18 }
  0xed   :  { %p10108_p8 = por %p10107_p7, %p10106_p6 }
  0xef   :  { %p10109_p9 = pnand %p10108_p8, %p10102_p5 }
  0xf1   :  { %10112 = shalt.err (!%p10109_p9)
}
  0xf2   :  { %339 = dma.hbm_to_vmem [thread:$0]  %s10713_s30, 16, %s337_s8, [#allocation33]  }
  0xf3   :  { %s10524_s22 = smov [#allocation35]   ;;  %s10525_s0 = smov [#allocation2]  }
  0xf4   :  { %s358_s3 = sshll.u32 %s10524_s22, 4  ;;  %s113_s23 = sshll.u32 %s10525_s0, 4  ;;  %s359_s3 = int_to_ptr.vmem [resolvable:$true] %s358_s3  ;;  %s10829_s23 = int_to_ptr.vmem [resolvable:$true] %s113_s23 }
  0xf5   :  { %s10113_s19 = scalar_lea.hbm %s10723_s17, 16 }
  0xf6   :  { %p10114_p10 = scmp.ne.s32.totalorder %s10723_s17, %s10113_s19  ;;  %p10117_p11 = scmp.lt.u32.totalorder %s10113_s19, %s10723_s17 }
  0xf8   :  { %p10119_p12 = pnand %p10117_p11, %p10114_p10 }
  0xfa   :  { %10122 = shalt.err (!%p10119_p12)
}
  0xfb   :  { %s10123_s26 = scalar_lea.vmem %s359_s3, 16  ;;  %s10127_s13 = scalar_lea.vmem %s359_s3, 32 }
  0xfc   :  { %p10124_p13 = scmp.ne.s32.totalorder %s359_s3, %s10123_s26  ;;  %p10128_p0 = scmp.lt.s32.totalorder %s359_s3, %s359_s3 }
  0xfd   :  { %p10129_p1 = scmp.lt.s32.totalorder %s10127_s13, %s10123_s26 }
  0xff   :  { %p10130_p2 = por %p10129_p1, %p10128_p0 }
 0x101   :  { %p10131_p3 = pnand %p10130_p2, %p10124_p13 }
 0x103   :  { %10134 = shalt.err (!%p10131_p3)
}
 0x104   :  { %361 = dma.hbm_to_vmem [thread:$0]  %s10723_s17, 16, %s359_s3, [#allocation36]  }
 0x105   :  { %s10135_s30 = scalar_lea.hbm %s10583_s25, 8192 }
 0x106   :  { %p10136_p4 = scmp.ne.s32.totalorder %s10583_s25, %s10135_s30  ;;  %p10139_p5 = scmp.lt.u32.totalorder %s10135_s30, %s10583_s25 }
 0x108   :  { %p10141_p6 = pnand %p10139_p5, %p10136_p4 }
 0x10a   :  { %10144 = shalt.err (!%p10141_p6)
}
 0x10b   :  { %s10145_s28 = scalar_lea.vmem %s10829_s23, 8192  ;;  %p10150_p8 = scmp.lt.s32.totalorder %s10829_s23, %s10829_s23 }
 0x10c   :  { %p10146_p7 = scmp.ne.s32.totalorder %s10829_s23, %s10145_s28  ;;  %p10151_p9 = scmp.lt.s32.totalorder %s10145_s28, %s10145_s28 }
 0x10e   :  { %p10152_p10 = por %p10151_p9, %p10150_p8 }
 0x110   :  { %p10153_p11 = pnand %p10152_p10, %p10146_p7 }
 0x112   :  { %10156 = shalt.err (!%p10153_p11)
}
 0x113   :  { %119 = dma.hbm_to_vmem [thread:$0]  %s10583_s25, 8192, %s10829_s23, [#allocation3], %s10512_s2, %s10512_s2, %s10513_s7  }
 0x114   :  { %s10526_s17 = smov [#allocation7]   ;;  %s10527_s10 = smov [#allocation10]  }
 0x115   :  { %s141_s1 = sshll.u32 %s10526_s17, 4  ;;  %s170_s24 = sshll.u32 %s10527_s10, 4  ;;  %s142_s1 = int_to_ptr.vmem [resolvable:$true] %s141_s1  ;;  %s171_s24 = int_to_ptr.vmem [resolvable:$true] %s170_s24 }
 0x116   :  { %s10157_s11 = scalar_lea.hbm %s10603_s14, 1024 }
 0x117   :  { %p10158_p12 = scmp.ne.s32.totalorder %s10603_s14, %s10157_s11  ;;  %p10161_p13 = scmp.lt.u32.totalorder %s10157_s11, %s10603_s14 }
 0x119   :  { %p10163_p0 = pnand %p10161_p13, %p10158_p12 }
 0x11b   :  { %10166 = shalt.err (!%p10163_p0)
}
 0x11c   :  { %s10167_s8 = scalar_lea.vmem %s142_s1, 1024  ;;  %p10172_p2 = scmp.lt.s32.totalorder %s142_s1, %s142_s1 }
 0x11d   :  { %p10168_p1 = scmp.ne.s32.totalorder %s142_s1, %s10167_s8  ;;  %p10173_p3 = scmp.lt.s32.totalorder %s10167_s8, %s10167_s8 }
 0x11f   :  { %p10174_p4 = por %p10173_p3, %p10172_p2 }
 0x121   :  { %p10175_p5 = pnand %p10174_p4, %p10168_p1 }
 0x123   :  { %10178 = shalt.err (!%p10175_p5)
}
 0x124   :  { %147 = dma.hbm_to_vmem [thread:$0]  %s10603_s14, 1024, %s142_s1, [#allocation6], %s10512_s2, %s10512_s2, %s10513_s7  }
 0x125   :  { %s10179_s25 = scalar_lea.hbm %s10623_s6, 16 }
 0x126   :  { %p10180_p6 = scmp.ne.s32.totalorder %s10623_s6, %s10179_s25  ;;  %p10183_p7 = scmp.lt.u32.totalorder %s10179_s25, %s10623_s6 }
 0x128   :  { %p10185_p8 = pnand %p10183_p7, %p10180_p6 }
 0x12a   :  { %10188 = shalt.err (!%p10185_p8)
}
 0x12b   :  { %s10189_s15 = scalar_lea.vmem %s171_s24, 16  ;;  %s10193_s16 = scalar_lea.vmem %s171_s24, 32 }
 0x12c   :  { %p10190_p9 = scmp.ne.s32.totalorder %s171_s24, %s10189_s15  ;;  %p10194_p10 = scmp.lt.s32.totalorder %s171_s24, %s171_s24 }
 0x12d   :  { %p10195_p11 = scmp.lt.s32.totalorder %s10193_s16, %s10189_s15 }
 0x12f   :  { %p10196_p12 = por %p10195_p11, %p10194_p10 }
 0x131   :  { %p10197_p13 = pnand %p10196_p12, %p10190_p9 }
 0x133   :  { %10200 = shalt.err (!%p10197_p13)
}
 0x134   :  { %s12036_s27 = sld [smem:[#allocation64_spill]]  ;;  %s10528_s9 = smov [#allocation13]  }
 0x135   :  { %173 = dma.hbm_to_vmem [thread:$0]  %s10623_s6, 16, %s171_s24, [#allocation9]  }
 0x136   :  { %s190_s14 = sshll.u32 %s10528_s9, 4  ;;  %s10529_s18 = smov [#allocation16]   ;;  %s191_s14 = int_to_ptr.vmem [resolvable:$true] %s190_s14 }
 0x137   :  { %s212_s21 = sshll.u32 %s10529_s18, 4  ;;  %s213_s21 = int_to_ptr.vmem [resolvable:$true] %s212_s21 }
 0x13a   :  { %s10201_s22 = scalar_lea.hbm %s12036_s27, 16 }
 0x13b   :  { %p10202_p0 = scmp.ne.s32.totalorder %s12036_s27, %s10201_s22  ;;  %p10205_p1 = scmp.lt.u32.totalorder %s10201_s22, %s12036_s27 }
 0x13d   :  { %p10207_p2 = pnand %p10205_p1, %p10202_p0 }
 0x13f   :  { %10210 = shalt.err (!%p10207_p2)
}
 0x140   :  { %s10211_s3 = scalar_lea.vmem %s191_s14, 16  ;;  %s10215_s0 = scalar_lea.vmem %s191_s14, 32 }
 0x141   :  { %p10212_p3 = scmp.ne.s32.totalorder %s191_s14, %s10211_s3  ;;  %p10216_p4 = scmp.lt.s32.totalorder %s191_s14, %s191_s14 }
 0x142   :  { %p10217_p5 = scmp.lt.s32.totalorder %s10215_s0, %s10211_s3 }
 0x144   :  { %p10218_p6 = por %p10217_p5, %p10216_p4 }
 0x146   :  { %p10219_p7 = pnand %p10218_p6, %p10212_p3 }
 0x148   :  { %10222 = shalt.err (!%p10219_p7)
}
 0x149   :  { %s12037_s6 = sld [smem:[#allocation65_spill]] }
 0x14a   :  { %193 = dma.hbm_to_vmem [thread:$0]  %s12036_s27, 16, %s191_s14, [#allocation12]  }
 0x14f   :  { %s10223_s23 = scalar_lea.hbm %s12037_s6, 64 }
 0x150   :  { %p10224_p8 = scmp.ne.s32.totalorder %s12037_s6, %s10223_s23  ;;  %p10227_p9 = scmp.lt.u32.totalorder %s10223_s23, %s12037_s6 }
 0x152   :  { %p10229_p10 = pnand %p10227_p9, %p10224_p8 }
 0x154   :  { %10232 = shalt.err (!%p10229_p10)
}
 0x155   :  { %s10233_s19 = scalar_lea.vmem %s213_s21, 64  ;;  %p10238_p12 = scmp.lt.s32.totalorder %s213_s21, %s213_s21 }
 0x156   :  { %p10234_p11 = scmp.ne.s32.totalorder %s213_s21, %s10233_s19  ;;  %p10239_p13 = scmp.lt.s32.totalorder %s10233_s19, %s10233_s19 }
 0x158   :  { %p10240_p0 = por %p10239_p13, %p10238_p12 }
 0x15a   :  { %p10241_p1 = pnand %p10240_p0, %p10234_p11 }
 0x15c   :  { %10244 = shalt.err (!%p10241_p1)
}
 0x15d   :  { %s12038_s26 = sld [smem:[#allocation66_spill]]  ;;  %s10530_s13 = smov [#allocation19]  }
 0x15e   :  { %215 = dma.hbm_to_vmem [thread:$0]  %s12037_s6, 64, %s213_s21, [#allocation15]  }
 0x15f   :  { %s234_s30 = sshll.u32 %s10530_s13, 4  ;;  %s10531_s28 = smov [#allocation22]   ;;  %s235_s30 = int_to_ptr.vmem [resolvable:$true] %s234_s30 }
 0x160   :  { %s255_s17 = sshll.u32 %s10531_s28, 4  ;;  %s10866_s17 = int_to_ptr.vmem [resolvable:$true] %s255_s17 }
 0x163   :  { %s10245_s1 = scalar_lea.hbm %s12038_s26, 16 }
 0x164   :  { %p10246_p2 = scmp.ne.s32.totalorder %s12038_s26, %s10245_s1  ;;  %p10249_p3 = scmp.lt.u32.totalorder %s10245_s1, %s12038_s26 }
 0x166   :  { %p10251_p4 = pnand %p10249_p3, %p10246_p2 }
 0x168   :  { %10254 = shalt.err (!%p10251_p4)
}
 0x169   :  { %s10255_s10 = scalar_lea.vmem %s235_s30, 16  ;;  %s10259_s24 = scalar_lea.vmem %s235_s30, 32 }
 0x16a   :  { %p10256_p5 = scmp.ne.s32.totalorder %s235_s30, %s10255_s10  ;;  %p10260_p6 = scmp.lt.s32.totalorder %s235_s30, %s235_s30 }
 0x16b   :  { %p10261_p7 = scmp.lt.s32.totalorder %s10259_s24, %s10255_s10 }
 0x16d   :  { %p10262_p8 = por %p10261_p7, %p10260_p6 }
 0x16f   :  { %p10263_p9 = pnand %p10262_p8, %p10256_p5 }
 0x171   :  { %10266 = shalt.err (!%p10263_p9)
}
 0x172   :  { %s12039_s11 = sld [smem:[#allocation67_spill]] }
 0x173   :  { %237 = dma.hbm_to_vmem [thread:$0]  %s12038_s26, 16, %s235_s30, [#allocation18]  }
 0x178   :  { %s10267_s8 = scalar_lea.hbm %s12039_s11, 128 }
 0x179   :  { %p10268_p10 = scmp.ne.s32.totalorder %s12039_s11, %s10267_s8  ;;  %p10271_p11 = scmp.lt.u32.totalorder %s10267_s8, %s12039_s11 }
 0x17b   :  { %p10273_p12 = pnand %p10271_p11, %p10268_p10 }
 0x17d   :  { %10276 = shalt.err (!%p10273_p12)
}
 0x17e   :  { %s10277_s25 = scalar_lea.vmem %s10866_s17, 128  ;;  %p10282_p0 = scmp.lt.s32.totalorder %s10866_s17, %s10866_s17 }
 0x17f   :  { %p10278_p13 = scmp.ne.s32.totalorder %s10866_s17, %s10277_s25  ;;  %p10283_p1 = scmp.lt.s32.totalorder %s10277_s25, %s10277_s25 }
 0x181   :  { %p10284_p2 = por %p10283_p1, %p10282_p0 }
 0x183   :  { %p10285_p3 = pnand %p10284_p2, %p10278_p13 }
 0x185   :  { %10288 = shalt.err (!%p10285_p3)
}
 0x186   :  { %s12040_s15 = sld [smem:[#allocation71_spill]]  ;;  %s10532_s16 = smov [#allocation25]  }
 0x187   :  { %261 = dma.hbm_to_vmem [thread:$0]  %s12039_s11, 128, %s10866_s17, [#allocation21], %s10512_s2, %s10512_s2, %s10513_s7  }
 0x188   :  { %s283_s27 = sshll.u32 %s10532_s16, 4  ;;  %s10533_s9 = smov [#allocation28]   ;;  %s284_s27 = int_to_ptr.vmem [resolvable:$true] %s283_s27 }
 0x189   :  { %s306_s14 = sshll.u32 %s10533_s9, 4  ;;  %s307_s14 = int_to_ptr.vmem [resolvable:$true] %s306_s14 }
 0x18c   :  { %s10289_s18 = scalar_lea.hbm %s12040_s15, 256 }
 0x18d   :  { %p10290_p4 = scmp.ne.s32.totalorder %s12040_s15, %s10289_s18  ;;  %p10293_p5 = scmp.lt.u32.totalorder %s10289_s18, %s12040_s15 }
 0x18f   :  { %p10295_p6 = pnand %p10293_p5, %p10290_p4 }
 0x191   :  { %10298 = shalt.err (!%p10295_p6)
}
 0x192   :  { %s10299_s21 = scalar_lea.vmem %s284_s27, 256  ;;  %p10304_p8 = scmp.lt.s32.totalorder %s284_s27, %s284_s27 }
 0x193   :  { %p10300_p7 = scmp.ne.s32.totalorder %s284_s27, %s10299_s21  ;;  %p10305_p9 = scmp.lt.s32.totalorder %s10299_s21, %s10299_s21 }
 0x195   :  { %p10306_p10 = por %p10305_p9, %p10304_p8 }
 0x197   :  { %p10307_p11 = pnand %p10306_p10, %p10300_p7 }
 0x199   :  { %10310 = shalt.err (!%p10307_p11)
}
 0x19a   :  { %s12041_s22 = sld [smem:[#allocation72_spill]] }
 0x19b   :  { %289 = dma.hbm_to_vmem [thread:$0]  %s12040_s15, 256, %s284_s27, [#allocation24], %s10512_s2, %s10512_s2, %s10513_s7  }
 0x1a0   :  { %s10311_s3 = scalar_lea.hbm %s12041_s22, 16 }
 0x1a1   :  { %p10312_p12 = scmp.ne.s32.totalorder %s12041_s22, %s10311_s3  ;;  %p10315_p13 = scmp.lt.u32.totalorder %s10311_s3, %s12041_s22 }
 0x1a3   :  { %p10317_p0 = pnand %p10315_p13, %p10312_p12 }
 0x1a5   :  { %10320 = shalt.err (!%p10317_p0)
}
 0x1a6   :  { %s10321_s0 = scalar_lea.vmem %s307_s14, 16  ;;  %s10325_s6 = scalar_lea.vmem %s307_s14, 32 }
 0x1a7   :  { %p10322_p1 = scmp.ne.s32.totalorder %s307_s14, %s10321_s0  ;;  %p10326_p2 = scmp.lt.s32.totalorder %s307_s14, %s307_s14 }
 0x1a8   :  { %p10327_p3 = scmp.lt.s32.totalorder %s10325_s6, %s10321_s0 }
 0x1aa   :  { %p10328_p4 = por %p10327_p3, %p10326_p2 }
 0x1ac   :  { %p10329_p5 = pnand %p10328_p4, %p10322_p1 }
 0x1ae   :  { %10332 = shalt.err (!%p10329_p5)
}
 0x1af   :  { %s12042_s23 = sld [smem:[#allocation73_spill]]  ;;  %s10534_s19 = smov [#allocation31]  }
 0x1b0   :  { %309 = dma.hbm_to_vmem [thread:$0]  %s12041_s22, 16, %s307_s14, [#allocation27]  }
 0x1b1   :  { %s326_s26 = sshll.u32 %s10534_s19, 4  ;;  %s10535_s13 = smov [#allocation34]   ;;  %s327_s26 = int_to_ptr.vmem [resolvable:$true] %s326_s26 }
 0x1b2   :  { %s345_s30 = sshll.u32 %s10535_s13, 4  ;;  %s10895_s30 = int_to_ptr.vmem [resolvable:$true] %s345_s30 }
 0x1b5   :  { %s10333_s28 = scalar_lea.hbm %s12042_s23, 16 }
 0x1b6   :  { %p10334_p6 = scmp.ne.s32.totalorder %s12042_s23, %s10333_s28  ;;  %p10337_p7 = scmp.lt.u32.totalorder %s10333_s28, %s12042_s23 }
 0x1b8   :  { %p10339_p8 = pnand %p10337_p7, %p10334_p6 }
 0x1ba   :  { %10342 = shalt.err (!%p10339_p8)
}
 0x1bb   :  { %s10343_s17 = scalar_lea.vmem %s327_s26, 16  ;;  %s10347_s1 = scalar_lea.vmem %s327_s26, 32 }
 0x1bc   :  { %p10344_p9 = scmp.ne.s32.totalorder %s327_s26, %s10343_s17  ;;  %p10348_p10 = scmp.lt.s32.totalorder %s327_s26, %s327_s26 }
 0x1bd   :  { %p10349_p11 = scmp.lt.s32.totalorder %s10347_s1, %s10343_s17 }
 0x1bf   :  { %p10350_p12 = por %p10349_p11, %p10348_p10 }
 0x1c1   :  { %p10351_p13 = pnand %p10350_p12, %p10344_p9 }
 0x1c3   :  { %10354 = shalt.err (!%p10351_p13)
}
 0x1c4   :  { %s12043_s10 = sld [smem:[#allocation74_spill]] }
 0x1c5   :  { %329 = dma.hbm_to_vmem [thread:$0]  %s12042_s23, 16, %s327_s26, [#allocation30]  }
 0x1ca   :  { %s10355_s24 = scalar_lea.hbm %s12043_s10, 256 }
 0x1cb   :  { %p10356_p0 = scmp.ne.s32.totalorder %s12043_s10, %s10355_s24  ;;  %p10359_p1 = scmp.lt.u32.totalorder %s10355_s24, %s12043_s10 }
 0x1cd   :  { %p10361_p2 = pnand %p10359_p1, %p10356_p0 }
 0x1cf   :  { %10364 = shalt.err (!%p10361_p2)
}
 0x1d0   :  { %s10365_s11 = scalar_lea.vmem %s10895_s30, 256  ;;  %p10370_p4 = scmp.lt.s32.totalorder %s10895_s30, %s10895_s30 }
 0x1d1   :  { %p10366_p3 = scmp.ne.s32.totalorder %s10895_s30, %s10365_s11  ;;  %p10371_p5 = scmp.lt.s32.totalorder %s10365_s11, %s10365_s11 }
 0x1d3   :  { %p10372_p6 = por %p10371_p5, %p10370_p4 }
 0x1d5   :  { %p10373_p7 = pnand %p10372_p6, %p10366_p3 }
 0x1d7   :  { %10376 = shalt.err (!%p10373_p7)
}
 0x1d8   :  { %s12044_s8 = sld [smem:[#allocation76_spill]]  ;;  %s10536_s25 = smov [#allocation37]  }
 0x1d9   :  { %351 = dma.hbm_to_vmem [thread:$0]  %s12043_s10, 256, %s10895_s30, [#allocation33], %s10512_s2, %s10512_s2, %s10513_s7  }
 0x1da   :  { %s370_s15 = sshll.u32 %s10536_s25, 4  ;;  %s10537_s16 = smov [#allocation38]   ;;  %s371_s15 = int_to_ptr.vmem [resolvable:$true] %s370_s15 }
 0x1db   :  { %s384_s27 = sshll.u32 %s10537_s16, 4  ;;  %s385_s27 = int_to_ptr.vmem [resolvable:$true] %s384_s27 }
 0x1de   :  { %s10377_s9 = scalar_lea.hbm %s12044_s8, 16 }
 0x1df   :  { %p10378_p8 = scmp.ne.s32.totalorder %s12044_s8, %s10377_s9  ;;  %p10381_p9 = scmp.lt.u32.totalorder %s10377_s9, %s12044_s8 }
 0x1e1   :  { %p10383_p10 = pnand %p10381_p9, %p10378_p8 }
 0x1e3   :  { %10386 = shalt.err (!%p10383_p10)
}
 0x1e4   :  { %s10387_s14 = scalar_lea.vmem %s371_s15, 16  ;;  %s10391_s18 = scalar_lea.vmem %s371_s15, 32 }
 0x1e5   :  { %p10388_p11 = scmp.ne.s32.totalorder %s371_s15, %s10387_s14  ;;  %p10392_p12 = scmp.lt.s32.totalorder %s371_s15, %s371_s15 }
 0x1e6   :  { %p10393_p13 = scmp.lt.s32.totalorder %s10391_s18, %s10387_s14 }
 0x1e8   :  { %p10394_p0 = por %p10393_p13, %p10392_p12 }
 0x1ea   :  { %p10395_p1 = pnand %p10394_p0, %p10388_p11 }
 0x1ec   :  { %10398 = shalt.err (!%p10395_p1)
}
 0x1ed   :  { %373 = dma.hbm_to_vmem [thread:$0]  %s12044_s8, 16, %s371_s15, [#allocation36]  }
 0x1ee   :  { %s10399_s7 = scalar_lea.hbm %s10748_s5, 16 }
 0x1ef   :  { %p10400_p2 = scmp.ne.s32.totalorder %s10748_s5, %s10399_s7  ;;  %p10403_p3 = scmp.lt.u32.totalorder %s10399_s7, %s10748_s5 }
 0x1f1   :  { %p10405_p4 = pnand %p10403_p3, %p10400_p2 }
 0x1f3   :  { %10408 = shalt.err (!%p10405_p4)
}
 0x1f4   :  { %s10409_s21 = scalar_lea.vmem %s385_s27, 16  ;;  %s10413_s22 = scalar_lea.vmem %s385_s27, 32 }
 0x1f5   :  { %p10410_p5 = scmp.ne.s32.totalorder %s385_s27, %s10409_s21  ;;  %p10414_p6 = scmp.lt.s32.totalorder %s385_s27, %s385_s27 }
 0x1f6   :  { %p10415_p7 = scmp.lt.s32.totalorder %s10413_s22, %s10409_s21 }
 0x1f8   :  { %p10416_p8 = por %p10415_p7, %p10414_p6 }
 0x1fa   :  { %p10417_p9 = pnand %p10416_p8, %p10410_p5 }
 0x1fc   :  { %10420 = shalt.err (!%p10417_p9)
}
 0x1fd   :  { %387 = dma.hbm_to_vmem [thread:$0]  %s10748_s5, 16, %s385_s27, [#allocation39]  }
 0x1fe   :  { %10443 = dma.done.wait [#allocation3], 8192  }
 0x1ff   :  { %10444 = vsyncadd [#allocation3], 4294959104 }
 0x200   :  { %10445 = dma.done.wait [#allocation6], 2048  }
 0x201   :  { %10446 = vsyncadd [#allocation6], 4294965248 }
 0x202   :  { %10447 = dma.done.wait [#allocation9], 1040  }
 0x203   :  { %10448 = vsyncadd [#allocation9], 4294966256 }
 0x204   :  { %10449 = dma.done.wait [#allocation12], 32  }
 0x205   :  { %10450 = vsyncadd [#allocation12], 4294967264 }
 0x206   :  { %10451 = dma.done.wait [#allocation15], 4160  }
 0x207   :  { %10452 = vsyncadd [#allocation15], 4294963136 }
 0x208   :  { %10453 = dma.done.wait [#allocation18], 4112  }
 0x209   :  { %10454 = vsyncadd [#allocation18], 4294963184 }
 0x20a   :  { %10455 = dma.done.wait [#allocation21], 16512  }
 0x20b   :  { %10456 = vsyncadd [#allocation21], 4294950784 }
 0x20c   :  { %10457 = dma.done.wait [#allocation24], 384  }
 0x20d   :  { %10458 = vsyncadd [#allocation24], 4294966912 }
 0x20e   :  { %10459 = dma.done.wait [#allocation27], 32  }
 0x20f   :  { %10460 = vsyncadd [#allocation27], 4294967264 }
 0x210   :  { %10461 = dma.done.wait [#allocation30], 32  }
 0x211   :  { %10462 = vsyncadd [#allocation30], 4294967264 }
 0x212   :  { %10463 = dma.done.wait [#allocation33], 272  }
 0x213   :  { %10464 = vsyncadd [#allocation33], 4294967024 }
 0x214   :  { %10465 = dma.done.wait [#allocation36], 32  }
 0x215   :  { %10466 = vsyncadd [#allocation36], 4294967264 }
 0x216   :  { %10467 = dma.done.wait [#allocation39], 16  }
 0x217   :  { %10468 = vsyncadd [#allocation39], 4294967280  ;;  %s12045_s5 = sld [smem:[#allocation55_spill]]  ;;  %v10538_v0 = vmov 0   ;;  %v9432_v5 = vld [vmem:[#allocation2 + $0x40] sm:$0xff]   ;;  %v9436_v9 = vld [vmem:[#allocation2 + $0x48] sm:$0xff]   ;;  %v465_v39 = vlaneseq }
 0x218   :  { %9385 = vset.pattern.permute.xlu0 %v10538_v0  ;;  %9386 = vset.pattern.permute.xlu1 %v10538_v0  ;;  %v9433_v6 = vld [vmem:[#allocation2 + $0xc0] sm:$0xff]   ;;  %v9437_v10 = vld [vmem:[#allocation2 + $0xc8] sm:$0xff]   ;;  %v9440_v13 = vld [vmem:[#allocation2 + $0x50] sm:$0xff]   ;;  %v10539_v52 = vmov 1.0|1.0   ;;  %s12052_s3 = sld [smem:[#allocation61_spill]] }
 0x219   :  { %8107 = vmatprep.subr.bf16.mxu0 %v9432_v5  ;;  %v9434_v7 = vld [vmem:[#allocation2] sm:$0xff]   ;;  %8135 = vmatprep.subr.bf16.mxu1 %v9433_v6  ;;  %v9438_v11 = vld [vmem:[#allocation2 + $0x8] sm:$0xff]   ;;  %v9441_v14 = vld [vmem:[#allocation2 + $0xd0] sm:$0xff]   ;;  %v10928_v40 = vand.u32 127, %v465_v39  ;;  %s12053_s0 = sld [smem:[#allocation60_spill]]  ;;  %s12054_s6 = sld [smem:[#allocation56_spill]] }
 0x21a   :  { %v9435_v8 = vld [vmem:[#allocation2 + $0x80] sm:$0xff]   ;;  %8108 = vmatpush3.bf16.msra.mxu0 %v9434_v7  ;;  %v9439_v12 = vld [vmem:[#allocation2 + $0x88] sm:$0xff]   ;;  %v9442_v15 = vld [vmem:[#allocation2 + $0x10] sm:$0xff]   ;;  %s10542_s23 = smov 96   ;;  %s10543_s19 = smov 32  }
 0x21b   :  { %8136 = vmatpush3.bf16.msra.mxu1 %v9435_v8  ;;  %8109 = vmatprep.subr.bf16.mxu0 %v9436_v9  ;;  %v9443_v16 = vld [vmem:[#allocation2 + $0x90] sm:$0xff]   ;;  %v9444_v17 = vld [vmem:[#allocation2 + $0x58] sm:$0xff]   ;;  %v9448_v21 = vld [vmem:[#allocation2 + $0x60] sm:$0xff]   ;;  %v467_v41 = vadd.s32 128, %v10928_v40  ;;  %v469_v42 = vadd.s32 384, %v10928_v40  ;;  %v468_v43 = vadd.s32 256, %v10928_v40 }
 0x21c   :  { %8137 = vmatprep.subr.bf16.mxu1 %v9437_v10  ;;  %v9445_v18 = vld [vmem:[#allocation2 + $0xd8] sm:$0xff]   ;;  %v9449_v22 = vld [vmem:[#allocation2 + $0xe0] sm:$0xff]   ;;  %v9452_v25 = vld [vmem:[#allocation2 + $0x68] sm:$0xff]   ;;  %v10970_v59 = vadd.s32 640, %v10928_v40  ;;  %v10973_v60 = vadd.s32 896, %v10928_v40  ;;  %v470_v5 = vadd.s32 512, %v10928_v40 }
 0x21d   :  { %v461_v1 = vld [vmem:[%s12045_s5] sm:$0xff]  ;;  %v462_v2 = vld [vmem:[%s12045_s5 + $0x8] sm:$0xff]  ;;  %v463_v3 = vld [vmem:[%s12045_s5 + $0x10] sm:$0xff]  ;;  %v472_v8 = vadd.s32 768, %v10928_v40  ;;  %s12056_s26 = sld [smem:[#allocation63_spill]]  ;;  %s12057_s13 = sld [smem:[#allocation57_spill]] }
 0x21e   :  { %475 = vperm.xlu0 %9385, %v461_v1   ;;  %481 = vperm.xlu1 %9386, %v463_v3   ;;  %v464_v4 = vld [vmem:[%s12045_s5 + $0x18] sm:$0xff]  ;;  %v9450_v23 = vld [vmem:[#allocation2 + $0x20] sm:$0xff]   ;;  %v9453_v26 = vld [vmem:[#allocation2 + $0xe8] sm:$0xff]   ;;  %s12058_s30 = sld [smem:[#allocation68_spill]]  ;;  %s12059_s28 = sld [smem:[#allocation69_spill]] }
 0x21f   :  { %8110 = vmatpush3.bf16.msra.mxu0 %v9438_v11  ;;  %8138 = vmatpush3.bf16.msra.mxu1 %v9439_v12  ;;  %v9446_v19 = vld [vmem:[#allocation2 + $0x18] sm:$0xff]   ;;  %v9451_v24 = vld [vmem:[#allocation2 + $0xa0] sm:$0xff]   ;;  %v9454_v27 = vld [vmem:[#allocation2 + $0x28] sm:$0xff]   ;;  %s12060_s17 = sld [smem:[#allocation70_spill]]  ;;  %s10544_s1 = smov 112  }
 0x220   :  { %8111 = vmatprep.subr.bf16.mxu0 %v9440_v13  ;;  %8139 = vmatprep.subr.bf16.mxu1 %v9441_v14  ;;  %v9447_v20 = vld [vmem:[#allocation2 + $0x98] sm:$0xff]   ;;  %v9455_v28 = vld [vmem:[#allocation2 + $0xa8] sm:$0xff]   ;;  %v9456_v29 = vld [vmem:[#allocation2 + $0x70] sm:$0xff]   ;;  %s10545_s10 = smov 120   ;;  %s10546_s24 = smov 104  }
 0x221   :  { %v9457_v30 = vld [vmem:[#allocation2 + $0xf0] sm:$0xff]   ;;  %v9460_v33 = vld [vmem:[#allocation2 + $0x78] sm:$0xff]   ;;  %v9464_v37 = vld [vmem:[#allocation2 + $0x140] sm:$0xff]   ;;  %s12061_s11 = sld [smem:[#allocation58_spill]]  ;;  %s10547_s8 = smov 8  }
 0x222   :  { %478 = vperm.xlu0 %9385, %v462_v2   ;;  %484 = vperm.xlu1 %9386, %v464_v4   ;;  %v9458_v31 = vld [vmem:[#allocation2 + $0x30] sm:$0xff]   ;;  %v9461_v34 = vld [vmem:[#allocation2 + $0xf8] sm:$0xff]   ;;  %v9465_v38 = vld [vmem:[#allocation2 + $0x1c0] sm:$0xff]   ;;  %s10548_s25 = smov 24   ;;  %s12063_s15 = sld [smem:[#allocation59_spill]] }
 0x223   :  { %8112 = vmatpush3.bf16.msra.mxu0 %v9442_v15  ;;  %8140 = vmatpush3.bf16.msra.mxu1 %v9443_v16  ;;  %v9459_v32 = vld [vmem:[#allocation2 + $0xb0] sm:$0xff]   ;;  %v9462_v35 = vld [vmem:[#allocation2 + $0x38] sm:$0xff]   ;;  %v9466_v47 = vld [vmem:[#allocation2 + $0x100] sm:$0xff]  }
 0x224   :  { %8113 = vmatprep.subr.bf16.mxu0 %v9444_v17  ;;  %8141 = vmatprep.subr.bf16.mxu1 %v9445_v18  ;;  %v9463_v36 = vld [vmem:[#allocation2 + $0xb8] sm:$0xff]   ;;  %v9467_v49 = vld [vmem:[#allocation2 + $0x180] sm:$0xff]   ;;  %v9468_v50 = vld [vmem:[#allocation2 + $0x148] sm:$0xff]  }
 0x225   :  { %v9469_v51 = vld [vmem:[#allocation2 + $0x1c8] sm:$0xff]   ;;  %v9472_v55 = vld [vmem:[#allocation2 + $0x150] sm:$0xff]   ;;  %v9476_v61 = vld [vmem:[#allocation2 + $0x158] sm:$0xff]  }
 0x226   :  { %v9470_v53 = vld [vmem:[#allocation2 + $0x108] sm:$0xff]   ;;  %v9473_v56 = vld [vmem:[#allocation2 + $0x1d0] sm:$0xff]   ;;  %v9477_v62 = vld [vmem:[#allocation2 + $0x1d8] sm:$0xff]  }
 0x227   :  { %8114 = vmatpush3.bf16.msra.mxu0 %v9446_v19  ;;  %8142 = vmatpush3.bf16.msra.mxu1 %v9447_v20  ;;  %v9471_v54 = vld [vmem:[#allocation2 + $0x188] sm:$0xff]   ;;  %v9474_v57 = vld [vmem:[#allocation2 + $0x110] sm:$0xff]   ;;  %v9478_v63 = vld [vmem:[#allocation2 + $0x118] sm:$0xff]  }
 0x228   :  { %8115 = vmatprep.subr.bf16.mxu0 %v9448_v21  ;;  %8143 = vmatprep.subr.bf16.mxu1 %v9449_v22  ;;  %v9475_v58 = vld [vmem:[#allocation2 + $0x190] sm:$0xff]   ;;  %v9479_v1 = vld [vmem:[#allocation2 + $0x198] sm:$0xff]   ;;  %v9480_v2 = vld [vmem:[#allocation2 + $0x160] sm:$0xff]  }
 0x229   :  { %v9481_v3 = vld [vmem:[#allocation2 + $0x1e0] sm:$0xff]   ;;  %v9484_v7 = vld [vmem:[#allocation2 + $0x168] sm:$0xff]   ;;  %v9488_v12 = vld [vmem:[#allocation2 + $0x170] sm:$0xff]  }
 0x22a   :  { %v9482_v4 = vld [vmem:[#allocation2 + $0x120] sm:$0xff]   ;;  %v9485_v9 = vld [vmem:[#allocation2 + $0x1e8] sm:$0xff]   ;;  %v9489_v13 = vld [vmem:[#allocation2 + $0x1f0] sm:$0xff]  }
 0x22b   :  { %8116 = vmatpush3.bf16.msra.mxu0 %v9450_v23  ;;  %8144 = vmatpush3.bf16.msra.mxu1 %v9451_v24  ;;  %v9483_v6 = vld [vmem:[#allocation2 + $0x1a0] sm:$0xff]   ;;  %v9486_v10 = vld [vmem:[#allocation2 + $0x128] sm:$0xff]   ;;  %v9490_v14 = vld [vmem:[#allocation2 + $0x130] sm:$0xff]  }
 0x22c   :  { %8117 = vmatprep.subr.bf16.mxu0 %v9452_v25  ;;  %8145 = vmatprep.subr.bf16.mxu1 %v9453_v26  ;;  %v9487_v11 = vld [vmem:[#allocation2 + $0x1a8] sm:$0xff]   ;;  %v9491_v15 = vld [vmem:[#allocation2 + $0x1b0] sm:$0xff]   ;;  %v9492_v16 = vld [vmem:[#allocation2 + $0x178] sm:$0xff]  }
 0x22d   :  { %v9493_v17 = vld [vmem:[#allocation2 + $0x1f8] sm:$0xff]   ;;  %v9496_v23 = vld [vmem:[%s12052_s3] sm:$0xff]   ;;  %v9498_v25 = vld [vmem:[%s12052_s3 + $0x8] sm:$0xff]  }
 0x22e   :  { %v9494_v18 = vld [vmem:[#allocation2 + $0x138] sm:$0xff]   ;;  %v9497_v24 = vld [vmem:[#allocation5] sm:$0xff]   ;;  %v9499_v26 = vld [vmem:[#allocation5 + $0x8] sm:$0xff]  }
 0x22f   :  { %8118 = vmatpush3.bf16.msra.mxu0 %v9454_v27  ;;  %8146 = vmatpush3.bf16.msra.mxu1 %v9455_v28  ;;  %v9495_v20 = vld [vmem:[#allocation2 + $0x1b8] sm:$0xff]   ;;  %v9500_v27 = vld [vmem:[%s12052_s3 + $0x10] sm:$0xff]  }
 0x230   :  { %8119 = vmatprep.subr.bf16.mxu0 %v9456_v29  ;;  %8147 = vmatprep.subr.bf16.mxu1 %v9457_v30  ;;  %v9501_v28 = vld [vmem:[#allocation5 + $0x10] sm:$0xff]   ;;  %v9502_v29 = vld [vmem:[%s12052_s3 + $0x18] sm:$0xff]  }
 0x231   :  { %v9503_v30 = vld [vmem:[#allocation5 + $0x18] sm:$0xff]  }
 0x233   :  { %8120 = vmatpush3.bf16.msra.mxu0 %v9458_v31  ;;  %8148 = vmatpush3.bf16.msra.mxu1 %v9459_v32  ;;  %v9504_v31 = vld [vmem:[%s12052_s3 + $0x20] sm:$0xff]  }
 0x234   :  { %8121 = vmatprep.subr.bf16.mxu0 %v9460_v33  ;;  %8149 = vmatprep.subr.bf16.mxu1 %v9461_v34  ;;  %v9505_v32 = vld [vmem:[#allocation5 + $0x20] sm:$0xff]   ;;  %v9506_v33 = vld [vmem:[%s12052_s3 + $0x28] sm:$0xff]  }
 0x235   :  { %v9507_v34 = vld [vmem:[#allocation5 + $0x28] sm:$0xff]  }
 0x237   :  { %8122 = vmatpush3.bf16.msra.mxu0 %v9462_v35  ;;  %8150 = vmatpush3.bf16.msra.mxu1 %v9463_v36  ;;  %v9508_v35 = vld [vmem:[%s12052_s3 + $0x30] sm:$0xff]  }
 0x238   :  { %8163 = vmatprep.subr.bf16.mxu0 %v9464_v37  ;;  %8191 = vmatprep.subr.bf16.mxu1 %v9465_v38  ;;  %v9509_v36 = vld [vmem:[#allocation5 + $0x30] sm:$0xff]   ;;  %v9510_v37 = vld [vmem:[%s12052_s3 + $0x38] sm:$0xff]  }
 0x239   :  { %v9511_v38 = vld [vmem:[#allocation5 + $0x38] sm:$0xff]  }
 0x29d   :  { %v10933_v44 = vpop.permute.xlu0 %475  ;;  %v10935_v45 = vpop.permute.xlu1 %481 }
 0x29e   :  { %vm487_vm0 = vcmp.eq.s32.totalorder %v467_v41, %v10933_v44  ;;  %vm489_vm5 = vcmp.eq.s32.totalorder %v469_v42, %v10933_v44  ;;  %vm486_vm8 = vcmp.eq.s32.totalorder %v10928_v40, %v10933_v44  ;;  %vm503_vm9 = vcmp.eq.s32.totalorder %v467_v41, %v10935_v45 }
 0x29f   :  { %vm488_vm12 = vcmp.eq.s32.totalorder %v468_v43, %v10933_v44  ;;  %vm505_vm13 = vcmp.eq.s32.totalorder %v469_v42, %v10935_v45 }
 0x2a1   :  { %v10937_v46 = vpop.permute.xlu0 %478  ;;  %v10939_v48 = vpop.permute.xlu1 %484 }
 0x2a2   :  { %vm495_vm1 = vcmp.eq.s32.totalorder %v467_v41, %v10937_v46  ;;  %vm497_vm2 = vcmp.eq.s32.totalorder %v469_v42, %v10937_v46  ;;  %vm494_vm3 = vcmp.eq.s32.totalorder %v10928_v40, %v10937_v46  ;;  %vm496_vm6 = vcmp.eq.s32.totalorder %v468_v43, %v10937_v46 }
 0x2a3   :  { %vm7723_vm4 = vmpackc.low %vm495_vm1, %vm487_vm0  ;;  %vm511_vm10 = vcmp.eq.s32.totalorder %v467_v41, %v10939_v48  ;;  %vm513_vm14 = vcmp.eq.s32.totalorder %v469_v42, %v10939_v48  ;;  %v11037_v41 = vld [vmem:[#allocation7] sm:$0xff]  }
 0x2a4   :  { %7724 = vmatprep.mubr.msk.bf16.mxu0 %vm7723_vm4, %v10539_v52  ;;  %vm7731_vm7 = vmpackc.low %vm497_vm2, %vm489_vm5  ;;  %vm502_vm2 = vcmp.eq.s32.totalorder %v10928_v40, %v10935_v45  ;;  %vm504_vm4 = vcmp.eq.s32.totalorder %v468_v43, %v10935_v45  ;;  %vm512_vm5 = vcmp.eq.s32.totalorder %v468_v43, %v10939_v48 }
 0x2a5   :  { %7732 = vmatprep.mubr.msk.bf16.mxu1 %vm7731_vm7, %v10539_v52  ;;  %vm7725_vm11 = vmpackc.low %vm494_vm3, %vm486_vm8  ;;  %vm510_vm3 = vcmp.eq.s32.totalorder %v10928_v40, %v10939_v48  ;;  %vm499_vm8 = vcmp.eq.s32.totalorder %v10970_v59, %v10937_v46 }
 0x2a6   :  { %7726 = vmatmul.mubr.msk.bf16.vlgmr.msra.gmra.mrb[0].mxu0 %vm7725_vm11, %v10539_v52  ;;  %vm7733_vm15 = vmpackc.low %vm496_vm6, %vm488_vm12  ;;  %vm493_vm12 = vcmp.eq.s32.totalorder %v10973_v60, %v10933_v44 }
 0x2a7   :  { %7734 = vmatmul.mubr.msk.bf16.vlgmr.msra.gmra.mrb[0].mxu1 %vm7733_vm15, %v10539_v52  ;;  %8164 = vmatpush3.bf16.msra.mxu0 %v9466_v47  ;;  %vm7727_vm0 = vmpackc.low %vm511_vm10, %vm503_vm9  ;;  %vm501_vm9 = vcmp.eq.s32.totalorder %v10973_v60, %v10937_v46  ;;  %vm491_vm10 = vcmp.eq.s32.totalorder %v10970_v59, %v10933_v44  ;;  %vm500_vm15 = vcmp.eq.s32.totalorder %v472_v8, %v10937_v46 }
 0x2a8   :  { %8192 = vmatpush3.bf16.msra.mxu1 %v9467_v49  ;;  %8165 = vmatprep.subr.bf16.mxu0 %v9468_v50  ;;  %vm7735_vm1 = vmpackc.low %vm513_vm14, %vm505_vm13  ;;  %vm498_vm14 = vcmp.eq.s32.totalorder %v470_v5, %v10937_v46 }
 0x2a9   :  { %8193 = vmatprep.subr.bf16.mxu1 %v9469_v51  ;;  %7728 = vmatprep.mubr.msk.bf16.mxu0 %vm7727_vm0, %v10539_v52  ;;  %vm7729_vm6 = vmpackc.low %vm510_vm3, %vm502_vm2  ;;  %vm507_vm0 = vcmp.eq.s32.totalorder %v10970_v59, %v10935_v45  ;;  %vm490_vm2 = vcmp.eq.s32.totalorder %v470_v5, %v10933_v44  ;;  %vm509_vm3 = vcmp.eq.s32.totalorder %v10973_v60, %v10935_v45  ;;  %v727_v51 = vld [vmem:[%s12053_s0 + $0x8] sm:$0xff] }
 0x2aa   :  { %7736 = vmatprep.mubr.msk.bf16.mxu1 %vm7735_vm1, %v10539_v52  ;;  %vm7737_vm7 = vmpackc.low %vm512_vm5, %vm504_vm4  ;;  %vm515_vm1 = vcmp.eq.s32.totalorder %v10970_v59, %v10939_v48  ;;  %vm517_vm4 = vcmp.eq.s32.totalorder %v10973_v60, %v10939_v48 }
 0x2ab   :  { %8166 = vmatpush3.bf16.msra.mxu0 %v9470_v53  ;;  %vm7739_vm11 = vmpackc.low %vm499_vm8, %vm491_vm10  ;;  %vm506_vm10 = vcmp.eq.s32.totalorder %v470_v5, %v10935_v45 }
 0x2ac   :  { %8194 = vmatpush3.bf16.msra.mxu1 %v9471_v54  ;;  %8167 = vmatprep.subr.bf16.mxu0 %v9472_v55  ;;  %vm7747_vm13 = vmpackc.low %vm501_vm9, %vm493_vm12  ;;  %vm508_vm12 = vcmp.eq.s32.totalorder %v472_v8, %v10935_v45 }
 0x2ad   :  { %8195 = vmatprep.subr.bf16.mxu1 %v9473_v56  ;;  %vm11000_vm5 = vmpackc.low %vm498_vm14, %vm490_vm2  ;;  %vm1705_vm2 = vcmask 130048  }
 0x2ae   :  { %7730 = vmatmul.mubr.msk.bf16.gmra.mrb[4].mxu0 %vm7729_vm6, %v10539_v52  ;;  %vm492_vm6 = vcmp.eq.s32.totalorder %v472_v8, %v10933_v44  ;;  %vm11009_vm8 = vmpackc.low %vm515_vm1, %vm507_vm0  ;;  %v726_v44 = vld [vmem:[%s12053_s0] sm:$0xff]  ;;  %vm10541_vm0 = vmmov 0   ;;  %vm1657_vm1 = vcmask 261120  }
 0x2af   :  { %7738 = vmatmul.mubr.msk.bf16.gmra.mrb[4].mxu1 %vm7737_vm7, %v10539_v52  ;;  %8168 = vmatpush3.bf16.msra.mxu0 %v9474_v57  ;;  %vm11005_vm7 = vmpackc.low %vm500_vm15, %vm492_vm6  ;;  %vm5471_vm6 = vcmask 1046528  }
 0x2b0   :  { %8196 = vmatpush3.bf16.msra.mxu1 %v9475_v58  ;;  %7740 = vmatprep.mubr.msk.bf16.mxu0 %vm7739_vm11, %v10539_v52  ;;  %vm7751_vm9 = vmpackc.low %vm517_vm4, %vm509_vm3  ;;  %vm514_vm11 = vcmp.eq.s32.totalorder %v470_v5, %v10939_v48  ;;  %vm2165_vm3 = vcmask 523264   ;;  %vm2168_vm4 = vcmask 785408  }
 0x2b1   :  { %7748 = vmatprep.mubr.msk.bf16.mxu1 %vm7747_vm13, %v10539_v52  ;;  %8169 = vmatprep.subr.bf16.mxu0 %v9476_v61  ;;  %vm516_vm13 = vcmp.eq.s32.totalorder %v472_v8, %v10939_v48  ;;  %vm7745_vm14 = vmpackc.low %vm514_vm11, %vm506_vm10  ;;  %vm5699_vm10 = vcmask 64512   ;;  %vm5761_vm11 = vcmask 1043456  }
 0x2b2   :  { %8197 = vmatprep.subr.bf16.mxu1 %v9477_v62  ;;  %vm7753_vm15 = vmpackc.low %vm516_vm13, %vm508_vm12  ;;  %vm6152_vm12 = vcmask 195584   ;;  %vm7507_vm13 = vcmask 1042432  }
 0x2b3   :  { %8170 = vmatpush3.bf16.msra.mxu0 %v9478_v63 }
 0x2b4   :  { %8198 = vmatpush3.bf16.msra.mxu1 %v9479_v1  ;;  %8171 = vmatprep.subr.bf16.mxu0 %v9480_v2 }
 0x2b5   :  { %8199 = vmatprep.subr.bf16.mxu1 %v9481_v3 }
 0x2b7   :  { %8172 = vmatpush3.bf16.msra.mxu0 %v9482_v4 }
 0x2b8   :  { %8200 = vmatpush3.bf16.msra.mxu1 %v9483_v6  ;;  %8173 = vmatprep.subr.bf16.mxu0 %v9484_v7 }
 0x2b9   :  { %8201 = vmatprep.subr.bf16.mxu1 %v9485_v9 }
 0x2bb   :  { %8174 = vmatpush3.bf16.msra.mxu0 %v9486_v10 }
 0x2bc   :  { %8202 = vmatpush3.bf16.msra.mxu1 %v9487_v11  ;;  %8175 = vmatprep.subr.bf16.mxu0 %v9488_v12 }
 0x2bd   :  { %8203 = vmatprep.subr.bf16.mxu1 %v9489_v13 }
 0x2bf   :  { %8176 = vmatpush3.bf16.msra.mxu0 %v9490_v14 }
 0x2c0   :  { %8204 = vmatpush3.bf16.msra.mxu1 %v9491_v15  ;;  %8177 = vmatprep.subr.bf16.mxu0 %v9492_v16 }
 0x2c1   :  { %8205 = vmatprep.subr.bf16.mxu1 %v9493_v17 }
 0x2c3   :  { %8178 = vmatpush3.bf16.msra.mxu0 %v9494_v18 }
 0x2c4   :  { %8206 = vmatpush3.bf16.msra.mxu1 %v9495_v20  ;;  %8576 = vmatprep.subr.bf16.mxu0 %v9496_v23 }
 0x2c5   :  { %8596 = vmatprep.subr.bf16.mxu1 %v9497_v24 }
 0x2c6   :  { %7742 = vmatmul.mubr.msk.bf16.vlgmr.msra.gmra.mrb[8].mxu0 %vm11000_vm5, %v10539_v52  ;;  %vm3661_vm5 = vcmask 1040384  }
 0x2c7   :  { %7750 = vmatmul.mubr.msk.bf16.vlgmr.msra.gmra.mrb[8].mxu1 %vm11005_vm7, %v10539_v52  ;;  %7744 = vmatprep.mubr.msk.bf16.mxu0 %vm11009_vm8, %v10539_v52 }
 0x2c8   :  { %7752 = vmatprep.mubr.msk.bf16.mxu1 %vm7751_vm9, %v10539_v52  ;;  %8577 = vmatpush3.bf16.msra.mxu0 %v9496_v23  ;;  %vm5467_vm9 = vcmask 113664  }
 0x2c9   :  { %8597 = vmatpush3.bf16.msra.mxu1 %v9497_v24  ;;  %8578 = vmatprep.subr.bf16.mxu0 %v9498_v25 }
 0x2ca   :  { %8598 = vmatprep.subr.bf16.mxu1 %v9499_v26 }
 0x2cc   :  { %8579 = vmatpush3.bf16.msra.mxu0 %v9498_v25 }
 0x2cd   :  { %8599 = vmatpush3.bf16.msra.mxu1 %v9499_v26  ;;  %8580 = vmatprep.subr.bf16.mxu0 %v9500_v27 }
 0x2ce   :  { %7746 = vmatmul.mubr.msk.bf16.gmra.mrb[12].mxu0 %vm7745_vm14, %v10539_v52  ;;  %8600 = vmatprep.subr.bf16.mxu1 %v9501_v28  ;;  %vm7503_vm14 = vcmask 179200  }
 0x2cf   :  { %7754 = vmatmul.mubr.msk.bf16.gmra.mrb[12].mxu1 %vm7753_vm15, %v10539_v52 }
 0x2d0   :  { %8581 = vmatpush3.bf16.msra.mxu0 %v9500_v27 }
 0x2d1   :  { %8601 = vmatpush3.bf16.msra.mxu1 %v9501_v28  ;;  %8582 = vmatprep.subr.bf16.mxu0 %v9502_v29 }
 0x2d2   :  { %8602 = vmatprep.subr.bf16.mxu1 %v9503_v30 }
 0x2d4   :  { %8583 = vmatpush3.bf16.msra.mxu0 %v9502_v29 }
 0x2d5   :  { %8603 = vmatpush3.bf16.msra.mxu1 %v9503_v30  ;;  %8584 = vmatprep.subr.bf16.mxu0 %v9504_v31 }
 0x2d6   :  { %8604 = vmatprep.subr.bf16.mxu1 %v9505_v32 }
 0x2d8   :  { %8585 = vmatpush3.bf16.msra.mxu0 %v9504_v31 }
 0x2d9   :  { %8605 = vmatpush3.bf16.msra.mxu1 %v9505_v32  ;;  %8586 = vmatprep.subr.bf16.mxu0 %v9506_v33 }
 0x2da   :  { %8606 = vmatprep.subr.bf16.mxu1 %v9507_v34 }
 0x2dc   :  { %8587 = vmatpush3.bf16.msra.mxu0 %v9506_v33 }
 0x2dd   :  { %8607 = vmatpush3.bf16.msra.mxu1 %v9507_v34  ;;  %8588 = vmatprep.subr.bf16.mxu0 %v9508_v35 }
 0x2de   :  { %8608 = vmatprep.subr.bf16.mxu1 %v9509_v36 }
 0x2e0   :  { %8589 = vmatpush3.bf16.msra.mxu0 %v9508_v35 }
 0x2e1   :  { %8609 = vmatpush3.bf16.msra.mxu1 %v9509_v36  ;;  %8590 = vmatprep.subr.bf16.mxu0 %v9510_v37 }
 0x2e2   :  { %8610 = vmatprep.subr.bf16.mxu1 %v9511_v38 }
 0x2e4   :  { %8591 = vmatpush3.bf16.msra.mxu0 %v9510_v37 }
 0x2e5   :  { %8611 = vmatpush3.bf16.msra.mxu1 %v9511_v38  ;;  %8616 = vmatprep.subr.bf16.mxu0 %v11037_v41 }
 0x379   :  { %v8123_v42 = vpop.f32.mrb[0].mxu0 }
 0x37a   :  { %v8151_v43 = vpop.f32.mrb[0].mxu1  ;;  %v8124_v45 = vpop.f32.mrb[1].mxu0 }
 0x37b   :  { %v8125_v46 = vadd.f32 %v8124_v45, %v8123_v42  ;;  %v8152_v47 = vpop.f32.mrb[1].mxu1  ;;  %v8126_v48 = vpop.f32.mrb[2].mxu0 }
 0x37c   :  { %v8153_v49 = vadd.f32 %v8152_v47, %v8151_v43  ;;  %v8154_v50 = vpop.f32.mrb[2].mxu1  ;;  %v8127_v52 = vpop.f32.mrb[3].mxu0 }
 0x37d   :  { %v1147_v53 = vadd.f32 %v8125_v46, %v726_v44  ;;  %v8128_v54 = vadd.f32 %v8127_v52, %v8126_v48  ;;  %v8155_v55 = vpop.f32.mrb[3].mxu1  ;;  %v9515_v52 = vld [vmem:[#allocation7 + $0x18] sm:$0xff]  }
 0x37e   :  { %v8156_v56 = vadd.f32 %v8155_v55, %v8154_v50  ;;  %v9513_v50 = vld [vmem:[#allocation7 + $0x8] sm:$0xff]   ;;  %v9518_v55 = vld [vmem:[#allocation7 + $0x30] sm:$0xff]  }
 0x37f   :  { %v1196_v57 = vadd.f32 %v8153_v49, %v1147_v53  ;;  %v1150_v58 = vadd.f32 %v8128_v54, %v727_v51  ;;  %v9516_v53 = vld [vmem:[#allocation7 + $0x20] sm:$0xff]   ;;  %v9517_v54 = vld [vmem:[#allocation7 + $0x28] sm:$0xff]  }
 0x381   :  { %v1199_v59 = vadd.f32 %v8156_v56, %v1150_v58  ;;  %v8129_v60 = vpop.f32.mrb[4].mxu0  ;;  %v9519_v56 = vld [vmem:[#allocation7 + $0x38] sm:$0xff]  }
 0x382   :  { %v8130_v61 = vpop.f32.mrb[5].mxu0  ;;  %v8157_v62 = vpop.f32.mrb[4].mxu1 }
 0x383   :  { %v8131_v63 = vadd.f32 %v8130_v61, %v8129_v60  ;;  %v8132_v1 = vpop.f32.mrb[6].mxu0  ;;  %v8158_v2 = vpop.f32.mrb[5].mxu1 }
 0x384   :  { %v8133_v3 = vpop.f32.mrb[7].mxu0  ;;  %v8159_v4 = vadd.f32 %v8158_v2, %v8157_v62  ;;  %v8160_v5 = vpop.f32.mrb[6].mxu1 }
 0x385   :  { %v1155_v6 = vadd.f32 %v8131_v63, %v726_v44  ;;  %v8134_v7 = vadd.f32 %v8133_v3, %v8132_v1  ;;  %v8161_v8 = vpop.f32.mrb[7].mxu1 }
 0x386   :  { %v8162_v9 = vadd.f32 %v8161_v8, %v8160_v5 }
 0x387   :  { %v1158_v10 = vadd.f32 %v8134_v7, %v727_v51  ;;  %v1204_v11 = vadd.f32 %v8159_v4, %v1155_v6  ;;  %v9514_v51 = vld [vmem:[#allocation7 + $0x10] sm:$0xff]  }
 0x389   :  { %v1207_v12 = vadd.f32 %v8162_v9, %v1158_v10 }
 0x399   :  { %v8179_v13 = vpop.f32.mrb[8].mxu0 }
 0x39a   :  { %v8207_v14 = vpop.f32.mrb[8].mxu1  ;;  %v8180_v15 = vpop.f32.mrb[9].mxu0 }
 0x39b   :  { %v8181_v16 = vadd.f32 %v8180_v15, %v8179_v13  ;;  %v8208_v17 = vpop.f32.mrb[9].mxu1  ;;  %v8182_v18 = vpop.f32.mrb[10].mxu0  ;;  %v11077_v13 = vshrl.u32 %v465_v39, 7  ;;  %v11083_v15 = vld [vmem:[%s12054_s6] sm:$0x3] }
 0x39c   :  { %v8209_v19 = vadd.f32 %v8208_v17, %v8207_v14  ;;  %v8210_v20 = vpop.f32.mrb[10].mxu1  ;;  %v8183_v21 = vpop.f32.mrb[11].mxu0 }
 0x39d   :  { %v1245_v22 = vadd.f32 %v8181_v16, %v1196_v57  ;;  %v8184_v23 = vadd.f32 %v8183_v21, %v8182_v18  ;;  %v8211_v24 = vpop.f32.mrb[11].mxu1  ;;  %v11080_v14 = vsub.s32 0, %v11077_v13 }
 0x39e   :  { %v8212_v25 = vadd.f32 %v8211_v24, %v8210_v20 }
 0x39f   :  { %v11042_v26 = vadd.f32 %v8209_v19, %v1245_v22  ;;  %v1248_v27 = vadd.f32 %v8184_v23, %v1199_v59  ;;  %v11087_v16 = vrot.slane %v11083_v15, %v11080_v14 }
 0x3a1   :  { %v11044_v28 = vadd.f32 %v8212_v25, %v1248_v27  ;;  %v8185_v29 = vpop.f32.mrb[12].mxu0 }
 0x3a2   :  { %v8213_v30 = vpop.f32.mrb[12].mxu1  ;;  %v8186_v31 = vpop.f32.mrb[13].mxu0 }
 0x3a3   :  { %v8187_v32 = vadd.f32 %v8186_v31, %v8185_v29  ;;  %v8214_v33 = vpop.f32.mrb[13].mxu1  ;;  %v8188_v34 = vpop.f32.mrb[14].mxu0  ;;  %v1308_v35 = vpack.c.bf16 %v11044_v28, %v11042_v26 }
 0x3a4   :  { %v8215_v36 = vadd.f32 %v8214_v33, %v8213_v30  ;;  %v8216_v37 = vpop.f32.mrb[14].mxu1  ;;  %v8189_v38 = vpop.f32.mrb[15].mxu0 }
 0x3a5   :  { %v1253_v42 = vadd.f32 %v8187_v32, %v1204_v11  ;;  %v8190_v43 = vadd.f32 %v8189_v38, %v8188_v34  ;;  %v8217_v44 = vpop.f32.mrb[15].mxu1  ;;  %8592 = vmatprep.mubr.bf16.mxu0 %v1308_v35  ;;  %8612 = vmatprep.mubr.bf16.mxu1 %v1308_v35 }
 0x3a6   :  { %v8218_v45 = vadd.f32 %v8217_v44, %v8216_v37 }
 0x3a7   :  { %v11048_v46 = vadd.f32 %v8215_v36, %v1253_v42  ;;  %v1256_v47 = vadd.f32 %v8190_v43, %v1207_v12 }
 0x3a9   :  { %v11050_v48 = vadd.f32 %v8218_v45, %v1256_v47 }
 0x3ab   :  { %v1309_v49 = vpack.c.bf16 %v11050_v48, %v11048_v46 }
 0x3ad   :  { %8593 = vmatmul.mubr.bf16.vlgmr.msra.gmra.mrb[16].mxu0 %v1309_v49  ;;  %8613 = vmatmul.mubr.bf16.vlgmr.msra.gmra.mrb[16].mxu1 %v1309_v49 }
 0x3ae   :  { %8617 = vmatpush3.bf16.msra.mxu0 %v11037_v41  ;;  %8632 = vmatprep.mubr.bf16.mxu0 %v1308_v35  ;;  %v10540_v41 = vmov 0.0  }
 0x3af   :  { %8618 = vmatprep.subr.bf16.mxu0 %v9513_v50  ;;  %8636 = vmatprep.subr.bf16.mxu1 %v10540_v41 }
 0x3b0   :  { %8638 = vmatprep.mubr.msk.bf16.mxu1 %vm10541_vm0, %v10540_v41 }
 0x3b2   :  { %8619 = vmatpush3.bf16.msra.mxu0 %v9513_v50 }
 0x3b3   :  { %8620 = vmatprep.subr.bf16.mxu0 %v9514_v51 }
 0x3b6   :  { %8621 = vmatpush3.bf16.msra.mxu0 %v9514_v51 }
 0x3b7   :  { %8622 = vmatprep.subr.bf16.mxu0 %v9515_v52 }
 0x3ba   :  { %8623 = vmatpush3.bf16.msra.mxu0 %v9515_v52 }
 0x3bb   :  { %8624 = vmatprep.subr.bf16.mxu0 %v9516_v53 }
 0x3be   :  { %8625 = vmatpush3.bf16.msra.mxu0 %v9516_v53 }
 0x3bf   :  { %8626 = vmatprep.subr.bf16.mxu0 %v9517_v54 }
 0x3c2   :  { %8627 = vmatpush3.bf16.msra.mxu0 %v9517_v54 }
 0x3c3   :  { %8628 = vmatprep.subr.bf16.mxu0 %v9518_v55 }
 0x3c6   :  { %8629 = vmatpush3.bf16.msra.mxu0 %v9518_v55 }
 0x3c7   :  { %8630 = vmatprep.subr.bf16.mxu0 %v9519_v56 }
 0x3ca   :  { %8631 = vmatpush3.bf16.msra.mxu0 %v9519_v56 }
 0x3cb   :  { %8660 = vmatprep.subr.bf16.mxu0 %v10540_v41 }
 0x3cd   :  { %8633 = vmatmul.mubr.bf16.vlgmr.msra.gmra.mrb[20].mxu0 %v1309_v49 }
 0x3ce   :  { %8662 = vmatprep.mubr.msk.bf16.mxu0 %vm10541_vm0, %v10540_v41 }
 0x480   :  { %v8594_v57 = vpop.f32.mrb[16].mxu0  ;;  %v8614_v58 = vpop.f32.mrb[16].mxu1 }
 0x481   :  { %v1408_v59 = vpop.f32.mrb[17].mxu0  ;;  %v1521_v60 = vpop.f32.mrb[17].mxu1 }
 0x482   :  { %v8595_v61 = vpop.f32.mrb[18].mxu0  ;;  %v8615_v62 = vpop.f32.mrb[18].mxu1 }
 0x483   :  { %v11061_v63 = vpack.c.bf16 %v8595_v61, %v8594_v57  ;;  %v11063_v1 = vpack.c.bf16 %v8615_v62, %v8614_v58  ;;  %v1411_v2 = vpop.f32.mrb[19].mxu0  ;;  %v1524_v3 = vpop.f32.mrb[19].mxu1 }
 0x484   :  { %v1650_v4 = vpack.c.bf16 %v1411_v2, %v1408_v59  ;;  %v1651_v5 = vpack.c.bf16 %v1524_v3, %v1521_v60 }
 0x485   :  { %v2182_v57 = vsel %vm1657_vm1, %v11063_v1, 0 }
 0x486   :  { %v1662_v6 = vsel %vm1657_vm1, %v1651_v5, 0 }
 0x487   :  { %8637 = vmatpush3.bf16.xpose.msra.mxu1 %v1662_v6 }
 0x488   :  { %8642 = vmatprep.subr.bf16.mxu1 %v10540_v41 }
 0x48e   :  { %8639 = vmatmul.mubr.msk.bf16.vlgmr.msra.gmra.mrb[20].mxu1 %vm1657_vm1, %v1650_v4 }
 0x48f   :  { %8644 = vmatprep.mubr.msk.bf16.mxu1 %vm10541_vm0, %v10540_v41 }
 0x4a0   :  { %v8634_v7 = vpop.f32.mrb[20].mxu0 }
 0x4a1   :  { %v1634_v8 = vpop.f32.mrb[21].mxu0 }
 0x4a2   :  { %v8635_v9 = vpop.f32.mrb[22].mxu0 }
 0x4a3   :  { %v11070_v10 = vpack.c.bf16 %v8635_v9, %v8634_v7  ;;  %v1637_v11 = vpop.f32.mrb[23].mxu0 }
 0x4a4   :  { %v11072_v12 = vpack.c.bf16 %v1637_v11, %v1634_v8 }
 0x4a6   :  { %8643 = vmatpush3.bf16.msra.mxu1 %v11072_v12 }
 0x4a7   :  { %8648 = vmatprep.subr.bf16.mxu1 %v10540_v41 }
 0x561   :  { %v1698_v17 = vpop.f32.mrb[20].mxu1 }
 0x562   :  { %v1699_v18 = vadd.f32 %v1698_v17, %v11087_v16  ;;  %v8640_v19 = vpop.f32.mrb[21].mxu1 }
 0x563   :  { %v1701_v20 = vpop.f32.mrb[22].mxu1 }
 0x564   :  { %v1702_v21 = vadd.f32 %v1701_v20, %v11087_v16  ;;  %v8641_v22 = vpop.f32.mrb[23].mxu1  ;;  %v1706_v39 = vsel %vm1705_vm2, %v1699_v18, -inf }
 0x565   :  { %1707 = vmax.xlane.f32.xlu0 %v1706_v39 }
 0x566   :  { %v1709_v23 = vsel %vm1705_vm2, %v1702_v21, -inf }
 0x567   :  { %1710 = vmax.xlane.f32.xlu1 %v1709_v23 }
 0x578   :  { %1777 = vrot.lane.b32.xlu1 %v1651_v5, %s10542_s23 }
 0x57c   :  { %1899 = vrot.lane.b32.xlu1 %v1651_v5, %s10512_s2 }
 0x580   :  { %1897 = vrot.lane.b32.xlu1 %v1650_v4, %s10512_s2 }
 0x584   :  { %2018 = vrot.lane.b32.xlu1 %v1650_v4, %s10543_s19 }
 0x588   :  { %2293 = vrot.lane.b32.xlu1 %v11061_v63, %s10542_s23 }
 0x58c   :  { %2416 = vrot.lane.b32.xlu1 %v11061_v63, %s10512_s2 }
 0x590   :  { %2537 = vrot.lane.b32.xlu1 %v11061_v63, %s10543_s19 }
 0x5f2   :  { %v1708_v24 = vpop.xlane.xlu0 %1707 }
 0x5f3   :  { %v1712_v25 = vsub.f32 %v1699_v18, %v1708_v24  ;;  %v11158_v24 = vsub.s32 1, %v11077_v13 }
 0x5f4   :  { %v1711_v27 = vpop.xlane.xlu1 %1710 }
 0x5f5   :  { %v1714_v29 = vmul.f32 1.442695, %v1712_v25  ;;  %v1713_v30 = vsub.f32 %v1702_v21, %v1711_v27 }
 0x5f7   :  { %9773 = vpow2.f32 %v1714_v29  ;;  %v1716_v31 = vmul.f32 1.442695, %v1713_v30 }
 0x5f8   :  { %v1778_v32 = vpop.permute.xlu1 %1777 }
 0x5f9   :  { %9775 = vpow2.f32 %v1716_v31  ;;  %v1783_v55 = vsel %vm1657_vm1, %v1778_v32, 0 }
 0x5fc   :  { %v1900_v33 = vpop.permute.xlu1 %1899 }
 0x5fd   :  { %v1905_v34 = vsel %vm1657_vm1, %v1900_v33, 0 }
 0x5fe   :  { %8661 = vmatpush3.bf16.xpose.msra.mxu0 %v1905_v34 }
 0x5ff   :  { %8672 = vmatprep.subr.bf16.mxu0 %v10540_v41 }
 0x600   :  { %v1898_v38 = vpop.permute.xlu1 %1897 }
 0x601   :  { %v9774_v35 = vpop.eup %9773 }
 0x602   :  { %v1718_v36 = vsel %vm1705_vm2, %v9774_v35, 0.0 }
 0x603   :  { %v9776_v37 = vpop.eup %9775  ;;  %1719 = vadd.xlane.f32.xlu0 %v1718_v36 }
 0x604   :  { %v1721_v42 = vsel %vm1705_vm2, %v9776_v37, 0.0  ;;  %v2019_v56 = vpop.permute.xlu1 %2018 }
 0x605   :  { %8663 = vmatmul.mubr.msk.bf16.vlgmr.msra.gmra.mrb[24].mxu0 %vm1657_vm1, %v1898_v38 }
 0x606   :  { %8674 = vmatprep.mubr.msk.bf16.mxu0 %vm10541_vm0, %v10540_v41 }
 0x607   :  { %1722 = vadd.xlane.f32.xlu0 %v1721_v42 }
 0x608   :  { %v2294_v61 = vpop.permute.xlu1 %2293 }
 0x61d   :  { %1774 = vrot.lane.b32.xlu0 %v1650_v4, %s10542_s23 }
 0x621   :  { %2020 = vrot.lane.b32.xlu0 %v1651_v5, %s10543_s19 }
 0x625   :  { %2296 = vrot.lane.b32.xlu0 %v11063_v1, %s10542_s23 }
 0x629   :  { %2418 = vrot.lane.b32.xlu0 %v11063_v1, %s10512_s2 }
 0x62d   :  { %2539 = vrot.lane.b32.xlu0 %v11063_v1, %s10543_s19  ;;  %v2417_v1 = vpop.permute.xlu1 %2416 }
 0x631   :  { %v2538_v3 = vpop.permute.xlu1 %2537 }
 0x690   :  { %v1720_v43 = vpop.xlane.xlu0 %1719 }
 0x691   :  { %9777 = vrcp.f32 %v1720_v43 }
 0x694   :  { %v1723_v44 = vpop.xlane.xlu0 %1722 }
 0x695   :  { %9779 = vrcp.f32 %v1723_v44 }
 0x698   :  { %v1775_v45 = vpop.permute.xlu0 %1774 }
 0x69b   :  { %v9778_v49 = vpop.eup %9777 }
 0x69c   :  { %v2021_v47 = vpop.permute.xlu0 %2020  ;;  %v1726_v52 = vmul.f32 %v9778_v49, %v9774_v35 }
 0x69d   :  { %v2026_v50 = vsel %vm1657_vm1, %v2021_v47, 0 }
 0x69e   :  { %8673 = vmatpush3.bf16.xpose.msra.mxu0 %v2026_v50 }
 0x69f   :  { %v9780_v51 = vpop.eup %9779  ;;  %8684 = vmatprep.subr.bf16.mxu0 %v10540_v41 }
 0x6a0   :  { %v1727_v53 = vmul.f32 %v9780_v51, %v9776_v37  ;;  %v2297_v58 = vpop.permute.xlu0 %2296  ;;  %v2177_v37 = vrot.slane %v11083_v15, %v11158_v24 }
 0x6a1   :  { %v2302_v59 = vsel %vm1657_vm1, %v2297_v58, 0 }
 0x6a2   :  { %v1728_v54 = vpack.c.bf16 %v1727_v53, %v1726_v52 }
 0x6a4   :  { %8645 = vmatmul.mubr.msk.bf16.vlgmr.msra.gmra.mrb[24].mxu1 %vm1705_vm2, %v1728_v54  ;;  %v2419_v60 = vpop.permute.xlu0 %2418 }
 0x6a5   :  { %8649 = vmatpush3.bf16.xpose.msra.mxu1 %v1783_v55  ;;  %8675 = vmatmul.mubr.msk.bf16.vlgmr.msra.gmra.mrb[28].mxu0 %vm1657_vm1, %v2019_v56  ;;  %v2424_v62 = vsel %vm1657_vm1, %v2419_v60, 0 }
 0x6a6   :  { %8685 = vmatpush3.bf16.xpose.msra.mxu0 %v2182_v57  ;;  %8650 = vmatprep.mubr.msk.bf16.mxu1 %vm10541_vm0, %v10540_v41 }
 0x6a7   :  { %8686 = vmatprep.mubr.msk.bf16.mxu0 %vm10541_vm0, %v10540_v41  ;;  %8696 = vmatprep.subr.bf16.mxu0 %v10540_v41 }
 0x6a8   :  { %8654 = vmatprep.subr.bf16.mxu1 %v10540_v41 }
 0x6ac   :  { %8651 = vmatmul.mubr.msk.bf16.vlgmr.msra.gmra.mrb[28].mxu1 %vm1657_vm1, %v1775_v45 }
 0x6ad   :  { %8687 = vmatmul.mubr.msk.bf16.vlgmr.msra.gmra.mrb[32].mxu0 %vm1657_vm1, %v11061_v63  ;;  %8656 = vmatprep.mubr.msk.bf16.mxu1 %vm10541_vm0, %v10540_v41  ;;  %v2540_v63 = vpop.permute.xlu0 %2539 }
 0x6ae   :  { %8697 = vmatpush3.bf16.xpose.msra.mxu0 %v2302_v59  ;;  %8698 = vmatprep.mubr.msk.bf16.mxu0 %vm10541_vm0, %v10540_v41  ;;  %v2545_v2 = vsel %vm1657_vm1, %v2540_v63, 0 }
 0x6af   :  { %8708 = vmatprep.subr.bf16.mxu0 %v10540_v41 }
 0x6b5   :  { %8699 = vmatmul.mubr.msk.bf16.vlgmr.msra.gmra.mrb[36].mxu0 %vm1657_vm1, %v2294_v61 }
 0x6b6   :  { %8709 = vmatpush3.bf16.xpose.msra.mxu0 %v2424_v62  ;;  %8710 = vmatprep.mubr.msk.bf16.mxu0 %vm10541_vm0, %v10540_v41 }
 0x6b7   :  { %8720 = vmatprep.subr.bf16.mxu0 %v10540_v41 }
 0x6bd   :  { %8711 = vmatmul.mubr.msk.bf16.vlgmr.msra.gmra.mrb[40].mxu0 %vm1657_vm1, %v2417_v1 }
 0x6be   :  { %8721 = vmatpush3.bf16.xpose.msra.mxu0 %v2545_v2  ;;  %8722 = vmatprep.mubr.msk.bf16.mxu0 %vm10541_vm0, %v10540_v41 }
 0x6c5   :  { %8723 = vmatmul.mubr.msk.bf16.vlgmr.msra.gmra.mrb[44].mxu0 %vm1657_vm1, %v2538_v3 }
 0x6d8   :  { %v1941_v4 = vpop.f32.mrb[24].mxu0 }
 0x6d9   :  { %v8664_v5 = vpop.f32.mrb[25].mxu0  ;;  %v1942_v30 = vadd.f32 %v1941_v4, %v11087_v16 }
 0x6da   :  { %v1944_v6 = vpop.f32.mrb[26].mxu0 }
 0x6db   :  { %v8665_v7 = vpop.f32.mrb[27].mxu0  ;;  %v1945_v42 = vadd.f32 %v1944_v6, %v11087_v16  ;;  %v1948_v43 = vsel %vm1705_vm2, %v1942_v30, -inf }
 0x6dd   :  { %v1951_v15 = vsel %vm1705_vm2, %v1945_v42, -inf }
 0x777   :  { %v11150_v8 = vpop.f32.mrb[24].mxu1 }
 0x778   :  { %v8646_v9 = vpop.f32.mrb[25].mxu1  ;;  %v2062_v11 = vpop.f32.mrb[28].mxu0 }
 0x779   :  { %v11152_v17 = vpop.f32.mrb[26].mxu1  ;;  %v8676_v18 = vpop.f32.mrb[29].mxu0  ;;  %v2063_v36 = vadd.f32 %v2062_v11, %v11087_v16 }
 0x77a   :  { %v8647_v19 = vpop.f32.mrb[27].mxu1  ;;  %v2065_v20 = vpop.f32.mrb[30].mxu0 }
 0x77b   :  { %v8677_v21 = vpop.f32.mrb[31].mxu0  ;;  %v2069_v47 = vsel %vm1705_vm2, %v2063_v36, -inf  ;;  %v2066_v50 = vadd.f32 %v2065_v20, %v11087_v16 }
 0x77d   :  { %v2072_v56 = vsel %vm1705_vm2, %v2066_v50, -inf }
 0x77f   :  { %v1819_v22 = vpop.f32.mrb[28].mxu1 }
 0x780   :  { %v11155_v39 = vadd.f32 %v1819_v22, %v11087_v16  ;;  %v8652_v23 = vpop.f32.mrb[29].mxu1  ;;  %v2218_v25 = vpop.f32.mrb[32].mxu0 }
 0x781   :  { %v1822_v27 = vpop.f32.mrb[30].mxu1  ;;  %v8688_v29 = vpop.f32.mrb[33].mxu0  ;;  %v2219_v44 = vadd.f32 %v2218_v25, %v2177_v37 }
 0x782   :  { %v11162_v31 = vadd.f32 %v1822_v27, %v11087_v16  ;;  %v8653_v32 = vpop.f32.mrb[31].mxu1  ;;  %v2221_v33 = vpop.f32.mrb[34].mxu0  ;;  %v1826_v34 = vsel %vm1705_vm2, %v11155_v39, -inf }
 0x783   :  { %v8689_v35 = vpop.f32.mrb[35].mxu0  ;;  %1827 = vmax.xlane.f32.xlu0 %v1826_v34  ;;  %v2225_v54 = vsel %vm1705_vm2, %v2219_v44, -inf  ;;  %v2222_v55 = vadd.f32 %v2221_v33, %v2177_v37 }
 0x784   :  { %v1829_v38 = vsel %vm1705_vm2, %v11162_v31, -inf }
 0x785   :  { %1830 = vmax.xlane.f32.xlu1 %v1829_v38  ;;  %v2228_v62 = vsel %vm1705_vm2, %v2222_v55, -inf }
 0x787   :  { %1949 = vmax.xlane.f32.xlu0 %v1948_v43 }
 0x788   :  { %v2338_v45 = vpop.f32.mrb[36].mxu0 }
 0x789   :  { %v8700_v49 = vpop.f32.mrb[37].mxu0  ;;  %2070 = vmax.xlane.f32.xlu1 %v2069_v47  ;;  %v11176_v53 = vadd.f32 %v2338_v45, %v2177_v37 }
 0x78a   :  { %v2341_v51 = vpop.f32.mrb[38].mxu0 }
 0x78b   :  { %v8701_v52 = vpop.f32.mrb[39].mxu0  ;;  %1952 = vmax.xlane.f32.xlu0 %v1951_v15  ;;  %v2345_v58 = vsel %vm1705_vm2, %v11176_v53, -inf  ;;  %v11184_v60 = vadd.f32 %v2341_v51, %v2177_v37 }
 0x78d   :  { %2226 = vmax.xlane.f32.xlu1 %v2225_v54  ;;  %v2348_v3 = vsel %vm1705_vm2, %v11184_v60, -inf }
 0x78f   :  { %2073 = vmax.xlane.f32.xlu0 %v2072_v56 }
 0x790   :  { %v2460_v57 = vpop.f32.mrb[40].mxu0 }
 0x791   :  { %v11182_v59 = vadd.f32 %v2460_v57, %v2177_v37  ;;  %v8712_v16 = vpop.f32.mrb[41].mxu0  ;;  %2346 = vmax.xlane.f32.xlu1 %v2345_v58 }
 0x792   :  { %v2463_v61 = vpop.f32.mrb[42].mxu0 }
 0x793   :  { %v8713_v63 = vpop.f32.mrb[43].mxu0  ;;  %2229 = vmax.xlane.f32.xlu0 %v2228_v62  ;;  %v2467_v1 = vsel %vm1705_vm2, %v11182_v59, -inf  ;;  %v11189_v2 = vadd.f32 %v2463_v61, %v2177_v37 }
 0x795   :  { %2468 = vmax.xlane.f32.xlu1 %v2467_v1  ;;  %v2470_v9 = vsel %vm1705_vm2, %v11189_v2, -inf }
 0x797   :  { %2349 = vmax.xlane.f32.xlu0 %v2348_v3 }
 0x798   :  { %v2581_v4 = vpop.f32.mrb[44].mxu0 }
 0x799   :  { %v11193_v5 = vadd.f32 %v2581_v4, %v2177_v37  ;;  %v8724_v6 = vpop.f32.mrb[45].mxu0 }
 0x79a   :  { %v2584_v7 = vpop.f32.mrb[46].mxu0 }
 0x79b   :  { %v11197_v11 = vadd.f32 %v2584_v7, %v2177_v37  ;;  %v8725_v18 = vpop.f32.mrb[47].mxu0  ;;  %2471 = vmax.xlane.f32.xlu0 %v2470_v9  ;;  %v2588_v19 = vsel %vm1705_vm2, %v11193_v5, -inf }
 0x79c   :  { %2589 = vmax.xlane.f32.xlu1 %v2588_v19 }
 0x79d   :  { %v2591_v20 = vsel %vm1705_vm2, %v11197_v11, -inf }
 0x79f   :  { %2592 = vmax.xlane.f32.xlu0 %v2591_v20 }
 0x810   :  { %v1828_v21 = vpop.xlane.xlu0 %1827 }
 0x811   :  { %v1832_v38 = vsub.f32 %v11155_v39, %v1828_v21 }
 0x812   :  { %v1831_v22 = vpop.xlane.xlu1 %1830 }
 0x813   :  { %v1834_v52 = vmul.f32 1.442695, %v1832_v38 }
 0x814   :  { %v1950_v23 = vpop.xlane.xlu0 %1949 }
 0x815   :  { %v1954_v25 = vsub.f32 %v1942_v30, %v1950_v23 }
 0x816   :  { %v2071_v27 = vpop.xlane.xlu1 %2070 }
 0x817   :  { %v1956_v29 = vmul.f32 1.442695, %v1954_v25  ;;  %v2075_v32 = vsub.f32 %v2063_v36, %v2071_v27 }
 0x818   :  { %v1953_v33 = vpop.xlane.xlu0 %1952 }
 0x819   :  { %9781 = vpow2.f32 %v1956_v29  ;;  %v2077_v34 = vmul.f32 1.442695, %v2075_v32  ;;  %v1955_v35 = vsub.f32 %v1945_v42, %v1953_v33 }
 0x81a   :  { %v2227_v37 = vpop.xlane.xlu1 %2226 }
 0x81b   :  { %9783 = vpow2.f32 %v2077_v34  ;;  %v1958_v43 = vmul.f32 1.442695, %v1955_v35  ;;  %v2231_v45 = vsub.f32 %v2219_v44, %v2227_v37 }
 0x81c   :  { %v2074_v47 = vpop.xlane.xlu0 %2073 }
 0x81d   :  { %9785 = vpow2.f32 %v1958_v43  ;;  %v2233_v49 = vmul.f32 1.442695, %v2231_v45  ;;  %v2076_v51 = vsub.f32 %v2066_v50, %v2074_v47 }
 0x81e   :  { %v2347_v15 = vpop.xlane.xlu1 %2346 }
 0x81f   :  { %9787 = vpow2.f32 %v2233_v49  ;;  %v2079_v30 = vmul.f32 1.442695, %v2076_v51  ;;  %v2351_v36 = vsub.f32 %v11176_v53, %v2347_v15  ;;  %v1833_v53 = vsub.f32 %v11162_v31, %v1831_v22 }
 0x820   :  { %v2230_v54 = vpop.xlane.xlu0 %2229 }
 0x821   :  { %9789 = vpow2.f32 %v2079_v30  ;;  %v2232_v56 = vsub.f32 %v2222_v55, %v2230_v54  ;;  %v2353_v39 = vmul.f32 1.442695, %v2351_v36 }
 0x822   :  { %9791 = vpow2.f32 %v1834_v52  ;;  %v2469_v27 = vpop.xlane.xlu1 %2468 }
 0x823   :  { %v11205_v42 = vpop.eup %9781  ;;  %v2235_v57 = vmul.f32 1.442695, %v2232_v56  ;;  %v2473_v29 = vsub.f32 %v11182_v59, %v2469_v27 }
 0x824   :  { %v2350_v58 = vpop.xlane.xlu0 %2349  ;;  %v1960_v44 = vsel %vm1705_vm2, %v11205_v42, 0.0 }
 0x825   :  { %v11209_v16 = vpop.eup %9783  ;;  %9793 = vpow2.f32 %v2235_v57  ;;  %v2352_v50 = vsub.f32 %v11184_v60, %v2350_v58  ;;  %1961 = vadd.xlane.f32.xlu1 %v1960_v44  ;;  %v1836_v60 = vmul.f32 1.442695, %v1833_v53  ;;  %v2475_v32 = vmul.f32 1.442695, %v2473_v29 }
 0x826   :  { %9795 = vpow2.f32 %v2353_v39  ;;  %v2081_v63 = vsel %vm1705_vm2, %v11209_v16, 0.0 }
 0x827   :  { %v11212_v61 = vpop.eup %9785  ;;  %v2355_v55 = vmul.f32 1.442695, %v2352_v50 }
 0x828   :  { %v1963_v62 = vsel %vm1705_vm2, %v11212_v61, 0.0  ;;  %v2472_v33 = vpop.xlane.xlu0 %2471 }
 0x829   :  { %v11219_v1 = vpop.eup %9787  ;;  %1964 = vadd.xlane.f32.xlu0 %v1963_v62  ;;  %2082 = vadd.xlane.f32.xlu1 %v2081_v63  ;;  %9797 = vpow2.f32 %v2355_v55  ;;  %v2474_v34 = vsub.f32 %v11189_v2, %v2472_v33  ;;  %v2590_v35 = vpop.xlane.xlu1 %2589 }
 0x82a   :  { %v2237_v31 = vsel %vm1705_vm2, %v11219_v1, 0.0  ;;  %9799 = vpow2.f32 %v1836_v60  ;;  %v2594_v38 = vsub.f32 %v11193_v5, %v2590_v35 }
 0x82b   :  { %v11221_v3 = vpop.eup %9789  ;;  %9801 = vpow2.f32 %v2475_v32  ;;  %v2477_v37 = vmul.f32 1.442695, %v2474_v34 }
 0x82c   :  { %v2084_v4 = vsel %vm1705_vm2, %v11221_v3, 0.0  ;;  %v11227_v6 = vpop.eup %9791  ;;  %v2593_v43 = vpop.xlane.xlu0 %2592  ;;  %v2596_v47 = vmul.f32 1.442695, %v2594_v38 }
 0x82d   :  { %2085 = vadd.xlane.f32.xlu0 %v2084_v4  ;;  %2238 = vadd.xlane.f32.xlu1 %v2237_v31  ;;  %v1838_v18 = vsel %vm1705_vm2, %v11227_v6, 0.0  ;;  %9803 = vpow2.f32 %v2477_v37  ;;  %v2595_v49 = vsub.f32 %v11197_v11, %v2593_v43 }
 0x82e   :  { %9805 = vpow2.f32 %v2596_v47 }
 0x82f   :  { %v11229_v7 = vpop.eup %9793  ;;  %v2598_v51 = vmul.f32 1.442695, %v2595_v49 }
 0x830   :  { %v2240_v9 = vsel %vm1705_vm2, %v11229_v7, 0.0  ;;  %v11235_v19 = vpop.eup %9795 }
 0x831   :  { %2241 = vadd.xlane.f32.xlu0 %v2240_v9  ;;  %1839 = vadd.xlane.f32.xlu1 %v1838_v18  ;;  %v2357_v20 = vsel %vm1705_vm2, %v11235_v19, 0.0  ;;  %9807 = vpow2.f32 %v2598_v51 }
 0x833   :  { %v11239_v21 = vpop.eup %9797 }
 0x834   :  { %v2360_v22 = vsel %vm1705_vm2, %v11239_v21, 0.0  ;;  %v9800_v23 = vpop.eup %9799 }
 0x835   :  { %2358 = vadd.xlane.f32.xlu0 %v2357_v20  ;;  %v1841_v25 = vsel %vm1705_vm2, %v9800_v23, 0.0  ;;  %v11251_v45 = vpop.eup %9801 }
 0x836   :  { %v2479_v59 = vsel %vm1705_vm2, %v11251_v45, 0.0 }
 0x837   :  { %v11256_v15 = vpop.eup %9803 }
 0x838   :  { %v2482_v2 = vsel %vm1705_vm2, %v11256_v15, 0.0  ;;  %v11260_v5 = vpop.eup %9805 }
 0x839   :  { %2361 = vadd.xlane.f32.xlu0 %v2360_v22  ;;  %v2600_v52 = vsel %vm1705_vm2, %v11260_v5, 0.0 }
 0x83b   :  { %v11264_v30 = vpop.eup %9807 }
 0x83c   :  { %v2603_v11 = vsel %vm1705_vm2, %v11264_v30, 0.0 }
 0x83d   :  { %1842 = vadd.xlane.f32.xlu0 %v1841_v25 }
 0x842   :  { %1850 = vrot.lane.b32.xlu1 %v11072_v12, %s10542_s23 }
 0x853   :  { %1971 = vrot.lane.b32.xlu0 %v11072_v12, %s10512_s2 }
 0x866   :  { %2480 = vadd.xlane.f32.xlu1 %v2479_v59 }
 0x872   :  { %2483 = vadd.xlane.f32.xlu0 %v2482_v2 }
 0x876   :  { %2601 = vadd.xlane.f32.xlu0 %v2600_v52 }
 0x877   :  { %2092 = vrot.lane.b32.xlu1 %v11072_v12, %s10543_s19 }
 0x87a   :  { %2604 = vadd.xlane.f32.xlu0 %v2603_v11 }
 0x87b   :  { %2369 = vrot.lane.b32.xlu1 %v11070_v10, %s10542_s23 }
 0x87f   :  { %2611 = vrot.lane.b32.xlu1 %v11070_v10, %s10543_s19 }
 0x890   :  { %2490 = vrot.lane.b32.xlu0 %v11070_v10, %s10512_s2 }
 0x8b2   :  { %v1962_v36 = vpop.xlane.xlu1 %1961 }
 0x8b6   :  { %v1965_v54 = vpop.xlane.xlu0 %1964  ;;  %v2083_v56 = vpop.xlane.xlu1 %2082 }
 0x8ba   :  { %v2086_v39 = vpop.xlane.xlu0 %2085  ;;  %v2239_v57 = vpop.xlane.xlu1 %2238 }
 0x8be   :  { %v2242_v58 = vpop.xlane.xlu0 %2241  ;;  %v1840_v12 = vpop.xlane.xlu1 %1839 }
 0x8bf   :  { %9809 = vrcp.f32 %v1840_v12 }
 0x8c2   :  { %v2359_v44 = vpop.xlane.xlu0 %2358  ;;  %v1851_v50 = vpop.permute.xlu1 %1850 }
 0x8c3   :  { %8655 = vmatpush3.bf16.msra.mxu1 %v1851_v50 }
 0x8c4   :  { %8666 = vmatprep.subr.bf16.mxu1 %v10540_v41 }
 0x8c6   :  { %v2362_v53 = vpop.xlane.xlu0 %2361 }
 0x8c9   :  { %v9810_v62 = vpop.eup %9809 }
 0x8ca   :  { %v1843_v55 = vpop.xlane.xlu0 %1842  ;;  %v1846_v60 = vmul.f32 %v9810_v62, %v11227_v6 }
 0x8cb   :  { %9811 = vrcp.f32 %v1843_v55 }
 0x8cc   :  { %9813 = vrcp.f32 %v1965_v54 }
 0x8cd   :  { %9815 = vrcp.f32 %v1962_v36 }
 0x8ce   :  { %v1972_v18 = vpop.permute.xlu0 %1971  ;;  %9817 = vrcp.f32 %v2086_v39 }
 0x8cf   :  { %9819 = vrcp.f32 %v2083_v56 }
 0x8d0   :  { %9821 = vrcp.f32 %v2242_v58 }
 0x8d1   :  { %9823 = vrcp.f32 %v2239_v57 }
 0x8d2   :  { %9825 = vrcp.f32 %v2362_v53 }
 0x8d3   :  { %9827 = vrcp.f32 %v2359_v44 }
 0x8d5   :  { %v9812_v63 = vpop.eup %9811 }
 0x8d6   :  { %v1847_v4 = vmul.f32 %v9812_v63, %v9800_v23  ;;  %v9814_v9 = vpop.eup %9813 }
 0x8d7   :  { %v9816_v20 = vpop.eup %9815  ;;  %v1969_v22 = vmul.f32 %v9814_v9, %v11212_v61 }
 0x8d8   :  { %v1848_v31 = vpack.c.bf16 %v1847_v4, %v1846_v60  ;;  %v1968_v25 = vmul.f32 %v9816_v20, %v11205_v42  ;;  %v9818_v6 = vpop.eup %9817 }
 0x8d9   :  { %v9820_v29 = vpop.eup %9819  ;;  %v2090_v32 = vmul.f32 %v9818_v6, %v11221_v3 }
 0x8da   :  { %8657 = vmatmul.mubr.msk.bf16.vlgmr.msra.gmra.mrb[32].mxu1 %vm1705_vm2, %v1848_v31  ;;  %v1970_v27 = vpack.c.bf16 %v1969_v22, %v1968_v25  ;;  %v2089_v61 = vmul.f32 %v9820_v29, %v11209_v16  ;;  %v9822_v34 = vpop.eup %9821  ;;  %v9522_v31 = vld [vmem:[#allocation8 + $0x10] sm:$0xff]   ;;  %v9523_v29 = vld [vmem:[#allocation8 + $0x18] sm:$0xff]  }
 0x8db   :  { %8667 = vmatpush3.bf16.msra.mxu1 %v1972_v18  ;;  %8668 = vmatprep.mubr.msk.bf16.mxu1 %vm10541_vm0, %v10540_v41  ;;  %v9824_v35 = vpop.eup %9823  ;;  %v2246_v3 = vmul.f32 %v9822_v34, %v11229_v7 }
 0x8dc   :  { %8678 = vmatprep.subr.bf16.mxu1 %v10540_v41  ;;  %v2091_v42 = vpack.c.bf16 %v2090_v32, %v2089_v61  ;;  %v2245_v16 = vmul.f32 %v9824_v35, %v11219_v1  ;;  %v9826_v43 = vpop.eup %9825  ;;  %v9524_v32 = vld [vmem:[#allocation8 + $0x20] sm:$0xff]   ;;  %v9525_v35 = vld [vmem:[#allocation8 + $0x28] sm:$0xff]  }
 0x8dd   :  { %v9828_v59 = vpop.eup %9827 }
 0x8de   :  { %v2247_v38 = vpack.c.bf16 %v2246_v3, %v2245_v16  ;;  %v2365_v1 = vmul.f32 %v9828_v59, %v11235_v19  ;;  %v9526_v3 = vld [vmem:[#allocation8 + $0x30] sm:$0xff]  }
 0x8e2   :  { %8669 = vmatmul.mubr.msk.bf16.vlgmr.msra.gmra.mrb[36].mxu1 %vm1705_vm2, %v1970_v27 }
 0x8e3   :  { %8680 = vmatprep.mubr.msk.bf16.mxu1 %vm10541_vm0, %v10540_v41 }
 0x8f3   :  { %v2481_v23 = vpop.xlane.xlu1 %2480 }
 0x8f7   :  { %v2093_v33 = vpop.permute.xlu1 %2092 }
 0x8f8   :  { %8679 = vmatpush3.bf16.msra.mxu1 %v2093_v33 }
 0x8f9   :  { %8690 = vmatprep.subr.bf16.mxu1 %v10540_v41 }
 0x8fb   :  { %8681 = vmatmul.mubr.msk.bf16.vlgmr.msra.gmra.mrb[40].mxu1 %vm1705_vm2, %v2091_v42  ;;  %v2370_v47 = vpop.permute.xlu1 %2369 }
 0x8fc   :  { %8691 = vmatpush3.bf16.msra.mxu1 %v11070_v10  ;;  %8692 = vmatprep.mubr.msk.bf16.mxu1 %vm10541_vm0, %v10540_v41  ;;  %v2366_v10 = vmul.f32 %v9826_v43, %v11239_v21 }
 0x8fd   :  { %8702 = vmatprep.subr.bf16.mxu1 %v10540_v41 }
 0x8fe   :  { %v2367_v51 = vpack.c.bf16 %v2366_v10, %v2365_v1  ;;  %v9527_v10 = vld [vmem:[#allocation8 + $0x38] sm:$0xff]  }
 0x8ff   :  { %v2484_v37 = vpop.xlane.xlu0 %2483  ;;  %v2612_v56 = vpop.permute.xlu1 %2611 }
 0x900   :  { %9829 = vrcp.f32 %v2484_v37 }
 0x901   :  { %9831 = vrcp.f32 %v2481_v23 }
 0x903   :  { %v2602_v49 = vpop.xlane.xlu0 %2601  ;;  %8693 = vmatmul.mubr.msk.bf16.vlgmr.msra.gmra.mrb[44].mxu1 %vm1705_vm2, %v2247_v38 }
 0x904   :  { %8703 = vmatpush3.bf16.msra.mxu1 %v2370_v47  ;;  %8704 = vmatprep.mubr.msk.bf16.mxu1 %vm10541_vm0, %v10540_v41 }
 0x905   :  { %8714 = vmatprep.subr.bf16.mxu1 %v10540_v41 }
 0x907   :  { %v2605_v7 = vpop.xlane.xlu0 %2604 }
 0x908   :  { %9833 = vrcp.f32 %v2605_v7 }
 0x909   :  { %9835 = vrcp.f32 %v2602_v49 }
 0x90a   :  { %v9830_v2 = vpop.eup %9829 }
 0x90b   :  { %v2491_v52 = vpop.permute.xlu0 %2490  ;;  %8705 = vmatmul.mubr.msk.bf16.vlgmr.msra.gmra.mrb[48].mxu1 %vm1705_vm2, %v2367_v51  ;;  %v9832_v11 = vpop.eup %9831  ;;  %v2488_v36 = vmul.f32 %v9830_v2, %v11256_v15 }
 0x90c   :  { %8715 = vmatpush3.bf16.msra.mxu1 %v2491_v52  ;;  %8716 = vmatprep.mubr.msk.bf16.mxu1 %vm10541_vm0, %v10540_v41  ;;  %v2487_v21 = vmul.f32 %v9832_v11, %v11251_v45 }
 0x90d   :  { %8726 = vmatprep.subr.bf16.mxu1 %v10540_v41 }
 0x90e   :  { %v2489_v19 = vpack.c.bf16 %v2488_v36, %v2487_v21 }
 0x912   :  { %v9834_v54 = vpop.eup %9833 }
 0x913   :  { %8717 = vmatmul.mubr.msk.bf16.vlgmr.msra.gmra.mrb[52].mxu1 %vm1705_vm2, %v2489_v19  ;;  %v9836_v39 = vpop.eup %9835  ;;  %v2609_v57 = vmul.f32 %v9834_v54, %v11264_v30  ;;  %v9521_v30 = vld [vmem:[#allocation8 + $0x8] sm:$0xff]  }
 0x914   :  { %8727 = vmatpush3.bf16.msra.mxu1 %v2612_v56  ;;  %8728 = vmatprep.mubr.msk.bf16.mxu1 %vm10541_vm0, %v10540_v41  ;;  %v2608_v58 = vmul.f32 %v9836_v39, %v11260_v5  ;;  %v9520_v5 = vld [vmem:[#allocation8] sm:$0xff]  }
 0x915   :  { %8732 = vmatprep.subr.bf16.mxu0 %v9520_v5 }
 0x916   :  { %v2610_v12 = vpack.c.bf16 %v2609_v57, %v2608_v58  ;;  %8733 = vmatpush3.bf16.msra.mxu0 %v9520_v5 }
 0x917   :  { %8734 = vmatprep.subr.bf16.mxu0 %v9521_v30 }
 0x91a   :  { %8735 = vmatpush3.bf16.msra.mxu0 %v9521_v30 }
 0x91b   :  { %8729 = vmatmul.mubr.msk.bf16.vlgmr.msra.gmra.mrb[56].mxu1 %vm1705_vm2, %v2610_v12  ;;  %8736 = vmatprep.subr.bf16.mxu0 %v9522_v31 }
 0x91c   :  { %3129 = vmatprep.mubr.bf16.mxu1 %v10538_v0 }
 0x91e   :  { %8737 = vmatpush3.bf16.msra.mxu0 %v9522_v31 }
 0x91f   :  { %8738 = vmatprep.subr.bf16.mxu0 %v9523_v29 }
 0x922   :  { %8739 = vmatpush3.bf16.msra.mxu0 %v9523_v29 }
 0x923   :  { %8740 = vmatprep.subr.bf16.mxu0 %v9524_v32 }
 0x926   :  { %8741 = vmatpush3.bf16.msra.mxu0 %v9524_v32 }
 0x927   :  { %8742 = vmatprep.subr.bf16.mxu0 %v9525_v35 }
 0x92a   :  { %8743 = vmatpush3.bf16.msra.mxu0 %v9525_v35 }
 0x92b   :  { %8744 = vmatprep.subr.bf16.mxu0 %v9526_v3 }
 0x92e   :  { %8745 = vmatpush3.bf16.msra.mxu0 %v9526_v3 }
 0x92f   :  { %8746 = vmatprep.subr.bf16.mxu0 %v9527_v10 }
 0x932   :  { %8747 = vmatpush3.bf16.msra.mxu0 %v9527_v10  ;;  %v9533_v10 = vld [vmem:[#allocation14 + $0xc] ss:$16 sps:$4 sm:$0xff]  }
 0x933   :  { %3150 = vmatprep.subr.bf16.mxu0 %v9533_v10 }
 0x9ad   :  { %v1890_v45 = vpop.f32.mrb[32].mxu1 }
 0x9ae   :  { %v8658_v15 = vpop.f32.mrb[33].mxu1 }
 0x9af   :  { %v1893_v44 = vpop.f32.mrb[34].mxu1 }
 0x9b0   :  { %v9387_v50 = vpack.i.bf16 %v1893_v44, %v1890_v45  ;;  %v8659_v53 = vpop.f32.mrb[35].mxu1 }
 0x9b2   :  { %9388 = vrot.lane.b32.xlu1 %v9387_v50, %s10543_s19 }
 0x9b5   :  { %v2011_v55 = vpop.f32.mrb[36].mxu1 }
 0x9b6   :  { %v8670_v62 = vpop.f32.mrb[37].mxu1 }
 0x9b7   :  { %v2014_v63 = vpop.f32.mrb[38].mxu1 }
 0x9b8   :  { %v9392_v60 = vpack.i.bf16 %v2014_v63, %v2011_v55  ;;  %v8671_v4 = vpop.f32.mrb[39].mxu1 }
 0x9ba   :  { %9393 = vrot.lane.b32.xlu1 %v9392_v60, %s10512_s2 }
 0x9ce   :  { %v2132_v9 = vpop.f32.mrb[40].mxu1 }
 0x9cf   :  { %v8682_v18 = vpop.f32.mrb[41].mxu1 }
 0x9d0   :  { %v2135_v20 = vpop.f32.mrb[42].mxu1 }
 0x9d1   :  { %v9397_v22 = vpack.i.bf16 %v2135_v20, %v2132_v9  ;;  %v8683_v25 = vpop.f32.mrb[43].mxu1 }
 0x9d3   :  { %9398 = vrot.lane.b32.xlu1 %v9397_v22, %s10542_s23 }
 0x9d6   :  { %v11319_v27 = vpop.f32.mrb[44].mxu1 }
 0x9d7   :  { %v8694_v6 = vpop.f32.mrb[45].mxu1 }
 0x9d8   :  { %v2288_v23 = vpop.f32.mrb[46].mxu1 }
 0x9d9   :  { %v8695_v61 = vpop.f32.mrb[47].mxu1 }
 0x9de   :  { %v2409_v33 = vpop.f32.mrb[48].mxu1 }
 0x9df   :  { %v8706_v42 = vpop.f32.mrb[49].mxu1 }
 0x9e0   :  { %v2412_v34 = vpop.f32.mrb[50].mxu1 }
 0x9e1   :  { %v9402_v16 = vpack.i.bf16 %v2412_v34, %v2409_v33  ;;  %v8707_v37 = vpop.f32.mrb[51].mxu1 }
 0x9e3   :  { %9403 = vrot.lane.b32.xlu1 %v9402_v16, %s10543_s19 }
 0x9e6   :  { %v2530_v38 = vpop.f32.mrb[52].mxu1 }
 0x9e7   :  { %v8718_v43 = vpop.f32.mrb[53].mxu1 }
 0x9e8   :  { %v2533_v47 = vpop.f32.mrb[54].mxu1 }
 0x9e9   :  { %v9407_v49 = vpack.i.bf16 %v2533_v47, %v2530_v38  ;;  %v8719_v59 = vpop.f32.mrb[55].mxu1  ;;  %v9528_v47 = vld [vmem:[#allocation14] ss:$16 sps:$4 sm:$0xff]  }
 0x9ea   :  { %v9531_v59 = vld [vmem:[#allocation14 + $0x8] ss:$16 sps:$4 sm:$0xff]  }
 0x9eb   :  { %9408 = vrot.lane.b32.xlu0 %v9407_v49, %s10512_s2  ;;  %s12055_s2 = sld [smem:[#allocation62_spill]]  ;;  %v9530_v49 = vld [vmem:[#allocation14 + $0x4] ss:$16 sps:$4 sm:$0xff]  }
 0x9ec   :  { %3097 = vmatprep.subr.bf16.mxu1 %v9530_v49 }
 0x9ed   :  { %3098 = vmatpush1.bf16.msra.mxu1 %v9528_v47 }
 0x9ee   :  { %v2651_v1 = vpop.f32.mrb[56].mxu1 }
 0x9ef   :  { %v8730_v7 = vpop.f32.mrb[57].mxu1 }
 0x9f0   :  { %v2654_v51 = vpop.f32.mrb[58].mxu1  ;;  %v9539_v7 = vld [vmem:[#allocation14 + $0x2c] ss:$16 sps:$4 sm:$0xff]  }
 0x9f1   :  { %v9412_v2 = vpack.i.bf16 %v2654_v51, %v2651_v1  ;;  %v8731_v52 = vpop.f32.mrb[59].mxu1  ;;  %v7795_v32 = vld [vmem:[%s12055_s2] ss:$0 sm:$0xff]  ;;  %v9536_v1 = vld [vmem:[#allocation14 + $0x24] ss:$16 sps:$4 sm:$0xff]  }
 0x9f2   :  { %3099 = vmatprep.subr.bf16.mxu1 %v9536_v1 }
 0x9f3   :  { %9413 = vrot.lane.b32.xlu1 %v9412_v2, %s10542_s23 }
 0xa24   :  { %v9389_v11 = vpop.permute.xlu1 %9388 }
 0xa25   :  { %v9391_v21 = vunpack.i.h.bf16 %v9389_v11  ;;  %v9390_v19 = vunpack.i.l.bf16 %v9389_v11 }
 0xa27   :  { %v2164_v57 = vsel %vm1657_vm1, %v11152_v17, %v9391_v21  ;;  %v2163_v58 = vsel %vm1657_vm1, %v11150_v8, %v9390_v19 }
 0xa2c   :  { %v9394_v36 = vpop.permute.xlu1 %9393 }
 0xa2d   :  { %v9396_v54 = vunpack.i.h.bf16 %v9394_v36  ;;  %v9395_v56 = vunpack.i.l.bf16 %v9394_v36 }
 0xa2f   :  { %v2167_v15 = vsel %vm2165_vm3, %v2164_v57, %v9396_v54  ;;  %v2166_v44 = vsel %vm2165_vm3, %v2163_v58, %v9395_v56 }
 0xa45   :  { %v9399_v39 = vpop.permute.xlu1 %9398 }
 0xa46   :  { %v9401_v12 = vunpack.i.h.bf16 %v9399_v39  ;;  %v9400_v45 = vunpack.i.l.bf16 %v9399_v39 }
 0xa48   :  { %v2169_v50 = vsel %vm2168_vm4, %v2166_v44, %v9400_v45  ;;  %v2170_v53 = vsel %vm2168_vm4, %v2167_v15, %v9401_v12  ;;  %v9542_v15 = vld [vmem:[#allocation14 + $0x44] ss:$16 sps:$4 sm:$0xff]   ;;  %v9545_v44 = vld [vmem:[#allocation14 + $0x4c] ss:$16 sps:$4 sm:$0xff]  }
 0xa49   :  { %v2688_v55 = vpack.c.bf16 %v2170_v53, %v2169_v50  ;;  %v9540_v50 = vld [vmem:[#allocation14 + $0x40] ss:$16 sps:$4 sm:$0xff]   ;;  %v9543_v53 = vld [vmem:[#allocation14 + $0x48] ss:$16 sps:$4 sm:$0xff]  }
 0xa4b   :  { %8748 = vmatprep.mubr.bf16.mxu0 %v2688_v55  ;;  %v9548_v55 = vld [vmem:[#allocation14 + $0x64] ss:$16 sps:$4 sm:$0xff]  }
 0xa55   :  { %v9404_v62 = vpop.permute.xlu1 %9403 }
 0xa56   :  { %v9406_v60 = vunpack.i.h.bf16 %v9404_v62  ;;  %v9405_v17 = vunpack.i.l.bf16 %v9404_v62  ;;  %v9551_v62 = vld [vmem:[#allocation14 + $0x6c] ss:$16 sps:$4 sm:$0xff]  }
 0xa58   :  { %v2683_v30 = vsel %vm1657_vm1, %v2288_v23, %v9406_v60  ;;  %v2682_v31 = vsel %vm1657_vm1, %v11319_v27, %v9405_v17  ;;  %v9549_v60 = vld [vmem:[#allocation14 + $0x68] ss:$16 sps:$4 sm:$0xff]   ;;  %v9554_v17 = vld [vmem:[#allocation14 + $0x84] ss:$16 sps:$4 sm:$0xff]  }
 0xa5d   :  { %v9409_v63 = vpop.permute.xlu0 %9408 }
 0xa5e   :  { %v9411_v4 = vunpack.i.h.bf16 %v9409_v63  ;;  %v9410_v5 = vunpack.i.l.bf16 %v9409_v63  ;;  %v9546_v63 = vld [vmem:[#allocation14 + $0x60] ss:$16 sps:$4 sm:$0xff]  }
 0xa60   :  { %v2685_v20 = vsel %vm2165_vm3, %v2683_v30, %v9411_v4  ;;  %v2684_v22 = vsel %vm2165_vm3, %v2682_v31, %v9410_v5  ;;  %v9557_v4 = vld [vmem:[#allocation14 + $0x8c] ss:$16 sps:$4 sm:$0xff]   ;;  %v9552_v5 = vld [vmem:[#allocation14 + $0x80] ss:$16 sps:$4 sm:$0xff]   ;;  %v9560_v30 = vld [vmem:[#allocation14 + $0xa4] ss:$16 sps:$4 sm:$0xff]  }
 0xa61   :  { %v9563_v31 = vld [vmem:[#allocation14 + $0xac] ss:$16 sps:$4 sm:$0xff]  }
 0xa65   :  { %v9414_v8 = vpop.permute.xlu1 %9413 }
 0xa66   :  { %v9416_v9 = vunpack.i.h.bf16 %v9414_v8  ;;  %v9415_v18 = vunpack.i.l.bf16 %v9414_v8  ;;  %v9555_v8 = vld [vmem:[#allocation14 + $0x88] ss:$16 sps:$4 sm:$0xff]  }
 0xa68   :  { %v2687_v25 = vsel %vm2168_vm4, %v2685_v20, %v9416_v9  ;;  %v2686_v6 = vsel %vm2168_vm4, %v2684_v22, %v9415_v18  ;;  %v9558_v9 = vld [vmem:[#allocation14 + $0xa0] ss:$16 sps:$4 sm:$0xff]   ;;  %v9561_v18 = vld [vmem:[#allocation14 + $0xa8] ss:$16 sps:$4 sm:$0xff]   ;;  %v9566_v20 = vld [vmem:[#allocation14 + $0xc4] ss:$16 sps:$4 sm:$0xff]  }
 0xa69   :  { %v2689_v29 = vpack.c.bf16 %v2687_v25, %v2686_v6  ;;  %v9569_v22 = vld [vmem:[#allocation14 + $0xcc] ss:$16 sps:$4 sm:$0xff]   ;;  %v9564_v25 = vld [vmem:[#allocation14 + $0xc0] ss:$16 sps:$4 sm:$0xff]   ;;  %v9567_v6 = vld [vmem:[#allocation14 + $0xc8] ss:$16 sps:$4 sm:$0xff]  }
 0xa6b   :  { %8749 = vmatmul.mubr.bf16.vlgmr.msra.gmra.mrb[48].mxu0 %v2689_v29  ;;  %v9572_v29 = vld [vmem:[#allocation14 + $0xe4] ss:$16 sps:$4 sm:$0xff]  }
 0xa6c   :  { %3182 = vmatprep.mubr.bf16.mxu0 %v10538_v0  ;;  %3151 = vmatpush1.bf16.msra.mxu0 %v9531_v59 }
 0xa6d   :  { %3152 = vmatprep.subr.bf16.mxu0 %v9539_v7  ;;  %v7804_v7 = vld [vmem:[%s12056_s26] ss:$0 sm:$0xff] }
 0xb3e   :  { %v8750_v61 = vpop.f32.mrb[48].mxu0 }
 0xb3f   :  { %v2795_v23 = vpop.f32.mrb[49].mxu0  ;;  %v2804_v34 = vadd.f32 %v8750_v61, %v7795_v32  ;;  %v9570_v61 = vld [vmem:[#allocation14 + $0xe0] ss:$16 sps:$4 sm:$0xff]  }
 0xb40   :  { %v2796_v33 = vadd.f32 %v7795_v32, %v2795_v23  ;;  %v8751_v42 = vpop.f32.mrb[50].mxu0  ;;  %v9573_v23 = vld [vmem:[#allocation14 + $0xe8] ss:$16 sps:$4 sm:$0xff]  }
 0xb41   :  { %v2798_v27 = vpop.f32.mrb[51].mxu0  ;;  %v2807_v37 = vadd.f32 %v8751_v42, %v7795_v32  ;;  %v2812_v38 = vadd.f32 %v2804_v34, %v11048_v46  ;;  %v9577_v42 = vld [vmem:[#allocation17 + $0xc0] sm:$0xff]  }
 0xb42   :  { %v2799_v35 = vadd.f32 %v7795_v32, %v2798_v27  ;;  %v2810_v3 = vadd.f32 %v2796_v33, %v11042_v26  ;;  %v9534_v26 = vld [vmem:[#allocation14 + $0x20] ss:$16 sps:$4 sm:$0xff]   ;;  %v9575_v32 = vld [vmem:[#allocation14 + $0xec] ss:$16 sps:$4 sm:$0xff]   ;;  %v9576_v33 = vld [vmem:[#allocation17 + $0x40] sm:$0xff]  }
 0xb43   :  { %v2813_v43 = vadd.f32 %v2807_v37, %v11050_v48  ;;  %3100 = vmatpush1.bf16.msra.mxu1 %v9534_v26 }
 0xb44   :  { %2816 = vadd.xlane.f32.xlu0 %v2810_v3  ;;  %v2811_v16 = vadd.f32 %v2799_v35, %v11044_v28  ;;  %v9537_v28 = vld [vmem:[#allocation14 + $0x28] ss:$16 sps:$4 sm:$0xff]   ;;  %3101 = vmatprep.subr.bf16.mxu1 %v9542_v15  ;;  %v9580_v15 = vld [vmem:[#allocation17 + $0x48] sm:$0xff]  }
 0xb45   :  { %3153 = vmatpush1.bf16.msra.mxu0 %v9537_v28 }
 0xb46   :  { %2818 = vadd.xlane.f32.xlu1 %v2811_v16  ;;  %3154 = vmatprep.subr.bf16.mxu0 %v9545_v44 }
 0xb47   :  { %3102 = vmatpush1.bf16.msra.mxu1 %v9540_v50 }
 0xb48   :  { %2820 = vadd.xlane.f32.xlu0 %v2812_v38  ;;  %3103 = vmatprep.subr.bf16.mxu1 %v9548_v55  ;;  %v9583_v55 = vld [vmem:[#allocation17 + $0x88] sm:$0xff]  }
 0xb49   :  { %3155 = vmatpush1.bf16.msra.mxu0 %v9543_v53 }
 0xb4a   :  { %3156 = vmatprep.subr.bf16.mxu0 %v9551_v62  ;;  %v9585_v62 = vld [vmem:[#allocation17 + $0xd0] sm:$0xff]  }
 0xb4b   :  { %3104 = vmatpush1.bf16.msra.mxu1 %v9546_v63 }
 0xb4c   :  { %2822 = vadd.xlane.f32.xlu0 %v2813_v43  ;;  %3105 = vmatprep.subr.bf16.mxu1 %v9554_v17  ;;  %v9586_v17 = vld [vmem:[#allocation17 + $0x10] sm:$0xff]  }
 0xb4d   :  { %3157 = vmatpush1.bf16.msra.mxu0 %v9549_v60 }
 0xb4e   :  { %3158 = vmatprep.subr.bf16.mxu0 %v9557_v4  ;;  %v9587_v4 = vld [vmem:[#allocation17 + $0x90] sm:$0xff]  }
 0xb4f   :  { %3106 = vmatpush1.bf16.msra.mxu1 %v9552_v5  ;;  %v9589_v5 = vld [vmem:[#allocation17 + $0xd8] sm:$0xff]  }
 0xb50   :  { %3107 = vmatprep.subr.bf16.mxu1 %v9560_v30  ;;  %v9591_v30 = vld [vmem:[#allocation17 + $0x98] sm:$0xff]  }
 0xb51   :  { %3159 = vmatpush1.bf16.msra.mxu0 %v9555_v8  ;;  %v9590_v8 = vld [vmem:[#allocation17 + $0x18] sm:$0xff]  }
 0xb52   :  { %3160 = vmatprep.subr.bf16.mxu0 %v9563_v31  ;;  %v9592_v31 = vld [vmem:[#allocation17 + $0x60] sm:$0xff]  }
 0xb53   :  { %3108 = vmatpush1.bf16.msra.mxu1 %v9558_v9  ;;  %v9593_v9 = vld [vmem:[#allocation17 + $0xe0] sm:$0xff]  }
 0xb54   :  { %3109 = vmatprep.subr.bf16.mxu1 %v9566_v20  ;;  %v9595_v20 = vld [vmem:[#allocation17 + $0xa0] sm:$0xff]  }
 0xb55   :  { %3161 = vmatpush1.bf16.msra.mxu0 %v9561_v18  ;;  %v9594_v18 = vld [vmem:[#allocation17 + $0x20] sm:$0xff]  }
 0xb56   :  { %3162 = vmatprep.subr.bf16.mxu0 %v9569_v22  ;;  %v9596_v22 = vld [vmem:[#allocation17 + $0x68] sm:$0xff]  }
 0xb57   :  { %3110 = vmatpush1.bf16.msra.mxu1 %v9564_v25  ;;  %v9597_v25 = vld [vmem:[#allocation17 + $0xe8] sm:$0xff]  }
 0xb58   :  { %3111 = vmatprep.subr.bf16.mxu1 %v9572_v29  ;;  %v9599_v29 = vld [vmem:[#allocation17 + $0xa8] sm:$0xff]  }
 0xb59   :  { %3163 = vmatpush1.bf16.msra.mxu0 %v9567_v6  ;;  %v9598_v6 = vld [vmem:[#allocation17 + $0x28] sm:$0xff]  }
 0xb5a   :  { %3164 = vmatprep.subr.bf16.mxu0 %v9575_v32  ;;  %v9600_v32 = vld [vmem:[#allocation17 + $0x70] sm:$0xff]  }
 0xb5b   :  { %3112 = vmatpush1.bf16.msra.mxu1 %v9570_v61  ;;  %v9601_v61 = vld [vmem:[#allocation17 + $0xf0] sm:$0xff]  }
 0xb5c   :  { %8291 = vmatprep.subr.bf16.mxu1 %v9576_v33  ;;  %v9603_v33 = vld [vmem:[#allocation17 + $0xb0] sm:$0xff]  }
 0xb5d   :  { %3165 = vmatpush1.bf16.msra.mxu0 %v9573_v23  ;;  %v9602_v23 = vld [vmem:[#allocation17 + $0x30] sm:$0xff]  }
 0xb5e   :  { %8319 = vmatprep.subr.bf16.mxu0 %v9577_v42  ;;  %v9604_v42 = vld [vmem:[#allocation17 + $0x78] sm:$0xff]  }
 0xbd1   :  { %v2817_v46 = vpop.xlane.xlu0 %2816 }
 0xbd2   :  { %v2825_v51 = vmul.f32 0.0078125, %v2817_v46 }
 0xbd3   :  { %v2819_v48 = vpop.xlane.xlu1 %2818 }
 0xbd4   :  { %v11345_v2 = vsub.f32 %v2810_v3, %v2825_v51  ;;  %v2826_v52 = vmul.f32 0.0078125, %v2819_v48 }
 0xbd5   :  { %v2821_v11 = vpop.xlane.xlu0 %2820 }
 0xbd6   :  { %v11347_v36 = vsub.f32 %v2811_v16, %v2826_v52  ;;  %v2827_v21 = vmul.f32 0.0078125, %v2821_v11  ;;  %v2833_v19 = vmul.f32 %v11345_v2, %v11345_v2  ;;  %v7805_v52 = vld [vmem:[#allocation10] ss:$0 sm:$0xff] }
 0xbd8   :  { %v11351_v54 = vsub.f32 %v2812_v38, %v2827_v21  ;;  %2837 = vadd.xlane.f32.xlu1 %v2833_v19  ;;  %v2834_v56 = vmul.f32 %v11347_v36, %v11347_v36 }
 0xbd9   :  { %v2823_v39 = vpop.xlane.xlu0 %2822 }
 0xbda   :  { %v2828_v57 = vmul.f32 0.0078125, %v2823_v39  ;;  %2839 = vadd.xlane.f32.xlu0 %v2834_v56  ;;  %v2835_v58 = vmul.f32 %v11351_v54, %v11351_v54 }
 0xbdc   :  { %v11357_v12 = vsub.f32 %v2813_v43, %v2828_v57  ;;  %2841 = vadd.xlane.f32.xlu1 %v2835_v58 }
 0xbde   :  { %v2836_v45 = vmul.f32 %v11357_v12, %v11357_v12 }
 0xbe0   :  { %2843 = vadd.xlane.f32.xlu0 %v2836_v45  ;;  %v9579_v45 = vld [vmem:[#allocation17 + $0x80] sm:$0xff]  }
 0xc65   :  { %v2838_v27 = vpop.xlane.xlu1 %2837 }
 0xc66   :  { %v2845_v34 = vmul.f32 0.0078125, %v2838_v27  ;;  %v9605_v27 = vld [vmem:[#allocation17 + $0xf8] sm:$0xff]  }
 0xc67   :  { %v2840_v35 = vpop.xlane.xlu0 %2839 }
 0xc68   :  { %v2849_v3 = vadd.f32 1e-05, %v2845_v34  ;;  %v2846_v16 = vmul.f32 0.0078125, %v2840_v35  ;;  %v9606_v34 = vld [vmem:[#allocation17 + $0x38] sm:$0xff]  }
 0xc69   :  { %v2842_v37 = vpop.xlane.xlu1 %2841  ;;  %v9607_v35 = vld [vmem:[#allocation17 + $0xb8] sm:$0xff]  }
 0xc6a   :  { %9837 = vrsqrt.f32 %v2849_v3  ;;  %v2850_v38 = vadd.f32 1e-05, %v2846_v16  ;;  %v2847_v43 = vmul.f32 0.0078125, %v2842_v37  ;;  %v2927_v3 = vsub.s32 2, %v11077_v13  ;;  %v2915_v16 = vld [vmem:[#allocation16] sm:$0xf] }
 0xc6b   :  { %v2931_v37 = vsub.s32 3, %v11077_v13 }
 0xc6c   :  { %9839 = vrsqrt.f32 %v2850_v38  ;;  %v2851_v47 = vadd.f32 1e-05, %v2847_v43  ;;  %v2920_v38 = vrot.slane %v2915_v16, %v11080_v14  ;;  %v2928_v43 = vrot.slane %v2915_v16, %v2927_v3 }
 0xc6d   :  { %v2844_v49 = vpop.xlane.xlu0 %2843 }
 0xc6e   :  { %9841 = vrsqrt.f32 %v2851_v47  ;;  %v2848_v59 = vmul.f32 0.0078125, %v2844_v49  ;;  %v2924_v47 = vrot.slane %v2915_v16, %v11158_v24  ;;  %v2932_v49 = vrot.slane %v2915_v16, %v2931_v37 }
 0xc70   :  { %v2852_v10 = vadd.f32 1e-05, %v2848_v59 }
 0xc72   :  { %9843 = vrsqrt.f32 %v2852_v10 }
 0xc74   :  { %v9838_v1 = vpop.eup %9837 }
 0xc75   :  { %v2857_v26 = vmul.f32 %v9838_v1, %v11345_v2  ;;  %v9578_v2 = vld [vmem:[#allocation17] sm:$0xff]  }
 0xc76   :  { %v9840_v28 = vpop.eup %9839 }
 0xc77   :  { %v2858_v46 = vmul.f32 %v9840_v28, %v11347_v36  ;;  %v2867_v51 = vmul.f32 %v7804_v7, %v2857_v26  ;;  %v9581_v36 = vld [vmem:[#allocation17 + $0xc8] sm:$0xff]  }
 0xc78   :  { %v9842_v48 = vpop.eup %9841 }
 0xc79   :  { %v2868_v11 = vmul.f32 %v7804_v7, %v2858_v46  ;;  %v11364_v21 = vadd.f32 %v7805_v52, %v2867_v51  ;;  %v2859_v56 = vmul.f32 %v9842_v48, %v11351_v54  ;;  %v9582_v54 = vld [vmem:[#allocation17 + $0x8] sm:$0xff]  }
 0xc7b   :  { %v11366_v19 = vadd.f32 %v7805_v52, %v2868_v11  ;;  %v2869_v44 = vmul.f32 %v7804_v7, %v2859_v56 }
 0xc7c   :  { %v9844_v39 = vpop.eup %9843 }
 0xc7d   :  { %v2881_v57 = vpack.c.bf16 %v11366_v19, %v11364_v21  ;;  %v2860_v58 = vmul.f32 %v9844_v39, %v11357_v12  ;;  %v9584_v12 = vld [vmem:[#allocation17 + $0x50] sm:$0xff]   ;;  %v11376_v63 = vadd.f32 %v7805_v52, %v2869_v44 }
 0xc7f   :  { %3130 = vmatmul.mubr.bf16.vlgmr.msra.gmra.mrb[60].mxu1 %v2881_v57  ;;  %3183 = vmatmul.mubr.bf16.vlgmr.msra.gmra.mrb[52].mxu0 %v2881_v57  ;;  %v2870_v50 = vmul.f32 %v7804_v7, %v2860_v58 }
 0xc80   :  { %3139 = vmatprep.mubr.bf16.mxu1 %v10538_v0  ;;  %3192 = vmatprep.mubr.bf16.mxu0 %v10538_v0  ;;  %v9588_v0 = vld [vmem:[#allocation17 + $0x58] sm:$0xff]  }
 0xc81   :  { %v11374_v53 = vadd.f32 %v7805_v52, %v2870_v50  ;;  %8292 = vmatpush3.bf16.msra.mxu1 %v9578_v2  ;;  %8320 = vmatpush3.bf16.msra.mxu0 %v9579_v45 }
 0xc82   :  { %8293 = vmatprep.subr.bf16.mxu1 %v9580_v15  ;;  %8321 = vmatprep.subr.bf16.mxu0 %v9581_v36 }
 0xc83   :  { %v2882_v60 = vpack.c.bf16 %v11374_v53, %v11376_v63 }
 0xc85   :  { %8294 = vmatpush3.bf16.msra.mxu1 %v9582_v54  ;;  %8322 = vmatpush3.bf16.msra.mxu0 %v9583_v55 }
 0xc86   :  { %8295 = vmatprep.subr.bf16.mxu1 %v9584_v12  ;;  %8323 = vmatprep.subr.bf16.mxu0 %v9585_v62 }
 0xc87   :  { %3140 = vmatmul.mubr.bf16.gmra.mrb[64].mxu1 %v2882_v60  ;;  %3193 = vmatmul.mubr.bf16.gmra.mrb[56].mxu0 %v2882_v60 }
 0xc89   :  { %8296 = vmatpush3.bf16.msra.mxu1 %v9586_v17  ;;  %8324 = vmatpush3.bf16.msra.mxu0 %v9587_v4 }
 0xc8a   :  { %8297 = vmatprep.subr.bf16.mxu1 %v9588_v0  ;;  %8325 = vmatprep.subr.bf16.mxu0 %v9589_v5 }
 0xc8d   :  { %8298 = vmatpush3.bf16.msra.mxu1 %v9590_v8  ;;  %8326 = vmatpush3.bf16.msra.mxu0 %v9591_v30 }
 0xc8e   :  { %8299 = vmatprep.subr.bf16.mxu1 %v9592_v31  ;;  %8327 = vmatprep.subr.bf16.mxu0 %v9593_v9 }
 0xc91   :  { %8300 = vmatpush3.bf16.msra.mxu1 %v9594_v18  ;;  %8328 = vmatpush3.bf16.msra.mxu0 %v9595_v20 }
 0xc92   :  { %8301 = vmatprep.subr.bf16.mxu1 %v9596_v22  ;;  %8329 = vmatprep.subr.bf16.mxu0 %v9597_v25 }
 0xc95   :  { %8302 = vmatpush3.bf16.msra.mxu1 %v9598_v6  ;;  %8330 = vmatpush3.bf16.msra.mxu0 %v9599_v29 }
 0xc96   :  { %8303 = vmatprep.subr.bf16.mxu1 %v9600_v32  ;;  %8331 = vmatprep.subr.bf16.mxu0 %v9601_v61 }
 0xc99   :  { %8304 = vmatpush3.bf16.msra.mxu1 %v9602_v23  ;;  %8332 = vmatpush3.bf16.msra.mxu0 %v9603_v33 }
 0xc9a   :  { %8305 = vmatprep.subr.bf16.mxu1 %v9604_v42  ;;  %8333 = vmatprep.subr.bf16.mxu0 %v9605_v27 }
 0xc9d   :  { %8306 = vmatpush3.bf16.msra.mxu1 %v9606_v34  ;;  %8334 = vmatpush3.bf16.msra.mxu0 %v9607_v35 }
 0xc9e   :  { %8752 = vmatprep.subr.bf16.mxu1 %v10540_v41  ;;  %8772 = vmatprep.subr.bf16.mxu0 %v10540_v41 }
 0xd52   :  { %v3131_v59 = vpop.f32.mrb[60].mxu1  ;;  %v3184_v10 = vpop.f32.mrb[52].mxu0 }
 0xd53   :  { %v3132_v1 = vadd.f32 %v3131_v59, %v2920_v38  ;;  %v3185_v7 = vadd.f32 %v3184_v10, %v2928_v43  ;;  %v3133_v26 = vpop.f32.mrb[61].mxu1  ;;  %v3186_v28 = vpop.f32.mrb[53].mxu0 }
 0xd54   :  { %v3134_v46 = vadd.f32 %v3133_v26, %v2924_v47  ;;  %v3187_v51 = vadd.f32 %v3186_v28, %v2932_v49  ;;  %v3135_v48 = vpop.f32.mrb[62].mxu1  ;;  %v3188_v52 = vpop.f32.mrb[54].mxu0 }
 0xd55   :  { %v3136_v11 = vadd.f32 %v3135_v48, %v2920_v38  ;;  %v3189_v56 = vadd.f32 %v3188_v52, %v2928_v43  ;;  %v3137_v39 = vpop.f32.mrb[63].mxu1  ;;  %v3190_v13 = vpop.f32.mrb[55].mxu0  ;;  %v3203_v2 = vmax.f32 %v3132_v1, 0.0  ;;  %v3205_v45 = vmax.f32 %v3185_v7, 0.0 }
 0xd56   :  { %v3138_v57 = vadd.f32 %v3137_v39, %v2924_v47  ;;  %v3191_v58 = vadd.f32 %v3190_v13, %v2932_v49  ;;  %v3204_v44 = vmax.f32 %v3134_v46, 0.0  ;;  %v3206_v50 = vmax.f32 %v3187_v51, 0.0 }
 0xd57   :  { %v3207_v15 = vmax.f32 %v3136_v11, 0.0  ;;  %v3209_v36 = vmax.f32 %v3189_v56, 0.0 }
 0xd58   :  { %v3208_v54 = vmax.f32 %v3138_v57, 0.0  ;;  %v3210_v55 = vmax.f32 %v3191_v58, 0.0 }
 0xd59   :  { %v3219_v12 = vpack.c.bf16 %v3207_v15, %v3203_v2  ;;  %v3221_v62 = vpack.c.bf16 %v3209_v36, %v3205_v45 }
 0xd5a   :  { %v3220_v60 = vpack.c.bf16 %v3208_v54, %v3204_v44  ;;  %v3222_v17 = vpack.c.bf16 %v3210_v55, %v3206_v50  ;;  %v3141_v4 = vpop.f32.mrb[64].mxu1  ;;  %v3194_v0 = vpop.f32.mrb[56].mxu0 }
 0xd5b   :  { %v3142_v5 = vadd.f32 %v3141_v4, %v2920_v38  ;;  %v3195_v8 = vadd.f32 %v3194_v0, %v2928_v43  ;;  %v3143_v30 = vpop.f32.mrb[65].mxu1  ;;  %v3196_v31 = vpop.f32.mrb[57].mxu0 }
 0xd5c   :  { %v3144_v9 = vadd.f32 %v3143_v30, %v2924_v47  ;;  %v3197_v18 = vadd.f32 %v3196_v31, %v2932_v49  ;;  %v3145_v20 = vpop.f32.mrb[66].mxu1  ;;  %v3198_v22 = vpop.f32.mrb[58].mxu0  ;;  %3522 = vmatprep.mubr.bf16.mxu1 %v3220_v60  ;;  %3571 = vmatprep.mubr.bf16.mxu0 %v3222_v17 }
 0xd5d   :  { %v3146_v25 = vadd.f32 %v3145_v20, %v2920_v38  ;;  %v3199_v6 = vadd.f32 %v3198_v22, %v2928_v43  ;;  %v3147_v29 = vpop.f32.mrb[67].mxu1  ;;  %v3200_v32 = vpop.f32.mrb[59].mxu0  ;;  %3523 = vmatmul.mubr.bf16.vlgmr.msra.gmra.mrb[68].mxu1 %v3219_v12  ;;  %3572 = vmatmul.mubr.bf16.vlgmr.msra.gmra.mrb[60].mxu0 %v3221_v62  ;;  %v3211_v33 = vmax.f32 %v3142_v5, 0.0  ;;  %v3213_v42 = vmax.f32 %v3195_v8, 0.0 }
 0xd5e   :  { %v3148_v61 = vadd.f32 %v3147_v29, %v2924_v47  ;;  %v3201_v23 = vadd.f32 %v3200_v32, %v2932_v49  ;;  %v3212_v35 = vmax.f32 %v3144_v9, 0.0  ;;  %v3214_v3 = vmax.f32 %v3197_v18, 0.0  ;;  %v7838_v47 = vld [vmem:[#allocation19] ss:$0 sm:$0xff] }
 0xd5f   :  { %v3215_v27 = vmax.f32 %v3146_v25, 0.0  ;;  %v3217_v34 = vmax.f32 %v3199_v6, 0.0 }
 0xd60   :  { %v3216_v16 = vmax.f32 %v3148_v61, 0.0  ;;  %v3218_v37 = vmax.f32 %v3201_v23, 0.0  ;;  %v9608_v23 = vld [vmem:[#allocation20 + $0x40] sm:$0xff]  }
 0xd61   :  { %v3223_v59 = vpack.c.bf16 %v3215_v27, %v3211_v33  ;;  %v3225_v10 = vpack.c.bf16 %v3217_v34, %v3213_v42  ;;  %8753 = vmatpush3.bf16.msra.mxu1 %v9608_v23  ;;  %v9609_v33 = vld [vmem:[#allocation20] sm:$0xff]   ;;  %v9610_v42 = vld [vmem:[#allocation20 + $0x48] sm:$0xff]   ;;  %v9612_v27 = vld [vmem:[#allocation20 + $0x50] sm:$0xff]  }
 0xd62   :  { %v3224_v1 = vpack.c.bf16 %v3216_v16, %v3212_v35  ;;  %v3226_v7 = vpack.c.bf16 %v3218_v37, %v3214_v3  ;;  %8754 = vmatprep.subr.bf16.mxu1 %v10540_v41  ;;  %8773 = vmatpush3.bf16.msra.mxu0 %v9609_v33  ;;  %v9614_v34 = vld [vmem:[#allocation20 + $0x58] sm:$0xff]   ;;  %v9616_v3 = vld [vmem:[#allocation20 + $0x60] sm:$0xff]   ;;  %v9618_v37 = vld [vmem:[#allocation20 + $0x68] sm:$0xff]  }
 0xd63   :  { %8774 = vmatprep.subr.bf16.mxu0 %v10540_v41  ;;  %v9615_v35 = vld [vmem:[#allocation20 + $0x18] sm:$0xff]   ;;  %v9617_v16 = vld [vmem:[#allocation20 + $0x20] sm:$0xff]   ;;  %v9628_v33 = vld [vmem:[#allocation20 + $0x90] sm:$0xff]  }
 0xd64   :  { %3530 = vmatprep.mubr.bf16.mxu1 %v3224_v1  ;;  %3579 = vmatprep.mubr.bf16.mxu0 %v3226_v7  ;;  %v9621_v1 = vld [vmem:[#allocation20 + $0x30] sm:$0xff]   ;;  %v9622_v7 = vld [vmem:[#allocation20 + $0x78] sm:$0xff]  }
 0xd65   :  { %3531 = vmatmul.mubr.bf16.gmra.mrb[72].mxu1 %v3223_v59  ;;  %3580 = vmatmul.mubr.bf16.gmra.mrb[64].mxu0 %v3225_v10  ;;  %v9619_v59 = vld [vmem:[#allocation20 + $0x28] sm:$0xff]   ;;  %v9620_v10 = vld [vmem:[#allocation20 + $0x70] sm:$0xff]   ;;  %v5445_v23 = vld [vmem:[%s12057_s13 + $0x8] sm:$0xff] }
 0xd66   :  { %8768 = vmatprep.mubr.msk.bf16.mxu1 %vm10541_vm0, %v10540_v41  ;;  %8788 = vmatprep.mubr.msk.bf16.mxu0 %vm10541_vm0, %v10540_v41 }
 0xd67   :  { %8755 = vmatpush3.bf16.msra.mxu1 %v9610_v42  ;;  %v9629_v42 = vld [vmem:[#allocation20 + $0xd0] sm:$0xff]  }
 0xd68   :  { %8756 = vmatprep.subr.bf16.mxu1 %v10540_v41 }
 0xd6b   :  { %8757 = vmatpush3.bf16.msra.mxu1 %v9612_v27  ;;  %v9631_v27 = vld [vmem:[#allocation20 + $0xd8] sm:$0xff]  }
 0xd6c   :  { %8758 = vmatprep.subr.bf16.mxu1 %v10540_v41 }
 0xd6f   :  { %8759 = vmatpush3.bf16.msra.mxu1 %v9614_v34  ;;  %v9633_v34 = vld [vmem:[#allocation20 + $0xe0] sm:$0xff]  }
 0xd70   :  { %8760 = vmatprep.subr.bf16.mxu1 %v10540_v41 }
 0xd73   :  { %8761 = vmatpush3.bf16.msra.mxu1 %v9616_v3  ;;  %v9635_v3 = vld [vmem:[#allocation20 + $0xe8] sm:$0xff]  }
 0xd74   :  { %8762 = vmatprep.subr.bf16.mxu1 %v10540_v41 }
 0xd77   :  { %8763 = vmatpush3.bf16.msra.mxu1 %v9618_v37  ;;  %v9637_v37 = vld [vmem:[#allocation20 + $0xf0] sm:$0xff]  }
 0xd78   :  { %8764 = vmatprep.subr.bf16.mxu1 %v10540_v41 }
 0xd7b   :  { %8765 = vmatpush3.bf16.msra.mxu1 %v9620_v10  ;;  %v9638_v10 = vld [vmem:[#allocation20 + $0xb8] sm:$0xff]  }
 0xd7c   :  { %8766 = vmatprep.subr.bf16.mxu1 %v10540_v41 }
 0xd7f   :  { %8767 = vmatpush3.bf16.msra.mxu1 %v9622_v7 }
 0xd80   :  { %8792 = vmatprep.subr.bf16.mxu1 %v10540_v41 }
 0xe30   :  { %v8307_v38 = vpop.f32.mrb[68].mxu1  ;;  %v8335_v43 = vpop.f32.mrb[60].mxu0 }
 0xe31   :  { %v8308_v49 = vpop.f32.mrb[69].mxu1  ;;  %v8336_v26 = vpop.f32.mrb[61].mxu0 }
 0xe32   :  { %v8309_v28 = vadd.f32 %v8308_v49, %v8307_v38  ;;  %v8337_v46 = vadd.f32 %v8336_v26, %v8335_v43  ;;  %v8310_v51 = vpop.f32.mrb[70].mxu1  ;;  %v8338_v48 = vpop.f32.mrb[62].mxu0  ;;  %v9623_v38 = vld [vmem:[#allocation20 + $0x38] sm:$0xff]  }
 0xe33   :  { %v8311_v52 = vpop.f32.mrb[71].mxu1  ;;  %v8339_v11 = vpop.f32.mrb[63].mxu0 }
 0xe34   :  { %v3525_v56 = vadd.f32 %v8309_v28, %v7838_v47  ;;  %v8312_v39 = vadd.f32 %v8311_v52, %v8310_v51  ;;  %v8340_v13 = vadd.f32 %v8339_v11, %v8338_v48 }
 0xe36   :  { %v3574_v57 = vadd.f32 %v8337_v46, %v3525_v56  ;;  %v3528_v58 = vadd.f32 %v8312_v39, %v7838_v47 }
 0xe38   :  { %v3577_v2 = vadd.f32 %v8340_v13, %v3528_v58  ;;  %v8313_v45 = vpop.f32.mrb[72].mxu1  ;;  %v8341_v15 = vpop.f32.mrb[64].mxu0  ;;  %v3588_v36 = vadd.f32 %v3574_v57, %v11364_v21 }
 0xe39   :  { %v8314_v44 = vpop.f32.mrb[73].mxu1  ;;  %v8342_v50 = vpop.f32.mrb[65].mxu0 }
 0xe3a   :  { %v8315_v54 = vadd.f32 %v8314_v44, %v8313_v45  ;;  %v8343_v55 = vadd.f32 %v8342_v50, %v8341_v15  ;;  %v8316_v12 = vpop.f32.mrb[74].mxu1  ;;  %v8344_v62 = vpop.f32.mrb[66].mxu0  ;;  %3594 = vadd.xlane.f32.xlu1 %v3588_v36 }
 0xe3b   :  { %v8317_v60 = vpop.f32.mrb[75].mxu1  ;;  %v8345_v17 = vpop.f32.mrb[67].mxu0 }
 0xe3c   :  { %v3533_v4 = vadd.f32 %v8315_v54, %v7838_v47  ;;  %v8318_v0 = vadd.f32 %v8317_v60, %v8316_v12  ;;  %v8346_v5 = vadd.f32 %v8345_v17, %v8344_v62 }
 0xe3e   :  { %v3582_v8 = vadd.f32 %v8343_v55, %v3533_v4  ;;  %v3536_v30 = vadd.f32 %v8318_v0, %v7838_v47  ;;  %v5444_v55 = vld [vmem:[%s12057_s13] sm:$0xff]  ;;  %v9624_v4 = vld [vmem:[#allocation20 + $0x80] sm:$0xff]  }
 0xe40   :  { %v3585_v31 = vadd.f32 %v8346_v5, %v3536_v30  ;;  %v3590_v9 = vadd.f32 %v3582_v8, %v11376_v63  ;;  %v11402_v63 = vadd.f32 %v3577_v2, %v11366_v19  ;;  %v9613_v19 = vld [vmem:[#allocation20 + $0x10] sm:$0xff]  }
 0xe41   :  { %v11429_v2 = vld [vmem:[#allocation11] ss:$0 sm:$0xff] }
 0xe42   :  { %3598 = vadd.xlane.f32.xlu0 %v3590_v9  ;;  %v3591_v29 = vadd.f32 %v3585_v31, %v11374_v53  ;;  %v9611_v53 = vld [vmem:[#allocation20 + $0x8] sm:$0xff]  }
 0xe43   :  { %8775 = vmatpush3.bf16.msra.mxu0 %v9611_v53  ;;  %v9630_v53 = vld [vmem:[#allocation20 + $0x98] sm:$0xff]  }
 0xe44   :  { %8776 = vmatprep.subr.bf16.mxu0 %v10540_v41 }
 0xe47   :  { %8777 = vmatpush3.bf16.msra.mxu0 %v9613_v19  ;;  %v9632_v19 = vld [vmem:[#allocation20 + $0xa0] sm:$0xff]  }
 0xe48   :  { %8778 = vmatprep.subr.bf16.mxu0 %v10540_v41 }
 0xe4b   :  { %8779 = vmatpush3.bf16.msra.mxu0 %v9615_v35  ;;  %v9634_v35 = vld [vmem:[#allocation20 + $0xa8] sm:$0xff]  }
 0xe4c   :  { %8780 = vmatprep.subr.bf16.mxu0 %v10540_v41 }
 0xe4f   :  { %8781 = vmatpush3.bf16.msra.mxu0 %v9617_v16  ;;  %v9636_v16 = vld [vmem:[#allocation20 + $0xb0] sm:$0xff]  }
 0xe50   :  { %8782 = vmatprep.subr.bf16.mxu0 %v10540_v41 }
 0xe53   :  { %8783 = vmatpush3.bf16.msra.mxu0 %v9619_v59 }
 0xe54   :  { %8784 = vmatprep.subr.bf16.mxu0 %v10540_v41 }
 0xe57   :  { %8785 = vmatpush3.bf16.msra.mxu0 %v9621_v1 }
 0xe58   :  { %8786 = vmatprep.subr.bf16.mxu0 %v10540_v41 }
 0xe5b   :  { %8787 = vmatpush3.bf16.msra.mxu0 %v9623_v38  ;;  %v9639_v38 = vld [vmem:[#allocation20 + $0xf8] sm:$0xff]  }
 0xe5c   :  { %8812 = vmatprep.subr.bf16.mxu0 %v10540_v41 }
 0xec7   :  { %v3595_v18 = vpop.xlane.xlu1 %3594 }
 0xec8   :  { %v3602_v21 = vmul.f32 0.0078125, %v3595_v18 }
 0xeca   :  { %v11392_v20 = vsub.f32 %v3588_v36, %v3602_v21  ;;  %v11434_v36 = vld [vmem:[#allocation13] ss:$0 sm:$0xff] }
 0xecc   :  { %v3610_v22 = vmul.f32 %v11392_v20, %v11392_v20 }
 0xece   :  { %3614 = vadd.xlane.f32.xlu1 %v3610_v22 }
 0xecf   :  { %v3599_v25 = vpop.xlane.xlu0 %3598 }
 0xed0   :  { %v3604_v6 = vmul.f32 0.0078125, %v3599_v25 }
 0xed2   :  { %v11397_v32 = vsub.f32 %v3590_v9, %v3604_v6  ;;  %3600 = vadd.xlane.f32.xlu1 %v3591_v29  ;;  %v9625_v9 = vld [vmem:[#allocation20 + $0xc0] sm:$0xff]   ;;  %v9626_v6 = vld [vmem:[#allocation20 + $0x88] sm:$0xff]  }
 0xed4   :  { %v3612_v61 = vmul.f32 %v11397_v32, %v11397_v32 }
 0xed6   :  { %3618 = vadd.xlane.f32.xlu0 %v3612_v61 }
 0xeda   :  { %3596 = vadd.xlane.f32.xlu0 %v11402_v63 }
 0xf5b   :  { %v3615_v43 = vpop.xlane.xlu1 %3614 }
 0xf5c   :  { %v3622_v47 = vmul.f32 0.0078125, %v3615_v43 }
 0xf5e   :  { %v3626_v49 = vadd.f32 1e-05, %v3622_v47 }
 0xf5f   :  { %v3601_v26 = vpop.xlane.xlu1 %3600 }
 0xf60   :  { %9845 = vrsqrt.f32 %v3626_v49  ;;  %v3605_v28 = vmul.f32 0.0078125, %v3601_v26  ;;  %v9640_v49 = vld [vmem:[#allocation20 + $0x100] sm:$0xff]  }
 0xf62   :  { %v11421_v46 = vsub.f32 %v3591_v29, %v3605_v28 }
 0xf63   :  { %v3619_v51 = vpop.xlane.xlu0 %3618 }
 0xf64   :  { %v3624_v48 = vmul.f32 0.0078125, %v3619_v51  ;;  %v3613_v52 = vmul.f32 %v11421_v46, %v11421_v46  ;;  %v9641_v51 = vld [vmem:[#allocation20 + $0x140] sm:$0xff]  }
 0xf66   :  { %v3628_v11 = vadd.f32 1e-05, %v3624_v48  ;;  %3620 = vadd.xlane.f32.xlu1 %v3613_v52  ;;  %v9642_v52 = vld [vmem:[#allocation20 + $0x108] sm:$0xff]  }
 0xf67   :  { %v3597_v56 = vpop.xlane.xlu0 %3596 }
 0xf68   :  { %9847 = vrsqrt.f32 %v3628_v11  ;;  %v3603_v39 = vmul.f32 0.0078125, %v3597_v56  ;;  %v9643_v11 = vld [vmem:[#allocation20 + $0x148] sm:$0xff]   ;;  %v9644_v56 = vld [vmem:[#allocation20 + $0x110] sm:$0xff]  }
 0xf6a   :  { %v9846_v13 = vpop.eup %9845  ;;  %v11426_v57 = vsub.f32 %v11402_v63, %v3603_v39  ;;  %v9627_v63 = vld [vmem:[#allocation20 + $0xc8] sm:$0xff]   ;;  %v9645_v39 = vld [vmem:[#allocation20 + $0x150] sm:$0xff]  }
 0xf6b   :  { %v3634_v58 = vmul.f32 %v9846_v13, %v11392_v20  ;;  %v9646_v13 = vld [vmem:[#allocation20 + $0x118] sm:$0xff]  }
 0xf6c   :  { %v3611_v45 = vmul.f32 %v11426_v57, %v11426_v57 }
 0xf6d   :  { %v3644_v15 = vmul.f32 %v11429_v2, %v3634_v58  ;;  %v9647_v58 = vld [vmem:[#allocation20 + $0x158] sm:$0xff]  }
 0xf6e   :  { %3616 = vadd.xlane.f32.xlu0 %v3611_v45  ;;  %v9648_v45 = vld [vmem:[#allocation20 + $0x120] sm:$0xff]  }
 0xf6f   :  { %v11437_v50 = vadd.f32 %v11434_v36, %v3644_v15  ;;  %v9649_v15 = vld [vmem:[#allocation20 + $0x160] sm:$0xff]  }
 0xf71   :  { %v3681_v60 = vrot.slane %v11437_v50, 1  ;;  %v4214_v18 = vrot.slane %v11437_v50, 5  ;;  %v4326_v21 = vrot.slane %v11437_v50, 6  ;;  %v4438_v25 = vrot.slane %v11437_v50, 7 }
 0xf72   :  { %v9848_v44 = vpop.eup %9847  ;;  %v3878_v1 = vrot.slane %v11437_v50, 2  ;;  %v3990_v47 = vrot.slane %v11437_v50, 3 }
 0xf73   :  { %v3636_v54 = vmul.f32 %v9848_v44, %v11397_v32  ;;  %v9650_v44 = vld [vmem:[#allocation20 + $0x128] sm:$0xff]  }
 0xf75   :  { %v3646_v12 = vmul.f32 %v11429_v2, %v3636_v54  ;;  %v9651_v54 = vld [vmem:[#allocation20 + $0x168] sm:$0xff]  }
 0xf77   :  { %v11443_v62 = vadd.f32 %v11434_v36, %v3646_v12  ;;  %5447 = vperm.xlu1 %9386, %v5444_v55   ;;  %v9652_v55 = vld [vmem:[#allocation20 + $0x130] sm:$0xff]  }
 0xf78   :  { %v9653_v12 = vld [vmem:[#allocation20 + $0x170] sm:$0xff]  }
 0xf79   :  { %v3683_v17 = vsel %vm3661_vm5, %v3681_v60, %v11443_v62  ;;  %v3659_v0 = vrot.slane %v11443_v62, 7  ;;  %v4216_v8 = vrot.slane %v11443_v62, 4  ;;  %v4328_v30 = vrot.slane %v11443_v62, 5 }
 0xf7a   :  { %v3684_v5 = vpack.c.bf16 %v3683_v17, %v3683_v17  ;;  %v4440_v20 = vrot.slane %v11443_v62, 6  ;;  %v3880_v59 = vrot.slane %v11443_v62, 1  ;;  %v3992_v7 = vrot.slane %v11443_v62, 2  ;;  %v9654_v17 = vld [vmem:[#allocation20 + $0x138] sm:$0xff]  }
 0xf7b   :  { %v3662_v31 = vsel %vm3661_vm5, %v11437_v50, %v3659_v0  ;;  %v11460_v29 = vsel %vm3661_vm5, %v4214_v18, %v4216_v8  ;;  %v11463_v32 = vsel %vm3661_vm5, %v4326_v21, %v4328_v30  ;;  %v4104_v60 = vrot.slane %v11443_v62, 3  ;;  %v9655_v0 = vld [vmem:[#allocation20 + $0x178] sm:$0xff]   ;;  %v9656_v8 = vld [vmem:[#allocation20 + $0x180] sm:$0xff]   ;;  %v9660_v18 = vld [vmem:[#allocation20 + $0x190] sm:$0xff]  }
 0xf7c   :  { %8769 = vmatmul.mubr.bf16.vlgmr.msra.gmra.mrb[76].mxu1 %v3684_v5  ;;  %v3663_v22 = vpack.c.bf16 %v3662_v31, %v3662_v31  ;;  %v11467_v61 = vsel %vm3661_vm5, %v4438_v25, %v4440_v20  ;;  %v3882_v43 = vsel %vm3661_vm5, %v3878_v1, %v3880_v59  ;;  %v3994_v26 = vsel %vm3661_vm5, %v3990_v47, %v3992_v7  ;;  %v9657_v62 = vld [vmem:[#allocation20 + $0x1c0] sm:$0xff]   ;;  %v9661_v21 = vld [vmem:[#allocation20 + $0x1d0] sm:$0xff]   ;;  %v9662_v20 = vld [vmem:[#allocation20 + $0x198] sm:$0xff]  }
 0xf7d   :  { %8793 = vmatpush3.bf16.msra.mxu1 %v9624_v4  ;;  %8808 = vmatprep.mubr.msk.bf16.mxu1 %vm10541_vm0, %v10540_v41  ;;  %v3883_v28 = vpack.c.bf16 %v3882_v43, %v3882_v43  ;;  %v3995_v48 = vpack.c.bf16 %v3994_v26, %v3994_v26  ;;  %v4102_v4 = vrot.slane %v11437_v50, 4  ;;  %v4219_v31 = vpack.c.bf16 %v11460_v29, %v11460_v29  ;;  %v9658_v50 = vld [vmem:[#allocation20 + $0x188] sm:$0xff]   ;;  %v9664_v25 = vld [vmem:[#allocation20 + $0x1a0] sm:$0xff]   ;;  %v9679_v59 = vld [vmem:[#allocation20 + $0x258] sm:$0xff]  }
 0xf7e   :  { %8789 = vmatmul.mubr.bf16.vlgmr.msra.gmra.mrb[68].mxu0 %v3663_v22  ;;  %8794 = vmatprep.subr.bf16.mxu1 %v10540_v41  ;;  %v9663_v22 = vld [vmem:[#allocation20 + $0x1d8] sm:$0xff]   ;;  %v9666_v29 = vld [vmem:[#allocation20 + $0x1a8] sm:$0xff]   ;;  %v9681_v1 = vld [vmem:[#allocation20 + $0x260] sm:$0xff]  }
 0xf7f   :  { %8813 = vmatpush3.bf16.msra.mxu0 %v9625_v9  ;;  %8828 = vmatprep.mubr.msk.bf16.mxu0 %vm10541_vm0, %v10540_v41  ;;  %v4106_v5 = vsel %vm3661_vm5, %v4102_v4, %v4104_v60  ;;  %v9659_v9 = vld [vmem:[#allocation20 + $0x1c8] sm:$0xff]   ;;  %v9684_v43 = vld [vmem:[#allocation20 + $0x230] sm:$0xff]  }
 0xf80   :  { %8814 = vmatprep.subr.bf16.mxu0 %v10540_v41  ;;  %v4107_v30 = vpack.c.bf16 %v4106_v5, %v4106_v5  ;;  %v9682_v7 = vld [vmem:[#allocation20 + $0x228] sm:$0xff]  }
 0xf81   :  { %8795 = vmatpush3.bf16.msra.mxu1 %v9626_v6  ;;  %v9665_v6 = vld [vmem:[#allocation20 + $0x1e0] sm:$0xff]  }
 0xf82   :  { %8796 = vmatprep.subr.bf16.mxu1 %v10540_v41 }
 0xf83   :  { %8815 = vmatpush3.bf16.msra.mxu0 %v9627_v63  ;;  %v9667_v63 = vld [vmem:[#allocation20 + $0x1e8] sm:$0xff]  }
 0xf84   :  { %5450 = vperm.xlu0 %9385, %v5445_v23   ;;  %8816 = vmatprep.subr.bf16.mxu0 %v10540_v41  ;;  %v9668_v23 = vld [vmem:[#allocation20 + $0x1b0] sm:$0xff]  }
 0xf85   :  { %8797 = vmatpush3.bf16.msra.mxu1 %v9628_v33  ;;  %v9669_v33 = vld [vmem:[#allocation20 + $0x1f0] sm:$0xff]  }
 0xf86   :  { %8798 = vmatprep.subr.bf16.mxu1 %v10540_v41 }
 0xf87   :  { %8817 = vmatpush3.bf16.msra.mxu0 %v9629_v42  ;;  %v9670_v42 = vld [vmem:[#allocation20 + $0x1b8] sm:$0xff]  }
 0xf88   :  { %8818 = vmatprep.subr.bf16.mxu0 %v10540_v41 }
 0xf89   :  { %8799 = vmatpush3.bf16.msra.mxu1 %v9630_v53  ;;  %v9671_v53 = vld [vmem:[#allocation20 + $0x1f8] sm:$0xff]  }
 0xf8a   :  { %8800 = vmatprep.subr.bf16.mxu1 %v10540_v41 }
 0xf8b   :  { %8819 = vmatpush3.bf16.msra.mxu0 %v9631_v27  ;;  %v9672_v27 = vld [vmem:[#allocation20 + $0x200] sm:$0xff]  }
 0xf8c   :  { %8820 = vmatprep.subr.bf16.mxu0 %v10540_v41 }
 0xf8d   :  { %8801 = vmatpush3.bf16.msra.mxu1 %v9632_v19  ;;  %v4331_v19 = vpack.c.bf16 %v11463_v32, %v11463_v32  ;;  %v9675_v32 = vld [vmem:[#allocation20 + $0x248] sm:$0xff]  }
 0xf8e   :  { %8802 = vmatprep.subr.bf16.mxu1 %v10540_v41 }
 0xf8f   :  { %8821 = vmatpush3.bf16.msra.mxu0 %v9633_v34  ;;  %v9673_v34 = vld [vmem:[#allocation20 + $0x240] sm:$0xff]  }
 0xf90   :  { %8822 = vmatprep.subr.bf16.mxu0 %v10540_v41 }
 0xf91   :  { %8803 = vmatpush3.bf16.msra.mxu1 %v9634_v35  ;;  %v4443_v35 = vpack.c.bf16 %v11467_v61, %v11467_v61  ;;  %v9677_v61 = vld [vmem:[#allocation20 + $0x250] sm:$0xff]  }
 0xf92   :  { %8804 = vmatprep.subr.bf16.mxu1 %v10540_v41 }
 0xf93   :  { %8823 = vmatpush3.bf16.msra.mxu0 %v9635_v3  ;;  %v9674_v3 = vld [vmem:[#allocation20 + $0x208] sm:$0xff]  }
 0xf94   :  { %8824 = vmatprep.subr.bf16.mxu0 %v10540_v41 }
 0xf95   :  { %8805 = vmatpush3.bf16.msra.mxu1 %v9636_v16  ;;  %v9676_v16 = vld [vmem:[#allocation20 + $0x210] sm:$0xff]  }
 0xf96   :  { %8806 = vmatprep.subr.bf16.mxu1 %v10540_v41 }
 0xf97   :  { %8825 = vmatpush3.bf16.msra.mxu0 %v9637_v37  ;;  %v9678_v37 = vld [vmem:[#allocation20 + $0x218] sm:$0xff]  }
 0xf98   :  { %8826 = vmatprep.subr.bf16.mxu0 %v10540_v41 }
 0xf99   :  { %8807 = vmatpush3.bf16.msra.mxu1 %v9638_v10  ;;  %v9680_v10 = vld [vmem:[#allocation20 + $0x220] sm:$0xff]  }
 0xf9a   :  { %8832 = vmatprep.subr.bf16.mxu1 %v10540_v41 }
 0xf9b   :  { %8827 = vmatpush3.bf16.msra.mxu0 %v9639_v38  ;;  %v9683_v38 = vld [vmem:[#allocation20 + $0x268] sm:$0xff]  }
 0xf9c   :  { %8809 = vmatmul.mubr.bf16.vlgmr.msra.gmra.mrb[80].mxu1 %v3883_v28  ;;  %8852 = vmatprep.subr.bf16.mxu0 %v10540_v41  ;;  %v9686_v28 = vld [vmem:[#allocation20 + $0x238] sm:$0xff]  }
 0xf9d   :  { %8833 = vmatpush3.bf16.msra.mxu1 %v9640_v49  ;;  %8848 = vmatprep.mubr.msk.bf16.mxu1 %vm10541_vm0, %v10540_v41  ;;  %v9685_v49 = vld [vmem:[#allocation20 + $0x270] sm:$0xff]  }
 0xf9e   :  { %8829 = vmatmul.mubr.bf16.vlgmr.msra.gmra.mrb[72].mxu0 %v3995_v48  ;;  %8834 = vmatprep.subr.bf16.mxu1 %v10540_v41  ;;  %v9687_v48 = vld [vmem:[#allocation20 + $0x278] sm:$0xff]  }
 0xf9f   :  { %8853 = vmatpush3.bf16.msra.mxu0 %v9641_v51  ;;  %8868 = vmatprep.mubr.msk.bf16.mxu0 %vm10541_vm0, %v10540_v41 }
 0xfa0   :  { %8854 = vmatprep.subr.bf16.mxu0 %v10540_v41 }
 0xfa1   :  { %8835 = vmatpush3.bf16.msra.mxu1 %v9642_v52 }
 0xfa2   :  { %8836 = vmatprep.subr.bf16.mxu1 %v10540_v41 }
 0xfa3   :  { %8855 = vmatpush3.bf16.msra.mxu0 %v9643_v11 }
 0xfa4   :  { %8856 = vmatprep.subr.bf16.mxu0 %v10540_v41 }
 0xfa5   :  { %8837 = vmatpush3.bf16.msra.mxu1 %v9644_v56 }
 0xfa6   :  { %8838 = vmatprep.subr.bf16.mxu1 %v10540_v41 }
 0xfa7   :  { %8857 = vmatpush3.bf16.msra.mxu0 %v9645_v39 }
 0xfa8   :  { %8858 = vmatprep.subr.bf16.mxu0 %v10540_v41 }
 0xfa9   :  { %8839 = vmatpush3.bf16.msra.mxu1 %v9646_v13 }
 0xfaa   :  { %8840 = vmatprep.subr.bf16.mxu1 %v10540_v41 }
 0xfab   :  { %8859 = vmatpush3.bf16.msra.mxu0 %v9647_v58 }
 0xfac   :  { %8860 = vmatprep.subr.bf16.mxu0 %v10540_v41 }
 0xfad   :  { %8841 = vmatpush3.bf16.msra.mxu1 %v9648_v45 }
 0xfae   :  { %8842 = vmatprep.subr.bf16.mxu1 %v10540_v41 }
 0xfaf   :  { %8861 = vmatpush3.bf16.msra.mxu0 %v9649_v15 }
 0xfb0   :  { %8862 = vmatprep.subr.bf16.mxu0 %v10540_v41 }
 0xfb1   :  { %8843 = vmatpush3.bf16.msra.mxu1 %v9650_v44 }
 0xfb2   :  { %8844 = vmatprep.subr.bf16.mxu1 %v10540_v41 }
 0xfb3   :  { %8863 = vmatpush3.bf16.msra.mxu0 %v9651_v54 }
 0xfb4   :  { %8864 = vmatprep.subr.bf16.mxu0 %v10540_v41 }
 0xfb5   :  { %8845 = vmatpush3.bf16.msra.mxu1 %v9652_v55 }
 0xfb6   :  { %8846 = vmatprep.subr.bf16.mxu1 %v10540_v41 }
 0xfb7   :  { %8865 = vmatpush3.bf16.msra.mxu0 %v9653_v12 }
 0xfb8   :  { %8866 = vmatprep.subr.bf16.mxu0 %v10540_v41 }
 0xfb9   :  { %8847 = vmatpush3.bf16.msra.mxu1 %v9654_v17  ;;  %v9688_v17 = vld [vmem:[#allocation20 + $0x280] sm:$0xff]  }
 0xfba   :  { %8872 = vmatprep.subr.bf16.mxu1 %v10540_v41 }
 0xfbb   :  { %8867 = vmatpush3.bf16.msra.mxu0 %v9655_v0 }
 0xfbc   :  { %8849 = vmatmul.mubr.bf16.vlgmr.msra.gmra.mrb[84].mxu1 %v4107_v30  ;;  %8892 = vmatprep.subr.bf16.mxu0 %v10540_v41 }
 0xfbd   :  { %8873 = vmatpush3.bf16.msra.mxu1 %v9656_v8  ;;  %8888 = vmatprep.mubr.msk.bf16.mxu1 %vm10541_vm0, %v10540_v41 }
 0xfbe   :  { %8869 = vmatmul.mubr.bf16.vlgmr.msra.gmra.mrb[76].mxu0 %v4219_v31  ;;  %8874 = vmatprep.subr.bf16.mxu1 %v10540_v41 }
 0xfbf   :  { %8893 = vmatpush3.bf16.msra.mxu0 %v9657_v62  ;;  %8908 = vmatprep.mubr.msk.bf16.mxu0 %vm10541_vm0, %v10540_v41 }
 0xfc0   :  { %8894 = vmatprep.subr.bf16.mxu0 %v10540_v41 }
 0xfc1   :  { %8875 = vmatpush3.bf16.msra.mxu1 %v9658_v50  ;;  %v9690_v50 = vld [vmem:[#allocation20 + $0x288] sm:$0xff]  }
 0xfc2   :  { %8876 = vmatprep.subr.bf16.mxu1 %v10540_v41 }
 0xfc3   :  { %8895 = vmatpush3.bf16.msra.mxu0 %v9659_v9 }
 0xfc4   :  { %8896 = vmatprep.subr.bf16.mxu0 %v10540_v41 }
 0xfc5   :  { %8877 = vmatpush3.bf16.msra.mxu1 %v9660_v18 }
 0xfc6   :  { %8878 = vmatprep.subr.bf16.mxu1 %v10540_v41 }
 0xfc7   :  { %8897 = vmatpush3.bf16.msra.mxu0 %v9661_v21 }
 0xfc8   :  { %8898 = vmatprep.subr.bf16.mxu0 %v10540_v41 }
 0xfc9   :  { %8879 = vmatpush3.bf16.msra.mxu1 %v9662_v20  ;;  %v9691_v20 = vld [vmem:[#allocation20 + $0x2c8] sm:$0xff]  }
 0xfca   :  { %8880 = vmatprep.subr.bf16.mxu1 %v10540_v41 }
 0xfcb   :  { %8899 = vmatpush3.bf16.msra.mxu0 %v9663_v22  ;;  %v9692_v22 = vld [vmem:[#allocation20 + $0x290] sm:$0xff]  }
 0xfcc   :  { %8900 = vmatprep.subr.bf16.mxu0 %v10540_v41 }
 0xfcd   :  { %8881 = vmatpush3.bf16.msra.mxu1 %v9664_v25  ;;  %v9693_v25 = vld [vmem:[#allocation20 + $0x2d0] sm:$0xff]  }
 0xfce   :  { %8882 = vmatprep.subr.bf16.mxu1 %v10540_v41 }
 0xfcf   :  { %8901 = vmatpush3.bf16.msra.mxu0 %v9665_v6  ;;  %v9694_v6 = vld [vmem:[#allocation20 + $0x298] sm:$0xff]  }
 0xfd0   :  { %8902 = vmatprep.subr.bf16.mxu0 %v10540_v41 }
 0xfd1   :  { %8883 = vmatpush3.bf16.msra.mxu1 %v9666_v29  ;;  %v9695_v29 = vld [vmem:[#allocation20 + $0x2d8] sm:$0xff]  }
 0xfd2   :  { %8884 = vmatprep.subr.bf16.mxu1 %v10540_v41 }
 0xfd3   :  { %8903 = vmatpush3.bf16.msra.mxu0 %v9667_v63  ;;  %v9696_v63 = vld [vmem:[#allocation20 + $0x2a0] sm:$0xff]  }
 0xfd4   :  { %8904 = vmatprep.subr.bf16.mxu0 %v10540_v41 }
 0xfd5   :  { %8885 = vmatpush3.bf16.msra.mxu1 %v9668_v23  ;;  %v9697_v23 = vld [vmem:[#allocation20 + $0x2e0] sm:$0xff]  }
 0xfd6   :  { %8886 = vmatprep.subr.bf16.mxu1 %v10540_v41 }
 0xfd7   :  { %8905 = vmatpush3.bf16.msra.mxu0 %v9669_v33  ;;  %v9698_v33 = vld [vmem:[#allocation20 + $0x2a8] sm:$0xff]  }
 0xfd8   :  { %8906 = vmatprep.subr.bf16.mxu0 %v10540_v41 }
 0xfd9   :  { %8887 = vmatpush3.bf16.msra.mxu1 %v9670_v42  ;;  %v9699_v42 = vld [vmem:[#allocation20 + $0x2e8] sm:$0xff]  }
 0xfda   :  { %8912 = vmatprep.subr.bf16.mxu1 %v10540_v41 }
 0xfdb   :  { %8907 = vmatpush3.bf16.msra.mxu0 %v9671_v53  ;;  %v9700_v53 = vld [vmem:[#allocation20 + $0x2b0] sm:$0xff]  }
 0xfdc   :  { %8889 = vmatmul.mubr.bf16.vlgmr.msra.gmra.mrb[88].mxu1 %v4331_v19  ;;  %8932 = vmatprep.subr.bf16.mxu0 %v10540_v41 }
 0xfdd   :  { %8913 = vmatpush3.bf16.msra.mxu1 %v9672_v27  ;;  %8928 = vmatprep.mubr.msk.bf16.mxu1 %vm10541_vm0, %v10540_v41  ;;  %v9701_v27 = vld [vmem:[#allocation20 + $0x2f0] sm:$0xff]  }
 0xfde   :  { %8909 = vmatmul.mubr.bf16.vlgmr.msra.gmra.mrb[80].mxu0 %v4443_v35  ;;  %8914 = vmatprep.subr.bf16.mxu1 %v10540_v41 }
 0xfdf   :  { %8933 = vmatpush3.bf16.msra.mxu0 %v9673_v34  ;;  %8948 = vmatprep.mubr.msk.bf16.mxu0 %vm10541_vm0, %v10540_v41  ;;  %v9702_v34 = vld [vmem:[#allocation20 + $0x2b8] sm:$0xff]  }
 0xfe0   :  { %8934 = vmatprep.subr.bf16.mxu0 %v10540_v41 }
 0xfe1   :  { %8915 = vmatpush3.bf16.msra.mxu1 %v9674_v3 }
 0xfe2   :  { %8916 = vmatprep.subr.bf16.mxu1 %v10540_v41 }
 0xfe3   :  { %8935 = vmatpush3.bf16.msra.mxu0 %v9675_v32  ;;  %v9703_v32 = vld [vmem:[#allocation20 + $0x2f8] sm:$0xff]  }
 0xfe4   :  { %8936 = vmatprep.subr.bf16.mxu0 %v10540_v41 }
 0xfe5   :  { %8917 = vmatpush3.bf16.msra.mxu1 %v9676_v16 }
 0xfe6   :  { %8918 = vmatprep.subr.bf16.mxu1 %v10540_v41 }
 0xfe7   :  { %8937 = vmatpush3.bf16.msra.mxu0 %v9677_v61 }
 0xfe8   :  { %8938 = vmatprep.subr.bf16.mxu0 %v10540_v41 }
 0xfe9   :  { %8919 = vmatpush3.bf16.msra.mxu1 %v9678_v37  ;;  %v9704_v37 = vld [vmem:[#allocation20 + $0x300] sm:$0xff]  }
 0xfea   :  { %8920 = vmatprep.subr.bf16.mxu1 %v10540_v41 }
 0xfeb   :  { %8939 = vmatpush3.bf16.msra.mxu0 %v9679_v59 }
 0xfec   :  { %8940 = vmatprep.subr.bf16.mxu0 %v10540_v41 }
 0xfed   :  { %8921 = vmatpush3.bf16.msra.mxu1 %v9680_v10 }
 0xfee   :  { %8922 = vmatprep.subr.bf16.mxu1 %v10540_v41 }
 0xfef   :  { %8941 = vmatpush3.bf16.msra.mxu0 %v9681_v1  ;;  %v9705_v1 = vld [vmem:[#allocation20 + $0x340] sm:$0xff]  }
 0xff0   :  { %8942 = vmatprep.subr.bf16.mxu0 %v10540_v41 }
 0xff1   :  { %8923 = vmatpush3.bf16.msra.mxu1 %v9682_v7 }
 0xff2   :  { %8924 = vmatprep.subr.bf16.mxu1 %v10540_v41 }
 0xff3   :  { %v3621_v47 = vpop.xlane.xlu1 %3620  ;;  %8943 = vmatpush3.bf16.msra.mxu0 %v9683_v38  ;;  %v9706_v38 = vld [vmem:[#allocation20 + $0x308] sm:$0xff]  }
 0xff4   :  { %v3625_v26 = vmul.f32 0.0078125, %v3621_v47  ;;  %8944 = vmatprep.subr.bf16.mxu0 %v10540_v41  ;;  %v9708_v47 = vld [vmem:[#allocation20 + $0x310] sm:$0xff]  }
 0xff5   :  { %8925 = vmatpush3.bf16.msra.mxu1 %v9684_v43  ;;  %v9707_v43 = vld [vmem:[#allocation20 + $0x348] sm:$0xff]  }
 0xff6   :  { %v3629_v51 = vadd.f32 1e-05, %v3625_v26  ;;  %8926 = vmatprep.subr.bf16.mxu1 %v10540_v41  ;;  %v9710_v26 = vld [vmem:[#allocation20 + $0x318] sm:$0xff]  }
 0xff7   :  { %8945 = vmatpush3.bf16.msra.mxu0 %v9685_v49  ;;  %v9709_v49 = vld [vmem:[#allocation20 + $0x350] sm:$0xff]  }
 0xff8   :  { %9849 = vrsqrt.f32 %v3629_v51  ;;  %8946 = vmatprep.subr.bf16.mxu0 %v10540_v41  ;;  %v9712_v51 = vld [vmem:[#allocation20 + $0x320] sm:$0xff]  }
 0xff9   :  { %8927 = vmatpush3.bf16.msra.mxu1 %v9686_v28  ;;  %v9711_v28 = vld [vmem:[#allocation20 + $0x358] sm:$0xff]  }
 0xffa   :  { %8952 = vmatprep.subr.bf16.mxu1 %v10540_v41 }
 0xffb   :  { %v3617_v52 = vpop.xlane.xlu0 %3616  ;;  %8947 = vmatpush3.bf16.msra.mxu0 %v9687_v48  ;;  %v9713_v48 = vld [vmem:[#allocation20 + $0x360] sm:$0xff]  }
 0xffc   :  { %v3623_v11 = vmul.f32 0.0078125, %v3617_v52  ;;  %8972 = vmatprep.subr.bf16.mxu0 %v10540_v41  ;;  %v9714_v52 = vld [vmem:[#allocation20 + $0x328] sm:$0xff]  }
 0xffe   :  { %v3627_v56 = vadd.f32 1e-05, %v3623_v11  ;;  %v9715_v11 = vld [vmem:[#allocation20 + $0x368] sm:$0xff]  }
0x1000   :  { %9851 = vrsqrt.f32 %v3627_v56  ;;  %v9716_v56 = vld [vmem:[#allocation20 + $0x330] sm:$0xff]  }
0x1002   :  { %v9850_v39 = vpop.eup %9849 }
0x1003   :  { %v3637_v13 = vmul.f32 %v9850_v39, %v11421_v46  ;;  %v9717_v39 = vld [vmem:[#allocation20 + $0x370] sm:$0xff]  }
0x1005   :  { %v3647_v58 = vmul.f32 %v11429_v2, %v3637_v13 }
0x1007   :  { %v11565_v15 = vadd.f32 %v11434_v36, %v3647_v58  ;;  %v9718_v58 = vld [vmem:[#allocation20 + $0x338] sm:$0xff]  }
0x1009   :  { %v4551_v12 = vrot.slane %v11565_v15, 7  ;;  %v5222_v8 = vrot.slane %v11565_v15, 5  ;;  %v5334_v31 = vrot.slane %v11565_v15, 6  ;;  %v4774_v35 = vrot.slane %v11565_v15, 1 }
0x100a   :  { %v9852_v45 = vpop.eup %9851  ;;  %v4886_v61 = vrot.slane %v11565_v15, 2 }
0x100b   :  { %v3635_v44 = vmul.f32 %v9852_v45, %v11426_v57  ;;  %v4998_v45 = vrot.slane %v11565_v15, 3 }
0x100d   :  { %v3645_v54 = vmul.f32 %v11429_v2, %v3635_v44  ;;  %v9689_v2 = vld [vmem:[#allocation20 + $0x2c0] sm:$0xff]  }
0x100f   :  { %v11570_v55 = vadd.f32 %v11434_v36, %v3645_v54  ;;  %v5110_v36 = vrot.slane %v11565_v15, 4  ;;  %v9719_v54 = vld [vmem:[#allocation20 + $0x378] sm:$0xff]  }
0x1011   :  { %v4553_v60 = vsel %vm3661_vm5, %v11570_v55, %v4551_v12  ;;  %v4662_v46 = vrot.slane %v11570_v55, 1  ;;  %v5108_v0 = vrot.slane %v11570_v55, 5  ;;  %v5220_v5 = vrot.slane %v11570_v55, 6 }
0x1012   :  { %v4554_v4 = vpack.c.bf16 %v4553_v60, %v4553_v60  ;;  %v5332_v30 = vrot.slane %v11570_v55, 7  ;;  %v4772_v19 = vrot.slane %v11570_v55, 2  ;;  %v4884_v3 = vrot.slane %v11570_v55, 3 }
0x1013   :  { %v4664_v57 = vsel %vm3661_vm5, %v4662_v46, %v11565_v15  ;;  %v11587_v9 = vsel %vm3661_vm5, %v5108_v0, %v5110_v36  ;;  %v11590_v18 = vsel %vm3661_vm5, %v5220_v5, %v5222_v8  ;;  %v4996_v13 = vrot.slane %v11570_v55, 4  ;;  %v9720_v55 = vld [vmem:[#allocation20 + $0x380] sm:$0xff]  }
0x1014   :  { %8929 = vmatmul.mubr.bf16.vlgmr.msra.gmra.mrb[92].mxu1 %v4554_v4  ;;  %v4665_v62 = vpack.c.bf16 %v4664_v57, %v4664_v57  ;;  %v11594_v21 = vsel %vm3661_vm5, %v5332_v30, %v5334_v31  ;;  %v4776_v16 = vsel %vm3661_vm5, %v4772_v19, %v4774_v35  ;;  %v4888_v59 = vsel %vm3661_vm5, %v4884_v3, %v4886_v61  ;;  %v9722_v30 = vld [vmem:[#allocation20 + $0x388] sm:$0xff]   ;;  %v9724_v31 = vld [vmem:[#allocation20 + $0x390] sm:$0xff]   ;;  %v5451_v19 = vpop.permute.xlu0 %5450 }
0x1015   :  { %8953 = vmatpush3.bf16.msra.mxu1 %v9688_v17  ;;  %8968 = vmatprep.mubr.msk.bf16.mxu1 %vm10541_vm0, %v10540_v41  ;;  %v4777_v10 = vpack.c.bf16 %v4776_v16, %v4776_v16  ;;  %v4889_v7 = vpack.c.bf16 %v4888_v59, %v4888_v59  ;;  %v5000_v12 = vsel %vm3661_vm5, %v4996_v13, %v4998_v45 }
0x1016   :  { %8949 = vmatmul.mubr.bf16.vlgmr.msra.gmra.mrb[84].mxu0 %v4665_v62  ;;  %8954 = vmatprep.subr.bf16.mxu1 %v10540_v41  ;;  %v5001_v57 = vpack.c.bf16 %v5000_v12, %v5000_v12  ;;  %v5113_v8 = vpack.c.bf16 %v11587_v9, %v11587_v9  ;;  %v9723_v62 = vld [vmem:[#allocation20 + $0x3c8] sm:$0xff]   ;;  %v9726_v9 = vld [vmem:[#allocation20 + $0x398] sm:$0xff]   ;;  %v5225_v59 = vpack.c.bf16 %v11590_v18, %v11590_v18 }
0x1017   :  { %8973 = vmatpush3.bf16.msra.mxu0 %v9689_v2  ;;  %8988 = vmatprep.mubr.msk.bf16.mxu0 %vm10541_vm0, %v10540_v41  ;;  %v9721_v2 = vld [vmem:[#allocation20 + $0x3c0] sm:$0xff]   ;;  %vm5453_vm7 = vcmp.eq.s32.totalorder %v10928_v40, %v5451_v19 }
0x1018   :  { %8974 = vmatprep.subr.bf16.mxu0 %v10540_v41  ;;  %v8002_v18 = vsel %vm5453_vm7, 1.0, %v10540_v41 }
0x1019   :  { %8955 = vmatpush3.bf16.msra.mxu1 %v9690_v50  ;;  %v9725_v50 = vld [vmem:[#allocation20 + $0x3d0] sm:$0xff]  }
0x101a   :  { %8956 = vmatprep.subr.bf16.mxu1 %v10540_v41 }
0x101b   :  { %8975 = vmatpush3.bf16.msra.mxu0 %v9691_v20  ;;  %v9727_v20 = vld [vmem:[#allocation20 + $0x3d8] sm:$0xff]  }
0x101c   :  { %8976 = vmatprep.subr.bf16.mxu0 %v10540_v41 }
0x101d   :  { %8957 = vmatpush3.bf16.msra.mxu1 %v9692_v22  ;;  %v9728_v22 = vld [vmem:[#allocation20 + $0x3a0] sm:$0xff]  }
0x101e   :  { %8958 = vmatprep.subr.bf16.mxu1 %v10540_v41 }
0x101f   :  { %8977 = vmatpush3.bf16.msra.mxu0 %v9693_v25  ;;  %v9729_v25 = vld [vmem:[#allocation20 + $0x3e0] sm:$0xff]  }
0x1020   :  { %8978 = vmatprep.subr.bf16.mxu0 %v10540_v41 }
0x1021   :  { %8959 = vmatpush3.bf16.msra.mxu1 %v9694_v6  ;;  %v9730_v6 = vld [vmem:[#allocation20 + $0x3a8] sm:$0xff]  }
0x1022   :  { %8960 = vmatprep.subr.bf16.mxu1 %v10540_v41 }
0x1023   :  { %8979 = vmatpush3.bf16.msra.mxu0 %v9695_v29  ;;  %v9731_v29 = vld [vmem:[#allocation20 + $0x3e8] sm:$0xff]  }
0x1024   :  { %8980 = vmatprep.subr.bf16.mxu0 %v10540_v41 }
0x1025   :  { %8961 = vmatpush3.bf16.msra.mxu1 %v9696_v63  ;;  %v9732_v63 = vld [vmem:[#allocation20 + $0x3b0] sm:$0xff]  }
0x1026   :  { %8962 = vmatprep.subr.bf16.mxu1 %v10540_v41 }
0x1027   :  { %8981 = vmatpush3.bf16.msra.mxu0 %v9697_v23  ;;  %v9733_v23 = vld [vmem:[#allocation20 + $0x3f0] sm:$0xff]  }
0x1028   :  { %8982 = vmatprep.subr.bf16.mxu0 %v10540_v41 }
0x1029   :  { %8963 = vmatpush3.bf16.msra.mxu1 %v9698_v33  ;;  %v9734_v33 = vld [vmem:[#allocation20 + $0x3b8] sm:$0xff]  }
0x102a   :  { %8964 = vmatprep.subr.bf16.mxu1 %v10540_v41 }
0x102b   :  { %8983 = vmatpush3.bf16.msra.mxu0 %v9699_v42  ;;  %v9736_v42 = vld [vmem:[#allocation22] sm:$0x7f]  }
0x102c   :  { %8984 = vmatprep.subr.bf16.mxu0 %v10540_v41 }
0x102d   :  { %8965 = vmatpush3.bf16.msra.mxu1 %v9700_v53 }
0x102e   :  { %8966 = vmatprep.subr.bf16.mxu1 %v10540_v41 }
0x102f   :  { %8985 = vmatpush3.bf16.msra.mxu0 %v9701_v27  ;;  %v9735_v27 = vld [vmem:[#allocation20 + $0x3f8] sm:$0xff]  }
0x1030   :  { %8986 = vmatprep.subr.bf16.mxu0 %v10540_v41 }
0x1031   :  { %8967 = vmatpush3.bf16.msra.mxu1 %v9702_v34 }
0x1032   :  { %8992 = vmatprep.subr.bf16.mxu1 %v10540_v41 }
0x1033   :  { %8987 = vmatpush3.bf16.msra.mxu0 %v9703_v32 }
0x1034   :  { %8969 = vmatmul.mubr.bf16.vlgmr.msra.gmra.mrb[96].mxu1 %v4777_v10  ;;  %9012 = vmatprep.subr.bf16.mxu0 %v10540_v41  ;;  %v5473_v10 = vsel %vm5471_vm6, %v9736_v42, 0 }
0x1035   :  { %8993 = vmatpush3.bf16.msra.mxu1 %v9704_v37  ;;  %9008 = vmatprep.mubr.msk.bf16.mxu1 %vm10541_vm0, %v10540_v41 }
0x1036   :  { %8989 = vmatmul.mubr.bf16.vlgmr.msra.gmra.mrb[88].mxu0 %v4889_v7  ;;  %8994 = vmatprep.subr.bf16.mxu1 %v10540_v41 }
0x1037   :  { %9013 = vmatpush3.bf16.msra.mxu0 %v9705_v1  ;;  %9028 = vmatprep.mubr.msk.bf16.mxu0 %vm10541_vm0, %v10540_v41  ;;  %v5448_v1 = vpop.permute.xlu1 %5447 }
0x1038   :  { %9014 = vmatprep.subr.bf16.mxu0 %v10540_v41  ;;  %vm5452_vm8 = vcmp.eq.s32.totalorder %v10928_v40, %v5448_v1 }
0x1039   :  { %8995 = vmatpush3.bf16.msra.mxu1 %v9706_v38 }
0x103a   :  { %8996 = vmatprep.subr.bf16.mxu1 %v10540_v41 }
0x103b   :  { %9015 = vmatpush3.bf16.msra.mxu0 %v9707_v43  ;;  %v5337_v43 = vpack.c.bf16 %v11594_v21, %v11594_v21 }
0x103c   :  { %9016 = vmatprep.subr.bf16.mxu0 %v10540_v41 }
0x103d   :  { %8997 = vmatpush3.bf16.msra.mxu1 %v9708_v47  ;;  %v8001_v47 = vsel %vm5452_vm8, 1.0, %v10540_v41 }
0x103e   :  { %8998 = vmatprep.subr.bf16.mxu1 %v10540_v41  ;;  %v5458_v21 = vpack.c.bf16 %v8002_v18, %v8001_v47 }
0x103f   :  { %9017 = vmatpush3.bf16.msra.mxu0 %v9709_v49 }
0x1040   :  { %9018 = vmatprep.subr.bf16.mxu0 %v10540_v41 }
0x1041   :  { %8999 = vmatpush3.bf16.msra.mxu1 %v9710_v26 }
0x1042   :  { %9000 = vmatprep.subr.bf16.mxu1 %v10540_v41 }
0x1043   :  { %9019 = vmatpush3.bf16.msra.mxu0 %v9711_v28 }
0x1044   :  { %9020 = vmatprep.subr.bf16.mxu0 %v10540_v41 }
0x1045   :  { %9001 = vmatpush3.bf16.msra.mxu1 %v9712_v51 }
0x1046   :  { %9002 = vmatprep.subr.bf16.mxu1 %v10540_v41 }
0x1047   :  { %9021 = vmatpush3.bf16.msra.mxu0 %v9713_v48 }
0x1048   :  { %9022 = vmatprep.subr.bf16.mxu0 %v10540_v41 }
0x1049   :  { %9003 = vmatpush3.bf16.msra.mxu1 %v9714_v52 }
0x104a   :  { %9004 = vmatprep.subr.bf16.mxu1 %v10540_v41 }
0x104b   :  { %9023 = vmatpush3.bf16.msra.mxu0 %v9715_v11 }
0x104c   :  { %9024 = vmatprep.subr.bf16.mxu0 %v10540_v41 }
0x104d   :  { %9005 = vmatpush3.bf16.msra.mxu1 %v9716_v56 }
0x104e   :  { %9006 = vmatprep.subr.bf16.mxu1 %v10540_v41 }
0x104f   :  { %9025 = vmatpush3.bf16.msra.mxu0 %v9717_v39  ;;  %v3784_v44 = vpop.f32.mrb[76].mxu1 }
0x1050   :  { %v8770_v60 = vpop.f32.mrb[77].mxu1  ;;  %9026 = vmatprep.subr.bf16.mxu0 %v10540_v41 }
0x1051   :  { %9007 = vmatpush3.bf16.msra.mxu1 %v9718_v58  ;;  %v3787_v17 = vpop.f32.mrb[78].mxu1  ;;  %v3872_v46 = vpop.f32.mrb[68].mxu0 }
0x1052   :  { %v3873_v4 = vadd.f32 %v3872_v46, %v3784_v44  ;;  %v8771_v0 = vpop.f32.mrb[79].mxu1  ;;  %v8790_v5 = vpop.f32.mrb[69].mxu0  ;;  %9032 = vmatprep.subr.bf16.mxu1 %v10540_v41 }
0x1053   :  { %9027 = vmatpush3.bf16.msra.mxu0 %v9719_v54  ;;  %v3875_v15 = vpop.f32.mrb[70].mxu0  ;;  %v9738_v0 = vld [vmem:[%s12058_s30 + $0x8] sm:$0xff]  }
0x1054   :  { %9009 = vmatmul.mubr.bf16.vlgmr.msra.gmra.mrb[100].mxu1 %v5001_v57  ;;  %v8791_v36 = vpop.f32.mrb[71].mxu0  ;;  %9052 = vmatprep.subr.bf16.mxu0 %v10540_v41 }
0x1055   :  { %9033 = vmatpush3.bf16.msra.mxu1 %v9720_v55  ;;  %9048 = vmatprep.mubr.msk.bf16.mxu1 %vm10541_vm0, %v10540_v41 }
0x1056   :  { %9029 = vmatmul.mubr.bf16.vlgmr.msra.gmra.mrb[92].mxu0 %v5113_v8  ;;  %9034 = vmatprep.subr.bf16.mxu1 %v10540_v41 }
0x1057   :  { %9053 = vmatpush3.bf16.msra.mxu0 %v9721_v2  ;;  %9068 = vmatprep.mubr.msk.bf16.mxu0 %vm10541_vm0, %v10540_v41 }
0x1058   :  { %9054 = vmatprep.subr.bf16.mxu0 %v10540_v41 }
0x1059   :  { %9035 = vmatpush3.bf16.msra.mxu1 %v9722_v30 }
0x105a   :  { %9036 = vmatprep.subr.bf16.mxu1 %v10540_v41 }
0x105b   :  { %9055 = vmatpush3.bf16.msra.mxu0 %v9723_v62 }
0x105c   :  { %9056 = vmatprep.subr.bf16.mxu0 %v10540_v41 }
0x105d   :  { %9037 = vmatpush3.bf16.msra.mxu1 %v9724_v31 }
0x105e   :  { %9038 = vmatprep.subr.bf16.mxu1 %v10540_v41 }
0x105f   :  { %9057 = vmatpush3.bf16.msra.mxu0 %v9725_v50 }
0x1060   :  { %9058 = vmatprep.subr.bf16.mxu0 %v10540_v41 }
0x1061   :  { %9039 = vmatpush3.bf16.msra.mxu1 %v9726_v9 }
0x1062   :  { %9040 = vmatprep.subr.bf16.mxu1 %v10540_v41 }
0x1063   :  { %9059 = vmatpush3.bf16.msra.mxu0 %v9727_v20 }
0x1064   :  { %9060 = vmatprep.subr.bf16.mxu0 %v10540_v41 }
0x1065   :  { %9041 = vmatpush3.bf16.msra.mxu1 %v9728_v22 }
0x1066   :  { %9042 = vmatprep.subr.bf16.mxu1 %v10540_v41 }
0x1067   :  { %9061 = vmatpush3.bf16.msra.mxu0 %v9729_v25 }
0x1068   :  { %9062 = vmatprep.subr.bf16.mxu0 %v10540_v41 }
0x1069   :  { %9043 = vmatpush3.bf16.msra.mxu1 %v9730_v6 }
0x106a   :  { %9044 = vmatprep.subr.bf16.mxu1 %v10540_v41 }
0x106b   :  { %9063 = vmatpush3.bf16.msra.mxu0 %v9731_v29 }
0x106c   :  { %9064 = vmatprep.subr.bf16.mxu0 %v10540_v41 }
0x106d   :  { %9045 = vmatpush3.bf16.msra.mxu1 %v9732_v63 }
0x106e   :  { %9046 = vmatprep.subr.bf16.mxu1 %v10540_v41 }
0x106f   :  { %v3983_v53 = vpop.f32.mrb[80].mxu1  ;;  %9065 = vmatpush3.bf16.msra.mxu0 %v9733_v23 }
0x1070   :  { %v3989_v34 = vadd.f32 %v3983_v53, %v3873_v4  ;;  %v8810_v35 = vpop.f32.mrb[81].mxu1  ;;  %9066 = vmatprep.subr.bf16.mxu0 %v10540_v41  ;;  %v9737_v4 = vld [vmem:[%s12058_s30] sm:$0xff]  }
0x1071   :  { %v3986_v3 = vpop.f32.mrb[82].mxu1  ;;  %v4095_v32 = vpop.f32.mrb[72].mxu0  ;;  %9047 = vmatpush3.bf16.msra.mxu1 %v9734_v33 }
0x1072   :  { %v4101_v16 = vadd.f32 %v4095_v32, %v3989_v34  ;;  %v8811_v61 = vpop.f32.mrb[83].mxu1  ;;  %v8830_v37 = vpop.f32.mrb[73].mxu0  ;;  %9072 = vmatprep.subr.bf16.mxu1 %v10540_v41 }
0x1073   :  { %v4098_v7 = vpop.f32.mrb[74].mxu0  ;;  %9067 = vmatpush3.bf16.msra.mxu0 %v9735_v27 }
0x1074   :  { %v8831_v38 = vpop.f32.mrb[75].mxu0  ;;  %9049 = vmatmul.mubr.bf16.vlgmr.msra.gmra.mrb[104].mxu1 %v5225_v59  ;;  %9102 = vmatprep.subr.bf16.mxu0 %v10540_v41 }
0x1075   :  { %9073 = vmatpush3.bf16.msra.mxu1 %v5473_v10  ;;  %9074 = vmatprep.mubr.msk.bf16.mxu1 %vm10541_vm0, %v10540_v41 }
0x1076   :  { %9069 = vmatmul.mubr.bf16.vlgmr.msra.gmra.mrb[96].mxu0 %v5337_v43  ;;  %9078 = vmatprep.subr.bf16.mxu1 %v10540_v41 }
0x1077   :  { %9104 = vmatprep.mubr.msk.bf16.mxu0 %vm10541_vm0, %v10540_v41 }
0x107c   :  { %9075 = vmatmul.mubr.msk.bf16.vlgmr.msra.gmra.mrb[108].mxu1 %vm5467_vm9, %v5458_v21 }
0x107d   :  { %9082 = vmatprep.mubr.msk.bf16.mxu1 %vm10541_vm0, %v10540_v41  ;;  %9079 = vmatpush3.bf16.msra.mxu1 %v9737_v4 }
0x107e   :  { %9080 = vmatprep.subr.bf16.mxu1 %v10540_v41 }
0x1081   :  { %9081 = vmatpush3.bf16.msra.mxu1 %v9738_v0 }
0x1082   :  { %9086 = vmatprep.subr.bf16.mxu1 %v10540_v41 }
0x108f   :  { %v4207_v49 = vpop.f32.mrb[84].mxu1 }
0x1090   :  { %v4213_v26 = vadd.f32 %v4207_v49, %v4101_v16  ;;  %v8850_v28 = vpop.f32.mrb[85].mxu1 }
0x1091   :  { %v4210_v40 = vpop.f32.mrb[86].mxu1  ;;  %v4319_v51 = vpop.f32.mrb[76].mxu0 }
0x1092   :  { %v4325_v48 = vadd.f32 %v4319_v51, %v4213_v26  ;;  %v8851_v52 = vpop.f32.mrb[87].mxu1  ;;  %v8870_v11 = vpop.f32.mrb[77].mxu0  ;;  %v5461_v26 = vld [vmem:[#allocation23] sm:$0xff] }
0x1093   :  { %v4322_v56 = vpop.f32.mrb[78].mxu0 }
0x1094   :  { %v8871_v39 = vpop.f32.mrb[79].mxu0  ;;  %v9739_v56 = vld [vmem:[%s12059_s28] sm:$0xff]  }
0x10af   :  { %v4431_v13 = vpop.f32.mrb[88].mxu1 }
0x10b0   :  { %v4437_v58 = vadd.f32 %v4431_v13, %v4325_v48  ;;  %v8890_v45 = vpop.f32.mrb[89].mxu1  ;;  %v9740_v13 = vld [vmem:[%s12059_s28 + $0x8] sm:$0xff]  }
0x10b1   :  { %v4434_v44 = vpop.f32.mrb[90].mxu1  ;;  %v4543_v54 = vpop.f32.mrb[80].mxu0  ;;  %v9742_v45 = vld [vmem:[%s12060_s17 + $0x8] sm:$0xff]  }
0x10b2   :  { %v4549_v12 = vadd.f32 %v4543_v54, %v4437_v58  ;;  %v8891_v60 = vpop.f32.mrb[91].mxu1  ;;  %v8910_v17 = vpop.f32.mrb[81].mxu0  ;;  %v9741_v58 = vld [vmem:[%s12060_s17] sm:$0xff]  }
0x10b3   :  { %v4546_v46 = vpop.f32.mrb[82].mxu0 }
0x10b4   :  { %v8911_v55 = vpop.f32.mrb[83].mxu0 }
0x10e7   :  { %v4654_v5 = vpop.f32.mrb[92].mxu1 }
0x10e8   :  { %v4660_v57 = vadd.f32 %v4654_v5, %v4549_v12  ;;  %v8930_v15 = vpop.f32.mrb[93].mxu1 }
0x10e9   :  { %v4657_v2 = vpop.f32.mrb[94].mxu1  ;;  %v4765_v36 = vpop.f32.mrb[84].mxu0 }
0x10ea   :  { %v4771_v8 = vadd.f32 %v4765_v36, %v4660_v57  ;;  %v8931_v30 = vpop.f32.mrb[95].mxu1  ;;  %v8950_v62 = vpop.f32.mrb[85].mxu0 }
0x10eb   :  { %v4768_v31 = vpop.f32.mrb[86].mxu0 }
0x10ec   :  { %v8951_v50 = vpop.f32.mrb[87].mxu0 }
0x1107   :  { %v4877_v9 = vpop.f32.mrb[96].mxu1 }
0x1108   :  { %v4883_v20 = vadd.f32 %v4877_v9, %v4771_v8  ;;  %v8970_v22 = vpop.f32.mrb[97].mxu1 }
0x1109   :  { %v4880_v25 = vpop.f32.mrb[98].mxu1  ;;  %v4989_v6 = vpop.f32.mrb[88].mxu0 }
0x110a   :  { %v4995_v29 = vadd.f32 %v4989_v6, %v4883_v20  ;;  %v8971_v63 = vpop.f32.mrb[99].mxu1  ;;  %v8990_v23 = vpop.f32.mrb[89].mxu0 }
0x110b   :  { %v4992_v33 = vpop.f32.mrb[90].mxu0 }
0x110c   :  { %v8991_v42 = vpop.f32.mrb[91].mxu0 }
0x1127   :  { %v5101_v53 = vpop.f32.mrb[100].mxu1 }
0x1128   :  { %v5107_v27 = vadd.f32 %v5101_v53, %v4995_v29  ;;  %v9010_v19 = vpop.f32.mrb[101].mxu1 }
0x1129   :  { %v5104_v34 = vpop.f32.mrb[102].mxu1  ;;  %v5213_v35 = vpop.f32.mrb[92].mxu0 }
0x112a   :  { %v5219_v3 = vadd.f32 %v5213_v35, %v5107_v27  ;;  %v9011_v32 = vpop.f32.mrb[103].mxu1  ;;  %v9030_v16 = vpop.f32.mrb[93].mxu0 }
0x112b   :  { %v5216_v61 = vpop.f32.mrb[94].mxu0 }
0x112c   :  { %v9031_v37 = vpop.f32.mrb[95].mxu0 }
0x112d   :  { %v5691_v37 = vld [vmem:[%s12061_s11] sm:$0x3] }
0x1147   :  { %v5325_v59 = vpop.f32.mrb[104].mxu1 }
0x1148   :  { %v5331_v10 = vadd.f32 %v5325_v59, %v5219_v3  ;;  %v9050_v1 = vpop.f32.mrb[105].mxu1  ;;  %v5698_v59 = vrot.slane %v5691_v37, %v11080_v14 }
0x1149   :  { %v5328_v7 = vpop.f32.mrb[106].mxu1  ;;  %v5437_v38 = vpop.f32.mrb[96].mxu0 }
0x114a   :  { %v11683_v43 = vadd.f32 %v5437_v38, %v5331_v10  ;;  %v9051_v18 = vpop.f32.mrb[107].mxu1  ;;  %v9070_v47 = vpop.f32.mrb[97].mxu0 }
0x114b   :  { %v5440_v21 = vpop.f32.mrb[98].mxu0 }
0x114c   :  { %v9071_v49 = vpop.f32.mrb[99].mxu0 }
0x114f   :  { %v5509_v28 = vpop.f32.mrb[108].mxu1 }
0x1150   :  { %v9076_v40 = vpop.f32.mrb[109].mxu1  ;;  %v11685_v48 = vadd.f32 %v5509_v28, %v5461_v26 }
0x1151   :  { %v5512_v51 = vpop.f32.mrb[110].mxu1 }
0x1152   :  { %v11687_v52 = vadd.f32 %v5512_v51, %v5461_v26  ;;  %v9077_v11 = vpop.f32.mrb[111].mxu1 }
0x1154   :  { %v5516_v39 = vpack.c.bf16 %v11687_v52, %v11685_v48 }
0x1156   :  { %9083 = vmatmul.mubr.msk.bf16.vlgmr.msra.gmra.mrb[112].mxu1 %vm1657_vm1, %v5516_v39 }
0x1157   :  { %9087 = vmatpush3.bf16.msra.mxu1 %v9739_v56  ;;  %9090 = vmatprep.mubr.msk.bf16.mxu1 %vm10541_vm0, %v10540_v41 }
0x1158   :  { %9088 = vmatprep.subr.bf16.mxu1 %v10540_v41 }
0x115b   :  { %9089 = vmatpush3.bf16.msra.mxu1 %v9740_v13 }
0x115c   :  { %9094 = vmatprep.subr.bf16.mxu1 %v10540_v41 }
0x115e   :  { %9091 = vmatmul.mubr.msk.bf16.vlgmr.msra.gmra.mrb[116].mxu1 %vm1657_vm1, %v5516_v39 }
0x115f   :  { %9095 = vmatpush3.bf16.msra.mxu1 %v9741_v58  ;;  %9098 = vmatprep.mubr.msk.bf16.mxu1 %vm10541_vm0, %v10540_v41 }
0x1160   :  { %9096 = vmatprep.subr.bf16.mxu1 %v10540_v41 }
0x1163   :  { %9097 = vmatpush3.bf16.msra.mxu1 %v9742_v45 }
0x1164   :  { %9108 = vmatprep.subr.bf16.mxu1 %v10540_v41 }
0x1166   :  { %9099 = vmatmul.mubr.msk.bf16.vlgmr.msra.gmra.mrb[120].mxu1 %vm1657_vm1, %v5516_v39 }
0x1167   :  { %9110 = vmatprep.mubr.msk.bf16.mxu1 %vm10541_vm0, %v10540_v41 }
0x1229   :  { %v5570_v44 = vpop.f32.mrb[112].mxu1 }
0x122a   :  { %v9084_v54 = vpop.f32.mrb[113].mxu1  ;;  %v5692_v57 = vpack.c.bf16 %v5570_v44, %v5570_v44 }
0x122b   :  { %v5573_v12 = vpop.f32.mrb[114].mxu1 }
0x122c   :  { %v9085_v60 = vpop.f32.mrb[115].mxu1  ;;  %v6154_v50 = vpack.c.bf16 %v5573_v12, %v5573_v12 }
0x1231   :  { %v5627_v17 = vpop.f32.mrb[116].mxu1 }
0x1232   :  { %v5693_v46 = vpack.c.bf16 %v5627_v17, %v5627_v17  ;;  %v9092_v55 = vpop.f32.mrb[117].mxu1 }
0x1233   :  { %v5630_v4 = vpop.f32.mrb[118].mxu1 }
0x1234   :  { %5920 = vrot.lane.b32.xlu0 %v5693_v46, %s10544_s1  ;;  %5809 = vrot.lane.b32.xlu1 %v5693_v46, %s10545_s10  ;;  %v9093_v0 = vpop.f32.mrb[119].mxu1  ;;  %v5704_v5 = vsel %vm5699_vm10, %v5693_v46, 0  ;;  %v6155_v8 = vpack.c.bf16 %v5630_v4, %v5630_v4 }
0x1235   :  { %9103 = vmatpush3.bf16.xpose.msra.mxu0 %v5704_v5 }
0x1236   :  { %9114 = vmatprep.subr.bf16.mxu0 %v10540_v41  ;;  %v6165_v42 = vsel %vm5699_vm10, %v6155_v8, 0 }
0x1238   :  { %6030 = vrot.lane.b32.xlu0 %v5693_v46, %s10546_s24  ;;  %5806 = vrot.lane.b32.xlu1 %v5692_v57, %s10545_s10  ;;  %v6160_v46 = vrot.slane %v5691_v37, %v11158_v24 }
0x1239   :  { %v5684_v15 = vpop.f32.mrb[120].mxu1 }
0x123a   :  { %v11714_v2 = vpack.c.bf16 %v5684_v15, %v5684_v15  ;;  %v9100_v36 = vpop.f32.mrb[121].mxu1 }
0x123b   :  { %v11716_v30 = vpop.f32.mrb[122].mxu1 }
0x123c   :  { %5918 = vrot.lane.b32.xlu1 %v5692_v57, %s10544_s1  ;;  %9105 = vmatmul.mubr.msk.bf16.vlgmr.msra.gmra.mrb[100].mxu0 %vm5699_vm10, %v5692_v57  ;;  %v9101_v62 = vpop.f32.mrb[123].mxu1  ;;  %v5763_v31 = vsel %vm5761_vm11, %v11714_v2, 0 }
0x123d   :  { %6269 = vrot.lane.b32.xlu0 %v6155_v8, %s10545_s10  ;;  %9109 = vmatpush3.bf16.msra.mxu1 %v5763_v31 }
0x123e   :  { %9116 = vmatprep.mubr.msk.bf16.mxu0 %vm10541_vm0, %v10540_v41  ;;  %9120 = vmatprep.subr.bf16.mxu1 %v10540_v41 }
0x1240   :  { %6028 = vrot.lane.b32.xlu1 %v5692_v57, %s10546_s24 }
0x1241   :  { %6380 = vrot.lane.b32.xlu0 %v6155_v8, %s10544_s1 }
0x1244   :  { %6266 = vrot.lane.b32.xlu1 %v6154_v50, %s10545_s10 }
0x1245   :  { %6490 = vrot.lane.b32.xlu0 %v6155_v8, %s10546_s24 }
0x1248   :  { %6378 = vrot.lane.b32.xlu1 %v6154_v50, %s10544_s1 }
0x124c   :  { %6488 = vrot.lane.b32.xlu1 %v6154_v50, %s10546_s24 }
0x12a6   :  { %v5810_v9 = vpop.permute.xlu1 %5809  ;;  %v5921_v22 = vpop.permute.xlu0 %5920 }
0x12a7   :  { %v5815_v20 = vsel %vm5699_vm10, %v5810_v9, 0  ;;  %v5926_v6 = vsel %vm5699_vm10, %v5921_v22, 0 }
0x12a8   :  { %9115 = vmatpush3.bf16.xpose.msra.mxu0 %v5815_v20 }
0x12a9   :  { %9126 = vmatprep.subr.bf16.mxu0 %v10540_v41 }
0x12aa   :  { %v5807_v25 = vpop.permute.xlu1 %5806  ;;  %v6031_v29 = vpop.permute.xlu0 %6030 }
0x12ab   :  { %v6036_v23 = vsel %vm5699_vm10, %v6031_v29, 0 }
0x12ae   :  { %v5919_v63 = vpop.permute.xlu1 %5918 }
0x12af   :  { %9117 = vmatmul.mubr.msk.bf16.vlgmr.msra.gmra.mrb[104].mxu0 %vm5699_vm10, %v5807_v25  ;;  %v6270_v53 = vpop.permute.xlu0 %6269 }
0x12b0   :  { %9127 = vmatpush3.bf16.xpose.msra.mxu0 %v5926_v6  ;;  %9128 = vmatprep.mubr.msk.bf16.mxu0 %vm10541_vm0, %v10540_v41  ;;  %v6275_v27 = vsel %vm5699_vm10, %v6270_v53, 0 }
0x12b1   :  { %9138 = vmatprep.subr.bf16.mxu0 %v10540_v41 }
0x12b2   :  { %v6029_v33 = vpop.permute.xlu1 %6028 }
0x12b3   :  { %v6381_v19 = vpop.permute.xlu0 %6380 }
0x12b4   :  { %v6386_v35 = vsel %vm5699_vm10, %v6381_v19, 0 }
0x12b6   :  { %v6267_v34 = vpop.permute.xlu1 %6266 }
0x12b7   :  { %9129 = vmatmul.mubr.msk.bf16.vlgmr.msra.gmra.mrb[108].mxu0 %vm5699_vm10, %v5919_v63  ;;  %v6491_v3 = vpop.permute.xlu0 %6490 }
0x12b8   :  { %9139 = vmatpush3.bf16.xpose.msra.mxu0 %v6036_v23  ;;  %9140 = vmatprep.mubr.msk.bf16.mxu0 %vm10541_vm0, %v10540_v41  ;;  %v6496_v16 = vsel %vm5699_vm10, %v6491_v3, 0 }
0x12b9   :  { %9150 = vmatprep.subr.bf16.mxu0 %v10540_v41 }
0x12ba   :  { %v6379_v32 = vpop.permute.xlu1 %6378 }
0x12be   :  { %v6489_v61 = vpop.permute.xlu1 %6488 }
0x12bf   :  { %9141 = vmatmul.mubr.msk.bf16.vlgmr.msra.gmra.mrb[112].mxu0 %vm5699_vm10, %v6029_v33 }
0x12c0   :  { %9151 = vmatpush3.bf16.xpose.msra.mxu0 %v6165_v42  ;;  %9152 = vmatprep.mubr.msk.bf16.mxu0 %vm10541_vm0, %v10540_v41 }
0x12c1   :  { %9162 = vmatprep.subr.bf16.mxu0 %v10540_v41 }
0x12c7   :  { %9153 = vmatmul.mubr.msk.bf16.vlgmr.msra.gmra.mrb[116].mxu0 %vm5699_vm10, %v6154_v50 }
0x12c8   :  { %9163 = vmatpush3.bf16.xpose.msra.mxu0 %v6275_v27  ;;  %9164 = vmatprep.mubr.msk.bf16.mxu0 %vm10541_vm0, %v10540_v41 }
0x12c9   :  { %9174 = vmatprep.subr.bf16.mxu0 %v10540_v41 }
0x12cf   :  { %9165 = vmatmul.mubr.msk.bf16.vlgmr.msra.gmra.mrb[120].mxu0 %vm5699_vm10, %v6267_v34 }
0x12d0   :  { %9175 = vmatpush3.bf16.xpose.msra.mxu0 %v6386_v35  ;;  %9176 = vmatprep.mubr.msk.bf16.mxu0 %vm10541_vm0, %v10540_v41 }
0x12d1   :  { %9186 = vmatprep.subr.bf16.mxu0 %v10540_v41 }
0x12d7   :  { %9177 = vmatmul.mubr.msk.bf16.vlgmr.msra.gmra.mrb[124].mxu0 %vm5699_vm10, %v6379_v32 }
0x12d8   :  { %9187 = vmatpush3.bf16.xpose.msra.mxu0 %v6496_v16  ;;  %9188 = vmatprep.mubr.msk.bf16.mxu0 %vm10541_vm0, %v10540_v41 }
0x12d9   :  { %9198 = vmatprep.subr.bf16.mxu0 %v10540_v41 }
0x12df   :  { %9189 = vmatmul.mubr.msk.bf16.vlgmr.msra.gmra.mrb[128].mxu0 %vm5699_vm10, %v6489_v61 }
0x12e0   :  { %9202 = vmatprep.mubr.msk.bf16.mxu0 %vm10541_vm0, %v10540_v41 }
0x130f   :  { %v5740_v10 = vpop.f32.mrb[100].mxu0 }
0x1310   :  { %v5741_v1 = vadd.f32 %v5740_v10, %v5698_v59  ;;  %v9106_v7 = vpop.f32.mrb[101].mxu0 }
0x1311   :  { %v5743_v38 = vpop.f32.mrb[102].mxu0 }
0x1312   :  { %v9107_v18 = vpop.f32.mrb[103].mxu0  ;;  %v5746_v47 = vsel %vm5699_vm10, %v5741_v1, -inf }
0x1313   :  { %5747 = vmax.xlane.f32.xlu0 %v5746_v47 }
0x1382   :  { %v5851_v21 = vpop.f32.mrb[104].mxu0 }
0x1383   :  { %v5852_v49 = vadd.f32 %v5851_v21, %v5698_v59  ;;  %v9118_v26 = vpop.f32.mrb[105].mxu0 }
0x1384   :  { %v5854_v28 = vpop.f32.mrb[106].mxu0 }
0x1385   :  { %v9119_v40 = vpop.f32.mrb[107].mxu0  ;;  %v5857_v51 = vsel %vm5699_vm10, %v5852_v49, -inf }
0x1386   :  { %5858 = vmax.xlane.f32.xlu1 %v5857_v51 }
0x138a   :  { %v5962_v11 = vpop.f32.mrb[108].mxu0 }
0x138b   :  { %v5963_v56 = vadd.f32 %v5962_v11, %v5698_v59  ;;  %v9130_v39 = vpop.f32.mrb[109].mxu0 }
0x138c   :  { %v5965_v14 = vpop.f32.mrb[110].mxu0 }
0x138d   :  { %v9131_v13 = vpop.f32.mrb[111].mxu0  ;;  %v5968_v58 = vsel %vm5699_vm10, %v5963_v56, -inf }
0x138e   :  { %5969 = vmax.xlane.f32.xlu0 %v5968_v58 }
0x1392   :  { %v6072_v45 = vpop.f32.mrb[112].mxu0 }
0x1393   :  { %v6073_v44 = vadd.f32 %v6072_v45, %v5698_v59  ;;  %v9142_v54 = vpop.f32.mrb[113].mxu0 }
0x1394   :  { %v6075_v12 = vpop.f32.mrb[114].mxu0 }
0x1395   :  { %v9143_v60 = vpop.f32.mrb[115].mxu0  ;;  %v6078_v17 = vsel %vm5699_vm10, %v6073_v44, -inf }
0x1396   :  { %6079 = vmax.xlane.f32.xlu0 %v6078_v17 }
0x139a   :  { %v6201_v55 = vpop.f32.mrb[116].mxu0 }
0x139b   :  { %v11774_v4 = vadd.f32 %v6201_v55, %v6160_v46  ;;  %v9154_v0 = vpop.f32.mrb[117].mxu0 }
0x139c   :  { %v6204_v5 = vpop.f32.mrb[118].mxu0 }
0x139d   :  { %v9155_v57 = vpop.f32.mrb[119].mxu0  ;;  %v6207_v15 = vsel %vm5699_vm10, %v11774_v4, -inf }
0x139e   :  { %6208 = vmax.xlane.f32.xlu1 %v6207_v15 }
0x13a0   :  { %v5748_v36 = vpop.xlane.xlu0 %5747 }
0x13a1   :  { %v5749_v8 = vsub.f32 %v5741_v1, %v5748_v36 }
0x13a2   :  { %v6311_v62 = vpop.f32.mrb[120].mxu0 }
0x13a3   :  { %v5750_v31 = vmul.f32 1.442695, %v5749_v8  ;;  %v11778_v50 = vadd.f32 %v6311_v62, %v6160_v46  ;;  %v9166_v9 = vpop.f32.mrb[121].mxu0 }
0x13a4   :  { %v6314_v20 = vpop.f32.mrb[122].mxu0 }
0x13a5   :  { %9853 = vpow2.f32 %v5750_v31  ;;  %v9167_v24 = vpop.f32.mrb[123].mxu0  ;;  %v6317_v22 = vsel %vm5699_vm10, %v11778_v50, -inf  ;;  %v6156_v31 = vpack.c.bf16 %v11716_v30, %v11716_v30 }
0x13a6   :  { %6318 = vmax.xlane.f32.xlu0 %v6317_v22 }
0x13aa   :  { %v6422_v25 = vpop.f32.mrb[124].mxu0 }
0x13ab   :  { %v6423_v6 = vadd.f32 %v6422_v25, %v6160_v46  ;;  %v9178_v29 = vpop.f32.mrb[125].mxu0 }
0x13ac   :  { %v6425_v63 = vpop.f32.mrb[126].mxu0 }
0x13ad   :  { %v9179_v23 = vpop.f32.mrb[127].mxu0  ;;  %v6428_v33 = vsel %vm5699_vm10, %v6423_v6, -inf }
0x13ae   :  { %6429 = vmax.xlane.f32.xlu1 %v6428_v33 }
0x13af   :  { %v9854_v42 = vpop.eup %9853 }
0x13b0   :  { %v5752_v53 = vsel %vm5699_vm10, %v9854_v42, 0.0 }
0x13b2   :  { %5753 = vadd.xlane.f32.xlu1 %v5752_v53  ;;  %v6532_v27 = vpop.f32.mrb[128].mxu0 }
0x13b3   :  { %v6533_v19 = vadd.f32 %v6532_v27, %v6160_v46  ;;  %v9190_v34 = vpop.f32.mrb[129].mxu0 }
0x13b4   :  { %v6535_v35 = vpop.f32.mrb[130].mxu0 }
0x13b5   :  { %v9191_v3 = vpop.f32.mrb[131].mxu0  ;;  %v6538_v32 = vsel %vm5699_vm10, %v6533_v19, -inf }
0x13b6   :  { %6539 = vmax.xlane.f32.xlu0 %v6538_v32  ;;  %v6223_v3 = vsel %vm5761_vm11, %v6156_v31, 0 }
0x1413   :  { %v5859_v16 = vpop.xlane.xlu1 %5858 }
0x1414   :  { %v5860_v61 = vsub.f32 %v5852_v49, %v5859_v16 }
0x1416   :  { %v5861_v37 = vmul.f32 1.442695, %v5860_v61 }
0x1418   :  { %9855 = vpow2.f32 %v5861_v37 }
0x141b   :  { %v5970_v59 = vpop.xlane.xlu0 %5969 }
0x141c   :  { %v5971_v10 = vsub.f32 %v5963_v56, %v5970_v59 }
0x141e   :  { %v5972_v1 = vmul.f32 1.442695, %v5971_v10 }
0x1420   :  { %9857 = vpow2.f32 %v5972_v1 }
0x1422   :  { %v9856_v7 = vpop.eup %9855 }
0x1423   :  { %v6080_v38 = vpop.xlane.xlu0 %6079  ;;  %v5863_v18 = vsel %vm5699_vm10, %v9856_v7, 0.0 }
0x1424   :  { %v6081_v47 = vsub.f32 %v6073_v44, %v6080_v38  ;;  %5864 = vadd.xlane.f32.xlu0 %v5863_v18 }
0x1426   :  { %v6082_v21 = vmul.f32 1.442695, %v6081_v47 }
0x1428   :  { %9859 = vpow2.f32 %v6082_v21 }
0x142a   :  { %v11786_v26 = vpop.eup %9857 }
0x142b   :  { %v5974_v28 = vsel %vm5699_vm10, %v11786_v26, 0.0  ;;  %v6209_v51 = vpop.xlane.xlu1 %6208 }
0x142c   :  { %5975 = vadd.xlane.f32.xlu1 %v5974_v28  ;;  %v6210_v58 = vsub.f32 %v11774_v4, %v6209_v51 }
0x142e   :  { %v6211_v54 = vmul.f32 1.442695, %v6210_v58 }
0x1432   :  { %v11790_v49 = vpop.eup %9859 }
0x1433   :  { %v6084_v40 = vsel %vm5699_vm10, %v11790_v49, 0.0  ;;  %v6319_v45 = vpop.xlane.xlu0 %6318 }
0x1434   :  { %6085 = vadd.xlane.f32.xlu0 %v6084_v40  ;;  %v6320_v44 = vsub.f32 %v11778_v50, %v6319_v45 }
0x1436   :  { %v6321_v17 = vmul.f32 1.442695, %v6320_v44 }
0x143b   :  { %v6430_v11 = vpop.xlane.xlu1 %6429 }
0x143c   :  { %v6431_v12 = vsub.f32 %v6423_v6, %v6430_v11 }
0x143d   :  { %5980 = vrot.lane.b32.xlu1 %v11714_v2, %s10544_s1 }
0x143e   :  { %v6432_v46 = vmul.f32 1.442695, %v6431_v12 }
0x143f   :  { %v5754_v56 = vpop.xlane.xlu1 %5753 }
0x1440   :  { %9861 = vrcp.f32 %v5754_v56 }
0x1441   :  { %6090 = vrot.lane.b32.xlu1 %v11714_v2, %s10546_s24  ;;  %9863 = vpow2.f32 %v6211_v54 }
0x1442   :  { %9865 = vpow2.f32 %v6321_v17 }
0x1443   :  { %v6540_v60 = vpop.xlane.xlu0 %6539  ;;  %9867 = vpow2.f32 %v6432_v46 }
0x144a   :  { %5870 = vrot.lane.b32.xlu0 %v11714_v2, %s10545_s10  ;;  %v9862_v39 = vpop.eup %9861  ;;  %v6541_v2 = vsub.f32 %v6533_v19, %v6540_v60 }
0x144b   :  { %v5756_v14 = vmul.f32 %v9862_v39, %v9854_v42  ;;  %v9864_v4 = vpop.eup %9863 }
0x144c   :  { %v6542_v55 = vmul.f32 1.442695, %v6541_v2  ;;  %v11805_v0 = vpop.eup %9865  ;;  %v6213_v5 = vsel %vm5699_vm10, %v9864_v4, 0.0 }
0x144d   :  { %v5757_v13 = vpack.c.bf16 %v5756_v14, %v5756_v14  ;;  %v11808_v57 = vpop.eup %9867  ;;  %v6323_v15 = vsel %vm5699_vm10, %v11805_v0, 0.0 }
0x144e   :  { %9869 = vpow2.f32 %v6542_v55  ;;  %v6434_v36 = vsel %vm5699_vm10, %v11808_v57, 0.0 }
0x144f   :  { %9111 = vmatmul.mubr.msk.bf16.vlgmr.msra.gmra.mrb[124].mxu1 %vm5699_vm10, %v5757_v13 }
0x1450   :  { %9122 = vmatprep.mubr.msk.bf16.mxu1 %vm10541_vm0, %v10540_v41 }
0x1458   :  { %v11814_v8 = vpop.eup %9869 }
0x1459   :  { %v6544_v62 = vsel %vm5699_vm10, %v11814_v8, 0.0 }
0x1465   :  { %6214 = vadd.xlane.f32.xlu1 %v6213_v5 }
0x1469   :  { %6324 = vadd.xlane.f32.xlu1 %v6323_v15  ;;  %6435 = vadd.xlane.f32.xlu0 %v6434_v36 }
0x146d   :  { %6545 = vadd.xlane.f32.xlu1 %v6544_v62 }
0x147e   :  { %6440 = vrot.lane.b32.xlu1 %v6156_v31, %s10544_s1 }
0x147f   :  { %6330 = vrot.lane.b32.xlu0 %v6156_v31, %s10545_s10 }
0x1483   :  { %6550 = vrot.lane.b32.xlu0 %v6156_v31, %s10546_s24 }
0x14b1   :  { %v5865_v50 = vpop.xlane.xlu0 %5864 }
0x14b2   :  { %9871 = vrcp.f32 %v5865_v50 }
0x14b9   :  { %v5976_v9 = vpop.xlane.xlu1 %5975 }
0x14ba   :  { %9873 = vrcp.f32 %v5976_v9 }
0x14bc   :  { %v9872_v20 = vpop.eup %9871 }
0x14bd   :  { %v5867_v22 = vmul.f32 %v9872_v20, %v9856_v7  ;;  %v5981_v29 = vpop.permute.xlu1 %5980  ;;  %v9743_v20 = vld [vmem:[#allocation25] sm:$0xff]  }
0x14be   :  { %v5986_v23 = vsel %vm5761_vm11, %v5981_v29, 0  ;;  %9199 = vmatpush3.bf16.msra.mxu0 %v9743_v20 }
0x14bf   :  { %v5868_v30 = vpack.c.bf16 %v5867_v22, %v5867_v22  ;;  %9200 = vmatprep.subr.bf16.mxu0 %v10540_v41 }
0x14c1   :  { %v6086_v24 = vpop.xlane.xlu0 %6085  ;;  %v6091_v42 = vpop.permute.xlu1 %6090 }
0x14c2   :  { %9875 = vrcp.f32 %v6086_v24  ;;  %v6096_v19 = vsel %vm5761_vm11, %v6091_v42, 0 }
0x14c4   :  { %v9874_v63 = vpop.eup %9873 }
0x14c5   :  { %v5871_v25 = vpop.permute.xlu0 %5870  ;;  %v5978_v33 = vmul.f32 %v9874_v63, %v11786_v26 }
0x14c6   :  { %v5876_v6 = vsel %vm5761_vm11, %v5871_v25, 0 }
0x14c7   :  { %9121 = vmatpush3.bf16.msra.mxu1 %v5876_v6  ;;  %v5979_v53 = vpack.c.bf16 %v5978_v33, %v5978_v33 }
0x14c8   :  { %9132 = vmatprep.subr.bf16.mxu1 %v10540_v41 }
0x14ca   :  { %9123 = vmatmul.mubr.msk.bf16.vlgmr.msra.gmra.mrb[128].mxu1 %vm5699_vm10, %v5868_v30 }
0x14cb   :  { %9133 = vmatpush3.bf16.msra.mxu1 %v5986_v23  ;;  %9134 = vmatprep.mubr.msk.bf16.mxu1 %vm10541_vm0, %v10540_v41  ;;  %v9744_v23 = vld [vmem:[#allocation25 + $0x8] sm:$0xff]  }
0x14cc   :  { %9144 = vmatprep.subr.bf16.mxu1 %v10540_v41  ;;  %v9876_v27 = vpop.eup %9875  ;;  %9201 = vmatpush3.bf16.msra.mxu0 %v9744_v23 }
0x14cd   :  { %v6088_v34 = vmul.f32 %v9876_v27, %v11790_v49  ;;  %9214 = vmatprep.subr.bf16.mxu0 %v10540_v41 }
0x14cf   :  { %v6089_v35 = vpack.c.bf16 %v6088_v34, %v6088_v34 }
0x14d2   :  { %9135 = vmatmul.mubr.msk.bf16.vlgmr.msra.gmra.mrb[132].mxu1 %vm5699_vm10, %v5979_v53 }
0x14d3   :  { %9145 = vmatpush3.bf16.msra.mxu1 %v6096_v19  ;;  %9146 = vmatprep.mubr.msk.bf16.mxu1 %vm10541_vm0, %v10540_v41 }
0x14d4   :  { %9156 = vmatprep.subr.bf16.mxu1 %v10540_v41 }
0x14da   :  { %9147 = vmatmul.mubr.msk.bf16.vlgmr.msra.gmra.mrb[136].mxu1 %vm5699_vm10, %v6089_v35 }
0x14db   :  { %9157 = vmatpush3.bf16.msra.mxu1 %v6223_v3  ;;  %9158 = vmatprep.mubr.msk.bf16.mxu1 %vm10541_vm0, %v10540_v41 }
0x14dc   :  { %9168 = vmatprep.subr.bf16.mxu1 %v10540_v41 }
0x14f2   :  { %v6215_v32 = vpop.xlane.xlu1 %6214 }
0x14f3   :  { %9877 = vrcp.f32 %v6215_v32 }
0x14f6   :  { %v6325_v16 = vpop.xlane.xlu1 %6324  ;;  %v6436_v61 = vpop.xlane.xlu0 %6435 }
0x14f7   :  { %9879 = vrcp.f32 %v6325_v16 }
0x14f8   :  { %9881 = vrcp.f32 %v6436_v61 }
0x14fa   :  { %v6331_v10 = vpop.permute.xlu0 %6330  ;;  %v6546_v38 = vpop.xlane.xlu1 %6545 }
0x14fb   :  { %v6336_v18 = vsel %vm5761_vm11, %v6331_v10, 0  ;;  %9883 = vrcp.f32 %v6546_v38 }
0x14fd   :  { %v9878_v37 = vpop.eup %9877 }
0x14fe   :  { %v6217_v59 = vmul.f32 %v9878_v37, %v9864_v4  ;;  %v6441_v21 = vpop.permute.xlu1 %6440  ;;  %v6551_v51 = vpop.permute.xlu0 %6550 }
0x14ff   :  { %v6446_v49 = vsel %vm5761_vm11, %v6441_v21, 0  ;;  %v6556_v39 = vsel %vm5761_vm11, %v6551_v51, 0 }
0x1500   :  { %v6218_v1 = vpack.c.bf16 %v6217_v59, %v6217_v59 }
0x1501   :  { %v9880_v7 = vpop.eup %9879 }
0x1502   :  { %9159 = vmatmul.mubr.msk.bf16.vlgmr.msra.gmra.mrb[140].mxu1 %vm5699_vm10, %v6218_v1  ;;  %v6327_v47 = vmul.f32 %v9880_v7, %v11805_v0  ;;  %v9882_v28 = vpop.eup %9881 }
0x1503   :  { %9169 = vmatpush3.bf16.msra.mxu1 %v6336_v18  ;;  %9170 = vmatprep.mubr.msk.bf16.mxu1 %vm10541_vm0, %v10540_v41  ;;  %v6438_v40 = vmul.f32 %v9882_v28, %v11808_v57 }
0x1504   :  { %9180 = vmatprep.subr.bf16.mxu1 %v10540_v41  ;;  %v6328_v26 = vpack.c.bf16 %v6327_v47, %v6327_v47 }
0x1505   :  { %v6439_v11 = vpack.c.bf16 %v6438_v40, %v6438_v40  ;;  %v9884_v56 = vpop.eup %9883  ;;  %v8030_v40 = vld [vmem:[#allocation26] ss:$0 sm:$0xff] }
0x1506   :  { %v6548_v14 = vmul.f32 %v9884_v56, %v11814_v8 }
0x1508   :  { %v6549_v13 = vpack.c.bf16 %v6548_v14, %v6548_v14 }
0x150a   :  { %9171 = vmatmul.mubr.msk.bf16.vlgmr.msra.gmra.mrb[144].mxu1 %vm5699_vm10, %v6328_v26 }
0x150b   :  { %9181 = vmatpush3.bf16.msra.mxu1 %v6446_v49  ;;  %9182 = vmatprep.mubr.msk.bf16.mxu1 %vm10541_vm0, %v10540_v41 }
0x150c   :  { %9192 = vmatprep.subr.bf16.mxu1 %v10540_v41 }
0x1512   :  { %9183 = vmatmul.mubr.msk.bf16.vlgmr.msra.gmra.mrb[148].mxu1 %vm5699_vm10, %v6439_v11 }
0x1513   :  { %9193 = vmatpush3.bf16.msra.mxu1 %v6556_v39  ;;  %9194 = vmatprep.mubr.msk.bf16.mxu1 %vm10541_vm0, %v10540_v41 }
0x1514   :  { %9206 = vmatprep.subr.bf16.mxu1 %v10540_v41 }
0x151a   :  { %9195 = vmatmul.mubr.msk.bf16.vlgmr.msra.gmra.mrb[152].mxu1 %vm5699_vm10, %v6549_v13 }
0x151b   :  { %9210 = vmatprep.mubr.msk.bf16.mxu1 %vm10541_vm0, %v10540_v41 }
0x1522   :  { %v5799_v58 = vpop.f32.mrb[124].mxu1 }
0x1523   :  { %v9112_v45 = vpop.f32.mrb[125].mxu1 }
0x1524   :  { %v5802_v44 = vpop.f32.mrb[126].mxu1 }
0x1525   :  { %v9113_v54 = vpop.f32.mrb[127].mxu1 }
0x159d   :  { %v5912_v12 = vpop.f32.mrb[128].mxu1 }
0x159e   :  { %v9124_v60 = vpop.f32.mrb[129].mxu1 }
0x159f   :  { %v5915_v17 = vpop.f32.mrb[130].mxu1 }
0x15a0   :  { %v9125_v46 = vpop.f32.mrb[131].mxu1 }
0x15a5   :  { %v6022_v2 = vpop.f32.mrb[132].mxu1 }
0x15a6   :  { %v9136_v55 = vpop.f32.mrb[133].mxu1 }
0x15a7   :  { %v6025_v4 = vpop.f32.mrb[134].mxu1 }
0x15a8   :  { %v9137_v0 = vpop.f32.mrb[135].mxu1 }
0x15ad   :  { %v6132_v5 = vpop.f32.mrb[136].mxu1 }
0x15ae   :  { %v9148_v57 = vpop.f32.mrb[137].mxu1 }
0x15af   :  { %v6135_v15 = vpop.f32.mrb[138].mxu1  ;;  %v9746_v57 = vld [vmem:[#allocation34 + $0x8] sm:$0xff]  }
0x15b0   :  { %v9149_v36 = vpop.f32.mrb[139].mxu1 }
0x15d5   :  { %v6259_v8 = vpop.f32.mrb[140].mxu1 }
0x15d6   :  { %v9160_v62 = vpop.f32.mrb[141].mxu1 }
0x15d7   :  { %v6262_v31 = vpop.f32.mrb[142].mxu1 }
0x15d8   :  { %v9161_v50 = vpop.f32.mrb[143].mxu1 }
0x15dd   :  { %v6372_v9 = vpop.f32.mrb[144].mxu1 }
0x15de   :  { %v9417_v24 = vpack.i.bf16 %v6372_v9, %v5912_v12  ;;  %v9172_v22 = vpop.f32.mrb[145].mxu1 }
0x15df   :  { %v6375_v25 = vpop.f32.mrb[146].mxu1 }
0x15e0   :  { %9418 = vrot.lane.b32.xlu0 %v9417_v24, %s10547_s8  ;;  %v9173_v6 = vpop.f32.mrb[147].mxu1 }
0x15e5   :  { %v6482_v29 = vpop.f32.mrb[148].mxu1 }
0x15e6   :  { %v9422_v30 = vpack.i.bf16 %v6482_v29, %v6022_v2  ;;  %v9184_v63 = vpop.f32.mrb[149].mxu1 }
0x15e7   :  { %v6485_v33 = vpop.f32.mrb[150].mxu1 }
0x15e8   :  { %9423 = vrot.lane.b32.xlu1 %v9422_v30, %s10517_s12  ;;  %v9185_v42 = vpop.f32.mrb[151].mxu1  ;;  %s12062_s12 = sld [smem:[#allocation75_spill]]  ;;  %v8034_v30 = vld [vmem:[#allocation28] ss:$0 sm:$0xff] }
0x15ed   :  { %v6592_v53 = vpop.f32.mrb[152].mxu1 }
0x15ee   :  { %v9427_v27 = vpack.i.bf16 %v6592_v53, %v6132_v5  ;;  %v9196_v19 = vpop.f32.mrb[153].mxu1  ;;  %v9745_v5 = vld [vmem:[#allocation34] sm:$0xff]   ;;  %v9747_v15 = vld [vmem:[%s12062_s12] sm:$0xff]   ;;  %v9748_v36 = vld [vmem:[%s12062_s12 + $0x8] sm:$0xff]  }
0x15ef   :  { %v6595_v34 = vpop.f32.mrb[154].mxu1  ;;  %9207 = vmatpush3.bf16.msra.mxu1 %v9745_v5  ;;  %v9750_v62 = vld [vmem:[%s12062_s12 + $0x18] sm:$0xff]   ;;  %v9751_v31 = vld [vmem:[%s12062_s12 + $0x20] sm:$0xff]   ;;  %v9752_v50 = vld [vmem:[%s12062_s12 + $0x28] sm:$0xff]  }
0x15f0   :  { %9428 = vrot.lane.b32.xlu0 %v9427_v27, %s10548_s25  ;;  %v9197_v35 = vpop.f32.mrb[155].mxu1  ;;  %9208 = vmatprep.subr.bf16.mxu1 %v10540_v41  ;;  %v8035_v53 = vld [vmem:[#allocation29] ss:$0 sm:$0xff] }
0x15f3   :  { %9209 = vmatpush3.bf16.msra.mxu1 %v9746_v57 }
0x15f4   :  { %9234 = vmatprep.subr.bf16.mxu1 %v10540_v41 }
0x1652   :  { %v9419_v3 = vpop.permute.xlu0 %9418 }
0x1653   :  { %v9421_v16 = vunpack.i.h.bf16 %v9419_v3  ;;  %v9420_v61 = vunpack.i.l.bf16 %v9419_v3  ;;  %v9753_v3 = vld [vmem:[%s12062_s12 + $0x30] sm:$0xff]  }
0x1655   :  { %v6610_v1 = vsel %vm5699_vm10, %v6259_v8, %v9421_v16  ;;  %v6150_v7 = vsel %vm5699_vm10, %v5799_v58, %v9420_v61  ;;  %v9749_v8 = vld [vmem:[%s12062_s12 + $0x10] sm:$0xff]   ;;  %v8036_v16 = vld [vmem:[#allocation35] ss:$0 sm:$0xff] }
0x165a   :  { %v9424_v32 = vpop.permute.xlu1 %9423 }
0x165b   :  { %v9426_v37 = vunpack.i.h.bf16 %v9424_v32  ;;  %v9425_v59 = vunpack.i.l.bf16 %v9424_v32  ;;  %v9754_v32 = vld [vmem:[%s12062_s12 + $0x38] sm:$0xff]  }
0x165d   :  { %v6611_v47 = vsel %vm1705_vm2, %v6610_v1, %v9426_v37  ;;  %v6151_v21 = vsel %vm1705_vm2, %v6150_v7, %v9425_v59 }
0x1662   :  { %v9429_v10 = vpop.permute.xlu0 %9428 }
0x1663   :  { %v9431_v38 = vunpack.i.h.bf16 %v9429_v10  ;;  %v9430_v18 = vunpack.i.l.bf16 %v9429_v10 }
0x1665   :  { %v6612_v26 = vsel %vm6152_vm12, %v6611_v47, %v9431_v38  ;;  %v6153_v28 = vsel %vm6152_vm12, %v6151_v21, %v9430_v18  ;;  %v8040_v21 = vld [vmem:[#allocation37] ss:$0 sm:$0xff] }
0x1666   :  { %v6613_v49 = vpack.c.bf16 %v6612_v26, %v6153_v28 }
0x1668   :  { %9203 = vmatmul.mubr.msk.bf16.vlgmr.msra.gmra.mrb[132].mxu0 %vm1657_vm1, %v6613_v49 }
0x1669   :  { %9230 = vmatprep.mubr.msk.bf16.mxu0 %vm10541_vm0, %v10540_v41  ;;  %9215 = vmatpush3.bf16.msra.mxu0 %v9747_v15 }
0x166a   :  { %9216 = vmatprep.subr.bf16.mxu0 %v10540_v41 }
0x166d   :  { %9217 = vmatpush3.bf16.msra.mxu0 %v9748_v36 }
0x166e   :  { %9218 = vmatprep.subr.bf16.mxu0 %v10540_v41 }
0x1671   :  { %9219 = vmatpush3.bf16.msra.mxu0 %v9749_v8 }
0x1672   :  { %9220 = vmatprep.subr.bf16.mxu0 %v10540_v41 }
0x1675   :  { %9221 = vmatpush3.bf16.msra.mxu0 %v9750_v62 }
0x1676   :  { %9222 = vmatprep.subr.bf16.mxu0 %v10540_v41 }
0x1679   :  { %9223 = vmatpush3.bf16.msra.mxu0 %v9751_v31 }
0x167a   :  { %9224 = vmatprep.subr.bf16.mxu0 %v10540_v41 }
0x167d   :  { %9225 = vmatpush3.bf16.msra.mxu0 %v9752_v50  ;;  %v8049_v50 = vld [vmem:[#allocation31] ss:$0 sm:$0xff] }
0x167e   :  { %9226 = vmatprep.subr.bf16.mxu0 %v10540_v41 }
0x1681   :  { %9227 = vmatpush3.bf16.msra.mxu0 %v9753_v3 }
0x1682   :  { %9228 = vmatprep.subr.bf16.mxu0 %v10540_v41 }
0x1685   :  { %9229 = vmatpush3.bf16.msra.mxu0 %v9754_v32  ;;  %v9761_v32 = vld [vmem:[%s10738_s29 + $0x8] sm:$0xff]  }
0x1686   :  { %9266 = vmatprep.subr.bf16.mxu0 %v10540_v41 }
0x173b   :  { %v6674_v51 = vpop.f32.mrb[132].mxu0 }
0x173c   :  { %v6675_v11 = vadd.f32 %v8030_v40, %v6674_v51  ;;  %v9204_v56 = vpop.f32.mrb[133].mxu0 }
0x173d   :  { %v6677_v39 = vpop.f32.mrb[134].mxu0 }
0x173e   :  { %v6681_v14 = vadd.f32 %v6675_v11, %v11685_v48  ;;  %v6678_v13 = vadd.f32 %v8030_v40, %v6677_v39  ;;  %v9205_v58 = vpop.f32.mrb[135].mxu0 }
0x1740   :  { %v6682_v45 = vadd.f32 %v6678_v13, %v11687_v52  ;;  %v6685_v44 = vsel %vm1657_vm1, %v6681_v14, 0.0 }
0x1741   :  { %6686 = vadd.xlane.f32.xlu1 %v6685_v44 }
0x1742   :  { %v6688_v54 = vsel %vm1657_vm1, %v6682_v45, 0.0 }
0x1743   :  { %6689 = vadd.xlane.f32.xlu0 %v6688_v54 }
0x17ce   :  { %v6687_v12 = vpop.xlane.xlu1 %6686 }
0x17cf   :  { %v6692_v60 = vmul.f32 0.03125, %v6687_v12 }
0x17d0   :  { %v6690_v17 = vpop.xlane.xlu0 %6689 }
0x17d1   :  { %v6694_v46 = vsub.f32 %v6681_v14, %v6692_v60  ;;  %v6693_v2 = vmul.f32 0.03125, %v6690_v17 }
0x17d3   :  { %v6695_v55 = vsub.f32 %v6682_v45, %v6693_v2  ;;  %v6696_v4 = vmul.f32 %v6694_v46, %v6694_v46 }
0x17d5   :  { %v6698_v48 = vsel %vm1657_vm1, %v6696_v4, 0.0  ;;  %v6697_v0 = vmul.f32 %v6695_v55, %v6695_v55  ;;  %v9755_v4 = vld [vmem:[%s10738_s29 + $0x10] sm:$0xff]  }
0x17d6   :  { %6699 = vadd.xlane.f32.xlu0 %v6698_v48  ;;  %v9756_v48 = vld [vmem:[%s10738_s29 + $0x40] sm:$0xff]  }
0x17d7   :  { %v6701_v52 = vsel %vm1657_vm1, %v6697_v0, 0.0  ;;  %v9757_v0 = vld [vmem:[%s10738_s29 + $0x18] sm:$0xff]  }
0x17d8   :  { %6702 = vadd.xlane.f32.xlu1 %v6701_v52  ;;  %v9758_v52 = vld [vmem:[%s10738_s29 + $0x48] sm:$0xff]  }
0x1863   :  { %v6700_v9 = vpop.xlane.xlu0 %6699 }
0x1864   :  { %v6704_v20 = vmul.f32 0.03125, %v6700_v9 }
0x1865   :  { %v6703_v24 = vpop.xlane.xlu1 %6702 }
0x1866   :  { %v6706_v22 = vadd.f32 1e-05, %v6704_v20  ;;  %v6705_v25 = vmul.f32 0.03125, %v6703_v24  ;;  %v8050_v24 = vld [vmem:[#allocation32] ss:$0 sm:$0xff] }
0x1868   :  { %9885 = vrsqrt.f32 %v6706_v22  ;;  %v6707_v6 = vadd.f32 1e-05, %v6705_v25 }
0x186a   :  { %9887 = vrsqrt.f32 %v6707_v6 }
0x1872   :  { %v9886_v29 = vpop.eup %9885 }
0x1873   :  { %v6710_v63 = vmul.f32 %v9886_v29, %v6694_v46 }
0x1874   :  { %v9888_v23 = vpop.eup %9887 }
0x1875   :  { %v6718_v33 = vmul.f32 %v8034_v30, %v6710_v63  ;;  %v6711_v42 = vmul.f32 %v9888_v23, %v6695_v55 }
0x1877   :  { %v6719_v27 = vmul.f32 %v8034_v30, %v6711_v42  ;;  %v6726_v19 = vadd.f32 %v8035_v53, %v6718_v33  ;;  %v9759_v33 = vld [vmem:[%s10738_s29] sm:$0xff]  }
0x1879   :  { %v6727_v34 = vadd.f32 %v8035_v53, %v6719_v27 }
0x187b   :  { %v6728_v35 = vpack.c.bf16 %v6727_v34, %v6726_v19 }
0x187d   :  { %9211 = vmatmul.mubr.msk.bf16.vlgmr.msra.gmra.mrb[156].mxu1 %vm1657_vm1, %v6728_v35 }
0x187e   :  { %9238 = vmatprep.mubr.msk.bf16.mxu1 %vm10541_vm0, %v10540_v41  ;;  %9235 = vmatpush3.bf16.msra.mxu1 %v9755_v4 }
0x187f   :  { %9236 = vmatprep.subr.bf16.mxu1 %v10540_v41 }
0x1882   :  { %9237 = vmatpush3.bf16.msra.mxu1 %v9757_v0 }
0x1883   :  { %9242 = vmatprep.subr.bf16.mxu1 %v10540_v41 }
0x1950   :  { %v6789_v61 = vpop.f32.mrb[156].mxu1 }
0x1951   :  { %v6790_v37 = vadd.f32 %v8036_v16, %v6789_v61  ;;  %v9212_v59 = vpop.f32.mrb[157].mxu1  ;;  %v9762_v61 = vld [vmem:[%s10738_s29 + $0x68] sm:$0xff]  }
0x1952   :  { %v6792_v10 = vpop.f32.mrb[158].mxu1 }
0x1953   :  { %v6793_v1 = vadd.f32 %v8036_v16, %v6792_v10  ;;  %v9213_v7 = vpop.f32.mrb[159].mxu1  ;;  %v6796_v38 = vmax.f32 %v6790_v37, 0.0  ;;  %v9763_v10 = vld [vmem:[%s10738_s29 + $0x20] sm:$0xff]  }
0x1955   :  { %v6797_v18 = vmax.f32 %v6793_v1, 0.0 }
0x1957   :  { %v6798_v47 = vpack.c.bf16 %v6797_v18, %v6796_v38  ;;  %v9771_v18 = vld [vmem:[%s10743_s20] sm:$0xff]  }
0x1959   :  { %9231 = vmatmul.mubr.bf16.vlgmr.msra.gmra.mrb[136].mxu0 %v6798_v47 }
0x195a   :  { %9270 = vmatprep.mubr.msk.bf16.mxu0 %vm10541_vm0, %v10540_v41  ;;  %9267 = vmatpush3.bf16.msra.mxu0 %v9756_v48  ;;  %v9770_v48 = vld [vmem:[%s10738_s29 + $0x78] sm:$0xff]  }
0x195b   :  { %9268 = vmatprep.subr.bf16.mxu0 %v10540_v41 }
0x195e   :  { %9269 = vmatpush3.bf16.msra.mxu0 %v9758_v52 }
0x195f   :  { %9282 = vmatprep.subr.bf16.mxu0 %v10540_v41 }
0x1a2c   :  { %v6904_v26 = vpop.f32.mrb[136].mxu0 }
0x1a2d   :  { %v6905_v28 = vadd.f32 %v8040_v21, %v6904_v26  ;;  %v9232_v49 = vpop.f32.mrb[137].mxu0  ;;  %v9764_v26 = vld [vmem:[%s10738_s29 + $0x28] sm:$0xff]  }
0x1a2e   :  { %v6907_v40 = vpop.f32.mrb[138].mxu0 }
0x1a2f   :  { %v6911_v51 = vadd.f32 %v6905_v28, %v6726_v19  ;;  %v6908_v11 = vadd.f32 %v8040_v21, %v6907_v40  ;;  %v9233_v56 = vpop.f32.mrb[139].mxu0  ;;  %v9772_v21 = vld [vmem:[%s10743_s20 + $0x8] ss:$0 sps:$4 sm:$0x77]   ;;  %v7488_v40 = vld [vmem:[%s12063_s15] sm:$0x3] }
0x1a31   :  { %v6912_v39 = vadd.f32 %v6908_v11, %v6727_v34  ;;  %v6915_v14 = vsel %vm1657_vm1, %v6911_v51, 0.0  ;;  %v9760_v34 = vld [vmem:[%s10738_s29 + $0x60] sm:$0xff]   ;;  %v9765_v11 = vld [vmem:[%s10738_s29 + $0x30] sm:$0xff]  }
0x1a32   :  { %6916 = vadd.xlane.f32.xlu0 %v6915_v14 }
0x1a33   :  { %v6918_v13 = vsel %vm1657_vm1, %v6912_v39, 0.0 }
0x1a34   :  { %6919 = vadd.xlane.f32.xlu1 %v6918_v13  ;;  %v9766_v13 = vld [vmem:[%s10738_s29 + $0x38] sm:$0xff]  }
0x1abf   :  { %v6917_v58 = vpop.xlane.xlu0 %6916 }
0x1ac0   :  { %v6921_v45 = vmul.f32 0.03125, %v6917_v58 }
0x1ac1   :  { %v6920_v44 = vpop.xlane.xlu1 %6919 }
0x1ac2   :  { %v6923_v54 = vsub.f32 %v6911_v51, %v6921_v45  ;;  %v6922_v12 = vmul.f32 0.03125, %v6920_v44  ;;  %v7509_v51 = vsel %vm7507_vm13, %v9772_v21, 0  ;;  %v9767_v44 = vld [vmem:[%s10738_s29 + $0x50] sm:$0xff]  }
0x1ac4   :  { %v6924_v60 = vsub.f32 %v6912_v39, %v6922_v12  ;;  %v6925_v17 = vmul.f32 %v6923_v54, %v6923_v54  ;;  %v7489_v39 = vpack.c.bf16 %v7488_v40, %v7488_v40 }
0x1ac6   :  { %v6927_v46 = vsel %vm1657_vm1, %v6925_v17, 0.0  ;;  %v6926_v2 = vmul.f32 %v6924_v60, %v6924_v60 }
0x1ac7   :  { %6928 = vadd.xlane.f32.xlu0 %v6927_v46 }
0x1ac8   :  { %v6930_v55 = vsel %vm1657_vm1, %v6926_v2, 0.0  ;;  %v9769_v2 = vld [vmem:[%s10738_s29 + $0x70] sm:$0xff]  }
0x1ac9   :  { %6931 = vadd.xlane.f32.xlu1 %v6930_v55 }
0x1b54   :  { %v6929_v5 = vpop.xlane.xlu0 %6928 }
0x1b55   :  { %v6933_v57 = vmul.f32 0.03125, %v6929_v5 }
0x1b56   :  { %v6932_v15 = vpop.xlane.xlu1 %6931 }
0x1b57   :  { %v6935_v36 = vadd.f32 1e-05, %v6933_v57  ;;  %v6934_v8 = vmul.f32 0.03125, %v6932_v15 }
0x1b59   :  { %9889 = vrsqrt.f32 %v6935_v36  ;;  %v6936_v62 = vadd.f32 1e-05, %v6934_v8 }
0x1b5b   :  { %9891 = vrsqrt.f32 %v6936_v62 }
0x1b63   :  { %v9890_v31 = vpop.eup %9889 }
0x1b64   :  { %v6939_v9 = vmul.f32 %v9890_v31, %v6923_v54 }
0x1b65   :  { %v9892_v20 = vpop.eup %9891 }
0x1b66   :  { %v6947_v22 = vmul.f32 %v8049_v50, %v6939_v9  ;;  %v6940_v25 = vmul.f32 %v9892_v20, %v6924_v60  ;;  %v9768_v60 = vld [vmem:[%s10738_s29 + $0x58] sm:$0xff]   ;;  %s10549_s29 = smov [#allocation40]  }
0x1b67   :  { %s7567_s20 = sshll.u32 %s10549_s29, 4  ;;  %s7568_s20 = int_to_ptr.vmem [resolvable:$true] %s7567_s20 }
0x1b68   :  { %v11914_v6 = vadd.f32 %v8050_v24, %v6947_v22  ;;  %v6948_v29 = vmul.f32 %v8049_v50, %v6940_v25  ;;  %s10421_s16 = scalar_lea.vmem %s7568_s20, 32  ;;  %p10426_p11 = scmp.lt.s32.totalorder %s7568_s20, %s7568_s20 }
0x1b69   :  { %p10422_p10 = scmp.ne.s32.totalorder %s7568_s20, %s10421_s16  ;;  %p10427_p12 = scmp.lt.s32.totalorder %s10421_s16, %s10421_s16 }
0x1b6a   :  { %v11916_v30 = vadd.f32 %v8050_v24, %v6948_v29  ;;  %v6967_v63 = vrot.slane %v11914_v6, 1  ;;  %v7220_v42 = vrot.slane %v11914_v6, 4  ;;  %v7354_v59 = vrot.slane %v11914_v6, 6 }
0x1b6b   :  { %v7086_v28 = vrot.slane %v11914_v6, 2  ;;  %v7153_v58 = vrot.slane %v11914_v6, 3  ;;  %v7287_v17 = vrot.slane %v11914_v6, 5  ;;  %v7421_v0 = vrot.slane %v11914_v6, 7  ;;  %p10428_p13 = por %p10427_p12, %p10426_p11 }
0x1b6c   :  { %v6969_v23 = vsel %vm3661_vm5, %v6967_v63, %v11916_v30  ;;  %v7222_v53 = vrot.slane %v11916_v30, 3  ;;  %v6958_v35 = vrot.slane %v11916_v30, 7  ;;  %v7356_v16 = vrot.slane %v11916_v30, 5 }
0x1b6d   :  { %v6970_v27 = vpack.c.bf16 %v6969_v23, %v6969_v23  ;;  %v7088_v38 = vrot.slane %v11916_v30, 1  ;;  %v7155_v14 = vrot.slane %v11916_v30, 2  ;;  %v7289_v12 = vrot.slane %v11916_v30, 4  ;;  %p10429_p0 = pnand %p10428_p13, %p10422_p10 }
0x1b6e   :  { %v7224_v19 = vsel %vm3661_vm5, %v7220_v42, %v7222_v53  ;;  %v6960_v37 = vsel %vm3661_vm5, %v11914_v6, %v6958_v35  ;;  %v7358_v1 = vsel %vm3661_vm5, %v7354_v59, %v7356_v16  ;;  %v7423_v4 = vrot.slane %v11916_v30, 6 }
0x1b6f   :  { %9239 = vmatmul.mubr.msk.bf16.vlgmr.msra.gmra.mrb[160].mxu1 %vm1657_vm1, %v6970_v27  ;;  %v7225_v3 = vpack.c.bf16 %v7224_v19, %v7224_v19  ;;  %v6961_v7 = vpack.c.bf16 %v6960_v37, %v6960_v37  ;;  %v7359_v47 = vpack.c.bf16 %v7358_v1, %v7358_v1  ;;  %v7090_v49 = vsel %vm3661_vm5, %v7086_v28, %v7088_v38 }
0x1b70   :  { %9243 = vmatpush3.bf16.msra.mxu1 %v9759_v33  ;;  %9246 = vmatprep.mubr.msk.bf16.mxu1 %vm10541_vm0, %v10540_v41  ;;  %v7091_v56 = vpack.c.bf16 %v7090_v49, %v7090_v49  ;;  %v7157_v45 = vsel %vm3661_vm5, %v7153_v58, %v7155_v14  ;;  %v7291_v46 = vsel %vm3661_vm5, %v7287_v17, %v7289_v12 }
0x1b71   :  { %9271 = vmatmul.mubr.msk.bf16.vlgmr.msra.gmra.mrb[140].mxu0 %vm1657_vm1, %v7225_v3  ;;  %9244 = vmatprep.subr.bf16.mxu1 %v10540_v41  ;;  %v7158_v54 = vpack.c.bf16 %v7157_v45, %v7157_v45  ;;  %v7292_v55 = vpack.c.bf16 %v7291_v46, %v7291_v46  ;;  %v7425_v52 = vsel %vm3661_vm5, %v7421_v0, %v7423_v4 }
0x1b72   :  { %9283 = vmatpush3.bf16.msra.mxu0 %v9760_v34  ;;  %9286 = vmatprep.mubr.msk.bf16.mxu0 %vm10541_vm0, %v10540_v41  ;;  %v7426_v5 = vpack.c.bf16 %v7425_v52, %v7425_v52 }
0x1b73   :  { %9284 = vmatprep.subr.bf16.mxu0 %v10540_v41 }
0x1b74   :  { %9245 = vmatpush3.bf16.msra.mxu1 %v9761_v32 }
0x1b75   :  { %9250 = vmatprep.subr.bf16.mxu1 %v10540_v41 }
0x1b76   :  { %9285 = vmatpush3.bf16.msra.mxu0 %v9762_v61 }
0x1b77   :  { %9247 = vmatmul.mubr.msk.bf16.vlgmr.msra.gmra.mrb[164].mxu1 %vm1657_vm1, %v6961_v7  ;;  %9298 = vmatprep.subr.bf16.mxu0 %v10540_v41 }
0x1b78   :  { %9251 = vmatpush3.bf16.msra.mxu1 %v9763_v10  ;;  %9254 = vmatprep.mubr.msk.bf16.mxu1 %vm10541_vm0, %v10540_v41 }
0x1b79   :  { %9287 = vmatmul.mubr.msk.bf16.vlgmr.msra.gmra.mrb[144].mxu0 %vm1657_vm1, %v7359_v47  ;;  %9252 = vmatprep.subr.bf16.mxu1 %v10540_v41 }
0x1b7a   :  { %9299 = vmatpush3.bf16.msra.mxu0 %v9771_v18  ;;  %9302 = vmatprep.mubr.msk.bf16.mxu0 %vm10541_vm0, %v10540_v41 }
0x1b7b   :  { %9300 = vmatprep.subr.bf16.mxu0 %v10540_v41 }
0x1b7c   :  { %9253 = vmatpush3.bf16.msra.mxu1 %v9764_v26 }
0x1b7d   :  { %9258 = vmatprep.subr.bf16.mxu1 %v10540_v41 }
0x1b7e   :  { %9301 = vmatpush3.bf16.msra.mxu0 %v7509_v51 }
0x1b7f   :  { %9255 = vmatmul.mubr.msk.bf16.vlgmr.msra.gmra.mrb[168].mxu1 %vm1657_vm1, %v7091_v56  ;;  %v8106_v56 = vld [vmem:[#allocation38] ss:$0 sm:$0xff] }
0x1b80   :  { %9259 = vmatpush3.bf16.msra.mxu1 %v9765_v11  ;;  %9262 = vmatprep.mubr.msk.bf16.mxu1 %vm10541_vm0, %v10540_v41 }
0x1b81   :  { %9260 = vmatprep.subr.bf16.mxu1 %v10540_v41  ;;  %9303 = vmatmul.mubr.msk.bf16.vlgmr.msra.gmra.mrb[148].mxu0 %vm7503_vm14, %v7489_v39 }
0x1b84   :  { %9261 = vmatpush3.bf16.msra.mxu1 %v9766_v13 }
0x1b85   :  { %9274 = vmatprep.subr.bf16.mxu1 %v10540_v41 }
0x1b87   :  { %9263 = vmatmul.mubr.msk.bf16.vlgmr.msra.gmra.mrb[172].mxu1 %vm1657_vm1, %v7158_v54 }
0x1b88   :  { %9275 = vmatpush3.bf16.msra.mxu1 %v9767_v44  ;;  %9278 = vmatprep.mubr.msk.bf16.mxu1 %vm10541_vm0, %v10540_v41 }
0x1b89   :  { %9276 = vmatprep.subr.bf16.mxu1 %v10540_v41 }
0x1b8c   :  { %9277 = vmatpush3.bf16.msra.mxu1 %v9768_v60 }
0x1b8d   :  { %9290 = vmatprep.subr.bf16.mxu1 %v10540_v41 }
0x1b8f   :  { %9279 = vmatmul.mubr.msk.bf16.vlgmr.msra.gmra.mrb[176].mxu1 %vm1657_vm1, %v7292_v55 }
0x1b90   :  { %9291 = vmatpush3.bf16.msra.mxu1 %v9769_v2  ;;  %9294 = vmatprep.mubr.msk.bf16.mxu1 %vm10541_vm0, %v10540_v41 }
0x1b91   :  { %9292 = vmatprep.subr.bf16.mxu1 %v10540_v41 }
0x1b94   :  { %9293 = vmatpush3.bf16.msra.mxu1 %v9770_v48 }
0x1b97   :  { %9295 = vmatmul.mubr.msk.bf16.vlgmr.msra.gmra.mrb[180].mxu1 %vm1657_vm1, %v7426_v5 }
0x1c42   :  { %v7025_v57 = vpop.f32.mrb[160].mxu1 }
0x1c43   :  { %v9240_v15 = vpop.f32.mrb[161].mxu1 }
0x1c44   :  { %v7028_v36 = vpop.f32.mrb[162].mxu1  ;;  %v7280_v8 = vpop.f32.mrb[140].mxu0 }
0x1c45   :  { %v9241_v62 = vpop.f32.mrb[163].mxu1  ;;  %v9272_v31 = vpop.f32.mrb[141].mxu0 }
0x1c46   :  { %v7283_v50 = vpop.f32.mrb[142].mxu0 }
0x1c47   :  { %v9273_v9 = vpop.f32.mrb[143].mxu0 }
0x1c4a   :  { %v7080_v20 = vpop.f32.mrb[164].mxu1 }
0x1c4b   :  { %v7081_v24 = vadd.f32 %v7080_v20, %v7025_v57  ;;  %v9248_v22 = vpop.f32.mrb[165].mxu1 }
0x1c4c   :  { %v7083_v25 = vpop.f32.mrb[166].mxu1  ;;  %v7414_v6 = vpop.f32.mrb[144].mxu0 }
0x1c4d   :  { %v9249_v41 = vpop.f32.mrb[167].mxu1  ;;  %v9288_v29 = vpop.f32.mrb[145].mxu0 }
0x1c4e   :  { %v7417_v30 = vpop.f32.mrb[146].mxu0 }
0x1c4f   :  { %v9289_v63 = vpop.f32.mrb[147].mxu0 }
0x1c52   :  { %v7146_v23 = vpop.f32.mrb[168].mxu1 }
0x1c53   :  { %v7152_v33 = vadd.f32 %v7146_v23, %v7081_v24  ;;  %v9256_v42 = vpop.f32.mrb[169].mxu1 }
0x1c54   :  { %v7149_v53 = vpop.f32.mrb[170].mxu1  ;;  %v7545_v27 = vpop.f32.mrb[148].mxu0 }
0x1c55   :  { %v9257_v19 = vpop.f32.mrb[171].mxu1  ;;  %v9304_v34 = vpop.f32.mrb[149].mxu0 }
0x1c56   :  { %v7548_v35 = vpop.f32.mrb[150].mxu0 }
0x1c57   :  { %v9305_v3 = vpop.f32.mrb[151].mxu0 }
0x1c5a   :  { %v7213_v32 = vpop.f32.mrb[172].mxu1 }
0x1c5b   :  { %v7219_v16 = vadd.f32 %v7213_v32, %v7152_v33  ;;  %v9264_v61 = vpop.f32.mrb[173].mxu1 }
0x1c5c   :  { %v7216_v37 = vpop.f32.mrb[174].mxu1 }
0x1c5d   :  { %v9265_v59 = vpop.f32.mrb[175].mxu1  ;;  %v7286_v10 = vadd.f32 %v7280_v8, %v7219_v16 }
0x1c62   :  { %v7347_v1 = vpop.f32.mrb[176].mxu1 }
0x1c63   :  { %v7353_v7 = vadd.f32 %v7347_v1, %v7286_v10  ;;  %v9280_v38 = vpop.f32.mrb[177].mxu1 }
0x1c64   :  { %v7350_v18 = vpop.f32.mrb[178].mxu1 }
0x1c65   :  { %v9281_v47 = vpop.f32.mrb[179].mxu1  ;;  %v7420_v21 = vadd.f32 %v7414_v6, %v7353_v7 }
0x1c6a   :  { %v7481_v26 = vpop.f32.mrb[180].mxu1 }
0x1c6b   :  { %v7487_v28 = vadd.f32 %v7481_v26, %v7420_v21  ;;  %v9296_v49 = vpop.f32.mrb[181].mxu1 }
0x1c6c   :  { %v7484_v40 = vpop.f32.mrb[182].mxu1 }
0x1c6d   :  { %v9297_v51 = vpop.f32.mrb[183].mxu1  ;;  %v7490_v11 = vadd.f32 %v7487_v28, %v11683_v43 }
0x1c6f   :  { %v7551_v39 = vadd.f32 %v7545_v27, %v7490_v11 }
0x1c71   :  { %v7559_v14 = vadd.f32 %v8106_v56, %v7551_v39 }
0x1c73   :  { %7560 = vst [vmem:[#allocation40] sm:$0x3] %v7559_v14 }
0x1c74   :  { %10432 = shalt.err (!%p10429_p0)
}
0x1c75   :  { %s10433_s27 = scalar_lea.hbm %s10753_s4, 32 }
0x1c76   :  { %p10434_p1 = scmp.ne.s32.totalorder %s10753_s4, %s10433_s27  ;;  %p10437_p2 = scmp.lt.u32.totalorder %s10433_s27, %s10753_s4 }
0x1c78   :  { %p10439_p3 = pnand %p10437_p2, %p10434_p1 }
0x1c7a   :  { %10442 = shalt.err (!%p10439_p3)
}
0x1c7b   :  { %7570 = dma.vmem_to_hbm [thread:$0]  %s7568_s20, 32, %s10753_s4, [#allocation4]  }
0x1c7c   :  { %10469 = dma.done.wait [#allocation4], 32  }
0x1c7d   :  { %10470 = vsyncadd [#allocation4], 4294967264 }
0x1c7e   :  { %7574 = vsyncpa [#allocation3], 1 }
0x1c7f   :  { %7575 = vsyncpa [#allocation6], 1 }
0x1c80   :  { %7576 = vsyncpa [#allocation9], 1 }
0x1c81   :  { %7577 = vsyncpa [#allocation12], 1 }
0x1c82   :  { %7578 = vsyncpa [#allocation15], 1 }
0x1c83   :  { %7579 = vsyncpa [#allocation18], 1 }
0x1c84   :  { %7580 = vsyncpa [#allocation21], 1 }
0x1c85   :  { %7581 = vsyncpa [#allocation24], 1 }
0x1c86   :  { %7582 = vsyncpa [#allocation27], 1 }
0x1c87   :  { %7583 = vsyncpa [#allocation30], 1 }
0x1c88   :  { %7584 = vsyncpa [#allocation33], 1 }
0x1c89   :  { %7585 = vsyncpa [#allocation36], 1 }
0x1c8a   :  { %7586 = vsyncpa [#allocation39], 1 }
0x1c8b   :  { %7587 = vsyncpa [#allocation4], 1 }

</bundles_post_ra>
